<compile_context>
chip_gen: v5e
topology: v5e:2x2
jax: 0.10.0
libtpu: 0.0.40
codegen_flags: <defaults>
</compile_context>

<pallas_src>
import functools

import jax
import jax.numpy as jnp
from jax import lax
from jax.experimental import pallas as pl
from jax.experimental.pallas import tpu as pltpu

K_NEIGHBORS = 7
KPAD = 8            # neighbour-index lanes (K padded to 8)
CPAD = 128          # lane-dense padded channel width used by every kernel


def _pick_bt(B, target):
    """Largest divisor of B that is <= target (so grid blocks tile B exactly)."""
    bt = max(1, min(B, target))
    while B % bt:
        bt -= 1
    return bt


# ----------------------------------------------------------------------------
# Pallas kernels
# ----------------------------------------------------------------------------
def _feature_conv_kernel(x_ref, m_ref, w_ref, b_ref, s_ref, t_ref, o_ref):
    """FeatureConv (BN+Conv1d+BN+ReLU folded) + bn_fts affine + mask, Bt batches."""
    Bt, P, Cin = x_ref.shape
    x = x_ref[...].reshape(Bt * P, Cin)
    m = m_ref[...].reshape(Bt * P, 1)
    y = jnp.dot(x * m, w_ref[...], preferred_element_type=jnp.float32) + b_ref[...]
    y = jnp.maximum(y, 0.0)
    o_ref[...] = ((y * s_ref[...] + t_ref[...]) * m).reshape(Bt, P, CPAD)


def _knn_kernel(pts_ref, m_ref, idx_ref, *, k, kpad):
    """Fused neg-squared-distance (Gram form) + iterative top-k selection.

    Emits (Bt, P, kpad) int32 neighbour indices; the (P, P) distance matrix
    never leaves VMEM.  Per-row ranking only needs 2*g[i,j] - |x_j|^2 (the
    |x_i|^2 term is constant per row), so a single sublane reduction suffices.
    """
    Bt, P, C = pts_ref.shape
    NEG = jnp.float32(-3.0e38)
    for b in range(Bt):                       # folded batch, looped in-kernel
        pb = pts_ref[b]                       # (P, C) f32
        mb = m_ref[b]                         # (P, 1)
        pe = pb * mb + (1.0 - mb) * 1e9       # masked points pushed far away
        g = lax.dot_general(pe, pe, (((1,), (1,)), ((), ())),
                            preferred_element_type=jnp.float32)   # pe @ pe.T
        r = lax.broadcasted_iota(jnp.int32, (P, P), 0)
        c = lax.broadcasted_iota(jnp.int32, (P, P), 1)
        cf = c.astype(jnp.float32)
        sq_j = jnp.sum(jnp.where(r == c, g, 0.0), axis=0, keepdims=True)  # |x_j|^2
        score = 2.0 * g - sq_j                # per-row ranking == -|xi-xj|^2 ranking
        score = jnp.where(r == c, NEG, score)  # never pick self
        # TODO(synk): torch.topk tie-break order for exactly duplicated points is
        # not reproduced (irrelevant: duplicated/masked neighbours give identical
        # edge features and masked rows are re-masked downstream).
        cols = []
        for _ in range(k):                    # iterative argmax (lane reductions)
            mx = jnp.max(score, axis=-1, keepdims=True)
            pick = jnp.min(jnp.where(score == mx, cf, float(P)),
                           axis=-1, keepdims=True)          # lowest tied index
            cols.append(pick)
            score = jnp.where(cf == pick, NEG, score)
        cols += [jnp.zeros_like(cols[0])] * (kpad - k)
        idx_ref[b] = jnp.concatenate(cols, axis=-1).astype(jnp.int32)


def _edgeconv_kernel(fts_ref, idx_ref, m_ref,
                     wfts_ref, bfts_ref, w1b_ref, w2_ref, b2_ref,
                     w3_ref, b3_ref, *rest, k, fuse):
    """Fused EdgeConvBlock over Bt batches.

    In-register bf16 one-hot gather (MXU), split-W1 edge conv (no ctr/ex
    concats), per-slot conv chain, mean over K, shortcut, ReLU, mask and, for
    fuse=True, the 96->128 fusion conv + masked global sum pool.
    """
    if fuse:
        wfb_ref, pool_ref = rest
    else:
        (o_ref,) = rest

    bf16 = jnp.bfloat16
    fts = fts_ref[...]                         # (Bt, P, C) f32, zero-padded chans
    Bt, P, C = fts.shape
    m = m_ref[...].reshape(Bt * P, 1)          # (Bt*P, 1)
    idx = idx_ref[...]                         # (Bt, K*P, 1) int32

    fts_b = fts.astype(bf16)
    fts2 = fts_b.reshape(Bt * P, C)

    # All centre-feature matmuls packed N-wide: [W1a-W1b | Wsc | WfA], biases in.
    pre = jnp.dot(fts2, wfts_ref[...],
                  preferred_element_type=jnp.float32) + bfts_ref[...]
    a_c = pre[:, :C]                           # fts @ (W1a - W1b) + b1
    sc = pre[:, C:2 * C]                       # shortcut conv (+ BN) + bias

    # One-hot neighbour gather, built in-register and run on the MXU in bf16.
    col = lax.broadcasted_iota(jnp.int32, (Bt, k * P, P), 2)
    onehot = (col == idx).astype(bf16)         # (Bt, K*P, P)
    nb = jnp.einsum('bnp,bpc->bnc', onehot, fts_b,
                    preferred_element_type=jnp.float32).astype(bf16)  # (Bt,K*P,C)

    acc = jnp.zeros((Bt * P, C), jnp.float32)
    for j in range(k):                         # per neighbour slot (M = Bt*P rows)
        nbj = nb[:, j * P:(j + 1) * P, :].reshape(Bt * P, C)
        h = a_c + jnp.dot(nbj, w1b_ref[...], preferred_element_type=jnp.float32)
        h = jnp.maximum(h, 0.0)
        h = jnp.dot(h.astype(bf16), w2_ref[...],
                    preferred_element_type=jnp.float32) + b2_ref[...]
        h = jnp.maximum(h, 0.0)
        h = jnp.dot(h.astype(bf16), w3_ref[...],
                    preferred_element_type=jnp.float32) + b3_ref[...]
        h = jnp.maximum(h, 0.0)
        acc = acc + h

    cur = jnp.maximum(acc * (1.0 / k) + sc, 0.0) * m        # block output (masked)

    if fuse:
        fus = pre[:, 2 * C:3 * C]              # fts @ WfA + bf (fusion bias folded)
        fused = jnp.maximum(
            fus + jnp.dot(cur.astype(bf16), wfb_ref[...],
                          preferred_element_type=jnp.float32), 0.0) * m
        # masked global sum pool fused here -> only (Bt, 1, 128) goes to HBM
        pool_ref[...] = jnp.sum(fused.reshape(Bt, P, C), axis=1, keepdims=True)
    else:
        o_ref[...] = cur.reshape(Bt, P, C)


def _head_kernel(x_ref, cnt_ref, w1_ref, b1_ref, w2_ref, b2_ref, o_ref):
    """Divide pooled sums by counts + Linear+ReLU + Linear (lane-dense out)."""
    bf16 = jnp.bfloat16
    x = x_ref[...] / cnt_ref[...]
    h = jnp.dot(x.astype(bf16), w1_ref[...],
                preferred_element_type=jnp.float32) + b1_ref[...]
    h = jnp.maximum(h, 0.0)
    o_ref[...] = jnp.dot(h.astype(bf16), w2_ref[...],
                         preferred_element_type=jnp.float32) + b2_ref[...]


# ----------------------------------------------------------------------------
# pallas_call wrappers
# ----------------------------------------------------------------------------
def feature_conv(x, m, w, b, s, t, bt=8):
    B, P, Cin = x.shape
    Bt = _pick_bt(B, bt)
    return pl.pallas_call(
        _feature_conv_kernel,
        out_shape=jax.ShapeDtypeStruct((B, P, CPAD), jnp.float32),
        grid=(B // Bt,),
        in_specs=[
            pl.BlockSpec((Bt, P, Cin), lambda i: (i, 0, 0)),
            pl.BlockSpec((Bt, P, 1), lambda i: (i, 0, 0)),
            pl.BlockSpec((Cin, CPAD), lambda i: (0, 0)),
            pl.BlockSpec((1, CPAD), lambda i: (0, 0)),
            pl.BlockSpec((1, CPAD), lambda i: (0, 0)),
            pl.BlockSpec((1, CPAD), lambda i: (0, 0)),
        ],
        out_specs=pl.BlockSpec((Bt, P, CPAD), lambda i: (i, 0, 0)),
        compiler_params=pltpu.CompilerParams(dimension_semantics=("parallel",)),
    )(x, m, w, b, s, t)


def knn_indices(pts, mask, k, bt=8):
    B, P, C = pts.shape
    Bt = _pick_bt(B, bt)
    return pl.pallas_call(
        functools.partial(_knn_kernel, k=k, kpad=KPAD),
        out_shape=jax.ShapeDtypeStruct((B, P, KPAD), jnp.int32),
        grid=(B // Bt,),
        in_specs=[pl.BlockSpec((Bt, P, C), lambda i: (i, 0, 0)),
                  pl.BlockSpec((Bt, P, 1), lambda i: (i, 0, 0))],
        out_specs=pl.BlockSpec((Bt, P, KPAD), lambda i: (i, 0, 0)),
        compiler_params=pltpu.CompilerParams(dimension_semantics=("parallel",)),
    )(pts, mask)


def edge_conv(fts, idx, mask, wp, k, fuse, bt=4):
    B, P, C = fts.shape
    KP = idx.shape[1]
    Bt = _pick_bt(B, bt)
    NW = wp["wfts"].shape[1]
    args = [fts, idx, mask, wp["wfts"], wp["bfts"], wp["w1b"],
            wp["w2"], wp["b2"], wp["w3"], wp["b3"]]
    in_specs = [
        pl.BlockSpec((Bt, P, C), lambda i: (i, 0, 0)),
        pl.BlockSpec((Bt, KP, 1), lambda i: (i, 0, 0)),
        pl.BlockSpec((Bt, P, 1), lambda i: (i, 0, 0)),
        pl.BlockSpec((C, NW), lambda i: (0, 0)),
        pl.BlockSpec((1, NW), lambda i: (0, 0)),
        pl.BlockSpec((C, C), lambda i: (0, 0)),
        pl.BlockSpec((C, C), lambda i: (0, 0)),
        pl.BlockSpec((1, C), lambda i: (0, 0)),
        pl.BlockSpec((C, C), lambda i: (0, 0)),
        pl.BlockSpec((1, C), lambda i: (0, 0)),
    ]
    if fuse:
        args.append(wp["wfb"])
        in_specs.append(pl.BlockSpec((C, C), lambda i: (0, 0)))
        out_shape = jax.ShapeDtypeStruct((B, 1, C), jnp.float32)   # pooled rows
        out_specs = pl.BlockSpec((Bt, 1, C), lambda i: (i, 0, 0))
    else:
        out_shape = jax.ShapeDtypeStruct((B, P, C), jnp.float32)
        out_specs = pl.BlockSpec((Bt, P, C), lambda i: (i, 0, 0))
    return pl.pallas_call(
        functools.partial(_edgeconv_kernel, k=k, fuse=fuse),
        out_shape=out_shape,
        grid=(B // Bt,),
        in_specs=in_specs,
        out_specs=out_specs,
        compiler_params=pltpu.CompilerParams(
            dimension_semantics=("parallel",),
            vmem_limit_bytes=24 * 1024 * 1024),
    )(*args)


def head(pooled, counts, w1, b1, w2, b2):
    B, C = pooled.shape
    NCP = w2.shape[1]
    return pl.pallas_call(
        _head_kernel,
        out_shape=jax.ShapeDtypeStruct((B, NCP), jnp.float32),
        grid=(1,),
        in_specs=[
            pl.BlockSpec((B, C), lambda i: (0, 0)),
            pl.BlockSpec((B, 1), lambda i: (0, 0)),
            pl.BlockSpec((C, C), lambda i: (0, 0)),
            pl.BlockSpec((1, C), lambda i: (0, 0)),
            pl.BlockSpec((C, NCP), lambda i: (0, 0)),
            pl.BlockSpec((1, NCP), lambda i: (0, 0)),
        ],
        out_specs=pl.BlockSpec((B, NCP), lambda i: (0, 0)),
        compiler_params=pltpu.CompilerParams(dimension_semantics=("arbitrary",)),
    )(pooled, counts, w1, b1, w2, b2)


# ----------------------------------------------------------------------------
# Parameter construction (deterministic, synthetic; BN folded into scale/shift)
# ----------------------------------------------------------------------------
def init_params(key, pf_dims, sv_dims, num_classes):
    keys = iter(jax.random.split(key, 128))
    nk = lambda: next(keys)

    def bn(C):  # eval-mode BatchNorm -> per-channel (scale, shift)
        gamma = 1.0 + 0.1 * jax.random.normal(nk(), (C,), jnp.float32)
        beta = 0.1 * jax.random.normal(nk(), (C,), jnp.float32)
        mean = 0.1 * jax.random.normal(nk(), (C,), jnp.float32)
        var = 1.0 + 0.1 * jax.random.uniform(nk(), (C,), jnp.float32)
        scale = gamma / jnp.sqrt(var + 1e-5)
        return scale, beta - mean * scale

    def conv_w(cin, cout):  # torch weight (cout, cin) stored transposed (cin, cout)
        return jax.random.normal(nk(), (cin, cout), jnp.float32) / jnp.sqrt(cin)

    def lin(cin, cout):
        w = jax.random.normal(nk(), (cin, cout), jnp.float32) / jnp.sqrt(cin)
        b = 0.1 * jax.random.normal(nk(), (cout,), jnp.float32)
        return w, b

    p = {}
    # FeatureConv: BN(in) -> Conv1d(in,32,no bias) -> BN(32) -> ReLU  (all folded)
    for name, dims in (("pf", pf_dims), ("sv", sv_dims)):
        s_in, b_in = bn(dims)
        wt = conv_w(dims, 32)
        s_o, b_o = bn(32)
        p[f"{name}_w"] = (s_in[:, None] * wt) * s_o[None, :]
        p[f"{name}_b"] = (b_in @ wt) * s_o + b_o

    # ParticleNet.bn_fts (BatchNorm1d(32))
    p["bn_fts_scale"], p["bn_fts_shift"] = bn(32)

    # EdgeConv blocks: conv_params = [(7,(32,32,32)), (7,(64,64,64))]
    conv_params = [(K_NEIGHBORS, (32, 32, 32)), (K_NEIGHBORS, (64, 64, 64))]
    in_feat = 32
    for i, (_, outs) in enumerate(conv_params):
        cin = 2 * in_feat
        for j, cout in enumerate(outs):
            wt = conv_w(cin, cout)
            s, b = bn(cout)
            p[f"ec{i}_w{j + 1}"] = wt * s[None, :]
            p[f"ec{i}_b{j + 1}"] = b
            cin = cout
        if in_feat != outs[-1]:  # shortcut Conv1d + BN
            wt = conv_w(in_feat, outs[-1])
            s, b = bn(outs[-1])
            p[f"ec{i}_scw"] = wt * s[None, :]
            p[f"ec{i}_scb"] = b
        in_feat = outs[-1]

    # fusion block: Conv1d(96 -> 128, no bias) + BN(128) + ReLU
    wt = conv_w(96, 128)
    s, b = bn(128)
    p["fus_w"] = wt * s[None, :]
    p["fus_b"] = b

    # fc: Linear(128,128)+ReLU(+Dropout) ; Linear(128, num_classes)
    p["fc1_w"], p["fc1_b"] = lin(128, 128)
    p["fc2_w"], p["fc2_b"] = lin(128, num_classes)
    return p


def prepare_kernel_params(p):
    """Zero-pad to 128-lane widths, split W1, pack centre-feature weights."""
    f32, bf16 = jnp.float32, jnp.bfloat16

    def padm(w, rows=CPAD, cols=CPAD, dtype=bf16):
        out = jnp.zeros((rows, cols), f32).at[:w.shape[0], :w.shape[1]].set(w)
        return out.astype(dtype)

    def padv(b, cols=CPAD):
        return jnp.zeros((1, cols), f32).at[0, :b.shape[0]].set(b)

    kp = {}
    # feature convs (tiny contraction dim -> keep f32) + bn_fts affine (padded)
    kp["pf_w"] = padm(p["pf_w"], rows=p["pf_w"].shape[0], dtype=f32)
    kp["pf_b"] = padv(p["pf_b"])
    kp["sv_w"] = padm(p["sv_w"], rows=p["sv_w"].shape[0], dtype=f32)
    kp["sv_b"] = padv(p["sv_b"])
    kp["bn_s"] = padv(p["bn_fts_scale"])
    kp["bn_t"] = padv(p["bn_fts_shift"])

    # edge-conv blocks
    ec = []
    for i in range(2):
        fuse = (i == 1)
        w1 = p[f"ec{i}_w1"]
        cin = w1.shape[0] // 2
        w1a, w1b = w1[:cin], w1[cin:]
        if f"ec{i}_scw" in p:                       # conv+BN shortcut
            scw, scb = p[f"ec{i}_scw"], p[f"ec{i}_scb"]
        else:                                       # identity shortcut
            scw = jnp.eye(cin, dtype=f32)
            scb = jnp.zeros((cin,), f32)
        # centre-feature weights packed N-wide: [W1a-W1b | Wsc | WfA]
        parts_w = [padm(w1a - w1b, dtype=f32), padm(scw, dtype=f32)]
        parts_b = [padv(p[f"ec{i}_b1"]), padv(scb)]
        if fuse:
            fw = p["fus_w"]        # rows :32 act on block-0 output, 32: on block-1
            parts_w.append(padm(fw[:32], dtype=f32))
            parts_b.append(padv(p["fus_b"]))
        blk = {
            "wfts": jnp.concatenate(parts_w, axis=1).astype(bf16),
            "bfts": jnp.concatenate(parts_b, axis=1),
            "w1b": padm(w1b),
            "w2": padm(p[f"ec{i}_w2"]), "b2": padv(p[f"ec{i}_b2"]),
            "w3": padm(p[f"ec{i}_w3"]), "b3": padv(p[f"ec{i}_b3"]),
        }
        if fuse:
            blk["wfb"] = padm(fw[32:])
        ec.append(blk)
    kp["ec0"], kp["ec1"] = ec

    # head (fc2 output padded to 128 lanes; sliced back in the wrapper)
    kp["fc1_w"] = p["fc1_w"].astype(bf16)
    kp["fc1_b"] = p["fc1_b"].reshape(1, -1)
    nc = p["fc2_w"].shape[1]
    kp["fc2_w"] = padm(p["fc2_w"], rows=p["fc2_w"].shape[0])
    kp["fc2_b"] = padv(p["fc2_b"])
    return kp, nc


# ----------------------------------------------------------------------------
# Forward pass (ParticleNetTagger.forward + ParticleNet.forward)
# ----------------------------------------------------------------------------
def particle_net_tagger_forward(kp, pf_points, pf_features, pf_mask,
                                sv_points, sv_features, sv_mask, *, num_classes):
    # Transpose from PyTorch NCP -> channels-last (B, P, C).
    t = lambda a: jnp.transpose(a, (0, 2, 1)).astype(jnp.float32)
    pf_pts, pf_fts, pf_m = t(pf_points), t(pf_features), t(pf_mask)
    sv_pts, sv_fts, sv_m = t(sv_points), t(sv_features), t(sv_mask)
    B = pf_pts.shape[0]
    k = K_NEIGHBORS

    # FeatureConv + bn_fts + masks, fused per branch (output padded to 128 lanes)
    pf_y = feature_conv(pf_fts, pf_m, kp["pf_w"], kp["pf_b"], kp["bn_s"], kp["bn_t"])
    sv_y = feature_conv(sv_fts, sv_m, kp["sv_w"], kp["sv_b"], kp["bn_s"], kp["bn_t"])

    fts = jnp.concatenate([pf_y, sv_y], axis=1)          # (B, P, 128)
    mask = jnp.concatenate([pf_m, sv_m], axis=1)         # (B, P, 1)
    pts0 = jnp.concatenate([pf_pts, sv_pts], axis=1)     # (B, P, 2)
    pts0 = jnp.pad(pts0, ((0, 0), (0, 0), (0, 8 - pts0.shape[-1])))  # 8 lanes only

    counts = jnp.maximum(jnp.sum(mask, axis=1), 1.0)     # (B, 1)
    P = fts.shape[1]

    def flat_idx(idx):
        # (B, P, KPAD) int32 -> (B, K*P, 1): row j*P+i = neighbour j of particle i
        return jnp.transpose(idx[:, :, :k], (0, 2, 1)).reshape(B, k * P, 1)

    idx0 = flat_idx(knn_indices(pts0, mask, k))          # kNN fully inside Pallas
    fts = edge_conv(fts, idx0, mask, kp["ec0"], k, fuse=False)      # block-0 out
    idx1 = flat_idx(knn_indices(fts, mask, k))
    pooled = edge_conv(fts, idx1, mask, kp["ec1"], k, fuse=True)    # (B, 1, 128)

    logits = head(pooled.reshape(B, CPAD), counts,
                  kp["fc1_w"], kp["fc1_b"], kp["fc2_w"], kp["fc2_b"])
    return logits[:, :num_classes]


# ----------------------------------------------------------------------------
if __name__ == "__main__":
    key = jax.random.PRNGKey(0)
    k_param, k_in = jax.random.split(key)

    B, PF_DIMS, SV_DIMS, NUM_CLASSES = 2, 4, 3, 5
    P_PF, P_SV = 12, 4   # total 16 particles >= k+1

    params = init_params(k_param, PF_DIMS, SV_DIMS, NUM_CLASSES)
    kernel_params, nc = prepare_kernel_params(params)

    ks = jax.random.split(k_in, 4)
    pf_points = jax.random.normal(ks[0], (B, 2, P_PF), jnp.float32)
    pf_features = jax.random.normal(ks[1], (B, PF_DIMS, P_PF), jnp.float32)
    sv_points = jax.random.normal(ks[2], (B, 2, P_SV), jnp.float32)
    sv_features = jax.random.normal(ks[3], (B, SV_DIMS, P_SV), jnp.float32)
    pf_mask = (jnp.arange(P_PF)[None, None, :]
               < jnp.array([10, 8])[:, None, None]).astype(jnp.float32)   # (B,1,P_PF)
    sv_mask = (jnp.arange(P_SV)[None, None, :]
               < jnp.array([3, 2])[:, None, None]).astype(jnp.float32)    # (B,1,P_SV)

    fwd = jax.jit(functools.partial(particle_net_tagger_forward, num_classes=nc))
    out = fwd(kernel_params, pf_points, pf_features, pf_mask,
              sv_points, sv_features, sv_mask)
    jax.block_until_ready(out)
    assert out.shape == (B, NUM_CLASSES) and out.dtype == jnp.float32
    print("KERNEL_OK")
</pallas_src>

<mosaic_0001>
module attributes {stable_mosaic.version = 11 : i64} {
  func.func @_feature_conv_kernel(%arg0: i32, %arg1: memref<2x4x3xf32, #tpu.memory_space<vmem>>, %arg2: memref<2x4x1xf32, #tpu.memory_space<vmem>>, %arg3: memref<3x128xf32, #tpu.memory_space<vmem>>, %arg4: memref<1x128xf32, #tpu.memory_space<vmem>>, %arg5: memref<1x128xf32, #tpu.memory_space<vmem>>, %arg6: memref<1x128xf32, #tpu.memory_space<vmem>>, %arg7: memref<2x4x128xf32, #tpu.memory_space<vmem>>) attributes {dimension_semantics = [#tpu.dimension_semantics<parallel>], iteration_bounds = array<i64: 1>, scalar_prefetch = 0 : i64, scratch_operands = 0 : i64, tpu.core_type = #tpu.core_type<tc>, window_params = [{transform_indices = @transform_0, window_bounds = array<i64: 2, 4, 3>}, {transform_indices = @transform_1, window_bounds = array<i64: 2, 4, 1>}, {pipeline_mode = #tpu.pipeline_mode<synchronous>, transform_indices = @transform_2, window_bounds = array<i64: 3, 128>}, {pipeline_mode = #tpu.pipeline_mode<synchronous>, transform_indices = @transform_3, window_bounds = array<i64: 1, 128>}, {pipeline_mode = #tpu.pipeline_mode<synchronous>, transform_indices = @transform_4, window_bounds = array<i64: 1, 128>}, {pipeline_mode = #tpu.pipeline_mode<synchronous>, transform_indices = @transform_5, window_bounds = array<i64: 1, 128>}, {transform_indices = @transform_6, window_bounds = array<i64: 2, 4, 128>}]} {
    %c0 = arith.constant 0 : index
    %c0_0 = arith.constant 0 : index
    %c0_1 = arith.constant 0 : index
    %0 = vector.load %arg1[%c0, %c0_0, %c0_1] : memref<2x4x3xf32, #tpu.memory_space<vmem>>, vector<2x4x3xf32>
    %1 = vector.shape_cast %0 : vector<2x4x3xf32> to vector<8x3xf32>
    %c0_2 = arith.constant 0 : index
    %c0_3 = arith.constant 0 : index
    %c0_4 = arith.constant 0 : index
    %2 = vector.load %arg2[%c0_2, %c0_3, %c0_4] : memref<2x4x1xf32, #tpu.memory_space<vmem>>, vector<2x4x1xf32>
    %3 = vector.shape_cast %2 : vector<2x4x1xf32> to vector<8x1xf32>
    %4 = vector.broadcast %3 : vector<8x1xf32> to vector<8x3xf32>
    %5 = arith.mulf %1, %4 : vector<8x3xf32>
    %c0_5 = arith.constant 0 : index
    %c0_6 = arith.constant 0 : index
    %6 = vector.load %arg3[%c0_5, %c0_6] : memref<3x128xf32, #tpu.memory_space<vmem>>, vector<3x128xf32>
    %cst = arith.constant dense<0.000000e+00> : vector<8x128xf32>
    %7 = tpu.matmul %5, %6, %cst {dimension_numbers = #tpu.dot_dimension_numbers<[1], [0], [0], [1], [0, 0, 1, 1], [], []>} : vector<8x3xf32>, vector<3x128xf32>, vector<8x128xf32> -> vector<8x128xf32>
    %c0_7 = arith.constant 0 : index
    %c0_8 = arith.constant 0 : index
    %8 = vector.load %arg4[%c0_7, %c0_8] : memref<1x128xf32, #tpu.memory_space<vmem>>, vector<1x128xf32>
    %9 = vector.broadcast %8 : vector<1x128xf32> to vector<8x128xf32>
    %10 = arith.addf %7, %9 : vector<8x128xf32>
    %cst_9 = arith.constant 0.000000e+00 : f32
    %11 = vector.broadcast %cst_9 : f32 to vector<8x128xf32>
    %12 = arith.maximumf %10, %11 : vector<8x128xf32>
    %c0_10 = arith.constant 0 : index
    %c0_11 = arith.constant 0 : index
    %13 = vector.load %arg5[%c0_10, %c0_11] : memref<1x128xf32, #tpu.memory_space<vmem>>, vector<1x128xf32>
    %14 = vector.broadcast %13 : vector<1x128xf32> to vector<8x128xf32>
    %15 = arith.mulf %12, %14 : vector<8x128xf32>
    %c0_12 = arith.constant 0 : index
    %c0_13 = arith.constant 0 : index
    %16 = vector.load %arg6[%c0_12, %c0_13] : memref<1x128xf32, #tpu.memory_space<vmem>>, vector<1x128xf32>
    %17 = vector.broadcast %16 : vector<1x128xf32> to vector<8x128xf32>
    %18 = arith.addf %15, %17 : vector<8x128xf32>
    %19 = vector.broadcast %3 : vector<8x1xf32> to vector<8x128xf32>
    %20 = arith.mulf %18, %19 : vector<8x128xf32>
    %21 = vector.shape_cast %20 : vector<8x128xf32> to vector<2x4x128xf32>
    %c0_14 = arith.constant 0 : index
    %c0_15 = arith.constant 0 : index
    %c0_16 = arith.constant 0 : index
    %22 = vector.load %arg7[%c0_14, %c0_15, %c0_16] : memref<2x4x128xf32, #tpu.memory_space<vmem>>, vector<2x4x128xf32>
    tpu.vector_store %arg7[%c0_14, %c0_15, %c0_16], %21 {strides = array<i32>} : memref<2x4x128xf32, #tpu.memory_space<vmem>>, vector<2x4x128xf32>,
    return
  }
  func.func @transform_0(%arg0: i32) -> (i32, i32, i32) {
    %c0_i32 = arith.constant 0 : i32
    %c0_i32_0 = arith.constant 0 : i32
    %c0_i32_1 = arith.constant 0 : i32
    return %arg0, %c0_i32, %c0_i32_0 : i32, i32, i32
  }
  func.func @transform_1(%arg0: i32) -> (i32, i32, i32) {
    %c0_i32 = arith.constant 0 : i32
    %c0_i32_0 = arith.constant 0 : i32
    %c0_i32_1 = arith.constant 0 : i32
    return %arg0, %c0_i32, %c0_i32_0 : i32, i32, i32
  }
  func.func @transform_2(%arg0: i32) -> (i32, i32) {
    %c0_i32 = arith.constant 0 : i32
    %c0_i32_0 = arith.constant 0 : i32
    %c0_i32_1 = arith.constant 0 : i32
    return %c0_i32, %c0_i32_0 : i32, i32
  }
  func.func @transform_3(%arg0: i32) -> (i32, i32) {
    %c0_i32 = arith.constant 0 : i32
    %c0_i32_0 = arith.constant 0 : i32
    %c0_i32_1 = arith.constant 0 : i32
    return %c0_i32, %c0_i32_0 : i32, i32
  }
  func.func @transform_4(%arg0: i32) -> (i32, i32) {
    %c0_i32 = arith.constant 0 : i32
    %c0_i32_0 = arith.constant 0 : i32
    %c0_i32_1 = arith.constant 0 : i32
    return %c0_i32, %c0_i32_0 : i32, i32
  }
  func.func @transform_5(%arg0: i32) -> (i32, i32) {
    %c0_i32 = arith.constant 0 : i32
    %c0_i32_0 = arith.constant 0 : i32
    %c0_i32_1 = arith.constant 0 : i32
    return %c0_i32, %c0_i32_0 : i32, i32
  }
  func.func @transform_6(%arg0: i32) -> (i32, i32, i32) {
    %c0_i32 = arith.constant 0 : i32
    %c0_i32_0 = arith.constant 0 : i32
    %c0_i32_1 = arith.constant 0 : i32
    return %arg0, %c0_i32, %c0_i32_0 : i32, i32, i32
  }
}

module attributes {stable_mosaic.version = 11 : i64} {
  func.func @_feature_conv_kernel(%arg0: i32, %arg1: memref<2x12x4xf32, #tpu.memory_space<vmem>>, %arg2: memref<2x12x1xf32, #tpu.memory_space<vmem>>, %arg3: memref<4x128xf32, #tpu.memory_space<vmem>>, %arg4: memref<1x128xf32, #tpu.memory_space<vmem>>, %arg5: memref<1x128xf32, #tpu.memory_space<vmem>>, %arg6: memref<1x128xf32, #tpu.memory_space<vmem>>, %arg7: memref<2x12x128xf32, #tpu.memory_space<vmem>>) attributes {dimension_semantics = [#tpu.dimension_semantics<parallel>], iteration_bounds = array<i64: 1>, scalar_prefetch = 0 : i64, scratch_operands = 0 : i64, tpu.core_type = #tpu.core_type<tc>, window_params = [{transform_indices = @transform_0, window_bounds = array<i64: 2, 12, 4>}, {transform_indices = @transform_1, window_bounds = array<i64: 2, 12, 1>}, {pipeline_mode = #tpu.pipeline_mode<synchronous>, transform_indices = @transform_2, window_bounds = array<i64: 4, 128>}, {pipeline_mode = #tpu.pipeline_mode<synchronous>, transform_indices = @transform_3, window_bounds = array<i64: 1, 128>}, {pipeline_mode = #tpu.pipeline_mode<synchronous>, transform_indices = @transform_4, window_bounds = array<i64: 1, 128>}, {pipeline_mode = #tpu.pipeline_mode<synchronous>, transform_indices = @transform_5, window_bounds = array<i64: 1, 128>}, {transform_indices = @transform_6, window_bounds = array<i64: 2, 12, 128>}]} {
    %c0 = arith.constant 0 : index
    %c0_0 = arith.constant 0 : index
    %c0_1 = arith.constant 0 : index
    %0 = vector.load %arg1[%c0, %c0_0, %c0_1] : memref<2x12x4xf32, #tpu.memory_space<vmem>>, vector<2x12x4xf32>
    %1 = vector.shape_cast %0 : vector<2x12x4xf32> to vector<24x4xf32>
    %c0_2 = arith.constant 0 : index
    %c0_3 = arith.constant 0 : index
    %c0_4 = arith.constant 0 : index
    %2 = vector.load %arg2[%c0_2, %c0_3, %c0_4] : memref<2x12x1xf32, #tpu.memory_space<vmem>>, vector<2x12x1xf32>
    %3 = vector.shape_cast %2 : vector<2x12x1xf32> to vector<24x1xf32>
    %4 = vector.broadcast %3 : vector<24x1xf32> to vector<24x4xf32>
    %5 = arith.mulf %1, %4 : vector<24x4xf32>
    %c0_5 = arith.constant 0 : index
    %c0_6 = arith.constant 0 : index
    %6 = vector.load %arg3[%c0_5, %c0_6] : memref<4x128xf32, #tpu.memory_space<vmem>>, vector<4x128xf32>
    %cst = arith.constant dense<0.000000e+00> : vector<24x128xf32>
    %7 = tpu.matmul %5, %6, %cst {dimension_numbers = #tpu.dot_dimension_numbers<[1], [0], [0], [1], [0, 0, 1, 1], [], []>} : vector<24x4xf32>, vector<4x128xf32>, vector<24x128xf32> -> vector<24x128xf32>
    %c0_7 = arith.constant 0 : index
    %c0_8 = arith.constant 0 : index
    %8 = vector.load %arg4[%c0_7, %c0_8] : memref<1x128xf32, #tpu.memory_space<vmem>>, vector<1x128xf32>
    %9 = vector.broadcast %8 : vector<1x128xf32> to vector<24x128xf32>
    %10 = arith.addf %7, %9 : vector<24x128xf32>
    %cst_9 = arith.constant 0.000000e+00 : f32
    %11 = vector.broadcast %cst_9 : f32 to vector<24x128xf32>
    %12 = arith.maximumf %10, %11 : vector<24x128xf32>
    %c0_10 = arith.constant 0 : index
    %c0_11 = arith.constant 0 : index
    %13 = vector.load %arg5[%c0_10, %c0_11] : memref<1x128xf32, #tpu.memory_space<vmem>>, vector<1x128xf32>
    %14 = vector.broadcast %13 : vector<1x128xf32> to vector<24x128xf32>
    %15 = arith.mulf %12, %14 : vector<24x128xf32>
    %c0_12 = arith.constant 0 : index
    %c0_13 = arith.constant 0 : index
    %16 = vector.load %arg6[%c0_12, %c0_13] : memref<1x128xf32, #tpu.memory_space<vmem>>, vector<1x128xf32>
    %17 = vector.broadcast %16 : vector<1x128xf32> to vector<24x128xf32>
    %18 = arith.addf %15, %17 : vector<24x128xf32>
    %19 = vector.broadcast %3 : vector<24x1xf32> to vector<24x128xf32>
    %20 = arith.mulf %18, %19 : vector<24x128xf32>
    %21 = vector.shape_cast %20 : vector<24x128xf32> to vector<2x12x128xf32>
    %c0_14 = arith.constant 0 : index
    %c0_15 = arith.constant 0 : index
    %c0_16 = arith.constant 0 : index
    %22 = vector.load %arg7[%c0_14, %c0_15, %c0_16] : memref<2x12x128xf32, #tpu.memory_space<vmem>>, vector<2x12x128xf32>
    tpu.vector_store %arg7[%c0_14, %c0_15, %c0_16], %21 {strides = array<i32>} : memref<2x12x128xf32, #tpu.memory_space<vmem>>, vector<2x12x128xf32>,
    return
  }
  func.func @transform_0(%arg0: i32) -> (i32, i32, i32) {
    %c0_i32 = arith.constant 0 : i32
    %c0_i32_0 = arith.constant 0 : i32
    %c0_i32_1 = arith.constant 0 : i32
    return %arg0, %c0_i32, %c0_i32_0 : i32, i32, i32
  }
  func.func @transform_1(%arg0: i32) -> (i32, i32, i32) {
    %c0_i32 = arith.constant 0 : i32
    %c0_i32_0 = arith.constant 0 : i32
    %c0_i32_1 = arith.constant 0 : i32
    return %arg0, %c0_i32, %c0_i32_0 : i32, i32, i32
  }
  func.func @transform_2(%arg0: i32) -> (i32, i32) {
    %c0_i32 = arith.constant 0 : i32
    %c0_i32_0 = arith.constant 0 : i32
    %c0_i32_1 = arith.constant 0 : i32
    return %c0_i32, %c0_i32_0 : i32, i32
  }
  func.func @transform_3(%arg0: i32) -> (i32, i32) {
    %c0_i32 = arith.constant 0 : i32
    %c0_i32_0 = arith.constant 0 : i32
    %c0_i32_1 = arith.constant 0 : i32
    return %c0_i32, %c0_i32_0 : i32, i32
  }
  func.func @transform_4(%arg0: i32) -> (i32, i32) {
    %c0_i32 = arith.constant 0 : i32
    %c0_i32_0 = arith.constant 0 : i32
    %c0_i32_1 = arith.constant 0 : i32
    return %c0_i32, %c0_i32_0 : i32, i32
  }
  func.func @transform_5(%arg0: i32) -> (i32, i32) {
    %c0_i32 = arith.constant 0 : i32
    %c0_i32_0 = arith.constant 0 : i32
    %c0_i32_1 = arith.constant 0 : i32
    return %c0_i32, %c0_i32_0 : i32, i32
  }
  func.func @transform_6(%arg0: i32) -> (i32, i32, i32) {
    %c0_i32 = arith.constant 0 : i32
    %c0_i32_0 = arith.constant 0 : i32
    %c0_i32_1 = arith.constant 0 : i32
    return %arg0, %c0_i32, %c0_i32_0 : i32, i32, i32
  }
}

module attributes {stable_mosaic.version = 11 : i64} {
  func.func @_knn_kernel(%arg0: i32, %arg1: memref<2x16x8xf32, #tpu.memory_space<vmem>>, %arg2: memref<2x16x1xf32, #tpu.memory_space<vmem>>, %arg3: memref<2x16x8xi32, #tpu.memory_space<vmem>>) attributes {dimension_semantics = [#tpu.dimension_semantics<parallel>], iteration_bounds = array<i64: 1>, scalar_prefetch = 0 : i64, scratch_operands = 0 : i64, tpu.core_type = #tpu.core_type<tc>, window_params = [{transform_indices = @transform_0, window_bounds = array<i64: 2, 16, 8>}, {transform_indices = @transform_1, window_bounds = array<i64: 2, 16, 1>}, {transform_indices = @transform_2, window_bounds = array<i64: 2, 16, 8>}]} {
    %c0 = arith.constant 0 : index
    %c0_0 = arith.constant 0 : index
    %c0_1 = arith.constant 0 : index
    %0 = vector.load %arg1[%c0, %c0_0, %c0_1] : memref<2x16x8xf32, #tpu.memory_space<vmem>>, vector<1x16x8xf32>
    %1 = vector.shape_cast %0 : vector<1x16x8xf32> to vector<16x8xf32>
    %c0_2 = arith.constant 0 : index
    %c0_3 = arith.constant 0 : index
    %c0_4 = arith.constant 0 : index
    %2 = vector.load %arg2[%c0_2, %c0_3, %c0_4] : memref<2x16x1xf32, #tpu.memory_space<vmem>>, vector<1x16x1xf32>
    %3 = vector.shape_cast %2 : vector<1x16x1xf32> to vector<16x1xf32>
    %4 = vector.broadcast %3 : vector<16x1xf32> to vector<16x8xf32>
    %5 = arith.mulf %1, %4 : vector<16x8xf32>
    %cst = arith.constant 1.000000e+00 : f32
    %6 = vector.broadcast %cst : f32 to vector<16x1xf32>
    %7 = arith.subf %6, %3 : vector<16x1xf32>
    %cst_5 = arith.constant 1.000000e+09 : f32
    %8 = vector.broadcast %cst_5 : f32 to vector<16x1xf32>
    %9 = arith.mulf %7, %8 : vector<16x1xf32>
    %10 = vector.broadcast %9 : vector<16x1xf32> to vector<16x8xf32>
    %11 = arith.addf %5, %10 : vector<16x8xf32>
    %cst_6 = arith.constant dense<0.000000e+00> : vector<16x16xf32>
    %12 = tpu.matmul %11, %11, %cst_6 {dimension_numbers = #tpu.dot_dimension_numbers<[1], [1], [0], [0], [0, 0, 1, 0], [], []>} : vector<16x8xf32>, vector<16x8xf32>, vector<16x16xf32> -> vector<16x16xf32>
    %13 = tpu.iota {dimensions = array<i32: 0>} : vector<16x16xi32>
    %14 = tpu.iota {dimensions = array<i32: 1>} : vector<16x16xi32>
    %15 = arith.sitofp %14 : vector<16x16xi32> to vector<16x16xf32>
    %16 = arith.cmpi eq, %13, %14 : vector<16x16xi32>
    %cst_7 = arith.constant 0.000000e+00 : f32
    %17 = vector.broadcast %cst_7 : f32 to vector<16x16xf32>
    %18 = arith.select %16, %12, %17 : vector<16x16xi1>, vector<16x16xf32>
    %cst_8 = arith.constant dense<0.000000e+00> : vector<16xf32>
    %19 = vector.multi_reduction <add>, %18, %cst_8 [0] : vector<16x16xf32> to vector<16xf32>
    %20 = vector.shape_cast %19 : vector<16xf32> to vector<1x16xf32>
    %cst_9 = arith.constant 2.000000e+00 : f32
    %21 = vector.broadcast %cst_9 : f32 to vector<16x16xf32>
    %22 = arith.mulf %21, %12 : vector<16x16xf32>
    %23 = vector.broadcast %20 : vector<1x16xf32> to vector<16x16xf32>
    %24 = arith.subf %22, %23 : vector<16x16xf32>
    %25 = arith.cmpi eq, %13, %14 : vector<16x16xi32>
    %cst_10 = arith.constant -3.000000e+38 : f32
    %26 = vector.broadcast %cst_10 : f32 to vector<16x16xf32>
    %27 = arith.select %25, %26, %24 : vector<16x16xi1>, vector<16x16xf32>
    %cst_11 = arith.constant dense<0xFF800000> : vector<16xf32>
    %28 = vector.multi_reduction <maximumf>, %27, %cst_11 [1] : vector<16x16xf32> to vector<16xf32>
    %29 = vector.shape_cast %28 : vector<16xf32> to vector<16x1xf32>
    %30 = vector.broadcast %29 : vector<16x1xf32> to vector<16x16xf32>
    %31 = arith.cmpf oeq, %27, %30 : vector<16x16xf32>
    %cst_12 = arith.constant 1.600000e+01 : f32
    %32 = vector.broadcast %cst_12 : f32 to vector<16x16xf32>
    %33 = arith.select %31, %15, %32 : vector<16x16xi1>, vector<16x16xf32>
    %cst_13 = arith.constant dense<0x7F800000> : vector<16xf32>
    %34 = vector.multi_reduction <minimumf>, %33, %cst_13 [1] : vector<16x16xf32> to vector<16xf32>
    %35 = vector.shape_cast %34 : vector<16xf32> to vector<16x1xf32>
    %36 = vector.broadcast %35 : vector<16x1xf32> to vector<16x16xf32>
    %37 = arith.cmpf oeq, %15, %36 : vector<16x16xf32>
    %cst_14 = arith.constant -3.000000e+38 : f32
    %38 = vector.broadcast %cst_14 : f32 to vector<16x16xf32>
    %39 = arith.select %37, %38, %27 : vector<16x16xi1>, vector<16x16xf32>
    %cst_15 = arith.constant dense<0xFF800000> : vector<16xf32>
    %40 = vector.multi_reduction <maximumf>, %39, %cst_15 [1] : vector<16x16xf32> to vector<16xf32>
    %41 = vector.shape_cast %40 : vector<16xf32> to vector<16x1xf32>
    %42 = vector.broadcast %41 : vector<16x1xf32> to vector<16x16xf32>
    %43 = arith.cmpf oeq, %39, %42 : vector<16x16xf32>
    %cst_16 = arith.constant 1.600000e+01 : f32
    %44 = vector.broadcast %cst_16 : f32 to vector<16x16xf32>
    %45 = arith.select %43, %15, %44 : vector<16x16xi1>, vector<16x16xf32>
    %cst_17 = arith.constant dense<0x7F800000> : vector<16xf32>
    %46 = vector.multi_reduction <minimumf>, %45, %cst_17 [1] : vector<16x16xf32> to vector<16xf32>
    %47 = vector.shape_cast %46 : vector<16xf32> to vector<16x1xf32>
    %48 = vector.broadcast %47 : vector<16x1xf32> to vector<16x16xf32>
    %49 = arith.cmpf oeq, %15, %48 : vector<16x16xf32>
    %cst_18 = arith.constant -3.000000e+38 : f32
    %50 = vector.broadcast %cst_18 : f32 to vector<16x16xf32>
    %51 = arith.select %49, %50, %39 : vector<16x16xi1>, vector<16x16xf32>
    %cst_19 = arith.constant dense<0xFF800000> : vector<16xf32>
    %52 = vector.multi_reduction <maximumf>, %51, %cst_19 [1] : vector<16x16xf32> to vector<16xf32>
    %53 = vector.shape_cast %52 : vector<16xf32> to vector<16x1xf32>
    %54 = vector.broadcast %53 : vector<16x1xf32> to vector<16x16xf32>
    %55 = arith.cmpf oeq, %51, %54 : vector<16x16xf32>
    %cst_20 = arith.constant 1.600000e+01 : f32
    %56 = vector.broadcast %cst_20 : f32 to vector<16x16xf32>
    %57 = arith.select %55, %15, %56 : vector<16x16xi1>, vector<16x16xf32>
    %cst_21 = arith.constant dense<0x7F800000> : vector<16xf32>
    %58 = vector.multi_reduction <minimumf>, %57, %cst_21 [1] : vector<16x16xf32> to vector<16xf32>
    %59 = vector.shape_cast %58 : vector<16xf32> to vector<16x1xf32>
    %60 = vector.broadcast %59 : vector<16x1xf32> to vector<16x16xf32>
    %61 = arith.cmpf oeq, %15, %60 : vector<16x16xf32>
    %cst_22 = arith.constant -3.000000e+38 : f32
    %62 = vector.broadcast %cst_22 : f32 to vector<16x16xf32>
    %63 = arith.select %61, %62, %51 : vector<16x16xi1>, vector<16x16xf32>
    %cst_23 = arith.constant dense<0xFF800000> : vector<16xf32>
    %64 = vector.multi_reduction <maximumf>, %63, %cst_23 [1] : vector<16x16xf32> to vector<16xf32>
    %65 = vector.shape_cast %64 : vector<16xf32> to vector<16x1xf32>
    %66 = vector.broadcast %65 : vector<16x1xf32> to vector<16x16xf32>
    %67 = arith.cmpf oeq, %63, %66 : vector<16x16xf32>
    %cst_24 = arith.constant 1.600000e+01 : f32
    %68 = vector.broadcast %cst_24 : f32 to vector<16x16xf32>
    %69 = arith.select %67, %15, %68 : vector<16x16xi1>, vector<16x16xf32>
    %cst_25 = arith.constant dense<0x7F800000> : vector<16xf32>
    %70 = vector.multi_reduction <minimumf>, %69, %cst_25 [1] : vector<16x16xf32> to vector<16xf32>
    %71 = vector.shape_cast %70 : vector<16xf32> to vector<16x1xf32>
    %72 = vector.broadcast %71 : vector<16x1xf32> to vector<16x16xf32>
    %73 = arith.cmpf oeq, %15, %72 : vector<16x16xf32>
    %cst_26 = arith.constant -3.000000e+38 : f32
    %74 = vector.broadcast %cst_26 : f32 to vector<16x16xf32>
    %75 = arith.select %73, %74, %63 : vector<16x16xi1>, vector<16x16xf32>
    %cst_27 = arith.constant dense<0xFF800000> : vector<16xf32>
    %76 = vector.multi_reduction <maximumf>, %75, %cst_27 [1] : vector<16x16xf32> to vector<16xf32>
    %77 = vector.shape_cast %76 : vector<16xf32> to vector<16x1xf32>
    %78 = vector.broadcast %77 : vector<16x1xf32> to vector<16x16xf32>
    %79 = arith.cmpf oeq, %75, %78 : vector<16x16xf32>
    %cst_28 = arith.constant 1.600000e+01 : f32
    %80 = vector.broadcast %cst_28 : f32 to vector<16x16xf32>
    %81 = arith.select %79, %15, %80 : vector<16x16xi1>, vector<16x16xf32>
    %cst_29 = arith.constant dense<0x7F800000> : vector<16xf32>
    %82 = vector.multi_reduction <minimumf>, %81, %cst_29 [1] : vector<16x16xf32> to vector<16xf32>
    %83 = vector.shape_cast %82 : vector<16xf32> to vector<16x1xf32>
    %84 = vector.broadcast %83 : vector<16x1xf32> to vector<16x16xf32>
    %85 = arith.cmpf oeq, %15, %84 : vector<16x16xf32>
    %cst_30 = arith.constant -3.000000e+38 : f32
    %86 = vector.broadcast %cst_30 : f32 to vector<16x16xf32>
    %87 = arith.select %85, %86, %75 : vector<16x16xi1>, vector<16x16xf32>
    %cst_31 = arith.constant dense<0xFF800000> : vector<16xf32>
    %88 = vector.multi_reduction <maximumf>, %87, %cst_31 [1] : vector<16x16xf32> to vector<16xf32>
    %89 = vector.shape_cast %88 : vector<16xf32> to vector<16x1xf32>
    %90 = vector.broadcast %89 : vector<16x1xf32> to vector<16x16xf32>
    %91 = arith.cmpf oeq, %87, %90 : vector<16x16xf32>
    %cst_32 = arith.constant 1.600000e+01 : f32
    %92 = vector.broadcast %cst_32 : f32 to vector<16x16xf32>
    %93 = arith.select %91, %15, %92 : vector<16x16xi1>, vector<16x16xf32>
    %cst_33 = arith.constant dense<0x7F800000> : vector<16xf32>
    %94 = vector.multi_reduction <minimumf>, %93, %cst_33 [1] : vector<16x16xf32> to vector<16xf32>
    %95 = vector.shape_cast %94 : vector<16xf32> to vector<16x1xf32>
    %96 = vector.broadcast %95 : vector<16x1xf32> to vector<16x16xf32>
    %97 = arith.cmpf oeq, %15, %96 : vector<16x16xf32>
    %cst_34 = arith.constant -3.000000e+38 : f32
    %98 = vector.broadcast %cst_34 : f32 to vector<16x16xf32>
    %99 = arith.select %97, %98, %87 : vector<16x16xi1>, vector<16x16xf32>
    %cst_35 = arith.constant dense<0xFF800000> : vector<16xf32>
    %100 = vector.multi_reduction <maximumf>, %99, %cst_35 [1] : vector<16x16xf32> to vector<16xf32>
    %101 = vector.shape_cast %100 : vector<16xf32> to vector<16x1xf32>
    %102 = vector.broadcast %101 : vector<16x1xf32> to vector<16x16xf32>
    %103 = arith.cmpf oeq, %99, %102 : vector<16x16xf32>
    %cst_36 = arith.constant 1.600000e+01 : f32
    %104 = vector.broadcast %cst_36 : f32 to vector<16x16xf32>
    %105 = arith.select %103, %15, %104 : vector<16x16xi1>, vector<16x16xf32>
    %cst_37 = arith.constant dense<0x7F800000> : vector<16xf32>
    %106 = vector.multi_reduction <minimumf>, %105, %cst_37 [1] : vector<16x16xf32> to vector<16xf32>
    %107 = vector.shape_cast %106 : vector<16xf32> to vector<16x1xf32>
    %cst_38 = arith.constant 0.000000e+00 : f32
    %108 = vector.broadcast %cst_38 : f32 to vector<16x1xf32>
    %109 = tpu.concatenate %35, %47, %59, %71, %83, %95, %107, %108 in 1 : vector<16x1xf32>, vector<16x1xf32>, vector<16x1xf32>, vector<16x1xf32>, vector<16x1xf32>, vector<16x1xf32>, vector<16x1xf32>, vector<16x1xf32> -> vector<16x8xf32>
    %110 = arith.fptosi %109 : vector<16x8xf32> to vector<16x8xi32>
    %c0_39 = arith.constant 0 : index
    %c0_40 = arith.constant 0 : index
    %c0_41 = arith.constant 0 : index
    %111 = vector.load %arg3[%c0_39, %c0_40, %c0_41] : memref<2x16x8xi32, #tpu.memory_space<vmem>>, vector<1x16x8xi32>
    %112 = vector.shape_cast %111 : vector<1x16x8xi32> to vector<16x8xi32>
    %113 = vector.shape_cast %110 : vector<16x8xi32> to vector<1x16x8xi32>
    tpu.vector_store %arg3[%c0_39, %c0_40, %c0_41], %113 {strides = array<i32>} : memref<2x16x8xi32, #tpu.memory_space<vmem>>, vector<1x16x8xi32>,
    %c1 = arith.constant 1 : index
    %c0_42 = arith.constant 0 : index
    %c0_43 = arith.constant 0 : index
    %114 = vector.load %arg1[%c1, %c0_42, %c0_43] : memref<2x16x8xf32, #tpu.memory_space<vmem>>, vector<1x16x8xf32>
    %115 = vector.shape_cast %114 : vector<1x16x8xf32> to vector<16x8xf32>
    %c1_44 = arith.constant 1 : index
    %c0_45 = arith.constant 0 : index
    %c0_46 = arith.constant 0 : index
    %116 = vector.load %arg2[%c1_44, %c0_45, %c0_46] : memref<2x16x1xf32, #tpu.memory_space<vmem>>, vector<1x16x1xf32>
    %117 = vector.shape_cast %116 : vector<1x16x1xf32> to vector<16x1xf32>
    %118 = vector.broadcast %117 : vector<16x1xf32> to vector<16x8xf32>
    %119 = arith.mulf %115, %118 : vector<16x8xf32>
    %cst_47 = arith.constant 1.000000e+00 : f32
    %120 = vector.broadcast %cst_47 : f32 to vector<16x1xf32>
    %121 = arith.subf %120, %117 : vector<16x1xf32>
    %cst_48 = arith.constant 1.000000e+09 : f32
    %122 = vector.broadcast %cst_48 : f32 to vector<16x1xf32>
    %123 = arith.mulf %121, %122 : vector<16x1xf32>
    %124 = vector.broadcast %123 : vector<16x1xf32> to vector<16x8xf32>
    %125 = arith.addf %119, %124 : vector<16x8xf32>
    %cst_49 = arith.constant dense<0.000000e+00> : vector<16x16xf32>
    %126 = tpu.matmul %125, %125, %cst_49 {dimension_numbers = #tpu.dot_dimension_numbers<[1], [1], [0], [0], [0, 0, 1, 0], [], []>} : vector<16x8xf32>, vector<16x8xf32>, vector<16x16xf32> -> vector<16x16xf32>
    %127 = tpu.iota {dimensions = array<i32: 0>} : vector<16x16xi32>
    %128 = tpu.iota {dimensions = array<i32: 1>} : vector<16x16xi32>
    %129 = arith.sitofp %128 : vector<16x16xi32> to vector<16x16xf32>
    %130 = arith.cmpi eq, %127, %128 : vector<16x16xi32>
    %cst_50 = arith.constant 0.000000e+00 : f32
    %131 = vector.broadcast %cst_50 : f32 to vector<16x16xf32>
    %132 = arith.select %130, %126, %131 : vector<16x16xi1>, vector<16x16xf32>
    %cst_51 = arith.constant dense<0.000000e+00> : vector<16xf32>
    %133 = vector.multi_reduction <add>, %132, %cst_51 [0] : vector<16x16xf32> to vector<16xf32>
    %134 = vector.shape_cast %133 : vector<16xf32> to vector<1x16xf32>
    %cst_52 = arith.constant 2.000000e+00 : f32
    %135 = vector.broadcast %cst_52 : f32 to vector<16x16xf32>
    %136 = arith.mulf %135, %126 : vector<16x16xf32>
    %137 = vector.broadcast %134 : vector<1x16xf32> to vector<16x16xf32>
    %138 = arith.subf %136, %137 : vector<16x16xf32>
    %139 = arith.cmpi eq, %127, %128 : vector<16x16xi32>
    %cst_53 = arith.constant -3.000000e+38 : f32
    %140 = vector.broadcast %cst_53 : f32 to vector<16x16xf32>
    %141 = arith.select %139, %140, %138 : vector<16x16xi1>, vector<16x16xf32>
    %cst_54 = arith.constant dense<0xFF800000> : vector<16xf32>
    %142 = vector.multi_reduction <maximumf>, %141, %cst_54 [1] : vector<16x16xf32> to vector<16xf32>
    %143 = vector.shape_cast %142 : vector<16xf32> to vector<16x1xf32>
    %144 = vector.broadcast %143 : vector<16x1xf32> to vector<16x16xf32>
    %145 = arith.cmpf oeq, %141, %144 : vector<16x16xf32>
    %cst_55 = arith.constant 1.600000e+01 : f32
    %146 = vector.broadcast %cst_55 : f32 to vector<16x16xf32>
    %147 = arith.select %145, %129, %146 : vector<16x16xi1>, vector<16x16xf32>
    %cst_56 = arith.constant dense<0x7F800000> : vector<16xf32>
    %148 = vector.multi_reduction <minimumf>, %147, %cst_56 [1] : vector<16x16xf32> to vector<16xf32>
    %149 = vector.shape_cast %148 : vector<16xf32> to vector<16x1xf32>
    %150 = vector.broadcast %149 : vector<16x1xf32> to vector<16x16xf32>
    %151 = arith.cmpf oeq, %129, %150 : vector<16x16xf32>
    %cst_57 = arith.constant -3.000000e+38 : f32
    %152 = vector.broadcast %cst_57 : f32 to vector<16x16xf32>
    %153 = arith.select %151, %152, %141 : vector<16x16xi1>, vector<16x16xf32>
    %cst_58 = arith.constant dense<0xFF800000> : vector<16xf32>
    %154 = vector.multi_reduction <maximumf>, %153, %cst_58 [1] : vector<16x16xf32> to vector<16xf32>
    %155 = vector.shape_cast %154 : vector<16xf32> to vector<16x1xf32>
    %156 = vector.broadcast %155 : vector<16x1xf32> to vector<16x16xf32>
    %157 = arith.cmpf oeq, %153, %156 : vector<16x16xf32>
    %cst_59 = arith.constant 1.600000e+01 : f32
    %158 = vector.broadcast %cst_59 : f32 to vector<16x16xf32>
    %159 = arith.select %157, %129, %158 : vector<16x16xi1>, vector<16x16xf32>
    %cst_60 = arith.constant dense<0x7F800000> : vector<16xf32>
    %160 = vector.multi_reduction <minimumf>, %159, %cst_60 [1] : vector<16x16xf32> to vector<16xf32>
    %161 = vector.shape_cast %160 : vector<16xf32> to vector<16x1xf32>
    %162 = vector.broadcast %161 : vector<16x1xf32> to vector<16x16xf32>
    %163 = arith.cmpf oeq, %129, %162 : vector<16x16xf32>
    %cst_61 = arith.constant -3.000000e+38 : f32
    %164 = vector.broadcast %cst_61 : f32 to vector<16x16xf32>
    %165 = arith.select %163, %164, %153 : vector<16x16xi1>, vector<16x16xf32>
    %cst_62 = arith.constant dense<0xFF800000> : vector<16xf32>
    %166 = vector.multi_reduction <maximumf>, %165, %cst_62 [1] : vector<16x16xf32> to vector<16xf32>
    %167 = vector.shape_cast %166 : vector<16xf32> to vector<16x1xf32>
    %168 = vector.broadcast %167 : vector<16x1xf32> to vector<16x16xf32>
    %169 = arith.cmpf oeq, %165, %168 : vector<16x16xf32>
    %cst_63 = arith.constant 1.600000e+01 : f32
    %170 = vector.broadcast %cst_63 : f32 to vector<16x16xf32>
    %171 = arith.select %169, %129, %170 : vector<16x16xi1>, vector<16x16xf32>
    %cst_64 = arith.constant dense<0x7F800000> : vector<16xf32>
    %172 = vector.multi_reduction <minimumf>, %171, %cst_64 [1] : vector<16x16xf32> to vector<16xf32>
    %173 = vector.shape_cast %172 : vector<16xf32> to vector<16x1xf32>
    %174 = vector.broadcast %173 : vector<16x1xf32> to vector<16x16xf32>
    %175 = arith.cmpf oeq, %129, %174 : vector<16x16xf32>
    %cst_65 = arith.constant -3.000000e+38 : f32
    %176 = vector.broadcast %cst_65 : f32 to vector<16x16xf32>
    %177 = arith.select %175, %176, %165 : vector<16x16xi1>, vector<16x16xf32>
    %cst_66 = arith.constant dense<0xFF800000> : vector<16xf32>
    %178 = vector.multi_reduction <maximumf>, %177, %cst_66 [1] : vector<16x16xf32> to vector<16xf32>
    %179 = vector.shape_cast %178 : vector<16xf32> to vector<16x1xf32>
    %180 = vector.broadcast %179 : vector<16x1xf32> to vector<16x16xf32>
    %181 = arith.cmpf oeq, %177, %180 : vector<16x16xf32>
    %cst_67 = arith.constant 1.600000e+01 : f32
    %182 = vector.broadcast %cst_67 : f32 to vector<16x16xf32>
    %183 = arith.select %181, %129, %182 : vector<16x16xi1>, vector<16x16xf32>
    %cst_68 = arith.constant dense<0x7F800000> : vector<16xf32>
    %184 = vector.multi_reduction <minimumf>, %183, %cst_68 [1] : vector<16x16xf32> to vector<16xf32>
    %185 = vector.shape_cast %184 : vector<16xf32> to vector<16x1xf32>
    %186 = vector.broadcast %185 : vector<16x1xf32> to vector<16x16xf32>
    %187 = arith.cmpf oeq, %129, %186 : vector<16x16xf32>
    %cst_69 = arith.constant -3.000000e+38 : f32
    %188 = vector.broadcast %cst_69 : f32 to vector<16x16xf32>
    %189 = arith.select %187, %188, %177 : vector<16x16xi1>, vector<16x16xf32>
    %cst_70 = arith.constant dense<0xFF800000> : vector<16xf32>
    %190 = vector.multi_reduction <maximumf>, %189, %cst_70 [1] : vector<16x16xf32> to vector<16xf32>
    %191 = vector.shape_cast %190 : vector<16xf32> to vector<16x1xf32>
    %192 = vector.broadcast %191 : vector<16x1xf32> to vector<16x16xf32>
    %193 = arith.cmpf oeq, %189, %192 : vector<16x16xf32>
    %cst_71 = arith.constant 1.600000e+01 : f32
    %194 = vector.broadcast %cst_71 : f32 to vector<16x16xf32>
    %195 = arith.select %193, %129, %194 : vector<16x16xi1>, vector<16x16xf32>
    %cst_72 = arith.constant dense<0x7F800000> : vector<16xf32>
    %196 = vector.multi_reduction <minimumf>, %195, %cst_72 [1] : vector<16x16xf32> to vector<16xf32>
    %197 = vector.shape_cast %196 : vector<16xf32> to vector<16x1xf32>
    %198 = vector.broadcast %197 : vector<16x1xf32> to vector<16x16xf32>
    %199 = arith.cmpf oeq, %129, %198 : vector<16x16xf32>
    %cst_73 = arith.constant -3.000000e+38 : f32
    %200 = vector.broadcast %cst_73 : f32 to vector<16x16xf32>
    %201 = arith.select %199, %200, %189 : vector<16x16xi1>, vector<16x16xf32>
    %cst_74 = arith.constant dense<0xFF800000> : vector<16xf32>
    %202 = vector.multi_reduction <maximumf>, %201, %cst_74 [1] : vector<16x16xf32> to vector<16xf32>
    %203 = vector.shape_cast %202 : vector<16xf32> to vector<16x1xf32>
    %204 = vector.broadcast %203 : vector<16x1xf32> to vector<16x16xf32>
    %205 = arith.cmpf oeq, %201, %204 : vector<16x16xf32>
    %cst_75 = arith.constant 1.600000e+01 : f32
    %206 = vector.broadcast %cst_75 : f32 to vector<16x16xf32>
    %207 = arith.select %205, %129, %206 : vector<16x16xi1>, vector<16x16xf32>
    %cst_76 = arith.constant dense<0x7F800000> : vector<16xf32>
    %208 = vector.multi_reduction <minimumf>, %207, %cst_76 [1] : vector<16x16xf32> to vector<16xf32>
    %209 = vector.shape_cast %208 : vector<16xf32> to vector<16x1xf32>
    %210 = vector.broadcast %209 : vector<16x1xf32> to vector<16x16xf32>
    %211 = arith.cmpf oeq, %129, %210 : vector<16x16xf32>
    %cst_77 = arith.constant -3.000000e+38 : f32
    %212 = vector.broadcast %cst_77 : f32 to vector<16x16xf32>
    %213 = arith.select %211, %212, %201 : vector<16x16xi1>, vector<16x16xf32>
    %cst_78 = arith.constant dense<0xFF800000> : vector<16xf32>
    %214 = vector.multi_reduction <maximumf>, %213, %cst_78 [1] : vector<16x16xf32> to vector<16xf32>
    %215 = vector.shape_cast %214 : vector<16xf32> to vector<16x1xf32>
    %216 = vector.broadcast %215 : vector<16x1xf32> to vector<16x16xf32>
    %217 = arith.cmpf oeq, %213, %216 : vector<16x16xf32>
    %cst_79 = arith.constant 1.600000e+01 : f32
    %218 = vector.broadcast %cst_79 : f32 to vector<16x16xf32>
    %219 = arith.select %217, %129, %218 : vector<16x16xi1>, vector<16x16xf32>
    %cst_80 = arith.constant dense<0x7F800000> : vector<16xf32>
    %220 = vector.multi_reduction <minimumf>, %219, %cst_80 [1] : vector<16x16xf32> to vector<16xf32>
    %221 = vector.shape_cast %220 : vector<16xf32> to vector<16x1xf32>
    %cst_81 = arith.constant 0.000000e+00 : f32
    %222 = vector.broadcast %cst_81 : f32 to vector<16x1xf32>
    %223 = tpu.concatenate %149, %161, %173, %185, %197, %209, %221, %222 in 1 : vector<16x1xf32>, vector<16x1xf32>, vector<16x1xf32>, vector<16x1xf32>, vector<16x1xf32>, vector<16x1xf32>, vector<16x1xf32>, vector<16x1xf32> -> vector<16x8xf32>
    %224 = arith.fptosi %223 : vector<16x8xf32> to vector<16x8xi32>
    %c1_82 = arith.constant 1 : index
    %c0_83 = arith.constant 0 : index
    %c0_84 = arith.constant 0 : index
    %225 = vector.load %arg3[%c1_82, %c0_83, %c0_84] : memref<2x16x8xi32, #tpu.memory_space<vmem>>, vector<1x16x8xi32>
    %226 = vector.shape_cast %225 : vector<1x16x8xi32> to vector<16x8xi32>
    %227 = vector.shape_cast %224 : vector<16x8xi32> to vector<1x16x8xi32>
    tpu.vector_store %arg3[%c1_82, %c0_83, %c0_84], %227 {strides = array<i32>} : memref<2x16x8xi32, #tpu.memory_space<vmem>>, vector<1x16x8xi32>,
    return
  }
  func.func @transform_0(%arg0: i32) -> (i32, i32, i32) {
    %c0_i32 = arith.constant 0 : i32
    %c0_i32_0 = arith.constant 0 : i32
    %c0_i32_1 = arith.constant 0 : i32
    return %arg0, %c0_i32, %c0_i32_0 : i32, i32, i32
  }
  func.func @transform_1(%arg0: i32) -> (i32, i32, i32) {
    %c0_i32 = arith.constant 0 : i32
    %c0_i32_0 = arith.constant 0 : i32
    %c0_i32_1 = arith.constant 0 : i32
    return %arg0, %c0_i32, %c0_i32_0 : i32, i32, i32
  }
  func.func @transform_2(%arg0: i32) -> (i32, i32, i32) {
    %c0_i32 = arith.constant 0 : i32
    %c0_i32_0 = arith.constant 0 : i32
    %c0_i32_1 = arith.constant 0 : i32
    return %arg0, %c0_i32, %c0_i32_0 : i32, i32, i32
  }
}

module attributes {stable_mosaic.version = 11 : i64} {
  func.func @_edgeconv_kernel(%arg0: i32, %arg1: memref<2x16x128xf32, #tpu.memory_space<vmem>>, %arg2: memref<2x112x1xi32, #tpu.memory_space<vmem>>, %arg3: memref<2x16x1xf32, #tpu.memory_space<vmem>>, %arg4: memref<128x384xbf16, #tpu.memory_space<vmem>>, %arg5: memref<1x384xf32, #tpu.memory_space<vmem>>, %arg6: memref<128x128xbf16, #tpu.memory_space<vmem>>, %arg7: memref<128x128xbf16, #tpu.memory_space<vmem>>, %arg8: memref<1x128xf32, #tpu.memory_space<vmem>>, %arg9: memref<128x128xbf16, #tpu.memory_space<vmem>>, %arg10: memref<1x128xf32, #tpu.memory_space<vmem>>, %arg11: memref<128x128xbf16, #tpu.memory_space<vmem>>, %arg12: memref<2x1x128xf32, #tpu.memory_space<vmem>>) attributes {dimension_semantics = [#tpu.dimension_semantics<parallel>], iteration_bounds = array<i64: 1>, scalar_prefetch = 0 : i64, scratch_operands = 0 : i64, tpu.core_type = #tpu.core_type<tc>, window_params = [{transform_indices = @transform_0, window_bounds = array<i64: 2, 16, 128>}, {transform_indices = @transform_1, window_bounds = array<i64: 2, 112, 1>}, {transform_indices = @transform_2, window_bounds = array<i64: 2, 16, 1>}, {pipeline_mode = #tpu.pipeline_mode<synchronous>, transform_indices = @transform_3, window_bounds = array<i64: 128, 384>}, {pipeline_mode = #tpu.pipeline_mode<synchronous>, transform_indices = @transform_4, window_bounds = array<i64: 1, 384>}, {pipeline_mode = #tpu.pipeline_mode<synchronous>, transform_indices = @transform_5, window_bounds = array<i64: 128, 128>}, {pipeline_mode = #tpu.pipeline_mode<synchronous>, transform_indices = @transform_6, window_bounds = array<i64: 128, 128>}, {pipeline_mode = #tpu.pipeline_mode<synchronous>, transform_indices = @transform_7, window_bounds = array<i64: 1, 128>}, {pipeline_mode = #tpu.pipeline_mode<synchronous>, transform_indices = @transform_8, window_bounds = array<i64: 128, 128>}, {pipeline_mode = #tpu.pipeline_mode<synchronous>, transform_indices = @transform_9, window_bounds = array<i64: 1, 128>}, {pipeline_mode = #tpu.pipeline_mode<synchronous>, transform_indices = @transform_10, window_bounds = array<i64: 128, 128>}, {transform_indices = @transform_11, window_bounds = array<i64: 2, 1, 128>}]} {
    %c0 = arith.constant 0 : index
    %c0_0 = arith.constant 0 : index
    %c0_1 = arith.constant 0 : index
    %0 = vector.load %arg1[%c0, %c0_0, %c0_1] : memref<2x16x128xf32, #tpu.memory_space<vmem>>, vector<2x16x128xf32>
    %c0_2 = arith.constant 0 : index
    %c0_3 = arith.constant 0 : index
    %c0_4 = arith.constant 0 : index
    %1 = vector.load %arg3[%c0_2, %c0_3, %c0_4] : memref<2x16x1xf32, #tpu.memory_space<vmem>>, vector<2x16x1xf32>
    %2 = vector.shape_cast %1 : vector<2x16x1xf32> to vector<32x1xf32>
    %c0_5 = arith.constant 0 : index
    %c0_6 = arith.constant 0 : index
    %c0_7 = arith.constant 0 : index
    %3 = vector.load %arg2[%c0_5, %c0_6, %c0_7] : memref<2x112x1xi32, #tpu.memory_space<vmem>>, vector<2x112x1xi32>
    %4 = arith.truncf %0 : vector<2x16x128xf32> to vector<2x16x128xbf16>
    %5 = vector.shape_cast %4 : vector<2x16x128xbf16> to vector<32x128xbf16>
    %c0_8 = arith.constant 0 : index
    %c0_9 = arith.constant 0 : index
    %6 = vector.load %arg4[%c0_8, %c0_9] : memref<128x384xbf16, #tpu.memory_space<vmem>>, vector<128x384xbf16>
    %cst = arith.constant dense<0.000000e+00> : vector<32x384xf32>
    %7 = tpu.matmul %5, %6, %cst {dimension_numbers = #tpu.dot_dimension_numbers<[1], [0], [0], [1], [0, 0, 1, 1], [], []>} : vector<32x128xbf16>, vector<128x384xbf16>, vector<32x384xf32> -> vector<32x384xf32>
    %c0_10 = arith.constant 0 : index
    %c0_11 = arith.constant 0 : index
    %8 = vector.load %arg5[%c0_10, %c0_11] : memref<1x384xf32, #tpu.memory_space<vmem>>, vector<1x384xf32>
    %9 = vector.broadcast %8 : vector<1x384xf32> to vector<32x384xf32>
    %10 = arith.addf %7, %9 : vector<32x384xf32>
    %11 = vector.extract_strided_slice %10 {offsets = [0, 0], sizes = [32, 128], strides = [1, 1]} : vector<32x384xf32> to vector<32x128xf32>
    %12 = vector.extract_strided_slice %10 {offsets = [0, 128], sizes = [32, 128], strides = [1, 1]} : vector<32x384xf32> to vector<32x128xf32>
    %13 = tpu.iota {dimensions = array<i32: 2>} : vector<2x112x16xi32>
    %14 = vector.broadcast %3 : vector<2x112x1xi32> to vector<2x112x16xi32>
    %15 = arith.cmpi eq, %13, %14 : vector<2x112x16xi32>
    %16 = arith.extui %15 : vector<2x112x16xi1> to vector<2x112x16xi32>
    %17 = arith.sitofp %16 : vector<2x112x16xi32> to vector<2x112x16xf32>
    %18 = arith.truncf %17 : vector<2x112x16xf32> to vector<2x112x16xbf16>
    "tpu.trace_start"() <{level = 10 : i32, message = "bnp,bpc->bnc"}> : () -> ()
    %cst_12 = arith.constant dense<0.000000e+00> : vector<2x112x128xf32>
    %19 = tpu.matmul %18, %4, %cst_12 {dimension_numbers = #tpu.dot_dimension_numbers<[2], [1], [1], [2], [0, 0, 0, 1, 1, 2], [0], [0]>} : vector<2x112x16xbf16>, vector<2x16x128xbf16>, vector<2x112x128xf32> -> vector<2x112x128xf32>
    "tpu.trace_stop"() : () -> ()
    %20 = arith.truncf %19 : vector<2x112x128xf32> to vector<2x112x128xbf16>
    %cst_13 = arith.constant 0.000000e+00 : f32
    %21 = vector.broadcast %cst_13 : f32 to vector<32x128xf32>
    %22 = vector.extract_strided_slice %20 {offsets = [0, 0, 0], sizes = [2, 16, 128], strides = [1, 1, 1]} : vector<2x112x128xbf16> to vector<2x16x128xbf16>
    %23 = vector.shape_cast %22 : vector<2x16x128xbf16> to vector<32x128xbf16>
    %c0_14 = arith.constant 0 : index
    %c0_15 = arith.constant 0 : index
    %24 = vector.load %arg6[%c0_14, %c0_15] : memref<128x128xbf16, #tpu.memory_space<vmem>>, vector<128x128xbf16>
    %cst_16 = arith.constant dense<0.000000e+00> : vector<32x128xf32>
    %25 = tpu.matmul %23, %24, %cst_16 {dimension_numbers = #tpu.dot_dimension_numbers<[1], [0], [0], [1], [0, 0, 1, 1], [], []>} : vector<32x128xbf16>, vector<128x128xbf16>, vector<32x128xf32> -> vector<32x128xf32>
    %26 = arith.addf %11, %25 : vector<32x128xf32>
    %cst_17 = arith.constant 0.000000e+00 : f32
    %27 = vector.broadcast %cst_17 : f32 to vector<32x128xf32>
    %28 = arith.maximumf %26, %27 : vector<32x128xf32>
    %29 = arith.truncf %28 : vector<32x128xf32> to vector<32x128xbf16>
    %c0_18 = arith.constant 0 : index
    %c0_19 = arith.constant 0 : index
    %30 = vector.load %arg7[%c0_18, %c0_19] : memref<128x128xbf16, #tpu.memory_space<vmem>>, vector<128x128xbf16>
    %cst_20 = arith.constant dense<0.000000e+00> : vector<32x128xf32>
    %31 = tpu.matmul %29, %30, %cst_20 {dimension_numbers = #tpu.dot_dimension_numbers<[1], [0], [0], [1], [0, 0, 1, 1], [], []>} : vector<32x128xbf16>, vector<128x128xbf16>, vector<32x128xf32> -> vector<32x128xf32>
    %c0_21 = arith.constant 0 : index
    %c0_22 = arith.constant 0 : index
    %32 = vector.load %arg8[%c0_21, %c0_22] : memref<1x128xf32, #tpu.memory_space<vmem>>, vector<1x128xf32>
    %33 = vector.broadcast %32 : vector<1x128xf32> to vector<32x128xf32>
    %34 = arith.addf %31, %33 : vector<32x128xf32>
    %cst_23 = arith.constant 0.000000e+00 : f32
    %35 = vector.broadcast %cst_23 : f32 to vector<32x128xf32>
    %36 = arith.maximumf %34, %35 : vector<32x128xf32>
    %37 = arith.truncf %36 : vector<32x128xf32> to vector<32x128xbf16>
    %c0_24 = arith.constant 0 : index
    %c0_25 = arith.constant 0 : index
    %38 = vector.load %arg9[%c0_24, %c0_25] : memref<128x128xbf16, #tpu.memory_space<vmem>>, vector<128x128xbf16>
    %cst_26 = arith.constant dense<0.000000e+00> : vector<32x128xf32>
    %39 = tpu.matmul %37, %38, %cst_26 {dimension_numbers = #tpu.dot_dimension_numbers<[1], [0], [0], [1], [0, 0, 1, 1], [], []>} : vector<32x128xbf16>, vector<128x128xbf16>, vector<32x128xf32> -> vector<32x128xf32>
    %c0_27 = arith.constant 0 : index
    %c0_28 = arith.constant 0 : index
    %40 = vector.load %arg10[%c0_27, %c0_28] : memref<1x128xf32, #tpu.memory_space<vmem>>, vector<1x128xf32>
    %41 = vector.broadcast %40 : vector<1x128xf32> to vector<32x128xf32>
    %42 = arith.addf %39, %41 : vector<32x128xf32>
    %cst_29 = arith.constant 0.000000e+00 : f32
    %43 = vector.broadcast %cst_29 : f32 to vector<32x128xf32>
    %44 = arith.maximumf %42, %43 : vector<32x128xf32>
    %45 = arith.addf %21, %44 : vector<32x128xf32>
    %46 = vector.extract_strided_slice %20 {offsets = [0, 16, 0], sizes = [2, 16, 128], strides = [1, 1, 1]} : vector<2x112x128xbf16> to vector<2x16x128xbf16>
    %47 = vector.shape_cast %46 : vector<2x16x128xbf16> to vector<32x128xbf16>
    %c0_30 = arith.constant 0 : index
    %c0_31 = arith.constant 0 : index
    %48 = vector.load %arg6[%c0_30, %c0_31] : memref<128x128xbf16, #tpu.memory_space<vmem>>, vector<128x128xbf16>
    %cst_32 = arith.constant dense<0.000000e+00> : vector<32x128xf32>
    %49 = tpu.matmul %47, %48, %cst_32 {dimension_numbers = #tpu.dot_dimension_numbers<[1], [0], [0], [1], [0, 0, 1, 1], [], []>} : vector<32x128xbf16>, vector<128x128xbf16>, vector<32x128xf32> -> vector<32x128xf32>
    %50 = arith.addf %11, %49 : vector<32x128xf32>
    %cst_33 = arith.constant 0.000000e+00 : f32
    %51 = vector.broadcast %cst_33 : f32 to vector<32x128xf32>
    %52 = arith.maximumf %50, %51 : vector<32x128xf32>
    %53 = arith.truncf %52 : vector<32x128xf32> to vector<32x128xbf16>
    %c0_34 = arith.constant 0 : index
    %c0_35 = arith.constant 0 : index
    %54 = vector.load %arg7[%c0_34, %c0_35] : memref<128x128xbf16, #tpu.memory_space<vmem>>, vector<128x128xbf16>
    %cst_36 = arith.constant dense<0.000000e+00> : vector<32x128xf32>
    %55 = tpu.matmul %53, %54, %cst_36 {dimension_numbers = #tpu.dot_dimension_numbers<[1], [0], [0], [1], [0, 0, 1, 1], [], []>} : vector<32x128xbf16>, vector<128x128xbf16>, vector<32x128xf32> -> vector<32x128xf32>
    %c0_37 = arith.constant 0 : index
    %c0_38 = arith.constant 0 : index
    %56 = vector.load %arg8[%c0_37, %c0_38] : memref<1x128xf32, #tpu.memory_space<vmem>>, vector<1x128xf32>
    %57 = vector.broadcast %56 : vector<1x128xf32> to vector<32x128xf32>
    %58 = arith.addf %55, %57 : vector<32x128xf32>
    %cst_39 = arith.constant 0.000000e+00 : f32
    %59 = vector.broadcast %cst_39 : f32 to vector<32x128xf32>
    %60 = arith.maximumf %58, %59 : vector<32x128xf32>
    %61 = arith.truncf %60 : vector<32x128xf32> to vector<32x128xbf16>
    %c0_40 = arith.constant 0 : index
    %c0_41 = arith.constant 0 : index
    %62 = vector.load %arg9[%c0_40, %c0_41] : memref<128x128xbf16, #tpu.memory_space<vmem>>, vector<128x128xbf16>
    %cst_42 = arith.constant dense<0.000000e+00> : vector<32x128xf32>
    %63 = tpu.matmul %61, %62, %cst_42 {dimension_numbers = #tpu.dot_dimension_numbers<[1], [0], [0], [1], [0, 0, 1, 1], [], []>} : vector<32x128xbf16>, vector<128x128xbf16>, vector<32x128xf32> -> vector<32x128xf32>
    %c0_43 = arith.constant 0 : index
    %c0_44 = arith.constant 0 : index
    %64 = vector.load %arg10[%c0_43, %c0_44] : memref<1x128xf32, #tpu.memory_space<vmem>>, vector<1x128xf32>
    %65 = vector.broadcast %64 : vector<1x128xf32> to vector<32x128xf32>
    %66 = arith.addf %63, %65 : vector<32x128xf32>
    %cst_45 = arith.constant 0.000000e+00 : f32
    %67 = vector.broadcast %cst_45 : f32 to vector<32x128xf32>
    %68 = arith.maximumf %66, %67 : vector<32x128xf32>
    %69 = arith.addf %45, %68 : vector<32x128xf32>
    %70 = vector.extract_strided_slice %20 {offsets = [0, 32, 0], sizes = [2, 16, 128], strides = [1, 1, 1]} : vector<2x112x128xbf16> to vector<2x16x128xbf16>
    %71 = vector.shape_cast %70 : vector<2x16x128xbf16> to vector<32x128xbf16>
    %c0_46 = arith.constant 0 : index
    %c0_47 = arith.constant 0 : index
    %72 = vector.load %arg6[%c0_46, %c0_47] : memref<128x128xbf16, #tpu.memory_space<vmem>>, vector<128x128xbf16>
    %cst_48 = arith.constant dense<0.000000e+00> : vector<32x128xf32>
    %73 = tpu.matmul %71, %72, %cst_48 {dimension_numbers = #tpu.dot_dimension_numbers<[1], [0], [0], [1], [0, 0, 1, 1], [], []>} : vector<32x128xbf16>, vector<128x128xbf16>, vector<32x128xf32> -> vector<32x128xf32>
    %74 = arith.addf %11, %73 : vector<32x128xf32>
    %cst_49 = arith.constant 0.000000e+00 : f32
    %75 = vector.broadcast %cst_49 : f32 to vector<32x128xf32>
    %76 = arith.maximumf %74, %75 : vector<32x128xf32>
    %77 = arith.truncf %76 : vector<32x128xf32> to vector<32x128xbf16>
    %c0_50 = arith.constant 0 : index
    %c0_51 = arith.constant 0 : index
    %78 = vector.load %arg7[%c0_50, %c0_51] : memref<128x128xbf16, #tpu.memory_space<vmem>>, vector<128x128xbf16>
    %cst_52 = arith.constant dense<0.000000e+00> : vector<32x128xf32>
    %79 = tpu.matmul %77, %78, %cst_52 {dimension_numbers = #tpu.dot_dimension_numbers<[1], [0], [0], [1], [0, 0, 1, 1], [], []>} : vector<32x128xbf16>, vector<128x128xbf16>, vector<32x128xf32> -> vector<32x128xf32>
    %c0_53 = arith.constant 0 : index
    %c0_54 = arith.constant 0 : index
    %80 = vector.load %arg8[%c0_53, %c0_54] : memref<1x128xf32, #tpu.memory_space<vmem>>, vector<1x128xf32>
    %81 = vector.broadcast %80 : vector<1x128xf32> to vector<32x128xf32>
    %82 = arith.addf %79, %81 : vector<32x128xf32>
    %cst_55 = arith.constant 0.000000e+00 : f32
    %83 = vector.broadcast %cst_55 : f32 to vector<32x128xf32>
    %84 = arith.maximumf %82, %83 : vector<32x128xf32>
    %85 = arith.truncf %84 : vector<32x128xf32> to vector<32x128xbf16>
    %c0_56 = arith.constant 0 : index
    %c0_57 = arith.constant 0 : index
    %86 = vector.load %arg9[%c0_56, %c0_57] : memref<128x128xbf16, #tpu.memory_space<vmem>>, vector<128x128xbf16>
    %cst_58 = arith.constant dense<0.000000e+00> : vector<32x128xf32>
    %87 = tpu.matmul %85, %86, %cst_58 {dimension_numbers = #tpu.dot_dimension_numbers<[1], [0], [0], [1], [0, 0, 1, 1], [], []>} : vector<32x128xbf16>, vector<128x128xbf16>, vector<32x128xf32> -> vector<32x128xf32>
    %c0_59 = arith.constant 0 : index
    %c0_60 = arith.constant 0 : index
    %88 = vector.load %arg10[%c0_59, %c0_60] : memref<1x128xf32, #tpu.memory_space<vmem>>, vector<1x128xf32>
    %89 = vector.broadcast %88 : vector<1x128xf32> to vector<32x128xf32>
    %90 = arith.addf %87, %89 : vector<32x128xf32>
    %cst_61 = arith.constant 0.000000e+00 : f32
    %91 = vector.broadcast %cst_61 : f32 to vector<32x128xf32>
    %92 = arith.maximumf %90, %91 : vector<32x128xf32>
    %93 = arith.addf %69, %92 : vector<32x128xf32>
    %94 = vector.extract_strided_slice %20 {offsets = [0, 48, 0], sizes = [2, 16, 128], strides = [1, 1, 1]} : vector<2x112x128xbf16> to vector<2x16x128xbf16>
    %95 = vector.shape_cast %94 : vector<2x16x128xbf16> to vector<32x128xbf16>
    %c0_62 = arith.constant 0 : index
    %c0_63 = arith.constant 0 : index
    %96 = vector.load %arg6[%c0_62, %c0_63] : memref<128x128xbf16, #tpu.memory_space<vmem>>, vector<128x128xbf16>
    %cst_64 = arith.constant dense<0.000000e+00> : vector<32x128xf32>
    %97 = tpu.matmul %95, %96, %cst_64 {dimension_numbers = #tpu.dot_dimension_numbers<[1], [0], [0], [1], [0, 0, 1, 1], [], []>} : vector<32x128xbf16>, vector<128x128xbf16>, vector<32x128xf32> -> vector<32x128xf32>
    %98 = arith.addf %11, %97 : vector<32x128xf32>
    %cst_65 = arith.constant 0.000000e+00 : f32
    %99 = vector.broadcast %cst_65 : f32 to vector<32x128xf32>
    %100 = arith.maximumf %98, %99 : vector<32x128xf32>
    %101 = arith.truncf %100 : vector<32x128xf32> to vector<32x128xbf16>
    %c0_66 = arith.constant 0 : index
    %c0_67 = arith.constant 0 : index
    %102 = vector.load %arg7[%c0_66, %c0_67] : memref<128x128xbf16, #tpu.memory_space<vmem>>, vector<128x128xbf16>
    %cst_68 = arith.constant dense<0.000000e+00> : vector<32x128xf32>
    %103 = tpu.matmul %101, %102, %cst_68 {dimension_numbers = #tpu.dot_dimension_numbers<[1], [0], [0], [1], [0, 0, 1, 1], [], []>} : vector<32x128xbf16>, vector<128x128xbf16>, vector<32x128xf32> -> vector<32x128xf32>
    %c0_69 = arith.constant 0 : index
    %c0_70 = arith.constant 0 : index
    %104 = vector.load %arg8[%c0_69, %c0_70] : memref<1x128xf32, #tpu.memory_space<vmem>>, vector<1x128xf32>
    %105 = vector.broadcast %104 : vector<1x128xf32> to vector<32x128xf32>
    %106 = arith.addf %103, %105 : vector<32x128xf32>
    %cst_71 = arith.constant 0.000000e+00 : f32
    %107 = vector.broadcast %cst_71 : f32 to vector<32x128xf32>
    %108 = arith.maximumf %106, %107 : vector<32x128xf32>
    %109 = arith.truncf %108 : vector<32x128xf32> to vector<32x128xbf16>
    %c0_72 = arith.constant 0 : index
    %c0_73 = arith.constant 0 : index
    %110 = vector.load %arg9[%c0_72, %c0_73] : memref<128x128xbf16, #tpu.memory_space<vmem>>, vector<128x128xbf16>
    %cst_74 = arith.constant dense<0.000000e+00> : vector<32x128xf32>
    %111 = tpu.matmul %109, %110, %cst_74 {dimension_numbers = #tpu.dot_dimension_numbers<[1], [0], [0], [1], [0, 0, 1, 1], [], []>} : vector<32x128xbf16>, vector<128x128xbf16>, vector<32x128xf32> -> vector<32x128xf32>
    %c0_75 = arith.constant 0 : index
    %c0_76 = arith.constant 0 : index
    %112 = vector.load %arg10[%c0_75, %c0_76] : memref<1x128xf32, #tpu.memory_space<vmem>>, vector<1x128xf32>
    %113 = vector.broadcast %112 : vector<1x128xf32> to vector<32x128xf32>
    %114 = arith.addf %111, %113 : vector<32x128xf32>
    %cst_77 = arith.constant 0.000000e+00 : f32
    %115 = vector.broadcast %cst_77 : f32 to vector<32x128xf32>
    %116 = arith.maximumf %114, %115 : vector<32x128xf32>
    %117 = arith.addf %93, %116 : vector<32x128xf32>
    %118 = vector.extract_strided_slice %20 {offsets = [0, 64, 0], sizes = [2, 16, 128], strides = [1, 1, 1]} : vector<2x112x128xbf16> to vector<2x16x128xbf16>
    %119 = vector.shape_cast %118 : vector<2x16x128xbf16> to vector<32x128xbf16>
    %c0_78 = arith.constant 0 : index
    %c0_79 = arith.constant 0 : index
    %120 = vector.load %arg6[%c0_78, %c0_79] : memref<128x128xbf16, #tpu.memory_space<vmem>>, vector<128x128xbf16>
    %cst_80 = arith.constant dense<0.000000e+00> : vector<32x128xf32>
    %121 = tpu.matmul %119, %120, %cst_80 {dimension_numbers = #tpu.dot_dimension_numbers<[1], [0], [0], [1], [0, 0, 1, 1], [], []>} : vector<32x128xbf16>, vector<128x128xbf16>, vector<32x128xf32> -> vector<32x128xf32>
    %122 = arith.addf %11, %121 : vector<32x128xf32>
    %cst_81 = arith.constant 0.000000e+00 : f32
    %123 = vector.broadcast %cst_81 : f32 to vector<32x128xf32>
    %124 = arith.maximumf %122, %123 : vector<32x128xf32>
    %125 = arith.truncf %124 : vector<32x128xf32> to vector<32x128xbf16>
    %c0_82 = arith.constant 0 : index
    %c0_83 = arith.constant 0 : index
    %126 = vector.load %arg7[%c0_82, %c0_83] : memref<128x128xbf16, #tpu.memory_space<vmem>>, vector<128x128xbf16>
    %cst_84 = arith.constant dense<0.000000e+00> : vector<32x128xf32>
    %127 = tpu.matmul %125, %126, %cst_84 {dimension_numbers = #tpu.dot_dimension_numbers<[1], [0], [0], [1], [0, 0, 1, 1], [], []>} : vector<32x128xbf16>, vector<128x128xbf16>, vector<32x128xf32> -> vector<32x128xf32>
    %c0_85 = arith.constant 0 : index
    %c0_86 = arith.constant 0 : index
    %128 = vector.load %arg8[%c0_85, %c0_86] : memref<1x128xf32, #tpu.memory_space<vmem>>, vector<1x128xf32>
    %129 = vector.broadcast %128 : vector<1x128xf32> to vector<32x128xf32>
    %130 = arith.addf %127, %129 : vector<32x128xf32>
    %cst_87 = arith.constant 0.000000e+00 : f32
    %131 = vector.broadcast %cst_87 : f32 to vector<32x128xf32>
    %132 = arith.maximumf %130, %131 : vector<32x128xf32>
    %133 = arith.truncf %132 : vector<32x128xf32> to vector<32x128xbf16>
    %c0_88 = arith.constant 0 : index
    %c0_89 = arith.constant 0 : index
    %134 = vector.load %arg9[%c0_88, %c0_89] : memref<128x128xbf16, #tpu.memory_space<vmem>>, vector<128x128xbf16>
    %cst_90 = arith.constant dense<0.000000e+00> : vector<32x128xf32>
    %135 = tpu.matmul %133, %134, %cst_90 {dimension_numbers = #tpu.dot_dimension_numbers<[1], [0], [0], [1], [0, 0, 1, 1], [], []>} : vector<32x128xbf16>, vector<128x128xbf16>, vector<32x128xf32> -> vector<32x128xf32>
    %c0_91 = arith.constant 0 : index
    %c0_92 = arith.constant 0 : index
    %136 = vector.load %arg10[%c0_91, %c0_92] : memref<1x128xf32, #tpu.memory_space<vmem>>, vector<1x128xf32>
    %137 = vector.broadcast %136 : vector<1x128xf32> to vector<32x128xf32>
    %138 = arith.addf %135, %137 : vector<32x128xf32>
    %cst_93 = arith.constant 0.000000e+00 : f32
    %139 = vector.broadcast %cst_93 : f32 to vector<32x128xf32>
    %140 = arith.maximumf %138, %139 : vector<32x128xf32>
    %141 = arith.addf %117, %140 : vector<32x128xf32>
    %142 = vector.extract_strided_slice %20 {offsets = [0, 80, 0], sizes = [2, 16, 128], strides = [1, 1, 1]} : vector<2x112x128xbf16> to vector<2x16x128xbf16>
    %143 = vector.shape_cast %142 : vector<2x16x128xbf16> to vector<32x128xbf16>
    %c0_94 = arith.constant 0 : index
    %c0_95 = arith.constant 0 : index
    %144 = vector.load %arg6[%c0_94, %c0_95] : memref<128x128xbf16, #tpu.memory_space<vmem>>, vector<128x128xbf16>
    %cst_96 = arith.constant dense<0.000000e+00> : vector<32x128xf32>
    %145 = tpu.matmul %143, %144, %cst_96 {dimension_numbers = #tpu.dot_dimension_numbers<[1], [0], [0], [1], [0, 0, 1, 1], [], []>} : vector<32x128xbf16>, vector<128x128xbf16>, vector<32x128xf32> -> vector<32x128xf32>
    %146 = arith.addf %11, %145 : vector<32x128xf32>
    %cst_97 = arith.constant 0.000000e+00 : f32
    %147 = vector.broadcast %cst_97 : f32 to vector<32x128xf32>
    %148 = arith.maximumf %146, %147 : vector<32x128xf32>
    %149 = arith.truncf %148 : vector<32x128xf32> to vector<32x128xbf16>
    %c0_98 = arith.constant 0 : index
    %c0_99 = arith.constant 0 : index
    %150 = vector.load %arg7[%c0_98, %c0_99] : memref<128x128xbf16, #tpu.memory_space<vmem>>, vector<128x128xbf16>
    %cst_100 = arith.constant dense<0.000000e+00> : vector<32x128xf32>
    %151 = tpu.matmul %149, %150, %cst_100 {dimension_numbers = #tpu.dot_dimension_numbers<[1], [0], [0], [1], [0, 0, 1, 1], [], []>} : vector<32x128xbf16>, vector<128x128xbf16>, vector<32x128xf32> -> vector<32x128xf32>
    %c0_101 = arith.constant 0 : index
    %c0_102 = arith.constant 0 : index
    %152 = vector.load %arg8[%c0_101, %c0_102] : memref<1x128xf32, #tpu.memory_space<vmem>>, vector<1x128xf32>
    %153 = vector.broadcast %152 : vector<1x128xf32> to vector<32x128xf32>
    %154 = arith.addf %151, %153 : vector<32x128xf32>
    %cst_103 = arith.constant 0.000000e+00 : f32
    %155 = vector.broadcast %cst_103 : f32 to vector<32x128xf32>
    %156 = arith.maximumf %154, %155 : vector<32x128xf32>
    %157 = arith.truncf %156 : vector<32x128xf32> to vector<32x128xbf16>
    %c0_104 = arith.constant 0 : index
    %c0_105 = arith.constant 0 : index
    %158 = vector.load %arg9[%c0_104, %c0_105] : memref<128x128xbf16, #tpu.memory_space<vmem>>, vector<128x128xbf16>
    %cst_106 = arith.constant dense<0.000000e+00> : vector<32x128xf32>
    %159 = tpu.matmul %157, %158, %cst_106 {dimension_numbers = #tpu.dot_dimension_numbers<[1], [0], [0], [1], [0, 0, 1, 1], [], []>} : vector<32x128xbf16>, vector<128x128xbf16>, vector<32x128xf32> -> vector<32x128xf32>
    %c0_107 = arith.constant 0 : index
    %c0_108 = arith.constant 0 : index
    %160 = vector.load %arg10[%c0_107, %c0_108] : memref<1x128xf32, #tpu.memory_space<vmem>>, vector<1x128xf32>
    %161 = vector.broadcast %160 : vector<1x128xf32> to vector<32x128xf32>
    %162 = arith.addf %159, %161 : vector<32x128xf32>
    %cst_109 = arith.constant 0.000000e+00 : f32
    %163 = vector.broadcast %cst_109 : f32 to vector<32x128xf32>
    %164 = arith.maximumf %162, %163 : vector<32x128xf32>
    %165 = arith.addf %141, %164 : vector<32x128xf32>
    %166 = vector.extract_strided_slice %20 {offsets = [0, 96, 0], sizes = [2, 16, 128], strides = [1, 1, 1]} : vector<2x112x128xbf16> to vector<2x16x128xbf16>
    %167 = vector.shape_cast %166 : vector<2x16x128xbf16> to vector<32x128xbf16>
    %c0_110 = arith.constant 0 : index
    %c0_111 = arith.constant 0 : index
    %168 = vector.load %arg6[%c0_110, %c0_111] : memref<128x128xbf16, #tpu.memory_space<vmem>>, vector<128x128xbf16>
    %cst_112 = arith.constant dense<0.000000e+00> : vector<32x128xf32>
    %169 = tpu.matmul %167, %168, %cst_112 {dimension_numbers = #tpu.dot_dimension_numbers<[1], [0], [0], [1], [0, 0, 1, 1], [], []>} : vector<32x128xbf16>, vector<128x128xbf16>, vector<32x128xf32> -> vector<32x128xf32>
    %170 = arith.addf %11, %169 : vector<32x128xf32>
    %cst_113 = arith.constant 0.000000e+00 : f32
    %171 = vector.broadcast %cst_113 : f32 to vector<32x128xf32>
    %172 = arith.maximumf %170, %171 : vector<32x128xf32>
    %173 = arith.truncf %172 : vector<32x128xf32> to vector<32x128xbf16>
    %c0_114 = arith.constant 0 : index
    %c0_115 = arith.constant 0 : index
    %174 = vector.load %arg7[%c0_114, %c0_115] : memref<128x128xbf16, #tpu.memory_space<vmem>>, vector<128x128xbf16>
    %cst_116 = arith.constant dense<0.000000e+00> : vector<32x128xf32>
    %175 = tpu.matmul %173, %174, %cst_116 {dimension_numbers = #tpu.dot_dimension_numbers<[1], [0], [0], [1], [0, 0, 1, 1], [], []>} : vector<32x128xbf16>, vector<128x128xbf16>, vector<32x128xf32> -> vector<32x128xf32>
    %c0_117 = arith.constant 0 : index
    %c0_118 = arith.constant 0 : index
    %176 = vector.load %arg8[%c0_117, %c0_118] : memref<1x128xf32, #tpu.memory_space<vmem>>, vector<1x128xf32>
    %177 = vector.broadcast %176 : vector<1x128xf32> to vector<32x128xf32>
    %178 = arith.addf %175, %177 : vector<32x128xf32>
    %cst_119 = arith.constant 0.000000e+00 : f32
    %179 = vector.broadcast %cst_119 : f32 to vector<32x128xf32>
    %180 = arith.maximumf %178, %179 : vector<32x128xf32>
    %181 = arith.truncf %180 : vector<32x128xf32> to vector<32x128xbf16>
    %c0_120 = arith.constant 0 : index
    %c0_121 = arith.constant 0 : index
    %182 = vector.load %arg9[%c0_120, %c0_121] : memref<128x128xbf16, #tpu.memory_space<vmem>>, vector<128x128xbf16>
    %cst_122 = arith.constant dense<0.000000e+00> : vector<32x128xf32>
    %183 = tpu.matmul %181, %182, %cst_122 {dimension_numbers = #tpu.dot_dimension_numbers<[1], [0], [0], [1], [0, 0, 1, 1], [], []>} : vector<32x128xbf16>, vector<128x128xbf16>, vector<32x128xf32> -> vector<32x128xf32>
    %c0_123 = arith.constant 0 : index
    %c0_124 = arith.constant 0 : index
    %184 = vector.load %arg10[%c0_123, %c0_124] : memref<1x128xf32, #tpu.memory_space<vmem>>, vector<1x128xf32>
    %185 = vector.broadcast %184 : vector<1x128xf32> to vector<32x128xf32>
    %186 = arith.addf %183, %185 : vector<32x128xf32>
    %cst_125 = arith.constant 0.000000e+00 : f32
    %187 = vector.broadcast %cst_125 : f32 to vector<32x128xf32>
    %188 = arith.maximumf %186, %187 : vector<32x128xf32>
    %189 = arith.addf %165, %188 : vector<32x128xf32>
    %cst_126 = arith.constant 0.142857149 : f32
    %190 = vector.broadcast %cst_126 : f32 to vector<32x128xf32>
    %191 = arith.mulf %189, %190 : vector<32x128xf32>
    %192 = arith.addf %191, %12 : vector<32x128xf32>
    %cst_127 = arith.constant 0.000000e+00 : f32
    %193 = vector.broadcast %cst_127 : f32 to vector<32x128xf32>
    %194 = arith.maximumf %192, %193 : vector<32x128xf32>
    %195 = vector.broadcast %2 : vector<32x1xf32> to vector<32x128xf32>
    %196 = arith.mulf %194, %195 : vector<32x128xf32>
    %197 = vector.extract_strided_slice %10 {offsets = [0, 256], sizes = [32, 128], strides = [1, 1]} : vector<32x384xf32> to vector<32x128xf32>
    %198 = arith.truncf %196 : vector<32x128xf32> to vector<32x128xbf16>
    %c0_128 = arith.constant 0 : index
    %c0_129 = arith.constant 0 : index
    %199 = vector.load %arg11[%c0_128, %c0_129] : memref<128x128xbf16, #tpu.memory_space<vmem>>, vector<128x128xbf16>
    %cst_130 = arith.constant dense<0.000000e+00> : vector<32x128xf32>
    %200 = tpu.matmul %198, %199, %cst_130 {dimension_numbers = #tpu.dot_dimension_numbers<[1], [0], [0], [1], [0, 0, 1, 1], [], []>} : vector<32x128xbf16>, vector<128x128xbf16>, vector<32x128xf32> -> vector<32x128xf32>
    %201 = arith.addf %197, %200 : vector<32x128xf32>
    %cst_131 = arith.constant 0.000000e+00 : f32
    %202 = vector.broadcast %cst_131 : f32 to vector<32x128xf32>
    %203 = arith.maximumf %201, %202 : vector<32x128xf32>
    %204 = vector.broadcast %2 : vector<32x1xf32> to vector<32x128xf32>
    %205 = arith.mulf %203, %204 : vector<32x128xf32>
    %206 = vector.shape_cast %205 : vector<32x128xf32> to vector<2x16x128xf32>
    %cst_132 = arith.constant dense<0.000000e+00> : vector<2x128xf32>
    %207 = vector.multi_reduction <add>, %206, %cst_132 [1] : vector<2x16x128xf32> to vector<2x128xf32>
    %208 = vector.shape_cast %207 : vector<2x128xf32> to vector<2x1x128xf32>
    %c0_133 = arith.constant 0 : index
    %c0_134 = arith.constant 0 : index
    %c0_135 = arith.constant 0 : index
    %209 = vector.load %arg12[%c0_133, %c0_134, %c0_135] : memref<2x1x128xf32, #tpu.memory_space<vmem>>, vector<2x1x128xf32>
    tpu.vector_store %arg12[%c0_133, %c0_134, %c0_135], %208 {strides = array<i32>} : memref<2x1x128xf32, #tpu.memory_space<vmem>>, vector<2x1x128xf32>,
    return
  }
  func.func @transform_0(%arg0: i32) -> (i32, i32, i32) {
    %c0_i32 = arith.constant 0 : i32
    %c0_i32_0 = arith.constant 0 : i32
    %c0_i32_1 = arith.constant 0 : i32
    return %arg0, %c0_i32, %c0_i32_0 : i32, i32, i32
  }
  func.func @transform_1(%arg0: i32) -> (i32, i32, i32) {
    %c0_i32 = arith.constant 0 : i32
    %c0_i32_0 = arith.constant 0 : i32
    %c0_i32_1 = arith.constant 0 : i32
    return %arg0, %c0_i32, %c0_i32_0 : i32, i32, i32
  }
  func.func @transform_2(%arg0: i32) -> (i32, i32, i32) {
    %c0_i32 = arith.constant 0 : i32
    %c0_i32_0 = arith.constant 0 : i32
    %c0_i32_1 = arith.constant 0 : i32
    return %arg0, %c0_i32, %c0_i32_0 : i32, i32, i32
  }
  func.func @transform_3(%arg0: i32) -> (i32, i32) {
    %c0_i32 = arith.constant 0 : i32
    %c0_i32_0 = arith.constant 0 : i32
    %c0_i32_1 = arith.constant 0 : i32
    return %c0_i32, %c0_i32_0 : i32, i32
  }
  func.func @transform_4(%arg0: i32) -> (i32, i32) {
    %c0_i32 = arith.constant 0 : i32
    %c0_i32_0 = arith.constant 0 : i32
    %c0_i32_1 = arith.constant 0 : i32
    return %c0_i32, %c0_i32_0 : i32, i32
  }
  func.func @transform_5(%arg0: i32) -> (i32, i32) {
    %c0_i32 = arith.constant 0 : i32
    %c0_i32_0 = arith.constant 0 : i32
    %c0_i32_1 = arith.constant 0 : i32
    return %c0_i32, %c0_i32_0 : i32, i32
  }
  func.func @transform_6(%arg0: i32) -> (i32, i32) {
    %c0_i32 = arith.constant 0 : i32
    %c0_i32_0 = arith.constant 0 : i32
    %c0_i32_1 = arith.constant 0 : i32
    return %c0_i32, %c0_i32_0 : i32, i32
  }
  func.func @transform_7(%arg0: i32) -> (i32, i32) {
    %c0_i32 = arith.constant 0 : i32
    %c0_i32_0 = arith.constant 0 : i32
    %c0_i32_1 = arith.constant 0 : i32
    return %c0_i32, %c0_i32_0 : i32, i32
  }
  func.func @transform_8(%arg0: i32) -> (i32, i32) {
    %c0_i32 = arith.constant 0 : i32
    %c0_i32_0 = arith.constant 0 : i32
    %c0_i32_1 = arith.constant 0 : i32
    return %c0_i32, %c0_i32_0 : i32, i32
  }
  func.func @transform_9(%arg0: i32) -> (i32, i32) {
    %c0_i32 = arith.constant 0 : i32
    %c0_i32_0 = arith.constant 0 : i32
    %c0_i32_1 = arith.constant 0 : i32
    return %c0_i32, %c0_i32_0 : i32, i32
  }
  func.func @transform_10(%arg0: i32) -> (i32, i32) {
    %c0_i32 = arith.constant 0 : i32
    %c0_i32_0 = arith.constant 0 : i32
    %c0_i32_1 = arith.constant 0 : i32
    return %c0_i32, %c0_i32_0 : i32, i32
  }
  func.func @transform_11(%arg0: i32) -> (i32, i32, i32) {
    %c0_i32 = arith.constant 0 : i32
    %c0_i32_0 = arith.constant 0 : i32
    %c0_i32_1 = arith.constant 0 : i32
    return %arg0, %c0_i32, %c0_i32_0 : i32, i32, i32
  }
}

module attributes {stable_mosaic.version = 11 : i64} {
  func.func @_knn_kernel(%arg0: i32, %arg1: memref<2x16x128xf32, #tpu.memory_space<vmem>>, %arg2: memref<2x16x1xf32, #tpu.memory_space<vmem>>, %arg3: memref<2x16x8xi32, #tpu.memory_space<vmem>>) attributes {dimension_semantics = [#tpu.dimension_semantics<parallel>], iteration_bounds = array<i64: 1>, scalar_prefetch = 0 : i64, scratch_operands = 0 : i64, tpu.core_type = #tpu.core_type<tc>, window_params = [{transform_indices = @transform_0, window_bounds = array<i64: 2, 16, 128>}, {transform_indices = @transform_1, window_bounds = array<i64: 2, 16, 1>}, {transform_indices = @transform_2, window_bounds = array<i64: 2, 16, 8>}]} {
    %c0 = arith.constant 0 : index
    %c0_0 = arith.constant 0 : index
    %c0_1 = arith.constant 0 : index
    %0 = vector.load %arg1[%c0, %c0_0, %c0_1] : memref<2x16x128xf32, #tpu.memory_space<vmem>>, vector<1x16x128xf32>
    %1 = vector.shape_cast %0 : vector<1x16x128xf32> to vector<16x128xf32>
    %c0_2 = arith.constant 0 : index
    %c0_3 = arith.constant 0 : index
    %c0_4 = arith.constant 0 : index
    %2 = vector.load %arg2[%c0_2, %c0_3, %c0_4] : memref<2x16x1xf32, #tpu.memory_space<vmem>>, vector<1x16x1xf32>
    %3 = vector.shape_cast %2 : vector<1x16x1xf32> to vector<16x1xf32>
    %4 = vector.broadcast %3 : vector<16x1xf32> to vector<16x128xf32>
    %5 = arith.mulf %1, %4 : vector<16x128xf32>
    %cst = arith.constant 1.000000e+00 : f32
    %6 = vector.broadcast %cst : f32 to vector<16x1xf32>
    %7 = arith.subf %6, %3 : vector<16x1xf32>
    %cst_5 = arith.constant 1.000000e+09 : f32
    %8 = vector.broadcast %cst_5 : f32 to vector<16x1xf32>
    %9 = arith.mulf %7, %8 : vector<16x1xf32>
    %10 = vector.broadcast %9 : vector<16x1xf32> to vector<16x128xf32>
    %11 = arith.addf %5, %10 : vector<16x128xf32>
    %cst_6 = arith.constant dense<0.000000e+00> : vector<16x16xf32>
    %12 = tpu.matmul %11, %11, %cst_6 {dimension_numbers = #tpu.dot_dimension_numbers<[1], [1], [0], [0], [0, 0, 1, 0], [], []>} : vector<16x128xf32>, vector<16x128xf32>, vector<16x16xf32> -> vector<16x16xf32>
    %13 = tpu.iota {dimensions = array<i32: 0>} : vector<16x16xi32>
    %14 = tpu.iota {dimensions = array<i32: 1>} : vector<16x16xi32>
    %15 = arith.sitofp %14 : vector<16x16xi32> to vector<16x16xf32>
    %16 = arith.cmpi eq, %13, %14 : vector<16x16xi32>
    %cst_7 = arith.constant 0.000000e+00 : f32
    %17 = vector.broadcast %cst_7 : f32 to vector<16x16xf32>
    %18 = arith.select %16, %12, %17 : vector<16x16xi1>, vector<16x16xf32>
    %cst_8 = arith.constant dense<0.000000e+00> : vector<16xf32>
    %19 = vector.multi_reduction <add>, %18, %cst_8 [0] : vector<16x16xf32> to vector<16xf32>
    %20 = vector.shape_cast %19 : vector<16xf32> to vector<1x16xf32>
    %cst_9 = arith.constant 2.000000e+00 : f32
    %21 = vector.broadcast %cst_9 : f32 to vector<16x16xf32>
    %22 = arith.mulf %21, %12 : vector<16x16xf32>
    %23 = vector.broadcast %20 : vector<1x16xf32> to vector<16x16xf32>
    %24 = arith.subf %22, %23 : vector<16x16xf32>
    %25 = arith.cmpi eq, %13, %14 : vector<16x16xi32>
    %cst_10 = arith.constant -3.000000e+38 : f32
    %26 = vector.broadcast %cst_10 : f32 to vector<16x16xf32>
    %27 = arith.select %25, %26, %24 : vector<16x16xi1>, vector<16x16xf32>
    %cst_11 = arith.constant dense<0xFF800000> : vector<16xf32>
    %28 = vector.multi_reduction <maximumf>, %27, %cst_11 [1] : vector<16x16xf32> to vector<16xf32>
    %29 = vector.shape_cast %28 : vector<16xf32> to vector<16x1xf32>
    %30 = vector.broadcast %29 : vector<16x1xf32> to vector<16x16xf32>
    %31 = arith.cmpf oeq, %27, %30 : vector<16x16xf32>
    %cst_12 = arith.constant 1.600000e+01 : f32
    %32 = vector.broadcast %cst_12 : f32 to vector<16x16xf32>
    %33 = arith.select %31, %15, %32 : vector<16x16xi1>, vector<16x16xf32>
    %cst_13 = arith.constant dense<0x7F800000> : vector<16xf32>
    %34 = vector.multi_reduction <minimumf>, %33, %cst_13 [1] : vector<16x16xf32> to vector<16xf32>
    %35 = vector.shape_cast %34 : vector<16xf32> to vector<16x1xf32>
    %36 = vector.broadcast %35 : vector<16x1xf32> to vector<16x16xf32>
    %37 = arith.cmpf oeq, %15, %36 : vector<16x16xf32>
    %cst_14 = arith.constant -3.000000e+38 : f32
    %38 = vector.broadcast %cst_14 : f32 to vector<16x16xf32>
    %39 = arith.select %37, %38, %27 : vector<16x16xi1>, vector<16x16xf32>
    %cst_15 = arith.constant dense<0xFF800000> : vector<16xf32>
    %40 = vector.multi_reduction <maximumf>, %39, %cst_15 [1] : vector<16x16xf32> to vector<16xf32>
    %41 = vector.shape_cast %40 : vector<16xf32> to vector<16x1xf32>
    %42 = vector.broadcast %41 : vector<16x1xf32> to vector<16x16xf32>
    %43 = arith.cmpf oeq, %39, %42 : vector<16x16xf32>
    %cst_16 = arith.constant 1.600000e+01 : f32
    %44 = vector.broadcast %cst_16 : f32 to vector<16x16xf32>
    %45 = arith.select %43, %15, %44 : vector<16x16xi1>, vector<16x16xf32>
    %cst_17 = arith.constant dense<0x7F800000> : vector<16xf32>
    %46 = vector.multi_reduction <minimumf>, %45, %cst_17 [1] : vector<16x16xf32> to vector<16xf32>
    %47 = vector.shape_cast %46 : vector<16xf32> to vector<16x1xf32>
    %48 = vector.broadcast %47 : vector<16x1xf32> to vector<16x16xf32>
    %49 = arith.cmpf oeq, %15, %48 : vector<16x16xf32>
    %cst_18 = arith.constant -3.000000e+38 : f32
    %50 = vector.broadcast %cst_18 : f32 to vector<16x16xf32>
    %51 = arith.select %49, %50, %39 : vector<16x16xi1>, vector<16x16xf32>
    %cst_19 = arith.constant dense<0xFF800000> : vector<16xf32>
    %52 = vector.multi_reduction <maximumf>, %51, %cst_19 [1] : vector<16x16xf32> to vector<16xf32>
    %53 = vector.shape_cast %52 : vector<16xf32> to vector<16x1xf32>
    %54 = vector.broadcast %53 : vector<16x1xf32> to vector<16x16xf32>
    %55 = arith.cmpf oeq, %51, %54 : vector<16x16xf32>
    %cst_20 = arith.constant 1.600000e+01 : f32
    %56 = vector.broadcast %cst_20 : f32 to vector<16x16xf32>
    %57 = arith.select %55, %15, %56 : vector<16x16xi1>, vector<16x16xf32>
    %cst_21 = arith.constant dense<0x7F800000> : vector<16xf32>
    %58 = vector.multi_reduction <minimumf>, %57, %cst_21 [1] : vector<16x16xf32> to vector<16xf32>
    %59 = vector.shape_cast %58 : vector<16xf32> to vector<16x1xf32>
    %60 = vector.broadcast %59 : vector<16x1xf32> to vector<16x16xf32>
    %61 = arith.cmpf oeq, %15, %60 : vector<16x16xf32>
    %cst_22 = arith.constant -3.000000e+38 : f32
    %62 = vector.broadcast %cst_22 : f32 to vector<16x16xf32>
    %63 = arith.select %61, %62, %51 : vector<16x16xi1>, vector<16x16xf32>
    %cst_23 = arith.constant dense<0xFF800000> : vector<16xf32>
    %64 = vector.multi_reduction <maximumf>, %63, %cst_23 [1] : vector<16x16xf32> to vector<16xf32>
    %65 = vector.shape_cast %64 : vector<16xf32> to vector<16x1xf32>
    %66 = vector.broadcast %65 : vector<16x1xf32> to vector<16x16xf32>
    %67 = arith.cmpf oeq, %63, %66 : vector<16x16xf32>
    %cst_24 = arith.constant 1.600000e+01 : f32
    %68 = vector.broadcast %cst_24 : f32 to vector<16x16xf32>
    %69 = arith.select %67, %15, %68 : vector<16x16xi1>, vector<16x16xf32>
    %cst_25 = arith.constant dense<0x7F800000> : vector<16xf32>
    %70 = vector.multi_reduction <minimumf>, %69, %cst_25 [1] : vector<16x16xf32> to vector<16xf32>
    %71 = vector.shape_cast %70 : vector<16xf32> to vector<16x1xf32>
    %72 = vector.broadcast %71 : vector<16x1xf32> to vector<16x16xf32>
    %73 = arith.cmpf oeq, %15, %72 : vector<16x16xf32>
    %cst_26 = arith.constant -3.000000e+38 : f32
    %74 = vector.broadcast %cst_26 : f32 to vector<16x16xf32>
    %75 = arith.select %73, %74, %63 : vector<16x16xi1>, vector<16x16xf32>
    %cst_27 = arith.constant dense<0xFF800000> : vector<16xf32>
    %76 = vector.multi_reduction <maximumf>, %75, %cst_27 [1] : vector<16x16xf32> to vector<16xf32>
    %77 = vector.shape_cast %76 : vector<16xf32> to vector<16x1xf32>
    %78 = vector.broadcast %77 : vector<16x1xf32> to vector<16x16xf32>
    %79 = arith.cmpf oeq, %75, %78 : vector<16x16xf32>
    %cst_28 = arith.constant 1.600000e+01 : f32
    %80 = vector.broadcast %cst_28 : f32 to vector<16x16xf32>
    %81 = arith.select %79, %15, %80 : vector<16x16xi1>, vector<16x16xf32>
    %cst_29 = arith.constant dense<0x7F800000> : vector<16xf32>
    %82 = vector.multi_reduction <minimumf>, %81, %cst_29 [1] : vector<16x16xf32> to vector<16xf32>
    %83 = vector.shape_cast %82 : vector<16xf32> to vector<16x1xf32>
    %84 = vector.broadcast %83 : vector<16x1xf32> to vector<16x16xf32>
    %85 = arith.cmpf oeq, %15, %84 : vector<16x16xf32>
    %cst_30 = arith.constant -3.000000e+38 : f32
    %86 = vector.broadcast %cst_30 : f32 to vector<16x16xf32>
    %87 = arith.select %85, %86, %75 : vector<16x16xi1>, vector<16x16xf32>
    %cst_31 = arith.constant dense<0xFF800000> : vector<16xf32>
    %88 = vector.multi_reduction <maximumf>, %87, %cst_31 [1] : vector<16x16xf32> to vector<16xf32>
    %89 = vector.shape_cast %88 : vector<16xf32> to vector<16x1xf32>
    %90 = vector.broadcast %89 : vector<16x1xf32> to vector<16x16xf32>
    %91 = arith.cmpf oeq, %87, %90 : vector<16x16xf32>
    %cst_32 = arith.constant 1.600000e+01 : f32
    %92 = vector.broadcast %cst_32 : f32 to vector<16x16xf32>
    %93 = arith.select %91, %15, %92 : vector<16x16xi1>, vector<16x16xf32>
    %cst_33 = arith.constant dense<0x7F800000> : vector<16xf32>
    %94 = vector.multi_reduction <minimumf>, %93, %cst_33 [1] : vector<16x16xf32> to vector<16xf32>
    %95 = vector.shape_cast %94 : vector<16xf32> to vector<16x1xf32>
    %96 = vector.broadcast %95 : vector<16x1xf32> to vector<16x16xf32>
    %97 = arith.cmpf oeq, %15, %96 : vector<16x16xf32>
    %cst_34 = arith.constant -3.000000e+38 : f32
    %98 = vector.broadcast %cst_34 : f32 to vector<16x16xf32>
    %99 = arith.select %97, %98, %87 : vector<16x16xi1>, vector<16x16xf32>
    %cst_35 = arith.constant dense<0xFF800000> : vector<16xf32>
    %100 = vector.multi_reduction <maximumf>, %99, %cst_35 [1] : vector<16x16xf32> to vector<16xf32>
    %101 = vector.shape_cast %100 : vector<16xf32> to vector<16x1xf32>
    %102 = vector.broadcast %101 : vector<16x1xf32> to vector<16x16xf32>
    %103 = arith.cmpf oeq, %99, %102 : vector<16x16xf32>
    %cst_36 = arith.constant 1.600000e+01 : f32
    %104 = vector.broadcast %cst_36 : f32 to vector<16x16xf32>
    %105 = arith.select %103, %15, %104 : vector<16x16xi1>, vector<16x16xf32>
    %cst_37 = arith.constant dense<0x7F800000> : vector<16xf32>
    %106 = vector.multi_reduction <minimumf>, %105, %cst_37 [1] : vector<16x16xf32> to vector<16xf32>
    %107 = vector.shape_cast %106 : vector<16xf32> to vector<16x1xf32>
    %cst_38 = arith.constant 0.000000e+00 : f32
    %108 = vector.broadcast %cst_38 : f32 to vector<16x1xf32>
    %109 = tpu.concatenate %35, %47, %59, %71, %83, %95, %107, %108 in 1 : vector<16x1xf32>, vector<16x1xf32>, vector<16x1xf32>, vector<16x1xf32>, vector<16x1xf32>, vector<16x1xf32>, vector<16x1xf32>, vector<16x1xf32> -> vector<16x8xf32>
    %110 = arith.fptosi %109 : vector<16x8xf32> to vector<16x8xi32>
    %c0_39 = arith.constant 0 : index
    %c0_40 = arith.constant 0 : index
    %c0_41 = arith.constant 0 : index
    %111 = vector.load %arg3[%c0_39, %c0_40, %c0_41] : memref<2x16x8xi32, #tpu.memory_space<vmem>>, vector<1x16x8xi32>
    %112 = vector.shape_cast %111 : vector<1x16x8xi32> to vector<16x8xi32>
    %113 = vector.shape_cast %110 : vector<16x8xi32> to vector<1x16x8xi32>
    tpu.vector_store %arg3[%c0_39, %c0_40, %c0_41], %113 {strides = array<i32>} : memref<2x16x8xi32, #tpu.memory_space<vmem>>, vector<1x16x8xi32>,
    %c1 = arith.constant 1 : index
    %c0_42 = arith.constant 0 : index
    %c0_43 = arith.constant 0 : index
    %114 = vector.load %arg1[%c1, %c0_42, %c0_43] : memref<2x16x128xf32, #tpu.memory_space<vmem>>, vector<1x16x128xf32>
    %115 = vector.shape_cast %114 : vector<1x16x128xf32> to vector<16x128xf32>
    %c1_44 = arith.constant 1 : index
    %c0_45 = arith.constant 0 : index
    %c0_46 = arith.constant 0 : index
    %116 = vector.load %arg2[%c1_44, %c0_45, %c0_46] : memref<2x16x1xf32, #tpu.memory_space<vmem>>, vector<1x16x1xf32>
    %117 = vector.shape_cast %116 : vector<1x16x1xf32> to vector<16x1xf32>
    %118 = vector.broadcast %117 : vector<16x1xf32> to vector<16x128xf32>
    %119 = arith.mulf %115, %118 : vector<16x128xf32>
    %cst_47 = arith.constant 1.000000e+00 : f32
    %120 = vector.broadcast %cst_47 : f32 to vector<16x1xf32>
    %121 = arith.subf %120, %117 : vector<16x1xf32>
    %cst_48 = arith.constant 1.000000e+09 : f32
    %122 = vector.broadcast %cst_48 : f32 to vector<16x1xf32>
    %123 = arith.mulf %121, %122 : vector<16x1xf32>
    %124 = vector.broadcast %123 : vector<16x1xf32> to vector<16x128xf32>
    %125 = arith.addf %119, %124 : vector<16x128xf32>
    %cst_49 = arith.constant dense<0.000000e+00> : vector<16x16xf32>
    %126 = tpu.matmul %125, %125, %cst_49 {dimension_numbers = #tpu.dot_dimension_numbers<[1], [1], [0], [0], [0, 0, 1, 0], [], []>} : vector<16x128xf32>, vector<16x128xf32>, vector<16x16xf32> -> vector<16x16xf32>
    %127 = tpu.iota {dimensions = array<i32: 0>} : vector<16x16xi32>
    %128 = tpu.iota {dimensions = array<i32: 1>} : vector<16x16xi32>
    %129 = arith.sitofp %128 : vector<16x16xi32> to vector<16x16xf32>
    %130 = arith.cmpi eq, %127, %128 : vector<16x16xi32>
    %cst_50 = arith.constant 0.000000e+00 : f32
    %131 = vector.broadcast %cst_50 : f32 to vector<16x16xf32>
    %132 = arith.select %130, %126, %131 : vector<16x16xi1>, vector<16x16xf32>
    %cst_51 = arith.constant dense<0.000000e+00> : vector<16xf32>
    %133 = vector.multi_reduction <add>, %132, %cst_51 [0] : vector<16x16xf32> to vector<16xf32>
    %134 = vector.shape_cast %133 : vector<16xf32> to vector<1x16xf32>
    %cst_52 = arith.constant 2.000000e+00 : f32
    %135 = vector.broadcast %cst_52 : f32 to vector<16x16xf32>
    %136 = arith.mulf %135, %126 : vector<16x16xf32>
    %137 = vector.broadcast %134 : vector<1x16xf32> to vector<16x16xf32>
    %138 = arith.subf %136, %137 : vector<16x16xf32>
    %139 = arith.cmpi eq, %127, %128 : vector<16x16xi32>
    %cst_53 = arith.constant -3.000000e+38 : f32
    %140 = vector.broadcast %cst_53 : f32 to vector<16x16xf32>
    %141 = arith.select %139, %140, %138 : vector<16x16xi1>, vector<16x16xf32>
    %cst_54 = arith.constant dense<0xFF800000> : vector<16xf32>
    %142 = vector.multi_reduction <maximumf>, %141, %cst_54 [1] : vector<16x16xf32> to vector<16xf32>
    %143 = vector.shape_cast %142 : vector<16xf32> to vector<16x1xf32>
    %144 = vector.broadcast %143 : vector<16x1xf32> to vector<16x16xf32>
    %145 = arith.cmpf oeq, %141, %144 : vector<16x16xf32>
    %cst_55 = arith.constant 1.600000e+01 : f32
    %146 = vector.broadcast %cst_55 : f32 to vector<16x16xf32>
    %147 = arith.select %145, %129, %146 : vector<16x16xi1>, vector<16x16xf32>
    %cst_56 = arith.constant dense<0x7F800000> : vector<16xf32>
    %148 = vector.multi_reduction <minimumf>, %147, %cst_56 [1] : vector<16x16xf32> to vector<16xf32>
    %149 = vector.shape_cast %148 : vector<16xf32> to vector<16x1xf32>
    %150 = vector.broadcast %149 : vector<16x1xf32> to vector<16x16xf32>
    %151 = arith.cmpf oeq, %129, %150 : vector<16x16xf32>
    %cst_57 = arith.constant -3.000000e+38 : f32
    %152 = vector.broadcast %cst_57 : f32 to vector<16x16xf32>
    %153 = arith.select %151, %152, %141 : vector<16x16xi1>, vector<16x16xf32>
    %cst_58 = arith.constant dense<0xFF800000> : vector<16xf32>
    %154 = vector.multi_reduction <maximumf>, %153, %cst_58 [1] : vector<16x16xf32> to vector<16xf32>
    %155 = vector.shape_cast %154 : vector<16xf32> to vector<16x1xf32>
    %156 = vector.broadcast %155 : vector<16x1xf32> to vector<16x16xf32>
    %157 = arith.cmpf oeq, %153, %156 : vector<16x16xf32>
    %cst_59 = arith.constant 1.600000e+01 : f32
    %158 = vector.broadcast %cst_59 : f32 to vector<16x16xf32>
    %159 = arith.select %157, %129, %158 : vector<16x16xi1>, vector<16x16xf32>
    %cst_60 = arith.constant dense<0x7F800000> : vector<16xf32>
    %160 = vector.multi_reduction <minimumf>, %159, %cst_60 [1] : vector<16x16xf32> to vector<16xf32>
    %161 = vector.shape_cast %160 : vector<16xf32> to vector<16x1xf32>
    %162 = vector.broadcast %161 : vector<16x1xf32> to vector<16x16xf32>
    %163 = arith.cmpf oeq, %129, %162 : vector<16x16xf32>
    %cst_61 = arith.constant -3.000000e+38 : f32
    %164 = vector.broadcast %cst_61 : f32 to vector<16x16xf32>
    %165 = arith.select %163, %164, %153 : vector<16x16xi1>, vector<16x16xf32>
    %cst_62 = arith.constant dense<0xFF800000> : vector<16xf32>
    %166 = vector.multi_reduction <maximumf>, %165, %cst_62 [1] : vector<16x16xf32> to vector<16xf32>
    %167 = vector.shape_cast %166 : vector<16xf32> to vector<16x1xf32>
    %168 = vector.broadcast %167 : vector<16x1xf32> to vector<16x16xf32>
    %169 = arith.cmpf oeq, %165, %168 : vector<16x16xf32>
    %cst_63 = arith.constant 1.600000e+01 : f32
    %170 = vector.broadcast %cst_63 : f32 to vector<16x16xf32>
    %171 = arith.select %169, %129, %170 : vector<16x16xi1>, vector<16x16xf32>
    %cst_64 = arith.constant dense<0x7F800000> : vector<16xf32>
    %172 = vector.multi_reduction <minimumf>, %171, %cst_64 [1] : vector<16x16xf32> to vector<16xf32>
    %173 = vector.shape_cast %172 : vector<16xf32> to vector<16x1xf32>
    %174 = vector.broadcast %173 : vector<16x1xf32> to vector<16x16xf32>
    %175 = arith.cmpf oeq, %129, %174 : vector<16x16xf32>
    %cst_65 = arith.constant -3.000000e+38 : f32
    %176 = vector.broadcast %cst_65 : f32 to vector<16x16xf32>
    %177 = arith.select %175, %176, %165 : vector<16x16xi1>, vector<16x16xf32>
    %cst_66 = arith.constant dense<0xFF800000> : vector<16xf32>
    %178 = vector.multi_reduction <maximumf>, %177, %cst_66 [1] : vector<16x16xf32> to vector<16xf32>
    %179 = vector.shape_cast %178 : vector<16xf32> to vector<16x1xf32>
    %180 = vector.broadcast %179 : vector<16x1xf32> to vector<16x16xf32>
    %181 = arith.cmpf oeq, %177, %180 : vector<16x16xf32>
    %cst_67 = arith.constant 1.600000e+01 : f32
    %182 = vector.broadcast %cst_67 : f32 to vector<16x16xf32>
    %183 = arith.select %181, %129, %182 : vector<16x16xi1>, vector<16x16xf32>
    %cst_68 = arith.constant dense<0x7F800000> : vector<16xf32>
    %184 = vector.multi_reduction <minimumf>, %183, %cst_68 [1] : vector<16x16xf32> to vector<16xf32>
    %185 = vector.shape_cast %184 : vector<16xf32> to vector<16x1xf32>
    %186 = vector.broadcast %185 : vector<16x1xf32> to vector<16x16xf32>
    %187 = arith.cmpf oeq, %129, %186 : vector<16x16xf32>
    %cst_69 = arith.constant -3.000000e+38 : f32
    %188 = vector.broadcast %cst_69 : f32 to vector<16x16xf32>
    %189 = arith.select %187, %188, %177 : vector<16x16xi1>, vector<16x16xf32>
    %cst_70 = arith.constant dense<0xFF800000> : vector<16xf32>
    %190 = vector.multi_reduction <maximumf>, %189, %cst_70 [1] : vector<16x16xf32> to vector<16xf32>
    %191 = vector.shape_cast %190 : vector<16xf32> to vector<16x1xf32>
    %192 = vector.broadcast %191 : vector<16x1xf32> to vector<16x16xf32>
    %193 = arith.cmpf oeq, %189, %192 : vector<16x16xf32>
    %cst_71 = arith.constant 1.600000e+01 : f32
    %194 = vector.broadcast %cst_71 : f32 to vector<16x16xf32>
    %195 = arith.select %193, %129, %194 : vector<16x16xi1>, vector<16x16xf32>
    %cst_72 = arith.constant dense<0x7F800000> : vector<16xf32>
    %196 = vector.multi_reduction <minimumf>, %195, %cst_72 [1] : vector<16x16xf32> to vector<16xf32>
    %197 = vector.shape_cast %196 : vector<16xf32> to vector<16x1xf32>
    %198 = vector.broadcast %197 : vector<16x1xf32> to vector<16x16xf32>
    %199 = arith.cmpf oeq, %129, %198 : vector<16x16xf32>
    %cst_73 = arith.constant -3.000000e+38 : f32
    %200 = vector.broadcast %cst_73 : f32 to vector<16x16xf32>
    %201 = arith.select %199, %200, %189 : vector<16x16xi1>, vector<16x16xf32>
    %cst_74 = arith.constant dense<0xFF800000> : vector<16xf32>
    %202 = vector.multi_reduction <maximumf>, %201, %cst_74 [1] : vector<16x16xf32> to vector<16xf32>
    %203 = vector.shape_cast %202 : vector<16xf32> to vector<16x1xf32>
    %204 = vector.broadcast %203 : vector<16x1xf32> to vector<16x16xf32>
    %205 = arith.cmpf oeq, %201, %204 : vector<16x16xf32>
    %cst_75 = arith.constant 1.600000e+01 : f32
    %206 = vector.broadcast %cst_75 : f32 to vector<16x16xf32>
    %207 = arith.select %205, %129, %206 : vector<16x16xi1>, vector<16x16xf32>
    %cst_76 = arith.constant dense<0x7F800000> : vector<16xf32>
    %208 = vector.multi_reduction <minimumf>, %207, %cst_76 [1] : vector<16x16xf32> to vector<16xf32>
    %209 = vector.shape_cast %208 : vector<16xf32> to vector<16x1xf32>
    %210 = vector.broadcast %209 : vector<16x1xf32> to vector<16x16xf32>
    %211 = arith.cmpf oeq, %129, %210 : vector<16x16xf32>
    %cst_77 = arith.constant -3.000000e+38 : f32
    %212 = vector.broadcast %cst_77 : f32 to vector<16x16xf32>
    %213 = arith.select %211, %212, %201 : vector<16x16xi1>, vector<16x16xf32>
    %cst_78 = arith.constant dense<0xFF800000> : vector<16xf32>
    %214 = vector.multi_reduction <maximumf>, %213, %cst_78 [1] : vector<16x16xf32> to vector<16xf32>
    %215 = vector.shape_cast %214 : vector<16xf32> to vector<16x1xf32>
    %216 = vector.broadcast %215 : vector<16x1xf32> to vector<16x16xf32>
    %217 = arith.cmpf oeq, %213, %216 : vector<16x16xf32>
    %cst_79 = arith.constant 1.600000e+01 : f32
    %218 = vector.broadcast %cst_79 : f32 to vector<16x16xf32>
    %219 = arith.select %217, %129, %218 : vector<16x16xi1>, vector<16x16xf32>
    %cst_80 = arith.constant dense<0x7F800000> : vector<16xf32>
    %220 = vector.multi_reduction <minimumf>, %219, %cst_80 [1] : vector<16x16xf32> to vector<16xf32>
    %221 = vector.shape_cast %220 : vector<16xf32> to vector<16x1xf32>
    %cst_81 = arith.constant 0.000000e+00 : f32
    %222 = vector.broadcast %cst_81 : f32 to vector<16x1xf32>
    %223 = tpu.concatenate %149, %161, %173, %185, %197, %209, %221, %222 in 1 : vector<16x1xf32>, vector<16x1xf32>, vector<16x1xf32>, vector<16x1xf32>, vector<16x1xf32>, vector<16x1xf32>, vector<16x1xf32>, vector<16x1xf32> -> vector<16x8xf32>
    %224 = arith.fptosi %223 : vector<16x8xf32> to vector<16x8xi32>
    %c1_82 = arith.constant 1 : index
    %c0_83 = arith.constant 0 : index
    %c0_84 = arith.constant 0 : index
    %225 = vector.load %arg3[%c1_82, %c0_83, %c0_84] : memref<2x16x8xi32, #tpu.memory_space<vmem>>, vector<1x16x8xi32>
    %226 = vector.shape_cast %225 : vector<1x16x8xi32> to vector<16x8xi32>
    %227 = vector.shape_cast %224 : vector<16x8xi32> to vector<1x16x8xi32>
    tpu.vector_store %arg3[%c1_82, %c0_83, %c0_84], %227 {strides = array<i32>} : memref<2x16x8xi32, #tpu.memory_space<vmem>>, vector<1x16x8xi32>,
    return
  }
  func.func @transform_0(%arg0: i32) -> (i32, i32, i32) {
    %c0_i32 = arith.constant 0 : i32
    %c0_i32_0 = arith.constant 0 : i32
    %c0_i32_1 = arith.constant 0 : i32
    return %arg0, %c0_i32, %c0_i32_0 : i32, i32, i32
  }
  func.func @transform_1(%arg0: i32) -> (i32, i32, i32) {
    %c0_i32 = arith.constant 0 : i32
    %c0_i32_0 = arith.constant 0 : i32
    %c0_i32_1 = arith.constant 0 : i32
    return %arg0, %c0_i32, %c0_i32_0 : i32, i32, i32
  }
  func.func @transform_2(%arg0: i32) -> (i32, i32, i32) {
    %c0_i32 = arith.constant 0 : i32
    %c0_i32_0 = arith.constant 0 : i32
    %c0_i32_1 = arith.constant 0 : i32
    return %arg0, %c0_i32, %c0_i32_0 : i32, i32, i32
  }
}

module attributes {stable_mosaic.version = 11 : i64} {
  func.func @_edgeconv_kernel(%arg0: i32, %arg1: memref<2x16x128xf32, #tpu.memory_space<vmem>>, %arg2: memref<2x112x1xi32, #tpu.memory_space<vmem>>, %arg3: memref<2x16x1xf32, #tpu.memory_space<vmem>>, %arg4: memref<128x256xbf16, #tpu.memory_space<vmem>>, %arg5: memref<1x256xf32, #tpu.memory_space<vmem>>, %arg6: memref<128x128xbf16, #tpu.memory_space<vmem>>, %arg7: memref<128x128xbf16, #tpu.memory_space<vmem>>, %arg8: memref<1x128xf32, #tpu.memory_space<vmem>>, %arg9: memref<128x128xbf16, #tpu.memory_space<vmem>>, %arg10: memref<1x128xf32, #tpu.memory_space<vmem>>, %arg11: memref<2x16x128xf32, #tpu.memory_space<vmem>>) attributes {dimension_semantics = [#tpu.dimension_semantics<parallel>], iteration_bounds = array<i64: 1>, scalar_prefetch = 0 : i64, scratch_operands = 0 : i64, tpu.core_type = #tpu.core_type<tc>, window_params = [{transform_indices = @transform_0, window_bounds = array<i64: 2, 16, 128>}, {transform_indices = @transform_1, window_bounds = array<i64: 2, 112, 1>}, {transform_indices = @transform_2, window_bounds = array<i64: 2, 16, 1>}, {pipeline_mode = #tpu.pipeline_mode<synchronous>, transform_indices = @transform_3, window_bounds = array<i64: 128, 256>}, {pipeline_mode = #tpu.pipeline_mode<synchronous>, transform_indices = @transform_4, window_bounds = array<i64: 1, 256>}, {pipeline_mode = #tpu.pipeline_mode<synchronous>, transform_indices = @transform_5, window_bounds = array<i64: 128, 128>}, {pipeline_mode = #tpu.pipeline_mode<synchronous>, transform_indices = @transform_6, window_bounds = array<i64: 128, 128>}, {pipeline_mode = #tpu.pipeline_mode<synchronous>, transform_indices = @transform_7, window_bounds = array<i64: 1, 128>}, {pipeline_mode = #tpu.pipeline_mode<synchronous>, transform_indices = @transform_8, window_bounds = array<i64: 128, 128>}, {pipeline_mode = #tpu.pipeline_mode<synchronous>, transform_indices = @transform_9, window_bounds = array<i64: 1, 128>}, {transform_indices = @transform_10, window_bounds = array<i64: 2, 16, 128>}]} {
    %c0 = arith.constant 0 : index
    %c0_0 = arith.constant 0 : index
    %c0_1 = arith.constant 0 : index
    %0 = vector.load %arg1[%c0, %c0_0, %c0_1] : memref<2x16x128xf32, #tpu.memory_space<vmem>>, vector<2x16x128xf32>
    %c0_2 = arith.constant 0 : index
    %c0_3 = arith.constant 0 : index
    %c0_4 = arith.constant 0 : index
    %1 = vector.load %arg3[%c0_2, %c0_3, %c0_4] : memref<2x16x1xf32, #tpu.memory_space<vmem>>, vector<2x16x1xf32>
    %2 = vector.shape_cast %1 : vector<2x16x1xf32> to vector<32x1xf32>
    %c0_5 = arith.constant 0 : index
    %c0_6 = arith.constant 0 : index
    %c0_7 = arith.constant 0 : index
    %3 = vector.load %arg2[%c0_5, %c0_6, %c0_7] : memref<2x112x1xi32, #tpu.memory_space<vmem>>, vector<2x112x1xi32>
    %4 = arith.truncf %0 : vector<2x16x128xf32> to vector<2x16x128xbf16>
    %5 = vector.shape_cast %4 : vector<2x16x128xbf16> to vector<32x128xbf16>
    %c0_8 = arith.constant 0 : index
    %c0_9 = arith.constant 0 : index
    %6 = vector.load %arg4[%c0_8, %c0_9] : memref<128x256xbf16, #tpu.memory_space<vmem>>, vector<128x256xbf16>
    %cst = arith.constant dense<0.000000e+00> : vector<32x256xf32>
    %7 = tpu.matmul %5, %6, %cst {dimension_numbers = #tpu.dot_dimension_numbers<[1], [0], [0], [1], [0, 0, 1, 1], [], []>} : vector<32x128xbf16>, vector<128x256xbf16>, vector<32x256xf32> -> vector<32x256xf32>
    %c0_10 = arith.constant 0 : index
    %c0_11 = arith.constant 0 : index
    %8 = vector.load %arg5[%c0_10, %c0_11] : memref<1x256xf32, #tpu.memory_space<vmem>>, vector<1x256xf32>
    %9 = vector.broadcast %8 : vector<1x256xf32> to vector<32x256xf32>
    %10 = arith.addf %7, %9 : vector<32x256xf32>
    %11 = vector.extract_strided_slice %10 {offsets = [0, 0], sizes = [32, 128], strides = [1, 1]} : vector<32x256xf32> to vector<32x128xf32>
    %12 = vector.extract_strided_slice %10 {offsets = [0, 128], sizes = [32, 128], strides = [1, 1]} : vector<32x256xf32> to vector<32x128xf32>
    %13 = tpu.iota {dimensions = array<i32: 2>} : vector<2x112x16xi32>
    %14 = vector.broadcast %3 : vector<2x112x1xi32> to vector<2x112x16xi32>
    %15 = arith.cmpi eq, %13, %14 : vector<2x112x16xi32>
    %16 = arith.extui %15 : vector<2x112x16xi1> to vector<2x112x16xi32>
    %17 = arith.sitofp %16 : vector<2x112x16xi32> to vector<2x112x16xf32>
    %18 = arith.truncf %17 : vector<2x112x16xf32> to vector<2x112x16xbf16>
    "tpu.trace_start"() <{level = 10 : i32, message = "bnp,bpc->bnc"}> : () -> ()
    %cst_12 = arith.constant dense<0.000000e+00> : vector<2x112x128xf32>
    %19 = tpu.matmul %18, %4, %cst_12 {dimension_numbers = #tpu.dot_dimension_numbers<[2], [1], [1], [2], [0, 0, 0, 1, 1, 2], [0], [0]>} : vector<2x112x16xbf16>, vector<2x16x128xbf16>, vector<2x112x128xf32> -> vector<2x112x128xf32>
    "tpu.trace_stop"() : () -> ()
    %20 = arith.truncf %19 : vector<2x112x128xf32> to vector<2x112x128xbf16>
    %cst_13 = arith.constant 0.000000e+00 : f32
    %21 = vector.broadcast %cst_13 : f32 to vector<32x128xf32>
    %22 = vector.extract_strided_slice %20 {offsets = [0, 0, 0], sizes = [2, 16, 128], strides = [1, 1, 1]} : vector<2x112x128xbf16> to vector<2x16x128xbf16>
    %23 = vector.shape_cast %22 : vector<2x16x128xbf16> to vector<32x128xbf16>
    %c0_14 = arith.constant 0 : index
    %c0_15 = arith.constant 0 : index
    %24 = vector.load %arg6[%c0_14, %c0_15] : memref<128x128xbf16, #tpu.memory_space<vmem>>, vector<128x128xbf16>
    %cst_16 = arith.constant dense<0.000000e+00> : vector<32x128xf32>
    %25 = tpu.matmul %23, %24, %cst_16 {dimension_numbers = #tpu.dot_dimension_numbers<[1], [0], [0], [1], [0, 0, 1, 1], [], []>} : vector<32x128xbf16>, vector<128x128xbf16>, vector<32x128xf32> -> vector<32x128xf32>
    %26 = arith.addf %11, %25 : vector<32x128xf32>
    %cst_17 = arith.constant 0.000000e+00 : f32
    %27 = vector.broadcast %cst_17 : f32 to vector<32x128xf32>
    %28 = arith.maximumf %26, %27 : vector<32x128xf32>
    %29 = arith.truncf %28 : vector<32x128xf32> to vector<32x128xbf16>
    %c0_18 = arith.constant 0 : index
    %c0_19 = arith.constant 0 : index
    %30 = vector.load %arg7[%c0_18, %c0_19] : memref<128x128xbf16, #tpu.memory_space<vmem>>, vector<128x128xbf16>
    %cst_20 = arith.constant dense<0.000000e+00> : vector<32x128xf32>
    %31 = tpu.matmul %29, %30, %cst_20 {dimension_numbers = #tpu.dot_dimension_numbers<[1], [0], [0], [1], [0, 0, 1, 1], [], []>} : vector<32x128xbf16>, vector<128x128xbf16>, vector<32x128xf32> -> vector<32x128xf32>
    %c0_21 = arith.constant 0 : index
    %c0_22 = arith.constant 0 : index
    %32 = vector.load %arg8[%c0_21, %c0_22] : memref<1x128xf32, #tpu.memory_space<vmem>>, vector<1x128xf32>
    %33 = vector.broadcast %32 : vector<1x128xf32> to vector<32x128xf32>
    %34 = arith.addf %31, %33 : vector<32x128xf32>
    %cst_23 = arith.constant 0.000000e+00 : f32
    %35 = vector.broadcast %cst_23 : f32 to vector<32x128xf32>
    %36 = arith.maximumf %34, %35 : vector<32x128xf32>
    %37 = arith.truncf %36 : vector<32x128xf32> to vector<32x128xbf16>
    %c0_24 = arith.constant 0 : index
    %c0_25 = arith.constant 0 : index
    %38 = vector.load %arg9[%c0_24, %c0_25] : memref<128x128xbf16, #tpu.memory_space<vmem>>, vector<128x128xbf16>
    %cst_26 = arith.constant dense<0.000000e+00> : vector<32x128xf32>
    %39 = tpu.matmul %37, %38, %cst_26 {dimension_numbers = #tpu.dot_dimension_numbers<[1], [0], [0], [1], [0, 0, 1, 1], [], []>} : vector<32x128xbf16>, vector<128x128xbf16>, vector<32x128xf32> -> vector<32x128xf32>
    %c0_27 = arith.constant 0 : index
    %c0_28 = arith.constant 0 : index
    %40 = vector.load %arg10[%c0_27, %c0_28] : memref<1x128xf32, #tpu.memory_space<vmem>>, vector<1x128xf32>
    %41 = vector.broadcast %40 : vector<1x128xf32> to vector<32x128xf32>
    %42 = arith.addf %39, %41 : vector<32x128xf32>
    %cst_29 = arith.constant 0.000000e+00 : f32
    %43 = vector.broadcast %cst_29 : f32 to vector<32x128xf32>
    %44 = arith.maximumf %42, %43 : vector<32x128xf32>
    %45 = arith.addf %21, %44 : vector<32x128xf32>
    %46 = vector.extract_strided_slice %20 {offsets = [0, 16, 0], sizes = [2, 16, 128], strides = [1, 1, 1]} : vector<2x112x128xbf16> to vector<2x16x128xbf16>
    %47 = vector.shape_cast %46 : vector<2x16x128xbf16> to vector<32x128xbf16>
    %c0_30 = arith.constant 0 : index
    %c0_31 = arith.constant 0 : index
    %48 = vector.load %arg6[%c0_30, %c0_31] : memref<128x128xbf16, #tpu.memory_space<vmem>>, vector<128x128xbf16>
    %cst_32 = arith.constant dense<0.000000e+00> : vector<32x128xf32>
    %49 = tpu.matmul %47, %48, %cst_32 {dimension_numbers = #tpu.dot_dimension_numbers<[1], [0], [0], [1], [0, 0, 1, 1], [], []>} : vector<32x128xbf16>, vector<128x128xbf16>, vector<32x128xf32> -> vector<32x128xf32>
    %50 = arith.addf %11, %49 : vector<32x128xf32>
    %cst_33 = arith.constant 0.000000e+00 : f32
    %51 = vector.broadcast %cst_33 : f32 to vector<32x128xf32>
    %52 = arith.maximumf %50, %51 : vector<32x128xf32>
    %53 = arith.truncf %52 : vector<32x128xf32> to vector<32x128xbf16>
    %c0_34 = arith.constant 0 : index
    %c0_35 = arith.constant 0 : index
    %54 = vector.load %arg7[%c0_34, %c0_35] : memref<128x128xbf16, #tpu.memory_space<vmem>>, vector<128x128xbf16>
    %cst_36 = arith.constant dense<0.000000e+00> : vector<32x128xf32>
    %55 = tpu.matmul %53, %54, %cst_36 {dimension_numbers = #tpu.dot_dimension_numbers<[1], [0], [0], [1], [0, 0, 1, 1], [], []>} : vector<32x128xbf16>, vector<128x128xbf16>, vector<32x128xf32> -> vector<32x128xf32>
    %c0_37 = arith.constant 0 : index
    %c0_38 = arith.constant 0 : index
    %56 = vector.load %arg8[%c0_37, %c0_38] : memref<1x128xf32, #tpu.memory_space<vmem>>, vector<1x128xf32>
    %57 = vector.broadcast %56 : vector<1x128xf32> to vector<32x128xf32>
    %58 = arith.addf %55, %57 : vector<32x128xf32>
    %cst_39 = arith.constant 0.000000e+00 : f32
    %59 = vector.broadcast %cst_39 : f32 to vector<32x128xf32>
    %60 = arith.maximumf %58, %59 : vector<32x128xf32>
    %61 = arith.truncf %60 : vector<32x128xf32> to vector<32x128xbf16>
    %c0_40 = arith.constant 0 : index
    %c0_41 = arith.constant 0 : index
    %62 = vector.load %arg9[%c0_40, %c0_41] : memref<128x128xbf16, #tpu.memory_space<vmem>>, vector<128x128xbf16>
    %cst_42 = arith.constant dense<0.000000e+00> : vector<32x128xf32>
    %63 = tpu.matmul %61, %62, %cst_42 {dimension_numbers = #tpu.dot_dimension_numbers<[1], [0], [0], [1], [0, 0, 1, 1], [], []>} : vector<32x128xbf16>, vector<128x128xbf16>, vector<32x128xf32> -> vector<32x128xf32>
    %c0_43 = arith.constant 0 : index
    %c0_44 = arith.constant 0 : index
    %64 = vector.load %arg10[%c0_43, %c0_44] : memref<1x128xf32, #tpu.memory_space<vmem>>, vector<1x128xf32>
    %65 = vector.broadcast %64 : vector<1x128xf32> to vector<32x128xf32>
    %66 = arith.addf %63, %65 : vector<32x128xf32>
    %cst_45 = arith.constant 0.000000e+00 : f32
    %67 = vector.broadcast %cst_45 : f32 to vector<32x128xf32>
    %68 = arith.maximumf %66, %67 : vector<32x128xf32>
    %69 = arith.addf %45, %68 : vector<32x128xf32>
    %70 = vector.extract_strided_slice %20 {offsets = [0, 32, 0], sizes = [2, 16, 128], strides = [1, 1, 1]} : vector<2x112x128xbf16> to vector<2x16x128xbf16>
    %71 = vector.shape_cast %70 : vector<2x16x128xbf16> to vector<32x128xbf16>
    %c0_46 = arith.constant 0 : index
    %c0_47 = arith.constant 0 : index
    %72 = vector.load %arg6[%c0_46, %c0_47] : memref<128x128xbf16, #tpu.memory_space<vmem>>, vector<128x128xbf16>
    %cst_48 = arith.constant dense<0.000000e+00> : vector<32x128xf32>
    %73 = tpu.matmul %71, %72, %cst_48 {dimension_numbers = #tpu.dot_dimension_numbers<[1], [0], [0], [1], [0, 0, 1, 1], [], []>} : vector<32x128xbf16>, vector<128x128xbf16>, vector<32x128xf32> -> vector<32x128xf32>
    %74 = arith.addf %11, %73 : vector<32x128xf32>
    %cst_49 = arith.constant 0.000000e+00 : f32
    %75 = vector.broadcast %cst_49 : f32 to vector<32x128xf32>
    %76 = arith.maximumf %74, %75 : vector<32x128xf32>
    %77 = arith.truncf %76 : vector<32x128xf32> to vector<32x128xbf16>
    %c0_50 = arith.constant 0 : index
    %c0_51 = arith.constant 0 : index
    %78 = vector.load %arg7[%c0_50, %c0_51] : memref<128x128xbf16, #tpu.memory_space<vmem>>, vector<128x128xbf16>
    %cst_52 = arith.constant dense<0.000000e+00> : vector<32x128xf32>
    %79 = tpu.matmul %77, %78, %cst_52 {dimension_numbers = #tpu.dot_dimension_numbers<[1], [0], [0], [1], [0, 0, 1, 1], [], []>} : vector<32x128xbf16>, vector<128x128xbf16>, vector<32x128xf32> -> vector<32x128xf32>
    %c0_53 = arith.constant 0 : index
    %c0_54 = arith.constant 0 : index
    %80 = vector.load %arg8[%c0_53, %c0_54] : memref<1x128xf32, #tpu.memory_space<vmem>>, vector<1x128xf32>
    %81 = vector.broadcast %80 : vector<1x128xf32> to vector<32x128xf32>
    %82 = arith.addf %79, %81 : vector<32x128xf32>
    %cst_55 = arith.constant 0.000000e+00 : f32
    %83 = vector.broadcast %cst_55 : f32 to vector<32x128xf32>
    %84 = arith.maximumf %82, %83 : vector<32x128xf32>
    %85 = arith.truncf %84 : vector<32x128xf32> to vector<32x128xbf16>
    %c0_56 = arith.constant 0 : index
    %c0_57 = arith.constant 0 : index
    %86 = vector.load %arg9[%c0_56, %c0_57] : memref<128x128xbf16, #tpu.memory_space<vmem>>, vector<128x128xbf16>
    %cst_58 = arith.constant dense<0.000000e+00> : vector<32x128xf32>
    %87 = tpu.matmul %85, %86, %cst_58 {dimension_numbers = #tpu.dot_dimension_numbers<[1], [0], [0], [1], [0, 0, 1, 1], [], []>} : vector<32x128xbf16>, vector<128x128xbf16>, vector<32x128xf32> -> vector<32x128xf32>
    %c0_59 = arith.constant 0 : index
    %c0_60 = arith.constant 0 : index
    %88 = vector.load %arg10[%c0_59, %c0_60] : memref<1x128xf32, #tpu.memory_space<vmem>>, vector<1x128xf32>
    %89 = vector.broadcast %88 : vector<1x128xf32> to vector<32x128xf32>
    %90 = arith.addf %87, %89 : vector<32x128xf32>
    %cst_61 = arith.constant 0.000000e+00 : f32
    %91 = vector.broadcast %cst_61 : f32 to vector<32x128xf32>
    %92 = arith.maximumf %90, %91 : vector<32x128xf32>
    %93 = arith.addf %69, %92 : vector<32x128xf32>
    %94 = vector.extract_strided_slice %20 {offsets = [0, 48, 0], sizes = [2, 16, 128], strides = [1, 1, 1]} : vector<2x112x128xbf16> to vector<2x16x128xbf16>
    %95 = vector.shape_cast %94 : vector<2x16x128xbf16> to vector<32x128xbf16>
    %c0_62 = arith.constant 0 : index
    %c0_63 = arith.constant 0 : index
    %96 = vector.load %arg6[%c0_62, %c0_63] : memref<128x128xbf16, #tpu.memory_space<vmem>>, vector<128x128xbf16>
    %cst_64 = arith.constant dense<0.000000e+00> : vector<32x128xf32>
    %97 = tpu.matmul %95, %96, %cst_64 {dimension_numbers = #tpu.dot_dimension_numbers<[1], [0], [0], [1], [0, 0, 1, 1], [], []>} : vector<32x128xbf16>, vector<128x128xbf16>, vector<32x128xf32> -> vector<32x128xf32>
    %98 = arith.addf %11, %97 : vector<32x128xf32>
    %cst_65 = arith.constant 0.000000e+00 : f32
    %99 = vector.broadcast %cst_65 : f32 to vector<32x128xf32>
    %100 = arith.maximumf %98, %99 : vector<32x128xf32>
    %101 = arith.truncf %100 : vector<32x128xf32> to vector<32x128xbf16>
    %c0_66 = arith.constant 0 : index
    %c0_67 = arith.constant 0 : index
    %102 = vector.load %arg7[%c0_66, %c0_67] : memref<128x128xbf16, #tpu.memory_space<vmem>>, vector<128x128xbf16>
    %cst_68 = arith.constant dense<0.000000e+00> : vector<32x128xf32>
    %103 = tpu.matmul %101, %102, %cst_68 {dimension_numbers = #tpu.dot_dimension_numbers<[1], [0], [0], [1], [0, 0, 1, 1], [], []>} : vector<32x128xbf16>, vector<128x128xbf16>, vector<32x128xf32> -> vector<32x128xf32>
    %c0_69 = arith.constant 0 : index
    %c0_70 = arith.constant 0 : index
    %104 = vector.load %arg8[%c0_69, %c0_70] : memref<1x128xf32, #tpu.memory_space<vmem>>, vector<1x128xf32>
    %105 = vector.broadcast %104 : vector<1x128xf32> to vector<32x128xf32>
    %106 = arith.addf %103, %105 : vector<32x128xf32>
    %cst_71 = arith.constant 0.000000e+00 : f32
    %107 = vector.broadcast %cst_71 : f32 to vector<32x128xf32>
    %108 = arith.maximumf %106, %107 : vector<32x128xf32>
    %109 = arith.truncf %108 : vector<32x128xf32> to vector<32x128xbf16>
    %c0_72 = arith.constant 0 : index
    %c0_73 = arith.constant 0 : index
    %110 = vector.load %arg9[%c0_72, %c0_73] : memref<128x128xbf16, #tpu.memory_space<vmem>>, vector<128x128xbf16>
    %cst_74 = arith.constant dense<0.000000e+00> : vector<32x128xf32>
    %111 = tpu.matmul %109, %110, %cst_74 {dimension_numbers = #tpu.dot_dimension_numbers<[1], [0], [0], [1], [0, 0, 1, 1], [], []>} : vector<32x128xbf16>, vector<128x128xbf16>, vector<32x128xf32> -> vector<32x128xf32>
    %c0_75 = arith.constant 0 : index
    %c0_76 = arith.constant 0 : index
    %112 = vector.load %arg10[%c0_75, %c0_76] : memref<1x128xf32, #tpu.memory_space<vmem>>, vector<1x128xf32>
    %113 = vector.broadcast %112 : vector<1x128xf32> to vector<32x128xf32>
    %114 = arith.addf %111, %113 : vector<32x128xf32>
    %cst_77 = arith.constant 0.000000e+00 : f32
    %115 = vector.broadcast %cst_77 : f32 to vector<32x128xf32>
    %116 = arith.maximumf %114, %115 : vector<32x128xf32>
    %117 = arith.addf %93, %116 : vector<32x128xf32>
    %118 = vector.extract_strided_slice %20 {offsets = [0, 64, 0], sizes = [2, 16, 128], strides = [1, 1, 1]} : vector<2x112x128xbf16> to vector<2x16x128xbf16>
    %119 = vector.shape_cast %118 : vector<2x16x128xbf16> to vector<32x128xbf16>
    %c0_78 = arith.constant 0 : index
    %c0_79 = arith.constant 0 : index
    %120 = vector.load %arg6[%c0_78, %c0_79] : memref<128x128xbf16, #tpu.memory_space<vmem>>, vector<128x128xbf16>
    %cst_80 = arith.constant dense<0.000000e+00> : vector<32x128xf32>
    %121 = tpu.matmul %119, %120, %cst_80 {dimension_numbers = #tpu.dot_dimension_numbers<[1], [0], [0], [1], [0, 0, 1, 1], [], []>} : vector<32x128xbf16>, vector<128x128xbf16>, vector<32x128xf32> -> vector<32x128xf32>
    %122 = arith.addf %11, %121 : vector<32x128xf32>
    %cst_81 = arith.constant 0.000000e+00 : f32
    %123 = vector.broadcast %cst_81 : f32 to vector<32x128xf32>
    %124 = arith.maximumf %122, %123 : vector<32x128xf32>
    %125 = arith.truncf %124 : vector<32x128xf32> to vector<32x128xbf16>
    %c0_82 = arith.constant 0 : index
    %c0_83 = arith.constant 0 : index
    %126 = vector.load %arg7[%c0_82, %c0_83] : memref<128x128xbf16, #tpu.memory_space<vmem>>, vector<128x128xbf16>
    %cst_84 = arith.constant dense<0.000000e+00> : vector<32x128xf32>
    %127 = tpu.matmul %125, %126, %cst_84 {dimension_numbers = #tpu.dot_dimension_numbers<[1], [0], [0], [1], [0, 0, 1, 1], [], []>} : vector<32x128xbf16>, vector<128x128xbf16>, vector<32x128xf32> -> vector<32x128xf32>
    %c0_85 = arith.constant 0 : index
    %c0_86 = arith.constant 0 : index
    %128 = vector.load %arg8[%c0_85, %c0_86] : memref<1x128xf32, #tpu.memory_space<vmem>>, vector<1x128xf32>
    %129 = vector.broadcast %128 : vector<1x128xf32> to vector<32x128xf32>
    %130 = arith.addf %127, %129 : vector<32x128xf32>
    %cst_87 = arith.constant 0.000000e+00 : f32
    %131 = vector.broadcast %cst_87 : f32 to vector<32x128xf32>
    %132 = arith.maximumf %130, %131 : vector<32x128xf32>
    %133 = arith.truncf %132 : vector<32x128xf32> to vector<32x128xbf16>
    %c0_88 = arith.constant 0 : index
    %c0_89 = arith.constant 0 : index
    %134 = vector.load %arg9[%c0_88, %c0_89] : memref<128x128xbf16, #tpu.memory_space<vmem>>, vector<128x128xbf16>
    %cst_90 = arith.constant dense<0.000000e+00> : vector<32x128xf32>
    %135 = tpu.matmul %133, %134, %cst_90 {dimension_numbers = #tpu.dot_dimension_numbers<[1], [0], [0], [1], [0, 0, 1, 1], [], []>} : vector<32x128xbf16>, vector<128x128xbf16>, vector<32x128xf32> -> vector<32x128xf32>
    %c0_91 = arith.constant 0 : index
    %c0_92 = arith.constant 0 : index
    %136 = vector.load %arg10[%c0_91, %c0_92] : memref<1x128xf32, #tpu.memory_space<vmem>>, vector<1x128xf32>
    %137 = vector.broadcast %136 : vector<1x128xf32> to vector<32x128xf32>
    %138 = arith.addf %135, %137 : vector<32x128xf32>
    %cst_93 = arith.constant 0.000000e+00 : f32
    %139 = vector.broadcast %cst_93 : f32 to vector<32x128xf32>
    %140 = arith.maximumf %138, %139 : vector<32x128xf32>
    %141 = arith.addf %117, %140 : vector<32x128xf32>
    %142 = vector.extract_strided_slice %20 {offsets = [0, 80, 0], sizes = [2, 16, 128], strides = [1, 1, 1]} : vector<2x112x128xbf16> to vector<2x16x128xbf16>
    %143 = vector.shape_cast %142 : vector<2x16x128xbf16> to vector<32x128xbf16>
    %c0_94 = arith.constant 0 : index
    %c0_95 = arith.constant 0 : index
    %144 = vector.load %arg6[%c0_94, %c0_95] : memref<128x128xbf16, #tpu.memory_space<vmem>>, vector<128x128xbf16>
    %cst_96 = arith.constant dense<0.000000e+00> : vector<32x128xf32>
    %145 = tpu.matmul %143, %144, %cst_96 {dimension_numbers = #tpu.dot_dimension_numbers<[1], [0], [0], [1], [0, 0, 1, 1], [], []>} : vector<32x128xbf16>, vector<128x128xbf16>, vector<32x128xf32> -> vector<32x128xf32>
    %146 = arith.addf %11, %145 : vector<32x128xf32>
    %cst_97 = arith.constant 0.000000e+00 : f32
    %147 = vector.broadcast %cst_97 : f32 to vector<32x128xf32>
    %148 = arith.maximumf %146, %147 : vector<32x128xf32>
    %149 = arith.truncf %148 : vector<32x128xf32> to vector<32x128xbf16>
    %c0_98 = arith.constant 0 : index
    %c0_99 = arith.constant 0 : index
    %150 = vector.load %arg7[%c0_98, %c0_99] : memref<128x128xbf16, #tpu.memory_space<vmem>>, vector<128x128xbf16>
    %cst_100 = arith.constant dense<0.000000e+00> : vector<32x128xf32>
    %151 = tpu.matmul %149, %150, %cst_100 {dimension_numbers = #tpu.dot_dimension_numbers<[1], [0], [0], [1], [0, 0, 1, 1], [], []>} : vector<32x128xbf16>, vector<128x128xbf16>, vector<32x128xf32> -> vector<32x128xf32>
    %c0_101 = arith.constant 0 : index
    %c0_102 = arith.constant 0 : index
    %152 = vector.load %arg8[%c0_101, %c0_102] : memref<1x128xf32, #tpu.memory_space<vmem>>, vector<1x128xf32>
    %153 = vector.broadcast %152 : vector<1x128xf32> to vector<32x128xf32>
    %154 = arith.addf %151, %153 : vector<32x128xf32>
    %cst_103 = arith.constant 0.000000e+00 : f32
    %155 = vector.broadcast %cst_103 : f32 to vector<32x128xf32>
    %156 = arith.maximumf %154, %155 : vector<32x128xf32>
    %157 = arith.truncf %156 : vector<32x128xf32> to vector<32x128xbf16>
    %c0_104 = arith.constant 0 : index
    %c0_105 = arith.constant 0 : index
    %158 = vector.load %arg9[%c0_104, %c0_105] : memref<128x128xbf16, #tpu.memory_space<vmem>>, vector<128x128xbf16>
    %cst_106 = arith.constant dense<0.000000e+00> : vector<32x128xf32>
    %159 = tpu.matmul %157, %158, %cst_106 {dimension_numbers = #tpu.dot_dimension_numbers<[1], [0], [0], [1], [0, 0, 1, 1], [], []>} : vector<32x128xbf16>, vector<128x128xbf16>, vector<32x128xf32> -> vector<32x128xf32>
    %c0_107 = arith.constant 0 : index
    %c0_108 = arith.constant 0 : index
    %160 = vector.load %arg10[%c0_107, %c0_108] : memref<1x128xf32, #tpu.memory_space<vmem>>, vector<1x128xf32>
    %161 = vector.broadcast %160 : vector<1x128xf32> to vector<32x128xf32>
    %162 = arith.addf %159, %161 : vector<32x128xf32>
    %cst_109 = arith.constant 0.000000e+00 : f32
    %163 = vector.broadcast %cst_109 : f32 to vector<32x128xf32>
    %164 = arith.maximumf %162, %163 : vector<32x128xf32>
    %165 = arith.addf %141, %164 : vector<32x128xf32>
    %166 = vector.extract_strided_slice %20 {offsets = [0, 96, 0], sizes = [2, 16, 128], strides = [1, 1, 1]} : vector<2x112x128xbf16> to vector<2x16x128xbf16>
    %167 = vector.shape_cast %166 : vector<2x16x128xbf16> to vector<32x128xbf16>
    %c0_110 = arith.constant 0 : index
    %c0_111 = arith.constant 0 : index
    %168 = vector.load %arg6[%c0_110, %c0_111] : memref<128x128xbf16, #tpu.memory_space<vmem>>, vector<128x128xbf16>
    %cst_112 = arith.constant dense<0.000000e+00> : vector<32x128xf32>
    %169 = tpu.matmul %167, %168, %cst_112 {dimension_numbers = #tpu.dot_dimension_numbers<[1], [0], [0], [1], [0, 0, 1, 1], [], []>} : vector<32x128xbf16>, vector<128x128xbf16>, vector<32x128xf32> -> vector<32x128xf32>
    %170 = arith.addf %11, %169 : vector<32x128xf32>
    %cst_113 = arith.constant 0.000000e+00 : f32
    %171 = vector.broadcast %cst_113 : f32 to vector<32x128xf32>
    %172 = arith.maximumf %170, %171 : vector<32x128xf32>
    %173 = arith.truncf %172 : vector<32x128xf32> to vector<32x128xbf16>
    %c0_114 = arith.constant 0 : index
    %c0_115 = arith.constant 0 : index
    %174 = vector.load %arg7[%c0_114, %c0_115] : memref<128x128xbf16, #tpu.memory_space<vmem>>, vector<128x128xbf16>
    %cst_116 = arith.constant dense<0.000000e+00> : vector<32x128xf32>
    %175 = tpu.matmul %173, %174, %cst_116 {dimension_numbers = #tpu.dot_dimension_numbers<[1], [0], [0], [1], [0, 0, 1, 1], [], []>} : vector<32x128xbf16>, vector<128x128xbf16>, vector<32x128xf32> -> vector<32x128xf32>
    %c0_117 = arith.constant 0 : index
    %c0_118 = arith.constant 0 : index
    %176 = vector.load %arg8[%c0_117, %c0_118] : memref<1x128xf32, #tpu.memory_space<vmem>>, vector<1x128xf32>
    %177 = vector.broadcast %176 : vector<1x128xf32> to vector<32x128xf32>
    %178 = arith.addf %175, %177 : vector<32x128xf32>
    %cst_119 = arith.constant 0.000000e+00 : f32
    %179 = vector.broadcast %cst_119 : f32 to vector<32x128xf32>
    %180 = arith.maximumf %178, %179 : vector<32x128xf32>
    %181 = arith.truncf %180 : vector<32x128xf32> to vector<32x128xbf16>
    %c0_120 = arith.constant 0 : index
    %c0_121 = arith.constant 0 : index
    %182 = vector.load %arg9[%c0_120, %c0_121] : memref<128x128xbf16, #tpu.memory_space<vmem>>, vector<128x128xbf16>
    %cst_122 = arith.constant dense<0.000000e+00> : vector<32x128xf32>
    %183 = tpu.matmul %181, %182, %cst_122 {dimension_numbers = #tpu.dot_dimension_numbers<[1], [0], [0], [1], [0, 0, 1, 1], [], []>} : vector<32x128xbf16>, vector<128x128xbf16>, vector<32x128xf32> -> vector<32x128xf32>
    %c0_123 = arith.constant 0 : index
    %c0_124 = arith.constant 0 : index
    %184 = vector.load %arg10[%c0_123, %c0_124] : memref<1x128xf32, #tpu.memory_space<vmem>>, vector<1x128xf32>
    %185 = vector.broadcast %184 : vector<1x128xf32> to vector<32x128xf32>
    %186 = arith.addf %183, %185 : vector<32x128xf32>
    %cst_125 = arith.constant 0.000000e+00 : f32
    %187 = vector.broadcast %cst_125 : f32 to vector<32x128xf32>
    %188 = arith.maximumf %186, %187 : vector<32x128xf32>
    %189 = arith.addf %165, %188 : vector<32x128xf32>
    %cst_126 = arith.constant 0.142857149 : f32
    %190 = vector.broadcast %cst_126 : f32 to vector<32x128xf32>
    %191 = arith.mulf %189, %190 : vector<32x128xf32>
    %192 = arith.addf %191, %12 : vector<32x128xf32>
    %cst_127 = arith.constant 0.000000e+00 : f32
    %193 = vector.broadcast %cst_127 : f32 to vector<32x128xf32>
    %194 = arith.maximumf %192, %193 : vector<32x128xf32>
    %195 = vector.broadcast %2 : vector<32x1xf32> to vector<32x128xf32>
    %196 = arith.mulf %194, %195 : vector<32x128xf32>
    %197 = vector.shape_cast %196 : vector<32x128xf32> to vector<2x16x128xf32>
    %c0_128 = arith.constant 0 : index
    %c0_129 = arith.constant 0 : index
    %c0_130 = arith.constant 0 : index
    %198 = vector.load %arg11[%c0_128, %c0_129, %c0_130] : memref<2x16x128xf32, #tpu.memory_space<vmem>>, vector<2x16x128xf32>
    tpu.vector_store %arg11[%c0_128, %c0_129, %c0_130], %197 {strides = array<i32>} : memref<2x16x128xf32, #tpu.memory_space<vmem>>, vector<2x16x128xf32>,
    return
  }
  func.func @transform_0(%arg0: i32) -> (i32, i32, i32) {
    %c0_i32 = arith.constant 0 : i32
    %c0_i32_0 = arith.constant 0 : i32
    %c0_i32_1 = arith.constant 0 : i32
    return %arg0, %c0_i32, %c0_i32_0 : i32, i32, i32
  }
  func.func @transform_1(%arg0: i32) -> (i32, i32, i32) {
    %c0_i32 = arith.constant 0 : i32
    %c0_i32_0 = arith.constant 0 : i32
    %c0_i32_1 = arith.constant 0 : i32
    return %arg0, %c0_i32, %c0_i32_0 : i32, i32, i32
  }
  func.func @transform_2(%arg0: i32) -> (i32, i32, i32) {
    %c0_i32 = arith.constant 0 : i32
    %c0_i32_0 = arith.constant 0 : i32
    %c0_i32_1 = arith.constant 0 : i32
    return %arg0, %c0_i32, %c0_i32_0 : i32, i32, i32
  }
  func.func @transform_3(%arg0: i32) -> (i32, i32) {
    %c0_i32 = arith.constant 0 : i32
    %c0_i32_0 = arith.constant 0 : i32
    %c0_i32_1 = arith.constant 0 : i32
    return %c0_i32, %c0_i32_0 : i32, i32
  }
  func.func @transform_4(%arg0: i32) -> (i32, i32) {
    %c0_i32 = arith.constant 0 : i32
    %c0_i32_0 = arith.constant 0 : i32
    %c0_i32_1 = arith.constant 0 : i32
    return %c0_i32, %c0_i32_0 : i32, i32
  }
  func.func @transform_5(%arg0: i32) -> (i32, i32) {
    %c0_i32 = arith.constant 0 : i32
    %c0_i32_0 = arith.constant 0 : i32
    %c0_i32_1 = arith.constant 0 : i32
    return %c0_i32, %c0_i32_0 : i32, i32
  }
  func.func @transform_6(%arg0: i32) -> (i32, i32) {
    %c0_i32 = arith.constant 0 : i32
    %c0_i32_0 = arith.constant 0 : i32
    %c0_i32_1 = arith.constant 0 : i32
    return %c0_i32, %c0_i32_0 : i32, i32
  }
  func.func @transform_7(%arg0: i32) -> (i32, i32) {
    %c0_i32 = arith.constant 0 : i32
    %c0_i32_0 = arith.constant 0 : i32
    %c0_i32_1 = arith.constant 0 : i32
    return %c0_i32, %c0_i32_0 : i32, i32
  }
  func.func @transform_8(%arg0: i32) -> (i32, i32) {
    %c0_i32 = arith.constant 0 : i32
    %c0_i32_0 = arith.constant 0 : i32
    %c0_i32_1 = arith.constant 0 : i32
    return %c0_i32, %c0_i32_0 : i32, i32
  }
  func.func @transform_9(%arg0: i32) -> (i32, i32) {
    %c0_i32 = arith.constant 0 : i32
    %c0_i32_0 = arith.constant 0 : i32
    %c0_i32_1 = arith.constant 0 : i32
    return %c0_i32, %c0_i32_0 : i32, i32
  }
  func.func @transform_10(%arg0: i32) -> (i32, i32, i32) {
    %c0_i32 = arith.constant 0 : i32
    %c0_i32_0 = arith.constant 0 : i32
    %c0_i32_1 = arith.constant 0 : i32
    return %arg0, %c0_i32, %c0_i32_0 : i32, i32, i32
  }
}

module attributes {stable_mosaic.version = 11 : i64} {
  func.func @_head_kernel(%arg0: i32, %arg1: memref<2x128xf32, #tpu.memory_space<vmem>>, %arg2: memref<2x1xf32, #tpu.memory_space<vmem>>, %arg3: memref<128x128xbf16, #tpu.memory_space<vmem>>, %arg4: memref<1x128xf32, #tpu.memory_space<vmem>>, %arg5: memref<128x128xbf16, #tpu.memory_space<vmem>>, %arg6: memref<1x128xf32, #tpu.memory_space<vmem>>, %arg7: memref<2x128xf32, #tpu.memory_space<vmem>>) attributes {dimension_semantics = [#tpu.dimension_semantics<arbitrary>], iteration_bounds = array<i64: 1>, scalar_prefetch = 0 : i64, scratch_operands = 0 : i64, tpu.core_type = #tpu.core_type<tc>, window_params = [{pipeline_mode = #tpu.pipeline_mode<synchronous>, transform_indices = @transform_0, window_bounds = array<i64: 2, 128>}, {pipeline_mode = #tpu.pipeline_mode<synchronous>, transform_indices = @transform_1, window_bounds = array<i64: 2, 1>}, {pipeline_mode = #tpu.pipeline_mode<synchronous>, transform_indices = @transform_2, window_bounds = array<i64: 128, 128>}, {pipeline_mode = #tpu.pipeline_mode<synchronous>, transform_indices = @transform_3, window_bounds = array<i64: 1, 128>}, {pipeline_mode = #tpu.pipeline_mode<synchronous>, transform_indices = @transform_4, window_bounds = array<i64: 128, 128>}, {pipeline_mode = #tpu.pipeline_mode<synchronous>, transform_indices = @transform_5, window_bounds = array<i64: 1, 128>}, {pipeline_mode = #tpu.pipeline_mode<synchronous>, transform_indices = @transform_6, window_bounds = array<i64: 2, 128>}]} {
    %c0 = arith.constant 0 : index
    %c0_0 = arith.constant 0 : index
    %0 = vector.load %arg1[%c0, %c0_0] : memref<2x128xf32, #tpu.memory_space<vmem>>, vector<2x128xf32>
    %c0_1 = arith.constant 0 : index
    %c0_2 = arith.constant 0 : index
    %1 = vector.load %arg2[%c0_1, %c0_2] : memref<2x1xf32, #tpu.memory_space<vmem>>, vector<2x1xf32>
    %2 = vector.broadcast %1 : vector<2x1xf32> to vector<2x128xf32>
    %3 = arith.divf %0, %2 : vector<2x128xf32>
    %4 = arith.truncf %3 : vector<2x128xf32> to vector<2x128xbf16>
    %c0_3 = arith.constant 0 : index
    %c0_4 = arith.constant 0 : index
    %5 = vector.load %arg3[%c0_3, %c0_4] : memref<128x128xbf16, #tpu.memory_space<vmem>>, vector<128x128xbf16>
    %cst = arith.constant dense<0.000000e+00> : vector<2x128xf32>
    %6 = tpu.matmul %4, %5, %cst {dimension_numbers = #tpu.dot_dimension_numbers<[1], [0], [0], [1], [0, 0, 1, 1], [], []>} : vector<2x128xbf16>, vector<128x128xbf16>, vector<2x128xf32> -> vector<2x128xf32>
    %c0_5 = arith.constant 0 : index
    %c0_6 = arith.constant 0 : index
    %7 = vector.load %arg4[%c0_5, %c0_6] : memref<1x128xf32, #tpu.memory_space<vmem>>, vector<1x128xf32>
    %8 = vector.broadcast %7 : vector<1x128xf32> to vector<2x128xf32>
    %9 = arith.addf %6, %8 : vector<2x128xf32>
    %cst_7 = arith.constant 0.000000e+00 : f32
    %10 = vector.broadcast %cst_7 : f32 to vector<2x128xf32>
    %11 = arith.maximumf %9, %10 : vector<2x128xf32>
    %12 = arith.truncf %11 : vector<2x128xf32> to vector<2x128xbf16>
    %c0_8 = arith.constant 0 : index
    %c0_9 = arith.constant 0 : index
    %13 = vector.load %arg5[%c0_8, %c0_9] : memref<128x128xbf16, #tpu.memory_space<vmem>>, vector<128x128xbf16>
    %cst_10 = arith.constant dense<0.000000e+00> : vector<2x128xf32>
    %14 = tpu.matmul %12, %13, %cst_10 {dimension_numbers = #tpu.dot_dimension_numbers<[1], [0], [0], [1], [0, 0, 1, 1], [], []>} : vector<2x128xbf16>, vector<128x128xbf16>, vector<2x128xf32> -> vector<2x128xf32>
    %c0_11 = arith.constant 0 : index
    %c0_12 = arith.constant 0 : index
    %15 = vector.load %arg6[%c0_11, %c0_12] : memref<1x128xf32, #tpu.memory_space<vmem>>, vector<1x128xf32>
    %16 = vector.broadcast %15 : vector<1x128xf32> to vector<2x128xf32>
    %17 = arith.addf %14, %16 : vector<2x128xf32>
    %c0_13 = arith.constant 0 : index
    %c0_14 = arith.constant 0 : index
    %18 = vector.load %arg7[%c0_13, %c0_14] : memref<2x128xf32, #tpu.memory_space<vmem>>, vector<2x128xf32>
    tpu.vector_store %arg7[%c0_13, %c0_14], %17 {strides = array<i32>} : memref<2x128xf32, #tpu.memory_space<vmem>>, vector<2x128xf32>,
    return
  }
  func.func @transform_0(%arg0: i32) -> (i32, i32) {
    %c0_i32 = arith.constant 0 : i32
    %c0_i32_0 = arith.constant 0 : i32
    %c0_i32_1 = arith.constant 0 : i32
    return %c0_i32, %c0_i32_0 : i32, i32
  }
  func.func @transform_1(%arg0: i32) -> (i32, i32) {
    %c0_i32 = arith.constant 0 : i32
    %c0_i32_0 = arith.constant 0 : i32
    %c0_i32_1 = arith.constant 0 : i32
    return %c0_i32, %c0_i32_0 : i32, i32
  }
  func.func @transform_2(%arg0: i32) -> (i32, i32) {
    %c0_i32 = arith.constant 0 : i32
    %c0_i32_0 = arith.constant 0 : i32
    %c0_i32_1 = arith.constant 0 : i32
    return %c0_i32, %c0_i32_0 : i32, i32
  }
  func.func @transform_3(%arg0: i32) -> (i32, i32) {
    %c0_i32 = arith.constant 0 : i32
    %c0_i32_0 = arith.constant 0 : i32
    %c0_i32_1 = arith.constant 0 : i32
    return %c0_i32, %c0_i32_0 : i32, i32
  }
  func.func @transform_4(%arg0: i32) -> (i32, i32) {
    %c0_i32 = arith.constant 0 : i32
    %c0_i32_0 = arith.constant 0 : i32
    %c0_i32_1 = arith.constant 0 : i32
    return %c0_i32, %c0_i32_0 : i32, i32
  }
  func.func @transform_5(%arg0: i32) -> (i32, i32) {
    %c0_i32 = arith.constant 0 : i32
    %c0_i32_0 = arith.constant 0 : i32
    %c0_i32_1 = arith.constant 0 : i32
    return %c0_i32, %c0_i32_0 : i32, i32
  }
  func.func @transform_6(%arg0: i32) -> (i32, i32) {
    %c0_i32 = arith.constant 0 : i32
    %c0_i32_0 = arith.constant 0 : i32
    %c0_i32_1 = arith.constant 0 : i32
    return %c0_i32, %c0_i32_0 : i32, i32
  }
}

</mosaic_0001>

<bundles_post_ra>
// kernel: particle_net_tagger_forward.7
= control target key start
LH: loop header
LB: loop body
LE: loop exit
PB: predicated region body
PF: predicated region fallthrough
CT: control target
= control target key end

     0   :  { %v249_v0 = vmov 0   ;;  %vm129_vm0 = vcmask 1043456   ;;  %v250_v8 = vmov 839922192   ;;  %vm122_vm1 = vcmask 31744   ;;  %s337_s1 = inlined_call_operand.vmem [shape: f32[2,12,1], index: 1, kind: input, shape index: {}]   ;;  %s338_s3 = inlined_call_operand.vmem [shape: f32[1,128], index: 3, kind: input, shape index: {}]   ;;  %s339_s4 = inlined_call_operand.vmem [shape: f32[1,128], index: 4, kind: input, shape index: {}]   ;;  %s340_s5 = inlined_call_operand.vmem [shape: f32[1,128], index: 5, kind: input, shape index: {}]   ;;  %s341_s2 = inlined_call_operand.vmem [shape: f32[4,128], index: 2, kind: input, shape index: {}]   ;;  %s342_s0 = inlined_call_operand.vmem [shape: f32[2,12,4], index: 0, kind: input, shape index: {}]   ;;  %s343_s6 = inlined_call_operand.vmem [shape: f32[2,12,128], index: 6, kind: output, shape index: {}]  }
   0x1   :  { %245 = vset.pattern.permute.xlu2 %v249_v0  ;;  %244 = vset.pattern.permute.xlu1 %v249_v0  ;;  %v34_v1 = vld [vmem:[%s337_s1 + $0x8] sm:$0xf]  ;;  %v33_v2 = vld [vmem:[%s337_s1] sm:$0xff]  ;;  %v35_v3 = vld [vmem:[%s337_s1 + $0x10] sm:$0xff]  ;;  %v48_v9 = vunpack.c.l.s4 %v250_v8 }
   0x2   :  { %60 = vperm.xlu2 %245, %v34_v1   ;;  %44 = vperm.xlu1 %244, %v33_v2   ;;  %v42_v4 = vrot.slane %v35_v3, 4  ;;  %v41_v5 = vrot.slane %v33_v2, 4  ;;  %v36_v6 = vld [vmem:[%s337_s1 + $0x18] sm:$0xf]  ;;  %v97_v7 = vld [vmem:[%s341_s2] sm:$0xf] }
   0x3   :  { %243 = vset.pattern.permute.xlu0 %v249_v0  ;;  %239 = vmatpush.msk.msra.mxu1 %vm129_vm0, %v97_v7  ;;  %v49_v10 = vunpack.c.0.s8 %v48_v9  ;;  %v24_v12 = vld [vmem:[%s342_s0 + $0x8] sm:$0xf]  ;;  %v25_v16 = vld [vmem:[%s342_s0 + $0x10] sm:$0xff]  ;;  %v23_v23 = vld [vmem:[%s342_s0] sm:$0xff] }
   0x4   :  { %76 = vperm.xlu0 %243, %v42_v4   ;;  %235 = vmatpush.msk.msra.mxu0 %vm129_vm0, %v97_v7  ;;  %v30_v22 = vrot.slane %v25_v16, 4  ;;  %v29_v28 = vrot.slane %v23_v23, 4  ;;  %v26_v32 = vld [vmem:[%s342_s0 + $0x18] sm:$0xf]  ;;  %v246_v38 = vld [vmem:[%s338_s3] ss:$0 sm:$0xff] }
   0x5   :  { %240 = vmatpush.msk.msra.mxu2 %vm129_vm0, %v97_v7  ;;  %v247_v41 = vld [vmem:[%s339_s4] ss:$0 sm:$0xff] }
   0x6   :  { %v248_v43 = vld [vmem:[%s340_s5] ss:$0 sm:$0xff] }
   0xa   :  { %68 = vperm.xlu2 %245, %v35_v3   ;;  %52 = vperm.xlu1 %244, %v41_v5  }
   0xc   :  { %84 = vperm.xlu0 %243, %v36_v6  }
  0x5c   :  { %v61_v11 = vpop.permute.xlu2 %60 }
  0x5d   :  { %v66_v13 = vperm.slane %v61_v11, %v49_v10 }
  0x5f   :  { %v93_v14 = vmul.f32 %v66_v13, %v24_v12 }
  0x61   :  { %112 = vst [vmem:[#allocation1 + $0x10] ss:$2 sm:$0xff] %v93_v14 }
  0x64   :  { %v69_v15 = vpop.permute.xlu2 %68 }
  0x65   :  { %v74_v17 = vperm.slane %v69_v15, %v49_v10 }
  0x67   :  { %v94_v18 = vmul.f32 %v74_v17, %v25_v16 }
  0x69   :  { %114 = vst [vmem:[#allocation1 + $0x11] ss:$2 sm:$0xff] %v94_v18 }
  0x70   :  { %v120_v19 = vld.sshfl [vmem:[#allocation1 + $0x10] sm:$0xff pattern:$0x75316420] }
  0x71   :  { %237 = vmatmul.msk.f32.vlgmr.msra.gmra.mxu1 %vm122_vm1, %v120_v19  ;;  %186 = vst [vmem:[#allocation1 + $0x10] ss:$2 sm:$0xff] %v66_v13 }
  0x72   :  { %188 = vst [vmem:[#allocation1 + $0x11] ss:$2 sm:$0xff] %v74_v17 }
  0x74   :  { %v45_v20 = vpop.permute.xlu1 %44 }
  0x75   :  { %v50_v21 = vperm.slane %v45_v20, %v49_v10 }
  0x76   :  { %v77_v24 = vpop.permute.xlu0 %76 }
  0x77   :  { %v91_v25 = vmul.f32 %v50_v21, %v23_v23  ;;  %v82_v26 = vperm.slane %v77_v24, %v49_v10 }
  0x79   :  { %108 = vst [vmem:[#allocation1] ss:$2 sm:$0xff] %v91_v25  ;;  %v95_v27 = vmul.f32 %v82_v26, %v30_v22  ;;  %v194_v46 = vld.sshfl [vmem:[#allocation1 + $0x10] sm:$0xff pattern:$0x75316420] }
  0x7b   :  { %116 = vst [vmem:[#allocation1 + $0x20] ss:$2 sm:$0xff] %v95_v27 }
  0x7c   :  { %v53_v29 = vpop.permute.xlu1 %52 }
  0x7d   :  { %v58_v30 = vperm.slane %v53_v29, %v49_v10 }
  0x7e   :  { %v85_v31 = vpop.permute.xlu0 %84 }
  0x7f   :  { %v92_v33 = vmul.f32 %v58_v30, %v29_v28  ;;  %v90_v34 = vperm.slane %v85_v31, %v49_v10 }
  0x81   :  { %110 = vst [vmem:[#allocation1 + $0x1] ss:$2 sm:$0xff] %v92_v33  ;;  %v96_v35 = vmul.f32 %v90_v34, %v26_v32 }
  0x83   :  { %118 = vst [vmem:[#allocation1 + $0x21] ss:$2 sm:$0xff] %v96_v35 }
  0x88   :  { %v119_v36 = vld.sshfl [vmem:[#allocation1] sm:$0xff pattern:$0x75316420] }
  0x89   :  { %184 = vst [vmem:[#allocation1 + $0x1] ss:$2 sm:$0xff] %v58_v30  ;;  %236 = vmatmul.msk.f32.vlgmr.msra.gmra.mxu0 %vm122_vm1, %v119_v36 }
  0x8a   :  { %182 = vst [vmem:[#allocation1] ss:$2 sm:$0xff] %v50_v21  ;;  %v121_v37 = vld.sshfl [vmem:[#allocation1 + $0x20] sm:$0xff pattern:$0x75316420] }
  0x8b   :  { %192 = vst [vmem:[#allocation1 + $0x21] ss:$2 sm:$0xff] %v90_v34  ;;  %238 = vmatmul.msk.f32.vlgmr.msra.gmra.mxu2 %vm122_vm1, %v121_v37 }
  0x8c   :  { %190 = vst [vmem:[#allocation1 + $0x20] ss:$2 sm:$0xff] %v82_v26 }
  0x91   :  { %v193_v56 = vld.sshfl [vmem:[#allocation1] sm:$0xff pattern:$0x75316420] }
  0x93   :  { %v195_v49 = vld.sshfl [vmem:[#allocation1 + $0x20] sm:$0xff pattern:$0x75316420] }
  0xee   :  { %v153_v39 = vpop.f32.mrf.mxu1 }
  0xef   :  { %v154_v40 = vadd.f32 %v246_v38, %v153_v39 }
  0xf1   :  { %v160_v42 = vmax.f32 %v154_v40, 0.0 }
  0xf3   :  { %v167_v44 = vmul.f32 %v247_v41, %v160_v42 }
  0xf5   :  { %v174_v45 = vadd.f32 %v248_v43, %v167_v44 }
  0xf7   :  { %v200_v47 = vmul.f32 %v194_v46, %v174_v45 }
  0xf9   :  { %v206_v48 = vrot.slane %v200_v47, 4  ;;  %212 = vst [vmem:[#allocation1 + $0x10] ss:$2 sm:$0xff] %v200_v47 }
  0xfb   :  { %216 = vst [vmem:[#allocation1 + $0x20] ss:$2 sm:$0xff] %v206_v48 }
 0x100   :  { %v214_v50 = vld.sshfl [vmem:[#allocation1 + $0x10] sm:$0xff pattern:$0x75316420] }
 0x101   :  { %228 = vst [vmem:[%s343_s6 + $0x8] sm:$0xf] %v214_v50 }
 0x106   :  { %v150_v51 = vpop.f32.mrf.mxu0 }
 0x107   :  { %v151_v52 = vadd.f32 %v246_v38, %v150_v51 }
 0x109   :  { %v159_v53 = vmax.f32 %v151_v52, 0.0 }
 0x10b   :  { %v166_v54 = vmul.f32 %v247_v41, %v159_v53 }
 0x10d   :  { %v173_v55 = vadd.f32 %v248_v43, %v166_v54 }
 0x10e   :  { %v156_v57 = vpop.f32.mrf.mxu2 }
 0x10f   :  { %v199_v58 = vmul.f32 %v193_v56, %v173_v55  ;;  %v157_v59 = vadd.f32 %v246_v38, %v156_v57 }
 0x111   :  { %v205_v60 = vrot.slane %v199_v58, 4  ;;  %208 = vst [vmem:[#allocation1] ss:$2 sm:$0xff] %v199_v58  ;;  %v161_v61 = vmax.f32 %v157_v59, 0.0 }
 0x113   :  { %210 = vst [vmem:[#allocation1 + $0x1] ss:$2 sm:$0xff] %v205_v60  ;;  %v168_v62 = vmul.f32 %v247_v41, %v161_v61 }
 0x115   :  { %v175_v63 = vadd.f32 %v248_v43, %v168_v62 }
 0x117   :  { %v201_v0 = vmul.f32 %v195_v49, %v175_v63 }
 0x119   :  { %v207_v1 = vrot.slane %v201_v0, 4  ;;  %218 = vst [vmem:[#allocation1 + $0x21] ss:$2 sm:$0xff] %v201_v0 }
 0x11a   :  { %v213_v2 = vld.sshfl [vmem:[#allocation1] sm:$0xff pattern:$0x75316420] }
 0x11b   :  { %227 = vst [vmem:[%s343_s6] sm:$0xff] %v213_v2 }
 0x11c   :  { %220 = vst [vmem:[#allocation1 + $0x30] ss:$2 sm:$0xff] %v207_v1 }
 0x120   :  { %v221_v3 = vld.sshfl [vmem:[#allocation1 + $0x20] sm:$0xff pattern:$0x75316420] }
 0x121   :  { %229 = vst [vmem:[%s343_s6 + $0x10] sm:$0xff] %v221_v3 }
 0x123   :  { %v222_v4 = vld.sshfl [vmem:[#allocation1 + $0x30] sm:$0xff pattern:$0x75316420] }
 0x124   :  { %230 = vst [vmem:[%s343_s6 + $0x18] sm:$0xf] %v222_v4 }

// kernel: particle_net_tagger_forward.8
= control target key start
LH: loop header
LB: loop body
LE: loop exit
PB: predicated region body
PF: predicated region fallthrough
CT: control target
= control target key end

     0   :  { %v121_v0 = vmov 0   ;;  %vm61_vm0 = vcmask 1042432   ;;  %v122_v4 = vmov 839922192   ;;  %vm58_vm1 = vcmask 23552   ;;  %s188_s1 = inlined_call_operand.vmem [shape: f32[2,4,1], index: 1, kind: input, shape index: {}]   ;;  %s189_s3 = inlined_call_operand.vmem [shape: f32[1,128], index: 3, kind: input, shape index: {}]   ;;  %s190_s4 = inlined_call_operand.vmem [shape: f32[1,128], index: 4, kind: input, shape index: {}]   ;;  %s191_s5 = inlined_call_operand.vmem [shape: f32[1,128], index: 5, kind: input, shape index: {}]   ;;  %s192_s2 = inlined_call_operand.vmem [shape: f32[3,128], index: 2, kind: input, shape index: {}]   ;;  %s193_s0 = inlined_call_operand.vmem [shape: f32[2,4,3], index: 0, kind: input, shape index: {}]   ;;  %s194_s6 = inlined_call_operand.vmem [shape: f32[2,4,128], index: 6, kind: output, shape index: {}]  }
   0x1   :  { %117 = vset.pattern.permute.xlu0 %v121_v0  ;;  %v25_v1 = vld [vmem:[%s188_s1] sm:$0xf]  ;;  %v26_v2 = vld [vmem:[%s188_s1 + $0x4] sm:$0xf]  ;;  %v33_v5 = vunpack.c.l.s4 %v122_v4 }
   0x2   :  { %29 = vperm.xlu0 %117, %v25_v1   ;;  %v47_v3 = vld [vmem:[%s192_s2] sm:$0x7]  ;;  %v24_v12 = vld [vmem:[%s193_s0 + $0x4] sm:$0xf] }
   0x3   :  { %113 = vmatpush.msk.msra.mxu0 %vm61_vm0, %v47_v3  ;;  %v34_v6 = vunpack.c.0.s8 %v33_v5  ;;  %v23_v8 = vld [vmem:[%s193_s0] sm:$0xf] }
   0x4   :  { %v118_v16 = vld [vmem:[%s189_s3] ss:$0 sm:$0xff] }
   0x5   :  { %v119_v19 = vld [vmem:[%s190_s4] ss:$0 sm:$0xff] }
   0x6   :  { %v120_v21 = vld [vmem:[%s191_s5] ss:$0 sm:$0xff] }
   0xa   :  { %38 = vperm.xlu0 %117, %v26_v2  }
  0x74   :  { %v30_v7 = vpop.permute.xlu0 %29 }
  0x75   :  { %v35_v9 = vperm.slane %v30_v7, %v34_v6 }
  0x77   :  { %v45_v10 = vmul.f32 %v35_v9, %v23_v8 }
  0x79   :  { %54 = vst [vmem:[#allocation1] ss:$2 sm:$0xff] %v45_v10 }
  0x7c   :  { %v39_v11 = vpop.permute.xlu0 %38 }
  0x7d   :  { %v44_v13 = vperm.slane %v39_v11, %v34_v6 }
  0x7f   :  { %v46_v14 = vmul.f32 %v44_v13, %v24_v12 }
  0x81   :  { %56 = vst [vmem:[#allocation1 + $0x1] ss:$2 sm:$0xff] %v46_v14 }
  0x88   :  { %v57_v15 = vld.sshfl [vmem:[#allocation1] sm:$0xff pattern:$0x75316420] }
  0x89   :  { %114 = vmatmul.msk.f32.vlgmr.msra.gmra.mxu0 %vm58_vm1, %v57_v15  ;;  %98 = vst [vmem:[#allocation1] ss:$2 sm:$0xff] %v35_v9 }
  0x8a   :  { %100 = vst [vmem:[#allocation1 + $0x1] ss:$2 sm:$0xff] %v44_v13 }
  0x91   :  { %v101_v24 = vld.sshfl [vmem:[#allocation1] sm:$0xff pattern:$0x75316420] }
 0x106   :  { %v82_v17 = vpop.f32.mrf.mxu0 }
 0x107   :  { %v83_v18 = vadd.f32 %v118_v16, %v82_v17 }
 0x109   :  { %v85_v20 = vmax.f32 %v83_v18, 0.0 }
 0x10b   :  { %v90_v22 = vmul.f32 %v119_v19, %v85_v20 }
 0x10d   :  { %v95_v23 = vadd.f32 %v120_v21, %v90_v22 }
 0x10f   :  { %v103_v25 = vmul.f32 %v101_v24, %v95_v23 }
 0x111   :  { %v105_v26 = vrot.slane %v103_v25, 4  ;;  %107 = vst [vmem:[%s194_s6] sm:$0xf] %v103_v25 }
 0x113   :  { %108 = vst [vmem:[%s194_s6 + $0x4] sm:$0xf] %v105_v26 }

// kernel: particle_net_tagger_forward.9
= control target key start
LH: loop header
LB: loop body
LE: loop exit
PB: predicated region body
PF: predicated region fallthrough
CT: control target
= control target key end

     0   :  { %v541_v0 = vmov 0   ;;  %vm43_vm0 = vcmask 64512   ;;  %v73_v33 = vlaneseq  ;;  %vm83_vm3 = vcmask 130048   ;;  %s827_s1 = inlined_call_operand.vmem [shape: f32[2,16,1], index: 1, kind: input, shape index: {}]   ;;  %s828_s0 = inlined_call_operand.vmem [shape: f32[2,16,8], index: 0, kind: input, shape index: {}]   ;;  %s829_s2 = inlined_call_operand.vmem [shape: s32[2,16,8], index: 2, kind: output, shape index: {}]  }
   0x1   :  { %538 = vset.pattern.permute.xlu0 %v541_v0  ;;  %v14_v1 = vld [vmem:[%s827_s1 + $0x8] sm:$0xff]  ;;  %539 = vset.pattern.permute.xlu1 %v541_v0  ;;  %v13_v3 = vld [vmem:[%s827_s1] sm:$0xff]  ;;  %v506_v4 = vld [vmem:[%s827_s1 + $0x18] sm:$0xff] }
   0x2   :  { %22 = vperm.xlu0 %538, %v14_v1   ;;  %v28_v2 = vsub.f32 1.0, %v14_v1  ;;  %540 = vset.pattern.permute.xlu2 %v541_v0  ;;  %v279_v6 = vsub.f32 1.0, %v506_v4  ;;  %v27_v8 = vsub.f32 1.0, %v13_v3  ;;  %v505_v9 = vld [vmem:[%s827_s1 + $0x10] sm:$0xff]  ;;  %v12_v14 = vld [vmem:[%s828_s0 + $0x8] sm:$0xff]  ;;  %v504_v20 = vld [vmem:[%s828_s0 + $0x18] sm:$0xff] }
   0x3   :  { %17 = vperm.xlu2 %540, %v13_v3   ;;  %v278_v11 = vsub.f32 1.0, %v505_v9  ;;  %v11_v21 = vld [vmem:[%s828_s0] sm:$0xff]  ;;  %v503_v27 = vld [vmem:[%s828_s0 + $0x10] sm:$0xff]  ;;  %v74_v34 = vshrl.u32 %v73_v33, 7  ;;  %v77_v35 = vand.u32 127, %v73_v33 }
   0x4   :  { %v30_v5 = vmul.f32 1e+09, %v28_v2  ;;  %v281_v7 = vmul.f32 1e+09, %v279_v6  ;;  %v29_v10 = vmul.f32 1e+09, %v27_v8 }
   0x5   :  { %v280_v12 = vmul.f32 1e+09, %v278_v11  ;;  %v75_v36 = vadd.s32 8, %v74_v34  ;;  %vm79_vm1 = vcmp.eq.s32.totalorder %v74_v34, %v77_v35 }
   0x6   :  { %38 = vperm.xlu1 %539, %v30_v5  }
   0x7   :  { %vm80_vm2 = vcmp.eq.s32.totalorder %v75_v36, %v77_v35 }
   0xa   :  { %273 = vperm.xlu0 %538, %v506_v4  }
   0xb   :  { %268 = vperm.xlu2 %540, %v505_v9  }
   0xe   :  { %289 = vperm.xlu1 %539, %v281_v7  }
  0x12   :  { %33 = vperm.xlu0 %538, %v29_v10  }
  0x16   :  { %284 = vperm.xlu1 %539, %v280_v12  }
  0x5d   :  { %v18_v18 = vpop.permute.xlu2 %17 }
  0x5e   :  { %v25_v24 = vmul.f32 %v18_v18, %v11_v21 }
  0x65   :  { %v269_v26 = vpop.permute.xlu2 %268 }
  0x66   :  { %v276_v30 = vmul.f32 %v503_v27, %v269_v26 }
  0x74   :  { %v23_v13 = vpop.permute.xlu0 %22 }
  0x75   :  { %v26_v15 = vmul.f32 %v23_v13, %v12_v14 }
  0x78   :  { %v39_v16 = vpop.permute.xlu1 %38 }
  0x79   :  { %v42_v17 = vadd.f32 %v39_v16, %v26_v15  ;;  %v609_v15 = vcvt.s32.f32 %v77_v35 }
  0x7b   :  { %499 = vmatpush.xpose.msk.msra.mxu0 %vm43_vm0, %v42_v17  ;;  %513 = vmatpush.xpose.msk.msra.mxu2 %vm43_vm0, %v42_v17 }
  0x7c   :  { %v274_v19 = vpop.permute.xlu0 %273 }
  0x7d   :  { %v277_v22 = vmul.f32 %v504_v20, %v274_v19 }
  0x80   :  { %v290_v23 = vpop.permute.xlu1 %289 }
  0x81   :  { %v293_v25 = vadd.f32 %v290_v23, %v277_v22 }
  0x83   :  { %507 = vmatpush.xpose.msk.msra.mxu1 %vm43_vm0, %v293_v25  ;;  %515 = vmatpush.xpose.msk.msra.mxu3 %vm43_vm0, %v293_v25 }
  0x84   :  { %v34_v28 = vpop.permute.xlu0 %33 }
  0x85   :  { %v41_v29 = vadd.f32 %v34_v28, %v25_v24 }
  0x87   :  { %500 = vmatpush.xpose.msk.msra.mxu0 %vm43_vm0, %v41_v29  ;;  %514 = vmatpush.xpose.msk.msra.mxu2 %vm43_vm0, %v41_v29 }
  0x88   :  { %v285_v31 = vpop.permute.xlu1 %284 }
  0x89   :  { %v292_v32 = vadd.f32 %v285_v31, %v276_v30 }
  0x8a   :  { %501 = vmatmul.msk.f32.vlgmr.msra.gmra.mxu0 %vm43_vm0, %v41_v29  ;;  %502 = vmatmul.msk.f32.vlgmr.msra.gmra.mxu2 %vm43_vm0, %v42_v17 }
  0x8b   :  { %508 = vmatpush.xpose.msk.msra.mxu1 %vm43_vm0, %v292_v32  ;;  %516 = vmatpush.xpose.msk.msra.mxu3 %vm43_vm0, %v292_v32 }
  0x8e   :  { %509 = vmatmul.msk.f32.vlgmr.msra.gmra.mxu1 %vm43_vm0, %v292_v32  ;;  %510 = vmatmul.msk.f32.vlgmr.msra.gmra.mxu3 %vm43_vm0, %v293_v25 }
 0x107   :  { %v67_v37 = vpop.f32.mrf.mxu0 }
 0x108   :  { %v81_v38 = vsel %vm79_vm1, %v67_v37, 0.0  ;;  %v93_v59 = vmul.f32 2.0, %v67_v37 }
 0x109   :  { %v84_v42 = vsel %vm83_vm3, %v81_v38, 0.0 }
 0x10b   :  { %v317_v39 = vpop.f32.mrf.mxu1 }
 0x10c   :  { %v323_v44 = vsel %vm79_vm1, %v317_v39, 0.0  ;;  %v334_v2 = vmul.f32 2.0, %v317_v39 }
 0x10d   :  { %v70_v40 = vpop.f32.mrf.mxu2  ;;  %v325_v49 = vsel %vm83_vm3, %v323_v44, 0.0 }
 0x10e   :  { %v82_v41 = vsel %vm80_vm2, %v70_v40, 0.0  ;;  %v94_v61 = vmul.f32 2.0, %v70_v40 }
 0x10f   :  { %v85_v43 = vsel %vm83_vm3, %v82_v41, 0.0 }
 0x110   :  { %v86_v45 = vadd.f32 %v85_v43, %v84_v42 }
 0x111   :  { %v320_v46 = vpop.f32.mrf.mxu3 }
 0x112   :  { %v87_v47 = vrot.slane %v86_v45, 4  ;;  %v324_v48 = vsel %vm80_vm2, %v320_v46, 0.0  ;;  %v335_v4 = vmul.f32 2.0, %v320_v46 }
 0x113   :  { %v326_v50 = vsel %vm83_vm3, %v324_v48, 0.0 }
 0x114   :  { %v88_v51 = vadd.f32 %v87_v47, %v86_v45  ;;  %v327_v52 = vadd.f32 %v326_v50, %v325_v49 }
 0x116   :  { %v89_v53 = vrot.slane %v88_v51, 2  ;;  %v328_v54 = vrot.slane %v327_v52, 4 }
 0x118   :  { %v90_v55 = vadd.f32 %v89_v53, %v88_v51  ;;  %v329_v56 = vadd.f32 %v328_v54, %v327_v52 }
 0x11a   :  { %v91_v57 = vrot.slane %v90_v55, 1  ;;  %v330_v58 = vrot.slane %v329_v56, 2 }
 0x11c   :  { %v92_v60 = vadd.f32 %v91_v57, %v90_v55  ;;  %v331_v62 = vadd.f32 %v330_v58, %v329_v56 }
 0x11e   :  { %v96_v63 = vsub.f32 %v94_v61, %v92_v60  ;;  %v332_v0 = vrot.slane %v331_v62, 1  ;;  %v95_v1 = vsub.f32 %v93_v59, %v92_v60 }
 0x120   :  { %v333_v3 = vadd.f32 %v332_v0, %v331_v62  ;;  %v98_v5 = vsel %vm80_vm2, -3e+38, %v96_v63  ;;  %v97_v6 = vsel %vm79_vm1, -3e+38, %v95_v1 }
 0x121   :  { %v102_v7 = vsel %vm83_vm3, %v98_v5, -inf  ;;  %v99_v8 = vsel %vm83_vm3, %v97_v6, -inf }
 0x122   :  { %v337_v9 = vsub.f32 %v335_v4, %v333_v3  ;;  %103 = vmax.xlane.f32.xlu0 %v102_v7  ;;  %100 = vmax.xlane.f32.xlu2 %v99_v8  ;;  %v336_v10 = vsub.f32 %v334_v2, %v333_v3 }
 0x124   :  { %v338_v11 = vsel %vm79_vm1, -3e+38, %v336_v10  ;;  %v339_v13 = vsel %vm80_vm2, -3e+38, %v337_v9 }
 0x125   :  { %v340_v12 = vsel %vm83_vm3, %v338_v11, -inf  ;;  %v343_v14 = vsel %vm83_vm3, %v339_v13, -inf }
 0x126   :  { %341 = vmax.xlane.f32.xlu1 %v340_v12 }
 0x12a   :  { %344 = vmax.xlane.f32.xlu2 %v343_v14 }
 0x195   :  { %v104_v16 = vpop.xlane.xlu0 %103  ;;  %v101_v17 = vpop.xlane.xlu2 %100 }
 0x196   :  { %vm106_vm4 = vcmp.eq.f32.partialorder %v98_v5, %v104_v16  ;;  %vm105_vm5 = vcmp.eq.f32.partialorder %v97_v6, %v101_v17 }
 0x197   :  { %v108_v18 = vsel %vm106_vm4, %v609_v15, 16.0  ;;  %v107_v19 = vsel %vm105_vm5, %v609_v15, 16.0 }
 0x198   :  { %v112_v20 = vsel %vm83_vm3, %v108_v18, inf  ;;  %v109_v21 = vsel %vm83_vm3, %v107_v19, inf }
 0x199   :  { %v342_v22 = vpop.xlane.xlu1 %341  ;;  %113 = vmin.xlane.f32.xlu0 %v112_v20  ;;  %110 = vmin.xlane.f32.xlu2 %v109_v21 }
 0x19a   :  { %vm346_vm6 = vcmp.eq.f32.partialorder %v338_v11, %v342_v22 }
 0x19b   :  { %v348_v23 = vsel %vm346_vm6, %v609_v15, 16.0 }
 0x19c   :  { %v350_v24 = vsel %vm83_vm3, %v348_v23, inf }
 0x19d   :  { %351 = vmin.xlane.f32.xlu1 %v350_v24  ;;  %v345_v25 = vpop.xlane.xlu2 %344 }
 0x19e   :  { %vm347_vm7 = vcmp.eq.f32.partialorder %v339_v13, %v345_v25 }
 0x19f   :  { %v349_v26 = vsel %vm347_vm7, %v609_v15, 16.0 }
 0x1a0   :  { %v353_v27 = vsel %vm83_vm3, %v349_v26, inf }
 0x1a1   :  { %354 = vmin.xlane.f32.xlu2 %v353_v27 }
 0x20c   :  { %v619_v28 = vpop.xlane.xlu0 %113  ;;  %v621_v29 = vpop.xlane.xlu2 %110 }
 0x20d   :  { %vm116_vm8 = vcmp.eq.f32.partialorder %v609_v15, %v619_v28  ;;  %vm115_vm9 = vcmp.eq.f32.partialorder %v609_v15, %v621_v29 }
 0x20e   :  { %v118_v30 = vsel %vm116_vm8, -3e+38, %v98_v5  ;;  %v117_v31 = vsel %vm115_vm9, -3e+38, %v97_v6 }
 0x20f   :  { %v122_v32 = vsel %vm83_vm3, %v118_v30, -inf  ;;  %v119_v33 = vsel %vm83_vm3, %v117_v31, -inf }
 0x210   :  { %v629_v34 = vpop.xlane.xlu1 %351  ;;  %123 = vmax.xlane.f32.xlu1 %v122_v32  ;;  %120 = vmax.xlane.f32.xlu0 %v119_v33 }
 0x211   :  { %vm356_vm10 = vcmp.eq.f32.partialorder %v609_v15, %v629_v34 }
 0x212   :  { %v358_v35 = vsel %vm356_vm10, -3e+38, %v338_v11  ;;  %vm235_vm10 = vcmask 7168  }
 0x213   :  { %v360_v36 = vsel %vm83_vm3, %v358_v35, -inf }
 0x214   :  { %361 = vmax.xlane.f32.xlu2 %v360_v36  ;;  %v634_v37 = vpop.xlane.xlu2 %354 }
 0x215   :  { %vm357_vm11 = vcmp.eq.f32.partialorder %v609_v15, %v634_v37 }
 0x216   :  { %v359_v38 = vsel %vm357_vm11, -3e+38, %v339_v13  ;;  %vm238_vm11 = vcmask 15360  }
 0x217   :  { %v363_v39 = vsel %vm83_vm3, %v359_v38, -inf }
 0x218   :  { %364 = vmax.xlane.f32.xlu0 %v363_v39 }
 0x283   :  { %v124_v40 = vpop.xlane.xlu1 %123  ;;  %v121_v41 = vpop.xlane.xlu0 %120 }
 0x284   :  { %vm126_vm12 = vcmp.eq.f32.partialorder %v118_v30, %v124_v40  ;;  %vm125_vm13 = vcmp.eq.f32.partialorder %v117_v31, %v121_v41 }
 0x285   :  { %v128_v42 = vsel %vm126_vm12, %v609_v15, 16.0  ;;  %v127_v43 = vsel %vm125_vm13, %v609_v15, 16.0 }
 0x286   :  { %v132_v44 = vsel %vm83_vm3, %v128_v42, inf  ;;  %v129_v45 = vsel %vm83_vm3, %v127_v43, inf }
 0x287   :  { %133 = vmin.xlane.f32.xlu2 %v132_v44  ;;  %130 = vmin.xlane.f32.xlu1 %v129_v45  ;;  %v362_v46 = vpop.xlane.xlu2 %361 }
 0x288   :  { %vm366_vm14 = vcmp.eq.f32.partialorder %v358_v35, %v362_v46 }
 0x289   :  { %v368_v47 = vsel %vm366_vm14, %v609_v15, 16.0 }
 0x28a   :  { %v370_v48 = vsel %vm83_vm3, %v368_v47, inf }
 0x28b   :  { %v365_v49 = vpop.xlane.xlu0 %364  ;;  %371 = vmin.xlane.f32.xlu0 %v370_v48 }
 0x28c   :  { %vm367_vm15 = vcmp.eq.f32.partialorder %v359_v38, %v365_v49 }
 0x28d   :  { %v369_v50 = vsel %vm367_vm15, %v609_v15, 16.0 }
 0x28e   :  { %v373_v51 = vsel %vm83_vm3, %v369_v50, inf }
 0x28f   :  { %374 = vmin.xlane.f32.xlu1 %v373_v51 }
 0x2fa   :  { %v131_v52 = vpop.xlane.xlu1 %130  ;;  %v647_v53 = vpop.xlane.xlu2 %133 }
 0x2fb   :  { %vm135_vm1 = vcmp.eq.f32.partialorder %v609_v15, %v131_v52  ;;  %vm136_vm2 = vcmp.eq.f32.partialorder %v609_v15, %v647_v53  ;;  %v236_v12 = vsel %vm235_vm10, %v621_v29, %v131_v52 }
 0x2fc   :  { %v137_v54 = vsel %vm135_vm1, -3e+38, %v117_v31  ;;  %v138_v55 = vsel %vm136_vm2, -3e+38, %v118_v30 }
 0x2fd   :  { %v139_v56 = vsel %vm83_vm3, %v137_v54, -inf  ;;  %v142_v57 = vsel %vm83_vm3, %v138_v55, -inf }
 0x2fe   :  { %140 = vmax.xlane.f32.xlu2 %v139_v56  ;;  %v654_v58 = vpop.xlane.xlu0 %371  ;;  %143 = vmax.xlane.f32.xlu0 %v142_v57 }
 0x2ff   :  { %vm376_vm4 = vcmp.eq.f32.partialorder %v609_v15, %v654_v58 }
 0x300   :  { %v378_v59 = vsel %vm376_vm4, -3e+38, %v358_v35 }
 0x301   :  { %v380_v60 = vsel %vm83_vm3, %v378_v59, -inf }
 0x302   :  { %v659_v61 = vpop.xlane.xlu1 %374  ;;  %381 = vmax.xlane.f32.xlu1 %v380_v60 }
 0x303   :  { %vm377_vm5 = vcmp.eq.f32.partialorder %v609_v15, %v659_v61 }
 0x304   :  { %v379_v62 = vsel %vm377_vm5, -3e+38, %v359_v38 }
 0x305   :  { %v383_v63 = vsel %vm83_vm3, %v379_v62, -inf }
 0x306   :  { %384 = vmax.xlane.f32.xlu2 %v383_v63 }
 0x371   :  { %v144_v0 = vpop.xlane.xlu0 %143  ;;  %v141_v1 = vpop.xlane.xlu2 %140 }
 0x372   :  { %vm146_vm6 = vcmp.eq.f32.partialorder %v138_v55, %v144_v0  ;;  %vm145_vm7 = vcmp.eq.f32.partialorder %v137_v54, %v141_v1 }
 0x373   :  { %v148_v2 = vsel %vm146_vm6, %v609_v15, 16.0  ;;  %v147_v3 = vsel %vm145_vm7, %v609_v15, 16.0  ;;  %vm241_vm6 = vcmask 23552  }
 0x374   :  { %v152_v4 = vsel %vm83_vm3, %v148_v2, inf  ;;  %v149_v5 = vsel %vm83_vm3, %v147_v3, inf }
 0x375   :  { %v382_v6 = vpop.xlane.xlu1 %381  ;;  %153 = vmin.xlane.f32.xlu1 %v152_v4  ;;  %150 = vmin.xlane.f32.xlu0 %v149_v5 }
 0x376   :  { %vm386_vm8 = vcmp.eq.f32.partialorder %v378_v59, %v382_v6 }
 0x377   :  { %v388_v7 = vsel %vm386_vm8, %v609_v15, 16.0 }
 0x378   :  { %v390_v8 = vsel %vm83_vm3, %v388_v7, inf }
 0x379   :  { %391 = vmin.xlane.f32.xlu2 %v390_v8  ;;  %v385_v9 = vpop.xlane.xlu2 %384 }
 0x37a   :  { %vm387_vm9 = vcmp.eq.f32.partialorder %v379_v62, %v385_v9 }
 0x37b   :  { %v389_v10 = vsel %vm387_vm9, %v609_v15, 16.0 }
 0x37c   :  { %v393_v11 = vsel %vm83_vm3, %v389_v10, inf }
 0x37d   :  { %394 = vmin.xlane.f32.xlu0 %v393_v11 }
 0x3e8   :  { %v674_v13 = vpop.xlane.xlu1 %153  ;;  %v151_v14 = vpop.xlane.xlu0 %150 }
 0x3e9   :  { %vm156_vm12 = vcmp.eq.f32.partialorder %v609_v15, %v674_v13  ;;  %vm155_vm13 = vcmp.eq.f32.partialorder %v609_v15, %v151_v14  ;;  %v239_v16 = vsel %vm238_vm11, %v236_v12, %v151_v14 }
 0x3ea   :  { %v158_v17 = vsel %vm156_vm12, -3e+38, %v138_v55  ;;  %v157_v18 = vsel %vm155_vm13, -3e+38, %v137_v54 }
 0x3eb   :  { %v162_v19 = vsel %vm83_vm3, %v158_v17, -inf  ;;  %v159_v20 = vsel %vm83_vm3, %v157_v18, -inf }
 0x3ec   :  { %163 = vmax.xlane.f32.xlu2 %v162_v19  ;;  %160 = vmax.xlane.f32.xlu1 %v159_v20  ;;  %v682_v21 = vpop.xlane.xlu2 %391 }
 0x3ed   :  { %vm396_vm14 = vcmp.eq.f32.partialorder %v609_v15, %v682_v21 }
 0x3ee   :  { %v398_v22 = vsel %vm396_vm14, -3e+38, %v378_v59 }
 0x3ef   :  { %v400_v23 = vsel %vm83_vm3, %v398_v22, -inf }
 0x3f0   :  { %v687_v24 = vpop.xlane.xlu0 %394  ;;  %401 = vmax.xlane.f32.xlu0 %v400_v23 }
 0x3f1   :  { %vm397_vm15 = vcmp.eq.f32.partialorder %v609_v15, %v687_v24 }
 0x3f2   :  { %v399_v25 = vsel %vm397_vm15, -3e+38, %v379_v62 }
 0x3f3   :  { %v403_v26 = vsel %vm83_vm3, %v399_v25, -inf }
 0x3f4   :  { %404 = vmax.xlane.f32.xlu1 %v403_v26 }
 0x45f   :  { %v161_v27 = vpop.xlane.xlu1 %160  ;;  %v164_v29 = vpop.xlane.xlu2 %163 }
 0x460   :  { %vm165_vm1 = vcmp.eq.f32.partialorder %v157_v18, %v161_v27  ;;  %vm166_vm2 = vcmp.eq.f32.partialorder %v158_v17, %v164_v29 }
 0x461   :  { %v167_v30 = vsel %vm165_vm1, %v609_v15, 16.0  ;;  %v168_v31 = vsel %vm166_vm2, %v609_v15, 16.0  ;;  %vm244_vm2 = vcmask 31744  }
 0x462   :  { %v169_v32 = vsel %vm83_vm3, %v167_v30, inf  ;;  %v172_v33 = vsel %vm83_vm3, %v168_v31, inf }
 0x463   :  { %170 = vmin.xlane.f32.xlu2 %v169_v32  ;;  %v402_v35 = vpop.xlane.xlu0 %401  ;;  %173 = vmin.xlane.f32.xlu0 %v172_v33 }
 0x464   :  { %vm406_vm4 = vcmp.eq.f32.partialorder %v398_v22, %v402_v35 }
 0x465   :  { %v408_v36 = vsel %vm406_vm4, %v609_v15, 16.0 }
 0x466   :  { %v410_v38 = vsel %vm83_vm3, %v408_v36, inf }
 0x467   :  { %v405_v39 = vpop.xlane.xlu1 %404  ;;  %411 = vmin.xlane.f32.xlu1 %v410_v38 }
 0x468   :  { %vm407_vm5 = vcmp.eq.f32.partialorder %v399_v25, %v405_v39 }
 0x469   :  { %v409_v40 = vsel %vm407_vm5, %v609_v15, 16.0 }
 0x46a   :  { %v413_v41 = vsel %vm83_vm3, %v409_v40, inf }
 0x46b   :  { %414 = vmin.xlane.f32.xlu2 %v413_v41 }
 0x4d6   :  { %v700_v42 = vpop.xlane.xlu0 %173  ;;  %v171_v43 = vpop.xlane.xlu2 %170 }
 0x4d7   :  { %vm176_vm7 = vcmp.eq.f32.partialorder %v609_v15, %v700_v42  ;;  %vm175_vm8 = vcmp.eq.f32.partialorder %v609_v15, %v171_v43  ;;  %v242_v44 = vsel %vm241_vm6, %v239_v16, %v171_v43 }
 0x4d8   :  { %v178_v45 = vsel %vm176_vm7, -3e+38, %v158_v17  ;;  %v177_v46 = vsel %vm175_vm8, -3e+38, %v157_v18 }
 0x4d9   :  { %v182_v47 = vsel %vm83_vm3, %v178_v45, -inf  ;;  %v179_v48 = vsel %vm83_vm3, %v177_v46, -inf }
 0x4da   :  { %v708_v49 = vpop.xlane.xlu1 %411  ;;  %183 = vmax.xlane.f32.xlu1 %v182_v47  ;;  %180 = vmax.xlane.f32.xlu0 %v179_v48 }
 0x4db   :  { %vm416_vm9 = vcmp.eq.f32.partialorder %v609_v15, %v708_v49 }
 0x4dc   :  { %v418_v50 = vsel %vm416_vm9, -3e+38, %v398_v22 }
 0x4dd   :  { %v420_v51 = vsel %vm83_vm3, %v418_v50, -inf }
 0x4de   :  { %421 = vmax.xlane.f32.xlu2 %v420_v51  ;;  %v713_v52 = vpop.xlane.xlu2 %414 }
 0x4df   :  { %vm417_vm12 = vcmp.eq.f32.partialorder %v609_v15, %v713_v52 }
 0x4e0   :  { %v419_v54 = vsel %vm417_vm12, -3e+38, %v399_v25 }
 0x4e1   :  { %v423_v55 = vsel %vm83_vm3, %v419_v54, -inf }
 0x4e2   :  { %424 = vmax.xlane.f32.xlu0 %v423_v55 }
 0x54d   :  { %v184_v56 = vpop.xlane.xlu1 %183  ;;  %v181_v57 = vpop.xlane.xlu0 %180 }
 0x54e   :  { %vm186_vm13 = vcmp.eq.f32.partialorder %v178_v45, %v184_v56  ;;  %vm185_vm14 = vcmp.eq.f32.partialorder %v177_v46, %v181_v57 }
 0x54f   :  { %v188_v59 = vsel %vm186_vm13, %v609_v15, 16.0  ;;  %v187_v60 = vsel %vm185_vm14, %v609_v15, 16.0 }
 0x550   :  { %v192_v62 = vsel %vm83_vm3, %v188_v59, inf  ;;  %v189_v63 = vsel %vm83_vm3, %v187_v60, inf }
 0x551   :  { %193 = vmin.xlane.f32.xlu2 %v192_v62  ;;  %190 = vmin.xlane.f32.xlu1 %v189_v63  ;;  %v422_v0 = vpop.xlane.xlu2 %421 }
 0x552   :  { %vm426_vm15 = vcmp.eq.f32.partialorder %v418_v50, %v422_v0 }
 0x553   :  { %v428_v1 = vsel %vm426_vm15, %v609_v15, 16.0  ;;  %vm247_vm15 = vcmask 39936  }
 0x554   :  { %v430_v2 = vsel %vm83_vm3, %v428_v1, inf }
 0x555   :  { %v425_v3 = vpop.xlane.xlu0 %424  ;;  %431 = vmin.xlane.f32.xlu0 %v430_v2 }
 0x556   :  { %vm427_vm1 = vcmp.eq.f32.partialorder %v419_v54, %v425_v3 }
 0x557   :  { %v429_v4 = vsel %vm427_vm1, %v609_v15, 16.0 }
 0x558   :  { %v433_v5 = vsel %vm83_vm3, %v429_v4, inf }
 0x559   :  { %434 = vmin.xlane.f32.xlu1 %v433_v5  ;;  %v237_v5 = vsel %vm235_vm10, %v619_v28, %v647_v53 }
 0x5c4   :  { %v191_v6 = vpop.xlane.xlu1 %190  ;;  %v726_v7 = vpop.xlane.xlu2 %193 }
 0x5c5   :  { %vm195_vm4 = vcmp.eq.f32.partialorder %v609_v15, %v191_v6  ;;  %v245_v8 = vsel %vm244_vm2, %v242_v44, %v191_v6  ;;  %vm196_vm5 = vcmp.eq.f32.partialorder %v609_v15, %v726_v7  ;;  %v240_v6 = vsel %vm238_vm11, %v237_v5, %v674_v13 }
 0x5c6   :  { %v197_v9 = vsel %vm195_vm4, -3e+38, %v177_v46  ;;  %v198_v10 = vsel %vm196_vm5, -3e+38, %v178_v45 }
 0x5c7   :  { %v199_v11 = vsel %vm83_vm3, %v197_v9, -inf  ;;  %v202_v12 = vsel %vm83_vm3, %v198_v10, -inf }
 0x5c8   :  { %200 = vmax.xlane.f32.xlu2 %v199_v11  ;;  %v734_v14 = vpop.xlane.xlu0 %431  ;;  %203 = vmax.xlane.f32.xlu0 %v202_v12 }
 0x5c9   :  { %vm436_vm7 = vcmp.eq.f32.partialorder %v609_v15, %v734_v14 }
 0x5ca   :  { %v438_v16 = vsel %vm436_vm7, -3e+38, %v418_v50 }
 0x5cb   :  { %v440_v17 = vsel %vm83_vm3, %v438_v16, -inf }
 0x5cc   :  { %v739_v18 = vpop.xlane.xlu1 %434  ;;  %441 = vmax.xlane.f32.xlu1 %v440_v17 }
 0x5cd   :  { %vm437_vm8 = vcmp.eq.f32.partialorder %v609_v15, %v739_v18 }
 0x5ce   :  { %v439_v19 = vsel %vm437_vm8, -3e+38, %v419_v54 }
 0x5cf   :  { %v443_v20 = vsel %vm83_vm3, %v439_v19, -inf }
 0x5d0   :  { %444 = vmax.xlane.f32.xlu2 %v443_v20 }
 0x63b   :  { %v204_v22 = vpop.xlane.xlu0 %203  ;;  %v201_v23 = vpop.xlane.xlu2 %200 }
 0x63c   :  { %vm206_vm9 = vcmp.eq.f32.partialorder %v198_v10, %v204_v22  ;;  %vm205_vm12 = vcmp.eq.f32.partialorder %v197_v9, %v201_v23 }
 0x63d   :  { %v208_v25 = vsel %vm206_vm9, %v609_v15, 16.0  ;;  %v207_v26 = vsel %vm205_vm12, %v609_v15, 16.0 }
 0x63e   :  { %v212_v27 = vsel %vm83_vm3, %v208_v25, inf  ;;  %v209_v29 = vsel %vm83_vm3, %v207_v26, inf }
 0x63f   :  { %v442_v30 = vpop.xlane.xlu1 %441  ;;  %213 = vmin.xlane.f32.xlu1 %v212_v27  ;;  %210 = vmin.xlane.f32.xlu0 %v209_v29 }
 0x640   :  { %vm446_vm13 = vcmp.eq.f32.partialorder %v438_v16, %v442_v30 }
 0x641   :  { %v448_v31 = vsel %vm446_vm13, %v609_v15, 16.0 }
 0x642   :  { %v450_v32 = vsel %vm83_vm3, %v448_v31, inf }
 0x643   :  { %451 = vmin.xlane.f32.xlu2 %v450_v32  ;;  %v445_v33 = vpop.xlane.xlu2 %444 }
 0x644   :  { %vm447_vm14 = vcmp.eq.f32.partialorder %v439_v19, %v445_v33 }
 0x645   :  { %v449_v35 = vsel %vm447_vm14, %v609_v15, 16.0  ;;  %vm250_vm14 = vcmask 48128  }
 0x646   :  { %v453_v36 = vsel %vm83_vm3, %v449_v35, inf }
 0x647   :  { %454 = vmin.xlane.f32.xlu0 %v453_v36 }
 0x6b2   :  { %v214_v38 = vpop.xlane.xlu1 %213  ;;  %v211_v39 = vpop.xlane.xlu0 %210 }
 0x6b3   :  { %vm216_vm1 = vcmp.eq.f32.partialorder %v609_v15, %v214_v38  ;;  %vm215_vm4 = vcmp.eq.f32.partialorder %v609_v15, %v211_v39  ;;  %v248_v40 = vsel %vm247_vm15, %v245_v8, %v211_v39  ;;  %v243_v8 = vsel %vm241_vm6, %v240_v6, %v700_v42 }
 0x6b4   :  { %v218_v41 = vsel %vm216_vm1, -3e+38, %v198_v10  ;;  %v217_v43 = vsel %vm215_vm4, -3e+38, %v197_v9  ;;  %v476_v9 = vsel %vm235_vm10, %v629_v34, %v654_v58  ;;  %v477_v34 = vsel %vm235_vm10, %v634_v37, %v659_v61 }
 0x6b5   :  { %v222_v44 = vsel %vm83_vm3, %v218_v41, -inf  ;;  %v219_v45 = vsel %vm83_vm3, %v217_v43, -inf  ;;  %v478_v10 = vsel %vm238_vm11, %v476_v9, %v682_v21 }
 0x6b6   :  { %223 = vmax.xlane.f32.xlu2 %v222_v44  ;;  %220 = vmax.xlane.f32.xlu1 %v219_v45  ;;  %v452_v46 = vpop.xlane.xlu2 %451  ;;  %v480_v13 = vsel %vm241_vm6, %v478_v10, %v708_v49  ;;  %v479_v49 = vsel %vm238_vm11, %v477_v34, %v687_v24 }
 0x6b7   :  { %vm456_vm5 = vcmp.eq.f32.partialorder %v609_v15, %v452_v46  ;;  %v482_v58 = vsel %vm244_vm2, %v480_v13, %v734_v14  ;;  %v481_v37 = vsel %vm241_vm6, %v479_v49, %v713_v52 }
 0x6b8   :  { %v458_v47 = vsel %vm456_vm5, -3e+38, %v438_v16  ;;  %v483_v25 = vsel %vm244_vm2, %v481_v37, %v739_v18 }
 0x6b9   :  { %v460_v48 = vsel %vm83_vm3, %v458_v47, -inf }
 0x6ba   :  { %v759_v50 = vpop.xlane.xlu0 %454  ;;  %461 = vmax.xlane.f32.xlu0 %v460_v48 }
 0x6bb   :  { %vm457_vm7 = vcmp.eq.f32.partialorder %v609_v15, %v759_v50  ;;  %v485_v32 = vsel %vm247_vm15, %v483_v25, %v759_v50 }
 0x6bc   :  { %v459_v51 = vsel %vm457_vm7, -3e+38, %v439_v19  ;;  %v484_v19 = vsel %vm247_vm15, %v482_v58, %v452_v46 }
 0x6bd   :  { %v463_v54 = vsel %vm83_vm3, %v459_v51, -inf }
 0x6be   :  { %464 = vmax.xlane.f32.xlu1 %v463_v54 }
 0x729   :  { %v221_v55 = vpop.xlane.xlu1 %220  ;;  %v224_v56 = vpop.xlane.xlu2 %223 }
 0x72a   :  { %vm225_vm8 = vcmp.eq.f32.partialorder %v217_v43, %v221_v55  ;;  %vm226_vm9 = vcmp.eq.f32.partialorder %v218_v41, %v224_v56 }
 0x72b   :  { %v227_v57 = vsel %vm225_vm8, %v609_v15, 16.0  ;;  %v228_v59 = vsel %vm226_vm9, %v609_v15, 16.0 }
 0x72c   :  { %v229_v60 = vsel %vm83_vm3, %v227_v57, inf  ;;  %v232_v62 = vsel %vm83_vm3, %v228_v59, inf }
 0x72d   :  { %230 = vmin.xlane.f32.xlu2 %v229_v60  ;;  %v462_v63 = vpop.xlane.xlu0 %461  ;;  %233 = vmin.xlane.f32.xlu0 %v232_v62 }
 0x72e   :  { %vm466_vm12 = vcmp.eq.f32.partialorder %v458_v47, %v462_v63 }
 0x72f   :  { %v468_v0 = vsel %vm466_vm12, %v609_v15, 16.0 }
 0x730   :  { %v470_v1 = vsel %vm83_vm3, %v468_v0, inf }
 0x731   :  { %v465_v2 = vpop.xlane.xlu1 %464  ;;  %471 = vmin.xlane.f32.xlu1 %v470_v1 }
 0x732   :  { %vm467_vm13 = vcmp.eq.f32.partialorder %v459_v51, %v465_v2 }
 0x733   :  { %v469_v3 = vsel %vm467_vm13, %v609_v15, 16.0  ;;  %v246_v15 = vsel %vm244_vm2, %v243_v8, %v726_v7 }
 0x734   :  { %v473_v4 = vsel %vm83_vm3, %v469_v3, inf  ;;  %vm253_vm3 = vcmask 56320   ;;  %v249_v28 = vsel %vm247_vm15, %v246_v15, %v214_v38 }
 0x735   :  { %474 = vmin.xlane.f32.xlu2 %v473_v4 }
 0x7a0   :  { %v234_v53 = vpop.xlane.xlu0 %233  ;;  %v231_v11 = vpop.xlane.xlu2 %230 }
 0x7a1   :  { %v252_v42 = vsel %vm250_vm14, %v249_v28, %v234_v53  ;;  %v251_v12 = vsel %vm250_vm14, %v248_v40, %v231_v11 }
 0x7a2   :  { %v255_v21 = vsel %vm253_vm3, %v252_v42, 0.0  ;;  %v254_v7 = vsel %vm253_vm3, %v251_v12, 0.0 }
 0x7a3   :  { %vm522_vm1 = vcmp.lt.s32.totalorder %v255_v21, 0  ;;  %v523_v16 = vceil.f32 %v255_v21  ;;  %v524_v17 = vfloor.f32 %v255_v21  ;;  %vm517_vm4 = vcmp.lt.s32.totalorder %v254_v7, 0 }
 0x7a4   :  { %v518_v20 = vceil.f32 %v254_v7  ;;  %v519_v22 = vfloor.f32 %v254_v7  ;;  %v472_v23 = vpop.xlane.xlu1 %471 }
 0x7a5   :  { %v525_v61 = vsel %vm522_vm1, %v523_v16, %v524_v17  ;;  %v486_v14 = vsel %vm250_vm14, %v484_v19, %v472_v23 }
 0x7a6   :  { %v526_v26 = vcvt.f32.s32 %v525_v61  ;;  %v520_v27 = vsel %vm517_vm4, %v518_v20, %v519_v22  ;;  %v488_v29 = vsel %vm253_vm3, %v486_v14, 0.0 }
 0x7a7   :  { %v521_v30 = vcvt.f32.s32 %v520_v27  ;;  %vm527_vm10 = vcmp.lt.s32.totalorder %v488_v29, 0  ;;  %v528_v24 = vceil.f32 %v488_v29  ;;  %v529_v31 = vfloor.f32 %v488_v29 }
 0x7a8   :  { %259 = vst.msk [vmem:[%s829_s2 + $0x8] sm:$0xff] %vm43_vm0, %v526_v26  ;;  %v475_v52 = vpop.xlane.xlu2 %474 }
 0x7a9   :  { %258 = vst.msk [vmem:[%s829_s2] sm:$0xff] %vm43_vm0, %v521_v30  ;;  %v530_v18 = vsel %vm527_vm10, %v528_v24, %v529_v31  ;;  %v487_v33 = vsel %vm250_vm14, %v485_v32, %v475_v52 }
 0x7aa   :  { %v531_v35 = vcvt.f32.s32 %v530_v18  ;;  %v489_v36 = vsel %vm253_vm3, %v487_v33, 0.0 }
 0x7ab   :  { %vm532_vm11 = vcmp.lt.s32.totalorder %v489_v36, 0  ;;  %v533_v38 = vceil.f32 %v489_v36  ;;  %v534_v39 = vfloor.f32 %v489_v36 }
 0x7ac   :  { %511 = vst.msk [vmem:[%s829_s2 + $0x10] sm:$0xff] %vm43_vm0, %v531_v35 }
 0x7ad   :  { %v535_v40 = vsel %vm532_vm11, %v533_v38, %v534_v39 }
 0x7ae   :  { %v536_v41 = vcvt.f32.s32 %v535_v40 }
 0x7b0   :  { %512 = vst.msk [vmem:[%s829_s2 + $0x18] sm:$0xff] %vm43_vm0, %v536_v41 }

// kernel: particle_net_tagger_forward.11
= control target key start
LH: loop header
LB: loop body
LE: loop exit
PB: predicated region body
PF: predicated region fallthrough
CT: control target
= control target key end

     0   :  { %v521_v0 = vmov 0   ;;  %v66_v33 = vlaneseq  ;;  %vm76_vm2 = vcmask 130048   ;;  %s795_s1 = inlined_call_operand.vmem [shape: f32[2,16,1], index: 1, kind: input, shape index: {}]   ;;  %s796_s0 = inlined_call_operand.vmem [shape: f32[2,16,128], index: 0, kind: input, shape index: {}]   ;;  %s797_s2 = inlined_call_operand.vmem [shape: s32[2,16,8], index: 2, kind: output, shape index: {}]  }
   0x1   :  { %518 = vset.pattern.permute.xlu0 %v521_v0  ;;  %v14_v1 = vld [vmem:[%s795_s1 + $0x8] sm:$0xff]  ;;  %519 = vset.pattern.permute.xlu1 %v521_v0  ;;  %v13_v3 = vld [vmem:[%s795_s1] sm:$0xff]  ;;  %v490_v4 = vld [vmem:[%s795_s1 + $0x18] sm:$0xff] }
   0x2   :  { %22 = vperm.xlu0 %518, %v14_v1   ;;  %v28_v2 = vsub.f32 1.0, %v14_v1  ;;  %520 = vset.pattern.permute.xlu2 %v521_v0  ;;  %v273_v6 = vsub.f32 1.0, %v490_v4  ;;  %v27_v8 = vsub.f32 1.0, %v13_v3  ;;  %v489_v9 = vld [vmem:[%s795_s1 + $0x10] sm:$0xff]  ;;  %v12_v14 = vld [vmem:[%s796_s0 + $0x8] sm:$0xff]  ;;  %v488_v20 = vld [vmem:[%s796_s0 + $0x18] sm:$0xff] }
   0x3   :  { %17 = vperm.xlu2 %520, %v13_v3   ;;  %v272_v11 = vsub.f32 1.0, %v489_v9  ;;  %v11_v21 = vld [vmem:[%s796_s0] sm:$0xff]  ;;  %v487_v27 = vld [vmem:[%s796_s0 + $0x10] sm:$0xff]  ;;  %v67_v34 = vshrl.u32 %v66_v33, 7  ;;  %v70_v35 = vand.u32 127, %v66_v33 }
   0x4   :  { %v30_v5 = vmul.f32 1e+09, %v28_v2  ;;  %v275_v7 = vmul.f32 1e+09, %v273_v6  ;;  %v29_v10 = vmul.f32 1e+09, %v27_v8 }
   0x5   :  { %v274_v12 = vmul.f32 1e+09, %v272_v11  ;;  %v68_v36 = vadd.s32 8, %v67_v34  ;;  %vm72_vm0 = vcmp.eq.s32.totalorder %v67_v34, %v70_v35 }
   0x6   :  { %38 = vperm.xlu1 %519, %v30_v5  }
   0x7   :  { %vm73_vm1 = vcmp.eq.s32.totalorder %v68_v36, %v70_v35 }
   0xa   :  { %267 = vperm.xlu0 %518, %v490_v4  }
   0xb   :  { %262 = vperm.xlu2 %520, %v489_v9  }
   0xe   :  { %283 = vperm.xlu1 %519, %v275_v7  }
  0x12   :  { %33 = vperm.xlu0 %518, %v29_v10  }
  0x16   :  { %278 = vperm.xlu1 %519, %v274_v12  }
  0x5d   :  { %v18_v18 = vpop.permute.xlu2 %17 }
  0x5e   :  { %v25_v24 = vmul.f32 %v18_v18, %v11_v21 }
  0x65   :  { %v263_v26 = vpop.permute.xlu2 %262 }
  0x66   :  { %v270_v30 = vmul.f32 %v487_v27, %v263_v26 }
  0x74   :  { %v23_v13 = vpop.permute.xlu0 %22 }
  0x75   :  { %v26_v15 = vmul.f32 %v23_v13, %v12_v14 }
  0x78   :  { %v39_v16 = vpop.permute.xlu1 %38 }
  0x79   :  { %v42_v17 = vadd.f32 %v39_v16, %v26_v15  ;;  %v577_v15 = vcvt.s32.f32 %v70_v35 }
  0x7b   :  { %57 = vmatpush.xpose.msra.mxu0 %v42_v17  ;;  %493 = vmatpush.xpose.msra.mxu2 %v42_v17 }
  0x7c   :  { %v268_v19 = vpop.permute.xlu0 %267 }
  0x7d   :  { %v271_v22 = vmul.f32 %v488_v20, %v268_v19 }
  0x80   :  { %v284_v23 = vpop.permute.xlu1 %283 }
  0x81   :  { %v287_v25 = vadd.f32 %v284_v23, %v271_v22 }
  0x83   :  { %302 = vmatpush.xpose.msra.mxu1 %v287_v25  ;;  %495 = vmatpush.xpose.msra.mxu3 %v287_v25 }
  0x84   :  { %v34_v28 = vpop.permute.xlu0 %33 }
  0x85   :  { %v41_v29 = vadd.f32 %v34_v28, %v25_v24 }
  0x87   :  { %58 = vmatpush.xpose.msra.mxu0 %v41_v29  ;;  %494 = vmatpush.xpose.msra.mxu2 %v41_v29 }
  0x88   :  { %v279_v31 = vpop.permute.xlu1 %278 }
  0x89   :  { %v286_v32 = vadd.f32 %v279_v31, %v270_v30 }
  0x8a   :  { %59 = vmatmul.f32.vlgmr.msra.gmra.mxu0 %v41_v29  ;;  %62 = vmatmul.f32.vlgmr.msra.gmra.mxu2 %v42_v17 }
  0x8b   :  { %303 = vmatpush.xpose.msra.mxu1 %v286_v32  ;;  %496 = vmatpush.xpose.msra.mxu3 %v286_v32 }
  0x8e   :  { %304 = vmatmul.f32.vlgmr.msra.gmra.mxu1 %v286_v32  ;;  %307 = vmatmul.f32.vlgmr.msra.gmra.mxu3 %v287_v25 }
 0x107   :  { %v60_v37 = vpop.f32.mrf.mxu0 }
 0x108   :  { %v74_v38 = vsel %vm72_vm0, %v60_v37, 0.0  ;;  %v86_v59 = vmul.f32 2.0, %v60_v37 }
 0x109   :  { %v77_v42 = vsel %vm76_vm2, %v74_v38, 0.0 }
 0x10b   :  { %v305_v39 = vpop.f32.mrf.mxu1 }
 0x10c   :  { %v311_v44 = vsel %vm72_vm0, %v305_v39, 0.0  ;;  %v322_v2 = vmul.f32 2.0, %v305_v39 }
 0x10d   :  { %v63_v40 = vpop.f32.mrf.mxu2  ;;  %v313_v49 = vsel %vm76_vm2, %v311_v44, 0.0 }
 0x10e   :  { %v75_v41 = vsel %vm73_vm1, %v63_v40, 0.0  ;;  %v87_v61 = vmul.f32 2.0, %v63_v40 }
 0x10f   :  { %v78_v43 = vsel %vm76_vm2, %v75_v41, 0.0 }
 0x110   :  { %v79_v45 = vadd.f32 %v78_v43, %v77_v42 }
 0x111   :  { %v308_v46 = vpop.f32.mrf.mxu3 }
 0x112   :  { %v80_v47 = vrot.slane %v79_v45, 4  ;;  %v312_v48 = vsel %vm73_vm1, %v308_v46, 0.0  ;;  %v323_v4 = vmul.f32 2.0, %v308_v46 }
 0x113   :  { %v314_v50 = vsel %vm76_vm2, %v312_v48, 0.0 }
 0x114   :  { %v81_v51 = vadd.f32 %v80_v47, %v79_v45  ;;  %v315_v52 = vadd.f32 %v314_v50, %v313_v49 }
 0x116   :  { %v82_v53 = vrot.slane %v81_v51, 2  ;;  %v316_v54 = vrot.slane %v315_v52, 4 }
 0x118   :  { %v83_v55 = vadd.f32 %v82_v53, %v81_v51  ;;  %v317_v56 = vadd.f32 %v316_v54, %v315_v52 }
 0x11a   :  { %v84_v57 = vrot.slane %v83_v55, 1  ;;  %v318_v58 = vrot.slane %v317_v56, 2 }
 0x11c   :  { %v85_v60 = vadd.f32 %v84_v57, %v83_v55  ;;  %v319_v62 = vadd.f32 %v318_v58, %v317_v56 }
 0x11e   :  { %v89_v63 = vsub.f32 %v87_v61, %v85_v60  ;;  %v320_v0 = vrot.slane %v319_v62, 1  ;;  %v88_v1 = vsub.f32 %v86_v59, %v85_v60 }
 0x120   :  { %v321_v3 = vadd.f32 %v320_v0, %v319_v62  ;;  %v91_v5 = vsel %vm73_vm1, -3e+38, %v89_v63  ;;  %v90_v6 = vsel %vm72_vm0, -3e+38, %v88_v1 }
 0x121   :  { %v95_v7 = vsel %vm76_vm2, %v91_v5, -inf  ;;  %v92_v8 = vsel %vm76_vm2, %v90_v6, -inf }
 0x122   :  { %v325_v9 = vsub.f32 %v323_v4, %v321_v3  ;;  %96 = vmax.xlane.f32.xlu0 %v95_v7  ;;  %93 = vmax.xlane.f32.xlu2 %v92_v8  ;;  %v324_v10 = vsub.f32 %v322_v2, %v321_v3 }
 0x124   :  { %v326_v11 = vsel %vm72_vm0, -3e+38, %v324_v10  ;;  %v327_v13 = vsel %vm73_vm1, -3e+38, %v325_v9 }
 0x125   :  { %v328_v12 = vsel %vm76_vm2, %v326_v11, -inf  ;;  %v331_v14 = vsel %vm76_vm2, %v327_v13, -inf }
 0x126   :  { %329 = vmax.xlane.f32.xlu1 %v328_v12 }
 0x12a   :  { %332 = vmax.xlane.f32.xlu2 %v331_v14 }
 0x195   :  { %v97_v16 = vpop.xlane.xlu0 %96  ;;  %v94_v17 = vpop.xlane.xlu2 %93 }
 0x196   :  { %vm99_vm3 = vcmp.eq.f32.partialorder %v91_v5, %v97_v16  ;;  %vm98_vm4 = vcmp.eq.f32.partialorder %v90_v6, %v94_v17 }
 0x197   :  { %v101_v18 = vsel %vm99_vm3, %v577_v15, 16.0  ;;  %v100_v19 = vsel %vm98_vm4, %v577_v15, 16.0 }
 0x198   :  { %v105_v20 = vsel %vm76_vm2, %v101_v18, inf  ;;  %v102_v21 = vsel %vm76_vm2, %v100_v19, inf }
 0x199   :  { %v330_v22 = vpop.xlane.xlu1 %329  ;;  %106 = vmin.xlane.f32.xlu0 %v105_v20  ;;  %103 = vmin.xlane.f32.xlu2 %v102_v21 }
 0x19a   :  { %vm334_vm5 = vcmp.eq.f32.partialorder %v326_v11, %v330_v22 }
 0x19b   :  { %v336_v23 = vsel %vm334_vm5, %v577_v15, 16.0 }
 0x19c   :  { %v338_v24 = vsel %vm76_vm2, %v336_v23, inf }
 0x19d   :  { %339 = vmin.xlane.f32.xlu1 %v338_v24  ;;  %v333_v25 = vpop.xlane.xlu2 %332 }
 0x19e   :  { %vm335_vm6 = vcmp.eq.f32.partialorder %v327_v13, %v333_v25 }
 0x19f   :  { %v337_v26 = vsel %vm335_vm6, %v577_v15, 16.0 }
 0x1a0   :  { %v341_v27 = vsel %vm76_vm2, %v337_v26, inf }
 0x1a1   :  { %342 = vmin.xlane.f32.xlu2 %v341_v27 }
 0x20c   :  { %v587_v28 = vpop.xlane.xlu0 %106  ;;  %v589_v29 = vpop.xlane.xlu2 %103 }
 0x20d   :  { %vm109_vm7 = vcmp.eq.f32.partialorder %v577_v15, %v587_v28  ;;  %vm108_vm8 = vcmp.eq.f32.partialorder %v577_v15, %v589_v29 }
 0x20e   :  { %v111_v30 = vsel %vm109_vm7, -3e+38, %v91_v5  ;;  %v110_v31 = vsel %vm108_vm8, -3e+38, %v90_v6  ;;  %vm228_vm8 = vcmask 7168  }
 0x20f   :  { %v115_v32 = vsel %vm76_vm2, %v111_v30, -inf  ;;  %v112_v33 = vsel %vm76_vm2, %v110_v31, -inf }
 0x210   :  { %v597_v34 = vpop.xlane.xlu1 %339  ;;  %116 = vmax.xlane.f32.xlu1 %v115_v32  ;;  %113 = vmax.xlane.f32.xlu0 %v112_v33 }
 0x211   :  { %vm344_vm9 = vcmp.eq.f32.partialorder %v577_v15, %v597_v34 }
 0x212   :  { %v346_v35 = vsel %vm344_vm9, -3e+38, %v326_v11  ;;  %vm231_vm9 = vcmask 15360  }
 0x213   :  { %v348_v36 = vsel %vm76_vm2, %v346_v35, -inf }
 0x214   :  { %349 = vmax.xlane.f32.xlu2 %v348_v36  ;;  %v602_v37 = vpop.xlane.xlu2 %342 }
 0x215   :  { %vm345_vm10 = vcmp.eq.f32.partialorder %v577_v15, %v602_v37 }
 0x216   :  { %v347_v38 = vsel %vm345_vm10, -3e+38, %v327_v13 }
 0x217   :  { %v351_v39 = vsel %vm76_vm2, %v347_v38, -inf }
 0x218   :  { %352 = vmax.xlane.f32.xlu0 %v351_v39 }
 0x283   :  { %v117_v40 = vpop.xlane.xlu1 %116  ;;  %v114_v41 = vpop.xlane.xlu0 %113 }
 0x284   :  { %vm119_vm11 = vcmp.eq.f32.partialorder %v111_v30, %v117_v40  ;;  %vm118_vm12 = vcmp.eq.f32.partialorder %v110_v31, %v114_v41 }
 0x285   :  { %v121_v42 = vsel %vm119_vm11, %v577_v15, 16.0  ;;  %v120_v43 = vsel %vm118_vm12, %v577_v15, 16.0 }
 0x286   :  { %v125_v44 = vsel %vm76_vm2, %v121_v42, inf  ;;  %v122_v45 = vsel %vm76_vm2, %v120_v43, inf }
 0x287   :  { %126 = vmin.xlane.f32.xlu2 %v125_v44  ;;  %123 = vmin.xlane.f32.xlu1 %v122_v45  ;;  %v350_v46 = vpop.xlane.xlu2 %349 }
 0x288   :  { %vm354_vm13 = vcmp.eq.f32.partialorder %v346_v35, %v350_v46 }
 0x289   :  { %v356_v47 = vsel %vm354_vm13, %v577_v15, 16.0 }
 0x28a   :  { %v358_v48 = vsel %vm76_vm2, %v356_v47, inf }
 0x28b   :  { %v353_v49 = vpop.xlane.xlu0 %352  ;;  %359 = vmin.xlane.f32.xlu0 %v358_v48 }
 0x28c   :  { %vm355_vm14 = vcmp.eq.f32.partialorder %v347_v38, %v353_v49 }
 0x28d   :  { %v357_v50 = vsel %vm355_vm14, %v577_v15, 16.0 }
 0x28e   :  { %v361_v51 = vsel %vm76_vm2, %v357_v50, inf }
 0x28f   :  { %362 = vmin.xlane.f32.xlu1 %v361_v51 }
 0x2fa   :  { %v124_v52 = vpop.xlane.xlu1 %123  ;;  %v615_v53 = vpop.xlane.xlu2 %126 }
 0x2fb   :  { %vm128_vm15 = vcmp.eq.f32.partialorder %v577_v15, %v124_v52  ;;  %vm129_vm0 = vcmp.eq.f32.partialorder %v577_v15, %v615_v53  ;;  %v229_v12 = vsel %vm228_vm8, %v589_v29, %v124_v52 }
 0x2fc   :  { %v130_v54 = vsel %vm128_vm15, -3e+38, %v110_v31  ;;  %v131_v55 = vsel %vm129_vm0, -3e+38, %v111_v30 }
 0x2fd   :  { %v132_v56 = vsel %vm76_vm2, %v130_v54, -inf  ;;  %v135_v57 = vsel %vm76_vm2, %v131_v55, -inf }
 0x2fe   :  { %133 = vmax.xlane.f32.xlu2 %v132_v56  ;;  %v622_v58 = vpop.xlane.xlu0 %359  ;;  %136 = vmax.xlane.f32.xlu0 %v135_v57 }
 0x2ff   :  { %vm364_vm1 = vcmp.eq.f32.partialorder %v577_v15, %v622_v58 }
 0x300   :  { %v366_v59 = vsel %vm364_vm1, -3e+38, %v346_v35 }
 0x301   :  { %v368_v60 = vsel %vm76_vm2, %v366_v59, -inf }
 0x302   :  { %v627_v61 = vpop.xlane.xlu1 %362  ;;  %369 = vmax.xlane.f32.xlu1 %v368_v60 }
 0x303   :  { %vm365_vm3 = vcmp.eq.f32.partialorder %v577_v15, %v627_v61 }
 0x304   :  { %v367_v62 = vsel %vm365_vm3, -3e+38, %v347_v38  ;;  %vm234_vm3 = vcmask 23552  }
 0x305   :  { %v371_v63 = vsel %vm76_vm2, %v367_v62, -inf }
 0x306   :  { %372 = vmax.xlane.f32.xlu2 %v371_v63 }
 0x371   :  { %v137_v0 = vpop.xlane.xlu0 %136  ;;  %v134_v1 = vpop.xlane.xlu2 %133 }
 0x372   :  { %vm139_vm4 = vcmp.eq.f32.partialorder %v131_v55, %v137_v0  ;;  %vm138_vm5 = vcmp.eq.f32.partialorder %v130_v54, %v134_v1 }
 0x373   :  { %v141_v2 = vsel %vm139_vm4, %v577_v15, 16.0  ;;  %v140_v3 = vsel %vm138_vm5, %v577_v15, 16.0 }
 0x374   :  { %v145_v4 = vsel %vm76_vm2, %v141_v2, inf  ;;  %v142_v5 = vsel %vm76_vm2, %v140_v3, inf }
 0x375   :  { %v370_v6 = vpop.xlane.xlu1 %369  ;;  %146 = vmin.xlane.f32.xlu1 %v145_v4  ;;  %143 = vmin.xlane.f32.xlu0 %v142_v5 }
 0x376   :  { %vm374_vm6 = vcmp.eq.f32.partialorder %v366_v59, %v370_v6 }
 0x377   :  { %v376_v7 = vsel %vm374_vm6, %v577_v15, 16.0 }
 0x378   :  { %v378_v8 = vsel %vm76_vm2, %v376_v7, inf }
 0x379   :  { %379 = vmin.xlane.f32.xlu2 %v378_v8  ;;  %v373_v9 = vpop.xlane.xlu2 %372 }
 0x37a   :  { %vm375_vm7 = vcmp.eq.f32.partialorder %v367_v62, %v373_v9 }
 0x37b   :  { %v377_v10 = vsel %vm375_vm7, %v577_v15, 16.0 }
 0x37c   :  { %v381_v11 = vsel %vm76_vm2, %v377_v10, inf }
 0x37d   :  { %382 = vmin.xlane.f32.xlu0 %v381_v11 }
 0x3e8   :  { %v642_v13 = vpop.xlane.xlu1 %146  ;;  %v144_v14 = vpop.xlane.xlu0 %143 }
 0x3e9   :  { %vm149_vm10 = vcmp.eq.f32.partialorder %v577_v15, %v642_v13  ;;  %vm148_vm11 = vcmp.eq.f32.partialorder %v577_v15, %v144_v14  ;;  %v232_v16 = vsel %vm231_vm9, %v229_v12, %v144_v14 }
 0x3ea   :  { %v151_v17 = vsel %vm149_vm10, -3e+38, %v131_v55  ;;  %v150_v18 = vsel %vm148_vm11, -3e+38, %v130_v54 }
 0x3eb   :  { %v155_v19 = vsel %vm76_vm2, %v151_v17, -inf  ;;  %v152_v20 = vsel %vm76_vm2, %v150_v18, -inf }
 0x3ec   :  { %156 = vmax.xlane.f32.xlu2 %v155_v19  ;;  %153 = vmax.xlane.f32.xlu1 %v152_v20  ;;  %v650_v21 = vpop.xlane.xlu2 %379 }
 0x3ed   :  { %vm384_vm12 = vcmp.eq.f32.partialorder %v577_v15, %v650_v21 }
 0x3ee   :  { %v386_v22 = vsel %vm384_vm12, -3e+38, %v366_v59 }
 0x3ef   :  { %v388_v23 = vsel %vm76_vm2, %v386_v22, -inf }
 0x3f0   :  { %v655_v24 = vpop.xlane.xlu0 %382  ;;  %389 = vmax.xlane.f32.xlu0 %v388_v23 }
 0x3f1   :  { %vm385_vm13 = vcmp.eq.f32.partialorder %v577_v15, %v655_v24 }
 0x3f2   :  { %v387_v25 = vsel %vm385_vm13, -3e+38, %v367_v62 }
 0x3f3   :  { %v391_v26 = vsel %vm76_vm2, %v387_v25, -inf }
 0x3f4   :  { %392 = vmax.xlane.f32.xlu1 %v391_v26 }
 0x45f   :  { %v154_v27 = vpop.xlane.xlu1 %153  ;;  %v157_v29 = vpop.xlane.xlu2 %156 }
 0x460   :  { %vm158_vm14 = vcmp.eq.f32.partialorder %v150_v18, %v154_v27  ;;  %vm159_vm15 = vcmp.eq.f32.partialorder %v151_v17, %v157_v29 }
 0x461   :  { %v160_v30 = vsel %vm158_vm14, %v577_v15, 16.0  ;;  %v161_v31 = vsel %vm159_vm15, %v577_v15, 16.0  ;;  %vm237_vm14 = vcmask 31744  }
 0x462   :  { %v162_v32 = vsel %vm76_vm2, %v160_v30, inf  ;;  %v165_v33 = vsel %vm76_vm2, %v161_v31, inf }
 0x463   :  { %163 = vmin.xlane.f32.xlu2 %v162_v32  ;;  %v390_v35 = vpop.xlane.xlu0 %389  ;;  %166 = vmin.xlane.f32.xlu0 %v165_v33 }
 0x464   :  { %vm394_vm0 = vcmp.eq.f32.partialorder %v386_v22, %v390_v35 }
 0x465   :  { %v396_v36 = vsel %vm394_vm0, %v577_v15, 16.0 }
 0x466   :  { %v398_v38 = vsel %vm76_vm2, %v396_v36, inf }
 0x467   :  { %v393_v39 = vpop.xlane.xlu1 %392  ;;  %399 = vmin.xlane.f32.xlu1 %v398_v38 }
 0x468   :  { %vm395_vm1 = vcmp.eq.f32.partialorder %v387_v25, %v393_v39 }
 0x469   :  { %v397_v40 = vsel %vm395_vm1, %v577_v15, 16.0 }
 0x46a   :  { %v401_v41 = vsel %vm76_vm2, %v397_v40, inf }
 0x46b   :  { %402 = vmin.xlane.f32.xlu2 %v401_v41 }
 0x4d6   :  { %v668_v42 = vpop.xlane.xlu0 %166  ;;  %v164_v43 = vpop.xlane.xlu2 %163 }
 0x4d7   :  { %vm169_vm4 = vcmp.eq.f32.partialorder %v577_v15, %v668_v42  ;;  %vm168_vm5 = vcmp.eq.f32.partialorder %v577_v15, %v164_v43  ;;  %v235_v44 = vsel %vm234_vm3, %v232_v16, %v164_v43 }
 0x4d8   :  { %v171_v45 = vsel %vm169_vm4, -3e+38, %v151_v17  ;;  %v170_v46 = vsel %vm168_vm5, -3e+38, %v150_v18 }
 0x4d9   :  { %v175_v47 = vsel %vm76_vm2, %v171_v45, -inf  ;;  %v172_v48 = vsel %vm76_vm2, %v170_v46, -inf }
 0x4da   :  { %v676_v49 = vpop.xlane.xlu1 %399  ;;  %176 = vmax.xlane.f32.xlu1 %v175_v47  ;;  %173 = vmax.xlane.f32.xlu0 %v172_v48 }
 0x4db   :  { %vm404_vm6 = vcmp.eq.f32.partialorder %v577_v15, %v676_v49 }
 0x4dc   :  { %v406_v50 = vsel %vm404_vm6, -3e+38, %v386_v22 }
 0x4dd   :  { %v408_v51 = vsel %vm76_vm2, %v406_v50, -inf }
 0x4de   :  { %409 = vmax.xlane.f32.xlu2 %v408_v51  ;;  %v681_v52 = vpop.xlane.xlu2 %402 }
 0x4df   :  { %vm405_vm7 = vcmp.eq.f32.partialorder %v577_v15, %v681_v52 }
 0x4e0   :  { %v407_v54 = vsel %vm405_vm7, -3e+38, %v387_v25 }
 0x4e1   :  { %v411_v55 = vsel %vm76_vm2, %v407_v54, -inf }
 0x4e2   :  { %412 = vmax.xlane.f32.xlu0 %v411_v55 }
 0x54d   :  { %v177_v56 = vpop.xlane.xlu1 %176  ;;  %v174_v57 = vpop.xlane.xlu0 %173 }
 0x54e   :  { %vm179_vm10 = vcmp.eq.f32.partialorder %v171_v45, %v177_v56  ;;  %vm178_vm11 = vcmp.eq.f32.partialorder %v170_v46, %v174_v57 }
 0x54f   :  { %v181_v59 = vsel %vm179_vm10, %v577_v15, 16.0  ;;  %v180_v60 = vsel %vm178_vm11, %v577_v15, 16.0  ;;  %vm240_vm11 = vcmask 39936  }
 0x550   :  { %v185_v62 = vsel %vm76_vm2, %v181_v59, inf  ;;  %v182_v63 = vsel %vm76_vm2, %v180_v60, inf }
 0x551   :  { %186 = vmin.xlane.f32.xlu2 %v185_v62  ;;  %183 = vmin.xlane.f32.xlu1 %v182_v63  ;;  %v410_v0 = vpop.xlane.xlu2 %409 }
 0x552   :  { %vm414_vm12 = vcmp.eq.f32.partialorder %v406_v50, %v410_v0 }
 0x553   :  { %v416_v1 = vsel %vm414_vm12, %v577_v15, 16.0 }
 0x554   :  { %v418_v2 = vsel %vm76_vm2, %v416_v1, inf }
 0x555   :  { %v413_v3 = vpop.xlane.xlu0 %412  ;;  %419 = vmin.xlane.f32.xlu0 %v418_v2 }
 0x556   :  { %vm415_vm13 = vcmp.eq.f32.partialorder %v407_v54, %v413_v3 }
 0x557   :  { %v417_v4 = vsel %vm415_vm13, %v577_v15, 16.0 }
 0x558   :  { %v421_v5 = vsel %vm76_vm2, %v417_v4, inf }
 0x559   :  { %422 = vmin.xlane.f32.xlu1 %v421_v5  ;;  %v230_v5 = vsel %vm228_vm8, %v587_v28, %v615_v53 }
 0x5c4   :  { %v184_v6 = vpop.xlane.xlu1 %183  ;;  %v694_v7 = vpop.xlane.xlu2 %186 }
 0x5c5   :  { %vm188_vm15 = vcmp.eq.f32.partialorder %v577_v15, %v184_v6  ;;  %v238_v8 = vsel %vm237_vm14, %v235_v44, %v184_v6  ;;  %vm189_vm0 = vcmp.eq.f32.partialorder %v577_v15, %v694_v7  ;;  %v233_v6 = vsel %vm231_vm9, %v230_v5, %v642_v13 }
 0x5c6   :  { %v190_v9 = vsel %vm188_vm15, -3e+38, %v170_v46  ;;  %v191_v10 = vsel %vm189_vm0, -3e+38, %v171_v45 }
 0x5c7   :  { %v192_v11 = vsel %vm76_vm2, %v190_v9, -inf  ;;  %v195_v12 = vsel %vm76_vm2, %v191_v10, -inf }
 0x5c8   :  { %193 = vmax.xlane.f32.xlu2 %v192_v11  ;;  %v702_v14 = vpop.xlane.xlu0 %419  ;;  %196 = vmax.xlane.f32.xlu0 %v195_v12 }
 0x5c9   :  { %vm424_vm1 = vcmp.eq.f32.partialorder %v577_v15, %v702_v14 }
 0x5ca   :  { %v426_v16 = vsel %vm424_vm1, -3e+38, %v406_v50 }
 0x5cb   :  { %v428_v17 = vsel %vm76_vm2, %v426_v16, -inf }
 0x5cc   :  { %v707_v18 = vpop.xlane.xlu1 %422  ;;  %429 = vmax.xlane.f32.xlu1 %v428_v17 }
 0x5cd   :  { %vm425_vm4 = vcmp.eq.f32.partialorder %v577_v15, %v707_v18 }
 0x5ce   :  { %v427_v19 = vsel %vm425_vm4, -3e+38, %v407_v54 }
 0x5cf   :  { %v431_v20 = vsel %vm76_vm2, %v427_v19, -inf }
 0x5d0   :  { %432 = vmax.xlane.f32.xlu2 %v431_v20 }
 0x63b   :  { %v197_v22 = vpop.xlane.xlu0 %196  ;;  %v194_v23 = vpop.xlane.xlu2 %193 }
 0x63c   :  { %vm199_vm5 = vcmp.eq.f32.partialorder %v191_v10, %v197_v22  ;;  %vm198_vm6 = vcmp.eq.f32.partialorder %v190_v9, %v194_v23 }
 0x63d   :  { %v201_v25 = vsel %vm199_vm5, %v577_v15, 16.0  ;;  %v200_v26 = vsel %vm198_vm6, %v577_v15, 16.0 }
 0x63e   :  { %v205_v27 = vsel %vm76_vm2, %v201_v25, inf  ;;  %v202_v29 = vsel %vm76_vm2, %v200_v26, inf }
 0x63f   :  { %v430_v30 = vpop.xlane.xlu1 %429  ;;  %206 = vmin.xlane.f32.xlu1 %v205_v27  ;;  %203 = vmin.xlane.f32.xlu0 %v202_v29 }
 0x640   :  { %vm434_vm7 = vcmp.eq.f32.partialorder %v426_v16, %v430_v30 }
 0x641   :  { %v436_v31 = vsel %vm434_vm7, %v577_v15, 16.0  ;;  %vm243_vm7 = vcmask 48128  }
 0x642   :  { %v438_v32 = vsel %vm76_vm2, %v436_v31, inf }
 0x643   :  { %439 = vmin.xlane.f32.xlu2 %v438_v32  ;;  %v433_v33 = vpop.xlane.xlu2 %432 }
 0x644   :  { %vm435_vm10 = vcmp.eq.f32.partialorder %v427_v19, %v433_v33 }
 0x645   :  { %v437_v35 = vsel %vm435_vm10, %v577_v15, 16.0 }
 0x646   :  { %v441_v36 = vsel %vm76_vm2, %v437_v35, inf }
 0x647   :  { %442 = vmin.xlane.f32.xlu0 %v441_v36 }
 0x6b2   :  { %v207_v38 = vpop.xlane.xlu1 %206  ;;  %v204_v39 = vpop.xlane.xlu0 %203 }
 0x6b3   :  { %vm209_vm12 = vcmp.eq.f32.partialorder %v577_v15, %v207_v38  ;;  %vm208_vm13 = vcmp.eq.f32.partialorder %v577_v15, %v204_v39  ;;  %v241_v40 = vsel %vm240_vm11, %v238_v8, %v204_v39  ;;  %v236_v8 = vsel %vm234_vm3, %v233_v6, %v668_v42 }
 0x6b4   :  { %v211_v41 = vsel %vm209_vm12, -3e+38, %v191_v10  ;;  %v210_v43 = vsel %vm208_vm13, -3e+38, %v190_v9  ;;  %v464_v9 = vsel %vm228_vm8, %v597_v34, %v622_v58  ;;  %v465_v34 = vsel %vm228_vm8, %v602_v37, %v627_v61 }
 0x6b5   :  { %v215_v44 = vsel %vm76_vm2, %v211_v41, -inf  ;;  %v212_v45 = vsel %vm76_vm2, %v210_v43, -inf  ;;  %v466_v10 = vsel %vm231_vm9, %v464_v9, %v650_v21  ;;  %vm251_vm8 = vcmask 64512  }
 0x6b6   :  { %216 = vmax.xlane.f32.xlu2 %v215_v44  ;;  %213 = vmax.xlane.f32.xlu1 %v212_v45  ;;  %v440_v46 = vpop.xlane.xlu2 %439  ;;  %v468_v13 = vsel %vm234_vm3, %v466_v10, %v676_v49  ;;  %v467_v49 = vsel %vm231_vm9, %v465_v34, %v655_v24 }
 0x6b7   :  { %vm444_vm15 = vcmp.eq.f32.partialorder %v577_v15, %v440_v46  ;;  %v470_v58 = vsel %vm237_vm14, %v468_v13, %v702_v14  ;;  %v469_v37 = vsel %vm234_vm3, %v467_v49, %v681_v52 }
 0x6b8   :  { %v446_v47 = vsel %vm444_vm15, -3e+38, %v426_v16  ;;  %v471_v25 = vsel %vm237_vm14, %v469_v37, %v707_v18 }
 0x6b9   :  { %v448_v48 = vsel %vm76_vm2, %v446_v47, -inf }
 0x6ba   :  { %v727_v50 = vpop.xlane.xlu0 %442  ;;  %449 = vmax.xlane.f32.xlu0 %v448_v48 }
 0x6bb   :  { %vm445_vm0 = vcmp.eq.f32.partialorder %v577_v15, %v727_v50  ;;  %v473_v32 = vsel %vm240_vm11, %v471_v25, %v727_v50 }
 0x6bc   :  { %v447_v51 = vsel %vm445_vm0, -3e+38, %v427_v19  ;;  %v472_v19 = vsel %vm240_vm11, %v470_v58, %v440_v46 }
 0x6bd   :  { %v451_v54 = vsel %vm76_vm2, %v447_v51, -inf }
 0x6be   :  { %452 = vmax.xlane.f32.xlu1 %v451_v54 }
 0x729   :  { %v214_v55 = vpop.xlane.xlu1 %213  ;;  %v217_v56 = vpop.xlane.xlu2 %216 }
 0x72a   :  { %vm218_vm1 = vcmp.eq.f32.partialorder %v210_v43, %v214_v55  ;;  %vm219_vm4 = vcmp.eq.f32.partialorder %v211_v41, %v217_v56 }
 0x72b   :  { %v220_v57 = vsel %vm218_vm1, %v577_v15, 16.0  ;;  %v221_v59 = vsel %vm219_vm4, %v577_v15, 16.0 }
 0x72c   :  { %v222_v60 = vsel %vm76_vm2, %v220_v57, inf  ;;  %v225_v62 = vsel %vm76_vm2, %v221_v59, inf }
 0x72d   :  { %223 = vmin.xlane.f32.xlu2 %v222_v60  ;;  %v450_v63 = vpop.xlane.xlu0 %449  ;;  %226 = vmin.xlane.f32.xlu0 %v225_v62 }
 0x72e   :  { %vm454_vm5 = vcmp.eq.f32.partialorder %v446_v47, %v450_v63 }
 0x72f   :  { %v456_v0 = vsel %vm454_vm5, %v577_v15, 16.0 }
 0x730   :  { %v458_v1 = vsel %vm76_vm2, %v456_v0, inf }
 0x731   :  { %v453_v2 = vpop.xlane.xlu1 %452  ;;  %459 = vmin.xlane.f32.xlu1 %v458_v1 }
 0x732   :  { %vm455_vm6 = vcmp.eq.f32.partialorder %v447_v51, %v453_v2 }
 0x733   :  { %v457_v3 = vsel %vm455_vm6, %v577_v15, 16.0  ;;  %v239_v15 = vsel %vm237_vm14, %v236_v8, %v694_v7 }
 0x734   :  { %v461_v4 = vsel %vm76_vm2, %v457_v3, inf  ;;  %vm246_vm2 = vcmask 56320   ;;  %v242_v28 = vsel %vm240_vm11, %v239_v15, %v207_v38 }
 0x735   :  { %462 = vmin.xlane.f32.xlu2 %v461_v4 }
 0x7a0   :  { %v227_v53 = vpop.xlane.xlu0 %226  ;;  %v224_v11 = vpop.xlane.xlu2 %223 }
 0x7a1   :  { %v245_v42 = vsel %vm243_vm7, %v242_v28, %v227_v53  ;;  %v244_v12 = vsel %vm243_vm7, %v241_v40, %v224_v11 }
 0x7a2   :  { %v248_v21 = vsel %vm246_vm2, %v245_v42, 0.0  ;;  %v247_v7 = vsel %vm246_vm2, %v244_v12, 0.0 }
 0x7a3   :  { %vm502_vm10 = vcmp.lt.s32.totalorder %v248_v21, 0  ;;  %v503_v16 = vceil.f32 %v248_v21  ;;  %v504_v17 = vfloor.f32 %v248_v21  ;;  %vm497_vm12 = vcmp.lt.s32.totalorder %v247_v7, 0 }
 0x7a4   :  { %v498_v20 = vceil.f32 %v247_v7  ;;  %v499_v22 = vfloor.f32 %v247_v7  ;;  %v460_v23 = vpop.xlane.xlu1 %459 }
 0x7a5   :  { %v505_v61 = vsel %vm502_vm10, %v503_v16, %v504_v17  ;;  %v474_v14 = vsel %vm243_vm7, %v472_v19, %v460_v23 }
 0x7a6   :  { %v506_v26 = vcvt.f32.s32 %v505_v61  ;;  %v500_v27 = vsel %vm497_vm12, %v498_v20, %v499_v22  ;;  %v476_v29 = vsel %vm246_vm2, %v474_v14, 0.0 }
 0x7a7   :  { %v501_v24 = vcvt.f32.s32 %v500_v27  ;;  %vm507_vm9 = vcmp.lt.s32.totalorder %v476_v29, 0  ;;  %v508_v30 = vceil.f32 %v476_v29  ;;  %v509_v31 = vfloor.f32 %v476_v29 }
 0x7a8   :  { %253 = vst.msk [vmem:[%s797_s2 + $0x8] sm:$0xff] %vm251_vm8, %v506_v26  ;;  %v463_v52 = vpop.xlane.xlu2 %462 }
 0x7a9   :  { %252 = vst.msk [vmem:[%s797_s2] sm:$0xff] %vm251_vm8, %v501_v24  ;;  %v510_v18 = vsel %vm507_vm9, %v508_v30, %v509_v31  ;;  %v475_v33 = vsel %vm243_vm7, %v473_v32, %v463_v52 }
 0x7aa   :  { %v511_v35 = vcvt.f32.s32 %v510_v18  ;;  %v477_v36 = vsel %vm246_vm2, %v475_v33, 0.0 }
 0x7ab   :  { %vm512_vm3 = vcmp.lt.s32.totalorder %v477_v36, 0  ;;  %v513_v38 = vceil.f32 %v477_v36  ;;  %v514_v39 = vfloor.f32 %v477_v36 }
 0x7ac   :  { %491 = vst.msk [vmem:[%s797_s2 + $0x10] sm:$0xff] %vm251_vm8, %v511_v35 }
 0x7ad   :  { %v515_v40 = vsel %vm512_vm3, %v513_v38, %v514_v39 }
 0x7ae   :  { %v516_v41 = vcvt.f32.s32 %v515_v40 }
 0x7b0   :  { %492 = vst.msk [vmem:[%s797_s2 + $0x18] sm:$0xff] %vm251_vm8, %v516_v41 }

// kernel: particle_net_tagger_forward.13
= control target key start
LH: loop header
LB: loop body
LE: loop exit
PB: predicated region body
PF: predicated region fallthrough
CT: control target
= control target key end

     0   :  { %v341_v2 = vmov 0   ;;  %s441_s0 = inlined_call_operand.vmem [shape: f32[2,128], index: 0, kind: input, shape index: {}]   ;;  %s442_s1 = inlined_call_operand.vmem [shape: f32[2,1], index: 1, kind: input, shape index: {}]   ;;  %s443_s2 = inlined_call_operand.vmem [shape: bf16[128,128], index: 2, kind: input, shape index: {}]   ;;  %s444_s3 = inlined_call_operand.vmem [shape: f32[1,128], index: 3, kind: input, shape index: {}]   ;;  %s445_s4 = inlined_call_operand.vmem [shape: bf16[128,128], index: 4, kind: input, shape index: {}]   ;;  %s446_s5 = inlined_call_operand.vmem [shape: f32[1,128], index: 5, kind: input, shape index: {}]   ;;  %s447_s6 = inlined_call_operand.hbm [shape: f32[2,128], index: 6, kind: output, shape index: {}]  }
   0x1   :  { %v25_v0 = vld [vmem:[%s442_s1] sm:$0x3]  ;;  %v299_v1 = vld [vmem:[%s443_s2 + $0x38] sm:$0xff]  ;;  %310 = vset.pattern.permute.xlu0 %v341_v2  ;;  %v298_v3 = vld [vmem:[%s443_s2 + $0x30] sm:$0xff] }
   0x2   :  { %28 = vperm.xlu0 %310, %v25_v0   ;;  %115 = vmatpush.bf16.msra.mxu0 %v299_v1 }
   0x3   :  { %11 = vsyncpa [#allocation3], 0  ;;  %v297_v4 = vld [vmem:[%s443_s2 + $0x28] sm:$0xff]  ;;  %v296_v5 = vld [vmem:[%s443_s2 + $0x20] sm:$0xff]  ;;  %s342_s9 = smov [#allocation2]  }
   0x4   :  { %v295_v6 = vld [vmem:[%s443_s2 + $0x18] sm:$0xff]  ;;  %v294_v7 = vld [vmem:[%s443_s2 + $0x10] sm:$0xff]  ;;  %v293_v8 = vld [vmem:[%s443_s2 + $0x8] sm:$0xff]  ;;  %s217_s10 = sshll.u32 %s342_s9, 4  ;;  %s218_s10 = int_to_ptr.vmem [resolvable:$true] %s217_s10 }
   0x5   :  { %v292_v9 = vld [vmem:[%s443_s2] sm:$0xff]  ;;  %v307_v10 = vld [vmem:[%s445_s4 + $0x38] sm:$0xff]  ;;  %v306_v11 = vld [vmem:[%s445_s4 + $0x30] sm:$0xff] }
   0x6   :  { %116 = vmatpush.bf16.msra.mxu0 %v298_v3  ;;  %198 = vmatpush.bf16.msra.mxu1 %v307_v10  ;;  %v305_v12 = vld [vmem:[%s445_s4 + $0x28] sm:$0xff]  ;;  %v304_v14 = vld [vmem:[%s445_s4 + $0x20] sm:$0xff]  ;;  %v303_v15 = vld [vmem:[%s445_s4 + $0x18] sm:$0xff] }
   0x7   :  { %v302_v18 = vld [vmem:[%s445_s4 + $0x10] sm:$0xff]  ;;  %v24_v25 = vld [vmem:[%s441_s0] sm:$0x3]  ;;  %v301_v30 = vld [vmem:[%s445_s4 + $0x8] sm:$0xff] }
   0x8   :  { %v300_v31 = vld [vmem:[%s445_s4] sm:$0xff]  ;;  %s219_s4 = sshll.u32 %s447_s6, 4  ;;  %s220_s4 = int_to_ptr.hbm [resolvable:$true] %s219_s4 }
   0x9   :  { %v311_v32 = vld [vmem:[%s444_s3] ss:$0 sm:$0xff] }
   0xa   :  { %117 = vmatpush.bf16.msra.mxu0 %v297_v4  ;;  %199 = vmatpush.bf16.msra.mxu1 %v306_v11  ;;  %v312_v38 = vld [vmem:[%s446_s5] ss:$0 sm:$0xff] }
   0xe   :  { %118 = vmatpush.bf16.msra.mxu0 %v296_v5  ;;  %200 = vmatpush.bf16.msra.mxu1 %v305_v12 }
  0x12   :  { %119 = vmatpush.bf16.msra.mxu0 %v295_v6  ;;  %201 = vmatpush.bf16.msra.mxu1 %v304_v14 }
  0x16   :  { %120 = vmatpush.bf16.msra.mxu0 %v294_v7  ;;  %202 = vmatpush.bf16.msra.mxu1 %v303_v15 }
  0x1a   :  { %121 = vmatpush.bf16.msra.mxu0 %v293_v8  ;;  %203 = vmatpush.bf16.msra.mxu1 %v302_v18 }
  0x1e   :  { %122 = vmatpush.bf16.msra.mxu0 %v292_v9  ;;  %204 = vmatpush.bf16.msra.mxu1 %v301_v30 }
  0x22   :  { %205 = vmatpush.bf16.msra.mxu1 %v300_v31 }
  0x74   :  { %v29_v13 = vpop.permute.xlu0 %28 }
  0x75   :  { %313 = vrcp.f32 %v29_v13  ;;  %v42_v20 = vand.u32 2147483648, %v29_v13  ;;  %v40_v22 = vand.u32 2147483647, %v29_v13  ;;  %vm36_vm1 = vweird.f32 %v29_v13 }
  0x77   :  { %v43_v24 = vor.u32 1.1754944e-38, %v42_v20  ;;  %vm41_vm3 = vcmp.eq.f32.partialorder %v40_v22, 8.507059e+37 }
  0x7b   :  { %v314_v16 = vpop.eup %313 }
  0x7c   :  { %v32_v17 = vmul.f32 %v314_v16, %v29_v13  ;;  %vm37_vm0 = vweird.f32 %v314_v16 }
  0x7d   :  { %vm38_vm2 = vmor %vm36_vm1, %vm37_vm0 }
  0x7e   :  { %v33_v19 = vsub.f32 1.0, %v32_v17 }
  0x80   :  { %v34_v21 = vmul.f32 %v314_v16, %v33_v19 }
  0x82   :  { %v35_v23 = vadd.f32 %v314_v16, %v34_v21 }
  0x84   :  { %v39_v26 = vsel %vm38_vm2, %v314_v16, %v35_v23 }
  0x85   :  { %v44_v27 = vsel %vm41_vm3, %v43_v24, %v39_v26 }
  0x86   :  { %v45_v28 = vmul.f32 %v44_v27, %v24_v25 }
  0x88   :  { %v46_v29 = vpack.c.bf16 %v45_v28, %v45_v28 }
  0x8a   :  { %123 = vmatmul.bf16.vlgmr.msra.gmra.mxu0 %v46_v29 }
 0x107   :  { %v124_v33 = vpop.f32.mrf.mxu0 }
 0x108   :  { %v125_v34 = vadd.f32 %v311_v32, %v124_v33 }
 0x10a   :  { %v128_v35 = vmax.f32 %v125_v34, 0.0 }
 0x10c   :  { %v129_v36 = vpack.c.bf16 %v128_v35, %v128_v35 }
 0x10e   :  { %206 = vmatmul.bf16.vlgmr.msra.gmra.mxu1 %v129_v36 }
 0x10f   :  { %v126_v37 = vpop.f32.mrf.mxu0 }
 0x18b   :  { %v207_v39 = vpop.f32.mrf.mxu1 }
 0x18c   :  { %v208_v40 = vadd.f32 %v312_v38, %v207_v39 }
 0x18e   :  { %211 = vst [vmem:[#allocation2] sm:$0x3] %v208_v40 }
 0x18f   :  { %222 = dma.vmem_to_hbm [thread:$0]  %s218_s10, 32, %s220_s4, [#allocation3]  }
 0x193   :  { %v209_v41 = vpop.f32.mrf.mxu1 }
 0x194   :  { %339 = dma.done.wait [#allocation3], 32  }
 0x195   :  { %340 = vsyncadd [#allocation3], 4294967264 }
 0x196   :  { %227 = vsyncpa [#allocation3], 1 }

// kernel: particle_net_tagger_forward.12
= control target key start
LH: loop header
LB: loop body
LE: loop exit
PB: predicated region body
PF: predicated region fallthrough
CT: control target
= control target key end

     0   :  { %v2077_v0 = vmov 0   ;;  %vm549_vm4 = vcmask 130048   ;;  %s3075_s1 = inlined_call_operand.vmem [shape: s32[2,112,1], index: 1, kind: input, shape index: {}]   ;;  %s3076_s3 = inlined_call_operand.vmem [shape: bf16[128,384], index: 3, kind: input, shape index: {}]   ;;  %s3077_s0 = inlined_call_operand.vmem [shape: f32[2,16,128], index: 0, kind: input, shape index: {}]   ;;  %s3078_s2 = inlined_call_operand.vmem [shape: f32[2,16,1], index: 2, kind: input, shape index: {}]   ;;  %s3079_s5 = inlined_call_operand.vmem [shape: bf16[128,128], index: 5, kind: input, shape index: {}]   ;;  %s3080_s6 = inlined_call_operand.vmem [shape: bf16[128,128], index: 6, kind: input, shape index: {}]   ;;  %s3081_s4 = inlined_call_operand.vmem [shape: f32[1,384], index: 4, kind: input, shape index: {}]   ;;  %s3082_s7 = inlined_call_operand.vmem [shape: f32[1,128], index: 7, kind: input, shape index: {}]   ;;  %s3083_s8 = inlined_call_operand.vmem [shape: bf16[128,128], index: 8, kind: input, shape index: {}]   ;;  %s3084_s9 = inlined_call_operand.vmem [shape: f32[1,128], index: 9, kind: input, shape index: {}]   ;;  %s3085_s10 = inlined_call_operand.vmem [shape: bf16[128,128], index: 10, kind: input, shape index: {}]   ;;  %s3086_s11 = inlined_call_operand.vmem [shape: f32[2,1,128], index: 11, kind: output, shape index: {}]  }
   0x1   :  { %2072 = vset.pattern.permute.xlu1 %v2077_v0  ;;  %2071 = vset.pattern.permute.xlu0 %v2077_v0  ;;  %v61_v1 = vld [vmem:[%s3075_s1 + $0x70] sm:$0xff]  ;;  %v47_v2 = vld [vmem:[%s3075_s1] sm:$0xff]  ;;  %v62_v4 = vld [vmem:[%s3075_s1 + $0x78] sm:$0xff] }
   0x2   :  { %361 = vperm.xlu1 %2072, %v61_v1   ;;  %319 = vperm.xlu0 %2071, %v47_v2   ;;  %v49_v3 = vld [vmem:[%s3075_s1 + $0x10] sm:$0xff]  ;;  %v48_v5 = vld [vmem:[%s3075_s1 + $0x8] sm:$0xff]  ;;  %v50_v6 = vld [vmem:[%s3075_s1 + $0x18] sm:$0xff] }
   0x3   :  { %2073 = vset.pattern.permute.xlu2 %v2077_v0  ;;  %v64_v7 = vld [vmem:[%s3075_s1 + $0x88] sm:$0xff]  ;;  %v63_v8 = vld [vmem:[%s3075_s1 + $0x80] sm:$0xff]  ;;  %v65_v10 = vld [vmem:[%s3075_s1 + $0x90] sm:$0xff] }
   0x4   :  { %325 = vperm.xlu2 %2073, %v49_v3   ;;  %v51_v9 = vld [vmem:[%s3075_s1 + $0x20] sm:$0xff]  ;;  %v52_v11 = vld [vmem:[%s3075_s1 + $0x28] sm:$0xff]  ;;  %v66_v12 = vld [vmem:[%s3075_s1 + $0x98] sm:$0xff] }
   0x5   :  { %v54_v13 = vld [vmem:[%s3075_s1 + $0x38] sm:$0xff]  ;;  %v53_v14 = vld [vmem:[%s3075_s1 + $0x30] sm:$0xff]  ;;  %v55_v15 = vld [vmem:[%s3075_s1 + $0x40] sm:$0xff] }
   0x6   :  { %v1833_v16 = vld [vmem:[%s3076_s3 + $0xa8] sm:$0xf]  ;;  %v2035_v17 = vld [vmem:[%s3076_s3 + $0xb0] sm:$0xf0]  ;;  %v1821_v18 = vld [vmem:[%s3076_s3 + $0x90] sm:$0xf] }
   0x7   :  { %v1834_v19 = vor.u32 %v2035_v17, %v1833_v16  ;;  %v2032_v20 = vld [vmem:[%s3076_s3 + $0x98] sm:$0xf0]  ;;  %v57_v22 = vld [vmem:[%s3075_s1 + $0x50] sm:$0xff]  ;;  %v56_v23 = vld [vmem:[%s3075_s1 + $0x48] sm:$0xff] }
   0x8   :  { %v1822_v21 = vor.u32 %v2032_v20, %v1821_v18  ;;  %v58_v24 = vld [vmem:[%s3075_s1 + $0x58] sm:$0xff]  ;;  %v2029_v26 = vld [vmem:[%s3076_s3 + $0x80] sm:$0xf0]  ;;  %v1797_v27 = vld [vmem:[%s3076_s3 + $0x60] sm:$0xf] }
   0x9   :  { %259 = vmatpush.bf16.msra.mxu0 %v1834_v19  ;;  %v1809_v25 = vld [vmem:[%s3076_s3 + $0x78] sm:$0xf]  ;;  %v2026_v29 = vld [vmem:[%s3076_s3 + $0x68] sm:$0xf0]  ;;  %v59_v32 = vld [vmem:[%s3075_s1 + $0x60] sm:$0xff] }
   0xa   :  { %364 = vperm.xlu1 %2072, %v62_v4   ;;  %322 = vperm.xlu0 %2071, %v48_v5   ;;  %v1810_v28 = vor.u32 %v2029_v26, %v1809_v25  ;;  %v1798_v30 = vor.u32 %v2026_v29, %v1797_v27  ;;  %v60_v31 = vld [vmem:[%s3075_s1 + $0x68] sm:$0xff]  ;;  %v67_v33 = vld [vmem:[%s3075_s1 + $0xa0] sm:$0xff]  ;;  %v2023_v35 = vld [vmem:[%s3076_s3 + $0x50] sm:$0xf0] }
   0xb   :  { %v1785_v34 = vld [vmem:[%s3076_s3 + $0x48] sm:$0xf]  ;;  %v1773_v36 = vld [vmem:[%s3076_s3 + $0x30] sm:$0xf]  ;;  %v2020_v38 = vld [vmem:[%s3076_s3 + $0x38] sm:$0xf0] }
   0xc   :  { %328 = vperm.xlu2 %2073, %v50_v6   ;;  %v1786_v37 = vor.u32 %v2023_v35, %v1785_v34  ;;  %v1774_v39 = vor.u32 %v2020_v38, %v1773_v36  ;;  %v39_v40 = vld [vmem:[%s3077_s0] sm:$0xff]  ;;  %v40_v41 = vld [vmem:[%s3077_s0 + $0x8] sm:$0xff]  ;;  %v1761_v42 = vld [vmem:[%s3076_s3 + $0x18] sm:$0xf] }
   0xd   :  { %260 = vmatpush.bf16.msra.mxu0 %v1822_v21  ;;  %v2017_v43 = vld [vmem:[%s3076_s3 + $0x20] sm:$0xf0]  ;;  %v75_v44 = vpack.c.bf16 %v39_v40, %v39_v40  ;;  %v76_v45 = vpack.c.bf16 %v40_v41, %v40_v41  ;;  %v69_v46 = vld [vmem:[%s3075_s1 + $0xb0] sm:$0xff]  ;;  %v68_v47 = vld [vmem:[%s3075_s1 + $0xa8] sm:$0xff] }
   0xe   :  { %v70_v50 = vld [vmem:[%s3075_s1 + $0xb8] sm:$0xff]  ;;  %v1762_v51 = vor.u32 %v2017_v43, %v1761_v42  ;;  %v1749_v52 = vld [vmem:[%s3076_s3] sm:$0xf]  ;;  %v2014_v53 = vld [vmem:[%s3076_s3 + $0x8] sm:$0xf0] }
   0xf   :  { %v123_v48 = vunpack.c.l.b16 %v75_v44  ;;  %v124_v49 = vunpack.c.l.b16 %v76_v45  ;;  %v1750_v55 = vor.u32 %v2014_v53, %v1749_v52  ;;  %v72_v56 = vld [vmem:[%s3075_s1 + $0xc8] sm:$0xff]  ;;  %v71_v57 = vld [vmem:[%s3075_s1 + $0xc0] sm:$0xff]  ;;  %v73_v58 = vld [vmem:[%s3075_s1 + $0xd0] sm:$0xff] }
  0x10   :  { %v43_v59 = vld [vmem:[%s3078_s2] sm:$0xff]  ;;  %v74_v60 = vld [vmem:[%s3075_s1 + $0xd8] sm:$0xff]  ;;  %v41_v61 = vld [vmem:[%s3077_s0 + $0x10] sm:$0xff] }
  0x11   :  { %261 = vmatpush.bf16.msra.mxu0 %v1810_v28  ;;  %v2265_v54 = vpack.c.b16 %v124_v49, %v123_v48  ;;  %v42_v62 = vld [vmem:[%s3077_s0 + $0x18] sm:$0xff]  ;;  %v45_v0 = vld [vmem:[%s3078_s2 + $0x10] sm:$0xff]  ;;  %v77_v1 = vpack.c.bf16 %v41_v61, %v41_v61 }
  0x12   :  { %370 = vperm.xlu1 %2072, %v64_v7   ;;  %367 = vperm.xlu0 %2071, %v63_v8   ;;  %v46_v63 = vld [vmem:[%s3078_s2 + $0x18] sm:$0xff]  ;;  %v78_v2 = vpack.c.bf16 %v42_v62, %v42_v62  ;;  %v316_v7 = vlaneseq }
  0x13   :  { %578 = vmatpush.bf16.msra.mxu3 %v2265_v54  ;;  %v125_v3 = vunpack.c.l.b16 %v77_v1 }
  0x14   :  { %331 = vperm.xlu2 %2073, %v51_v9   ;;  %v126_v4 = vunpack.c.l.b16 %v78_v2  ;;  %v2300_v9 = vand.u32 127, %v316_v7 }
  0x15   :  { %262 = vmatpush.bf16.msra.mxu0 %v1798_v30 }
  0x16   :  { %v2296_v5 = vpack.c.b16 %v126_v4, %v125_v3 }
  0x19   :  { %263 = vmatpush.bf16.msra.mxu0 %v1786_v37 }
  0x1a   :  { %373 = vperm.xlu1 %2072, %v65_v10   ;;  %334 = vperm.xlu0 %2071, %v52_v11  }
  0x1c   :  { %376 = vperm.xlu2 %2073, %v66_v12   ;;  %v2078_v12 = vmov 0.0  }
  0x1d   :  { %264 = vmatpush.bf16.msra.mxu0 %v1774_v39 }
  0x21   :  { %265 = vmatpush.bf16.msra.mxu0 %v1762_v51 }
  0x22   :  { %340 = vperm.xlu1 %2072, %v54_v13   ;;  %337 = vperm.xlu0 %2071, %v53_v14  }
  0x24   :  { %343 = vperm.xlu2 %2073, %v55_v15  }
  0x25   :  { %266 = vmatpush.bf16.msra.mxu0 %v1750_v55 }
  0x28   :  { %267 = vmatmul.bf16.vlgmr.msra.gmra.mxu0 %v2265_v54 }
  0x29   :  { %678 = vmatpush.bf16.msrb.mxu0 %v2296_v5 }
  0x2a   :  { %349 = vperm.xlu1 %2072, %v57_v22   ;;  %346 = vperm.xlu0 %2071, %v56_v23  }
  0x2c   :  { %352 = vperm.xlu2 %2073, %v58_v24  }
  0x32   :  { %358 = vperm.xlu1 %2072, %v60_v31   ;;  %355 = vperm.xlu0 %2071, %v59_v32  }
  0x34   :  { %379 = vperm.xlu2 %2073, %v67_v33  }
  0x38   :  { %272 = vmatmul.bf16.gmra.mxu0 %v2296_v5 }
  0x3a   :  { %385 = vperm.xlu1 %2072, %v69_v46   ;;  %382 = vperm.xlu0 %2071, %v68_v47  }
  0x3c   :  { %388 = vperm.xlu2 %2073, %v70_v50  }
  0x42   :  { %394 = vperm.xlu1 %2072, %v72_v56   ;;  %391 = vperm.xlu0 %2071, %v71_v57  }
  0x44   :  { %397 = vperm.xlu2 %2073, %v73_v58  }
  0x4a   :  { %1608 = vperm.xlu1 %2072, %v43_v59   ;;  %400 = vperm.xlu0 %2071, %v74_v60  }
  0x52   :  { %1623 = vperm.xlu1 %2072, %v46_v63   ;;  %1618 = vperm.xlu0 %2071, %v45_v0  }
  0x5e   :  { %v326_v6 = vpop.permute.xlu2 %325 }
  0x5f   :  { %vm404_vm5 = vcmp.eq.s32.totalorder %v2300_v9, %v326_v6 }
  0x60   :  { %v1845_v32 = vsel %vm404_vm5, 1.0, %v2078_v12 }
  0x61   :  { %v488_v37 = vpack.c.bf16 %v1845_v32, %v1845_v32 }
  0x63   :  { %v530_v43 = vunpack.c.l.b16 %v488_v37  ;;  %v1811_v37 = vld [vmem:[%s3076_s3 + $0x84] sm:$0xf0] }
  0x66   :  { %v329_v8 = vpop.permute.xlu2 %328 }
  0x67   :  { %vm405_vm6 = vcmp.eq.s32.totalorder %v2300_v9, %v329_v8 }
  0x68   :  { %v1846_v33 = vsel %vm405_vm6, 1.0, %v2078_v12 }
  0x69   :  { %v489_v38 = vpack.c.bf16 %v1846_v33, %v1846_v33 }
  0x6b   :  { %v531_v44 = vunpack.c.l.b16 %v489_v38  ;;  %v2025_v38 = vld [vmem:[%s3076_s3 + $0x64] sm:$0xf] }
  0x6d   :  { %v543_v48 = vpack.c.b16 %v531_v44, %v530_v43 }
  0x6e   :  { %v332_v16 = vpop.permute.xlu2 %331 }
  0x6f   :  { %vm406_vm9 = vcmp.eq.s32.totalorder %v2300_v9, %v332_v16  ;;  %v1823_v16 = vld [vmem:[%s3076_s3 + $0x9c] sm:$0xf0] }
  0x70   :  { %v1847_v52 = vsel %vm406_vm9, 1.0, %v2078_v12 }
  0x71   :  { %v490_v58 = vpack.c.bf16 %v1847_v52, %v1847_v52 }
  0x73   :  { %v532_v0 = vunpack.c.l.b16 %v490_v58 }
  0x74   :  { %v362_v10 = vpop.permute.xlu1 %361  ;;  %v320_v11 = vpop.permute.xlu0 %319 }
  0x75   :  { %vm416_vm0 = vcmp.eq.s32.totalorder %v2300_v9, %v362_v10  ;;  %vm402_vm1 = vcmp.eq.s32.totalorder %v2300_v9, %v320_v11  ;;  %v44_v10 = vld [vmem:[%s3078_s2 + $0x8] sm:$0xff] }
  0x76   :  { %v1857_v13 = vsel %vm416_vm0, 1.0, %v2078_v12  ;;  %v1843_v14 = vsel %vm402_vm1, 1.0, %v2078_v12  ;;  %v377_v34 = vpop.permute.xlu2 %376  ;;  %v2034_v11 = vld [vmem:[%s3076_s3 + $0xac] sm:$0xf]  ;;  %1613 = vperm.xlu2 %2073, %v44_v10  }
  0x77   :  { %v500_v15 = vpack.c.bf16 %v1857_v13, %v1857_v13  ;;  %v486_v19 = vpack.c.bf16 %v1843_v14, %v1843_v14  ;;  %vm421_vm11 = vcmp.eq.s32.totalorder %v2300_v9, %v377_v34  ;;  %v1835_v13 = vld [vmem:[%s3076_s3 + $0xb4] sm:$0xf0] }
  0x78   :  { %v1862_v55 = vsel %vm421_vm11, 1.0, %v2078_v12  ;;  %v1838_v14 = vor.u32 %v2034_v11, %v1835_v13 }
  0x79   :  { %v629_v22 = vunpack.c.l.b16 %v500_v15  ;;  %v528_v25 = vunpack.c.l.b16 %v486_v19  ;;  %v505_v60 = vpack.c.bf16 %v1862_v55, %v1862_v55  ;;  %v2031_v15 = vld [vmem:[%s3076_s3 + $0x94] sm:$0xf]  ;;  %v1775_v55 = vld [vmem:[%s3076_s3 + $0x3c] sm:$0xf0] }
  0x7a   :  { %278 = vmatpush.bf16.msra.mxu1 %v1838_v14 }
  0x7b   :  { %v634_v2 = vunpack.c.l.b16 %v505_v60 }
  0x7c   :  { %v365_v17 = vpop.permute.xlu1 %364  ;;  %v323_v18 = vpop.permute.xlu0 %322 }
  0x7d   :  { %vm417_vm2 = vcmp.eq.s32.totalorder %v2300_v9, %v365_v17  ;;  %vm403_vm3 = vcmp.eq.s32.totalorder %v2300_v9, %v323_v18 }
  0x7e   :  { %v1858_v20 = vsel %vm417_vm2, 1.0, %v2078_v12  ;;  %v1844_v21 = vsel %vm403_vm3, 1.0, %v2078_v12  ;;  %v2320_v47 = vpop.permute.xlu2 %343 }
  0x7f   :  { %v501_v23 = vpack.c.bf16 %v1858_v20, %v1858_v20  ;;  %v487_v24 = vpack.c.bf16 %v1844_v21, %v1844_v21  ;;  %v1826_v21 = vor.u32 %v2031_v15, %v1823_v16  ;;  %vm410_vm1 = vcmp.eq.s32.totalorder %v2300_v9, %v2320_v47  ;;  %v1787_v47 = vld [vmem:[%s3076_s3 + $0x54] sm:$0xf0] }
  0x80   :  { %v2427_v15 = vld [vmem:[%s3079_s5 + $0x38] sm:$0xff] }
  0x81   :  { %v630_v26 = vunpack.c.l.b16 %v501_v23  ;;  %v529_v27 = vunpack.c.l.b16 %v487_v24  ;;  %279 = vmatpush.bf16.msra.mxu1 %v1826_v21  ;;  %v2433_v21 = vld [vmem:[%s3079_s5 + $0x30] sm:$0xff] }
  0x83   :  { %v643_v28 = vpack.c.b16 %v630_v26, %v629_v22  ;;  %v542_v29 = vpack.c.b16 %v529_v27, %v528_v25 }
  0x84   :  { %v371_v30 = vpop.permute.xlu1 %370  ;;  %v368_v31 = vpop.permute.xlu0 %367 }
  0x85   :  { %vm419_vm7 = vcmp.eq.s32.totalorder %v2300_v9, %v371_v30  ;;  %vm418_vm8 = vcmp.eq.s32.totalorder %v2300_v9, %v368_v31  ;;  %1871 = vmatmul.msk.bf16.vlgmr.msra.gmra.mxu3 %vm549_vm4, %v542_v29  ;;  %1878 = vmatmul.msk.bf16.vlgmr.msrb.gmra.mxu0 %vm549_vm4, %v643_v28 }
  0x86   :  { %v1860_v35 = vsel %vm419_vm7, 1.0, %v2078_v12  ;;  %v1859_v36 = vsel %vm418_vm8, 1.0, %v2078_v12  ;;  %v2332_v57 = vpop.permute.xlu2 %352 }
  0x87   :  { %v503_v39 = vpack.c.bf16 %v1860_v35, %v1860_v35  ;;  %v502_v40 = vpack.c.bf16 %v1859_v36, %v1859_v36  ;;  %v2028_v36 = vld [vmem:[%s3076_s3 + $0x7c] sm:$0xf]  ;;  %vm413_vm6 = vcmp.eq.s32.totalorder %v2300_v9, %v2332_v57  ;;  %v1763_v57 = vld [vmem:[%s3076_s3 + $0x24] sm:$0xf0] }
  0x89   :  { %v632_v45 = vunpack.c.l.b16 %v503_v39  ;;  %v631_v46 = vunpack.c.l.b16 %v502_v40  ;;  %v1814_v39 = vor.u32 %v2028_v36, %v1811_v37  ;;  %v1799_v40 = vld [vmem:[%s3076_s3 + $0x6c] sm:$0xf0] }
  0x8b   :  { %v644_v49 = vpack.c.b16 %v632_v45, %v631_v46  ;;  %280 = vmatpush.bf16.msra.mxu1 %v1814_v39  ;;  %v1802_v45 = vor.u32 %v2025_v38, %v1799_v40  ;;  %v2022_v46 = vld [vmem:[%s3076_s3 + $0x4c] sm:$0xf] }
  0x8c   :  { %v374_v41 = vpop.permute.xlu1 %373  ;;  %v335_v42 = vpop.permute.xlu0 %334  ;;  %v1790_v52 = vor.u32 %v2022_v46, %v1787_v47  ;;  %v2483_v46 = vld [vmem:[%s3079_s5 + $0x8] sm:$0xff] }
  0x8d   :  { %vm420_vm10 = vcmp.eq.s32.totalorder %v2300_v9, %v374_v41  ;;  %vm407_vm12 = vcmp.eq.s32.totalorder %v2300_v9, %v335_v42  ;;  %v1851_v41 = vsel %vm410_vm1, 1.0, %v2078_v12 }
  0x8e   :  { %v1861_v53 = vsel %vm420_vm10, 1.0, %v2078_v12  ;;  %v1848_v56 = vsel %vm407_vm12, 1.0, %v2078_v12  ;;  %v380_v7 = vpop.permute.xlu2 %379 }
  0x8f   :  { %v504_v59 = vpack.c.bf16 %v1861_v53, %v1861_v53  ;;  %v491_v61 = vpack.c.bf16 %v1848_v56, %v1848_v56  ;;  %vm422_vm15 = vcmp.eq.s32.totalorder %v2300_v9, %v380_v7  ;;  %281 = vmatpush.bf16.msra.mxu1 %v1802_v45  ;;  %v2019_v53 = vld [vmem:[%s3076_s3 + $0x34] sm:$0xf]  ;;  %v1854_v7 = vsel %vm413_vm6, 1.0, %v2078_v12 }
  0x90   :  { %v1863_v20 = vsel %vm422_vm15, 1.0, %v2078_v12  ;;  %v2477_v45 = vld [vmem:[%s3079_s5 + $0x10] sm:$0xff] }
  0x91   :  { %v633_v1 = vunpack.c.l.b16 %v504_v59  ;;  %v533_v3 = vunpack.c.l.b16 %v491_v61  ;;  %v506_v24 = vpack.c.bf16 %v1863_v20, %v1863_v20  ;;  %v1778_v61 = vor.u32 %v2019_v53, %v1775_v55 }
  0x93   :  { %v544_v4 = vpack.c.b16 %v533_v3, %v532_v0  ;;  %v645_v6 = vpack.c.b16 %v634_v2, %v633_v1  ;;  %v635_v29 = vunpack.c.l.b16 %v506_v24  ;;  %282 = vmatpush.bf16.msra.mxu1 %v1790_v52  ;;  %v2016_v3 = vld [vmem:[%s3076_s3 + $0x1c] sm:$0xf] }
  0x94   :  { %v341_v50 = vpop.permute.xlu1 %340  ;;  %v338_v51 = vpop.permute.xlu0 %337 }
  0x95   :  { %1872 = vmatmul.msk.bf16.gmra.mxu3 %vm549_vm4, %v543_v48  ;;  %1879 = vmatmul.msk.bf16.gmra.mxu0 %vm549_vm4, %v644_v49  ;;  %vm409_vm13 = vcmp.eq.s32.totalorder %v2300_v9, %v341_v50  ;;  %vm408_vm14 = vcmp.eq.s32.totalorder %v2300_v9, %v338_v51  ;;  %v494_v48 = vpack.c.bf16 %v1851_v41, %v1851_v41  ;;  %v2461_v41 = vld [vmem:[%s3079_s5 + $0x20] sm:$0xff] }
  0x96   :  { %v1850_v17 = vsel %vm409_vm13, 1.0, %v2078_v12  ;;  %v1849_v18 = vsel %vm408_vm14, 1.0, %v2078_v12  ;;  %v389_v33 = vpop.permute.xlu2 %388 }
  0x97   :  { %v493_v22 = vpack.c.bf16 %v1850_v17, %v1850_v17  ;;  %v492_v23 = vpack.c.bf16 %v1849_v18, %v1849_v18  ;;  %vm425_vm5 = vcmp.eq.s32.totalorder %v2300_v9, %v389_v33  ;;  %v536_v56 = vunpack.c.l.b16 %v494_v48  ;;  %283 = vmatpush.bf16.msra.mxu1 %v1778_v61  ;;  %v2491_v48 = vld [vmem:[%s3079_s5] sm:$0xff] }
  0x98   :  { %v1866_v44 = vsel %vm425_vm5, 1.0, %v2078_v12  ;;  %v497_v17 = vpack.c.bf16 %v1854_v7, %v1854_v7 }
  0x99   :  { %v535_v27 = vunpack.c.l.b16 %v493_v22  ;;  %v534_v28 = vunpack.c.l.b16 %v492_v23  ;;  %v509_v51 = vpack.c.bf16 %v1866_v44, %v1866_v44  ;;  %v2471_v44 = vld [vmem:[%s3079_s5 + $0x18] sm:$0xff] }
  0x9a   :  { %v539_v23 = vunpack.c.l.b16 %v497_v17  ;;  %v2036_v17 = vld [vmem:[%s3076_s3 + $0xb8] sm:$0xf0] }
  0x9b   :  { %v545_v34 = vpack.c.b16 %v535_v27, %v534_v28  ;;  %v638_v60 = vunpack.c.l.b16 %v509_v51  ;;  %v2440_v28 = vld [vmem:[%s3079_s5 + $0x28] sm:$0xff] }
  0x9c   :  { %v347_v62 = vpop.permute.xlu0 %346  ;;  %v2334_v63 = vpop.permute.xlu1 %349 }
  0x9d   :  { %vm411_vm2 = vcmp.eq.s32.totalorder %v2300_v9, %v347_v62  ;;  %vm412_vm7 = vcmp.eq.s32.totalorder %v2300_v9, %v2334_v63  ;;  %v2013_v63 = vld [vmem:[%s3076_s3 + $0x4] sm:$0xf] }
  0x9e   :  { %v1852_v42 = vsel %vm411_vm2, 1.0, %v2078_v12  ;;  %v1853_v10 = vsel %vm412_vm7, 1.0, %v2078_v12 }
  0x9f   :  { %v495_v49 = vpack.c.bf16 %v1852_v42, %v1852_v42  ;;  %v496_v16 = vpack.c.bf16 %v1853_v10, %v1853_v10 }
  0xa1   :  { %v537_v58 = vunpack.c.l.b16 %v495_v49  ;;  %v538_v22 = vunpack.c.l.b16 %v496_v16  ;;  %v1841_v16 = vld [vmem:[%s3076_s3 + $0xb0] sm:$0xf] }
  0xa3   :  { %v546_v1 = vpack.c.b16 %v537_v58, %v536_v56 }
  0xa4   :  { %v2336_v8 = vpop.permute.xlu0 %355  ;;  %v2360_v19 = vpop.permute.xlu1 %358 }
  0xa5   :  { %1873 = vmatmul.msk.bf16.gmra.mxu3 %vm549_vm4, %v544_v4  ;;  %1880 = vmatmul.msk.bf16.gmra.mxu0 %vm549_vm4, %v645_v6  ;;  %v1766_v4 = vor.u32 %v2016_v3, %v1763_v57  ;;  %v1751_v6 = vld [vmem:[%s3076_s3 + $0xc] sm:$0xf0]  ;;  %vm415_vm11 = vcmp.eq.s32.totalorder %v2300_v9, %v2360_v19  ;;  %vm414_vm12 = vcmp.eq.s32.totalorder %v2300_v9, %v2336_v8  ;;  %v2455_v19 = vpop.f32.mrf.mxu0 }
  0xa6   :  { %v1754_v14 = vor.u32 %v2013_v63, %v1751_v6 }
  0xa7   :  { %284 = vmatpush.bf16.msra.mxu1 %v1766_v4 }
  0xab   :  { %285 = vmatpush.bf16.msra.mxu1 %v1754_v14 }
  0xac   :  { %v383_v25 = vpop.permute.xlu0 %382  ;;  %v386_v32 = vpop.permute.xlu1 %385 }
  0xad   :  { %vm423_vm0 = vcmp.eq.s32.totalorder %v2300_v9, %v383_v25  ;;  %vm424_vm3 = vcmp.eq.s32.totalorder %v2300_v9, %v386_v32  ;;  %v1855_v32 = vsel %vm414_vm12, 1.0, %v2078_v12 }
  0xae   :  { %v1864_v26 = vsel %vm423_vm0, 1.0, %v2078_v12  ;;  %v1865_v43 = vsel %vm424_vm3, 1.0, %v2078_v12  ;;  %286 = vmatmul.bf16.vlgmr.msra.gmra.mxu1 %v2265_v54  ;;  %v498_v8 = vpack.c.bf16 %v1855_v32, %v1855_v32  ;;  %v2027_v32 = vld [vmem:[%s3076_s3 + $0x70] sm:$0xf0] }
  0xaf   :  { %v507_v30 = vpack.c.bf16 %v1864_v26, %v1864_v26  ;;  %v508_v50 = vpack.c.bf16 %v1865_v43, %v1865_v43  ;;  %819 = vmatpush.bf16.msrb.mxu1 %v2427_v15  ;;  %v398_v26 = vpop.permute.xlu2 %397 }
  0xb0   :  { %vm428_vm10 = vcmp.eq.s32.totalorder %v2300_v9, %v398_v26  ;;  %v540_v38 = vunpack.c.l.b16 %v498_v8  ;;  %v1817_v26 = vld [vmem:[%s3076_s3 + $0x80] sm:$0xf]  ;;  %v1793_v8 = vld [vmem:[%s3076_s3 + $0x50] sm:$0xf] }
  0xb1   :  { %v636_v31 = vunpack.c.l.b16 %v507_v30  ;;  %v637_v59 = vunpack.c.l.b16 %v508_v50  ;;  %v1869_v33 = vsel %vm428_vm10, 1.0, %v2078_v12 }
  0xb2   :  { %v512_v36 = vpack.c.bf16 %v1869_v33, %v1869_v33 }
  0xb3   :  { %v646_v35 = vpack.c.b16 %v636_v31, %v635_v29  ;;  %v647_v2 = vpack.c.b16 %v638_v60, %v637_v59  ;;  %820 = vmatpush.bf16.msrb.mxu1 %v2433_v21  ;;  %v547_v29 = vpack.c.b16 %v539_v23, %v538_v22  ;;  %v1856_v31 = vsel %vm415_vm11, 1.0, %v2078_v12  ;;  %v1829_v22 = vld [vmem:[%s3076_s3 + $0x98] sm:$0xf]  ;;  %v2033_v23 = vld [vmem:[%s3076_s3 + $0xa0] sm:$0xf0] }
  0xb4   :  { %v395_v62 = vpop.permute.xlu1 %394  ;;  %v392_v0 = vpop.permute.xlu0 %391  ;;  %v641_v39 = vunpack.c.l.b16 %v512_v36  ;;  %v2024_v36 = vld [vmem:[%s3076_s3 + $0x58] sm:$0xf0] }
  0xb5   :  { %1874 = vmatmul.msk.bf16.gmra.mxu3 %vm549_vm4, %v545_v34  ;;  %1881 = vmatmul.msk.bf16.gmra.mxu0 %vm549_vm4, %v646_v35  ;;  %vm427_vm8 = vcmp.eq.s32.totalorder %v2300_v9, %v395_v62  ;;  %vm426_vm9 = vcmp.eq.s32.totalorder %v2300_v9, %v392_v0  ;;  %v499_v35 = vpack.c.bf16 %v1856_v31, %v1856_v31  ;;  %v1805_v31 = vld [vmem:[%s3076_s3 + $0x68] sm:$0xf] }
  0xb6   :  { %v1868_v11 = vsel %vm427_vm8, 1.0, %v2078_v12  ;;  %v1867_v13 = vsel %vm426_vm9, 1.0, %v2078_v12  ;;  %v1806_v33 = vor.u32 %v2027_v32, %v1805_v31 }
  0xb7   :  { %v511_v18 = vpack.c.bf16 %v1868_v11, %v1868_v11  ;;  %v510_v20 = vpack.c.bf16 %v1867_v13, %v1867_v13  ;;  %821 = vmatpush.bf16.msrb.mxu1 %v2440_v28  ;;  %v541_v37 = vunpack.c.l.b16 %v499_v35 }
  0xb9   :  { %v640_v24 = vunpack.c.l.b16 %v511_v18  ;;  %v639_v25 = vunpack.c.l.b16 %v510_v20  ;;  %v548_v42 = vpack.c.b16 %v541_v37, %v540_v38  ;;  %v1842_v20 = vor.u32 %v2036_v17, %v1841_v16 }
  0xba   :  { %v1794_v37 = vor.u32 %v2024_v36, %v1793_v8  ;;  %v2637_v8 = vld [vmem:[%s3080_s6 + $0x10] sm:$0xff] }
  0xbb   :  { %v648_v30 = vpack.c.b16 %v640_v24, %v639_v25  ;;  %822 = vmatpush.bf16.msrb.mxu1 %v2461_v41  ;;  %297 = vmatpush.bf16.msra.mxu2 %v1842_v20  ;;  %v1830_v24 = vor.u32 %v2033_v23, %v1829_v22  ;;  %v2602_v23 = vld [vmem:[%s3080_s6 + $0x28] sm:$0xff] }
  0xbc   :  { %v401_v27 = vpop.permute.xlu0 %400 }
  0xbd   :  { %vm429_vm13 = vcmp.eq.s32.totalorder %v2300_v9, %v401_v27  ;;  %v2030_v27 = vld [vmem:[%s3076_s3 + $0x88] sm:$0xf0] }
  0xbe   :  { %v1870_v34 = vsel %vm429_vm13, 1.0, %v2078_v12  ;;  %291 = vmatmul.bf16.gmra.mxu1 %v2296_v5  ;;  %v2463_v12 = vpop.f32.mrf.mxu0 }
  0xbf   :  { %v513_v9 = vpack.c.bf16 %v1870_v34, %v1870_v34  ;;  %823 = vmatpush.bf16.msrb.mxu1 %v2471_v44  ;;  %298 = vmatpush.bf16.msra.mxu2 %v1830_v24 }
  0xc1   :  { %v642_v40 = vunpack.c.l.b16 %v513_v9 }
  0xc3   :  { %v649_v43 = vpack.c.b16 %v642_v40, %v641_v39  ;;  %824 = vmatpush.bf16.msrb.mxu1 %v2477_v45 }
  0xc5   :  { %1875 = vmatmul.msk.bf16.gmra.mxu3 %vm549_vm4, %v546_v1  ;;  %1882 = vmatmul.msk.bf16.gmra.mxu0 %vm549_vm4, %v647_v2 }
  0xc6   :  { %v2485_v47 = vpop.f32.mrf.mxu0 }
  0xc7   :  { %825 = vmatpush.bf16.msrb.mxu1 %v2483_v46 }
  0xcb   :  { %826 = vmatpush.bf16.msrb.mxu1 %v2491_v48 }
  0xce   :  { %v2494_v49 = vpop.f32.mrf.mxu0 }
  0xd5   :  { %1876 = vmatmul.msk.bf16.gmra.mxu3 %vm549_vm4, %v547_v29  ;;  %1883 = vmatmul.msk.bf16.gmra.mxu0 %vm549_vm4, %v648_v30  ;;  %v1818_v30 = vor.u32 %v2030_v27, %v1817_v26 }
  0xd7   :  { %299 = vmatpush.bf16.msra.mxu2 %v1818_v30 }
  0xdb   :  { %300 = vmatpush.bf16.msra.mxu2 %v1806_v33  ;;  %v2626_v33 = vld [vmem:[%s3080_s6 + $0x18] sm:$0xff] }
  0xdf   :  { %301 = vmatpush.bf16.msra.mxu2 %v1794_v37 }
  0xe5   :  { %1877 = vmatmul.msk.bf16.gmra.mxu3 %vm549_vm4, %v548_v42  ;;  %1884 = vmatmul.msk.bf16.gmra.mxu0 %vm549_vm4, %v649_v43  ;;  %v1781_v42 = vld [vmem:[%s3076_s3 + $0x38] sm:$0xf]  ;;  %v2021_v43 = vld [vmem:[%s3076_s3 + $0x40] sm:$0xf0] }
 0x102   :  { %v680_v50 = vpop.f32.mrf.mxu0 }
 0x103   :  { %v729_v1 = vpack.c.bf16 %v680_v50, %v680_v50  ;;  %v1782_v50 = vor.u32 %v2021_v43, %v1781_v42  ;;  %v111_v42 = vld [vmem:[%s3081_s4] sm:$0x7] }
 0x105   :  { %v765_v57 = vunpack.c.l.b16 %v729_v1  ;;  %302 = vmatpush.bf16.msra.mxu2 %v1782_v50  ;;  %v2581_v1 = vld [vmem:[%s3080_s6 + $0x38] sm:$0xff]  ;;  %v113_v50 = vperm.slane %v111_v42, 0 }
 0x106   :  { %1077 = vmatpush.bf16.msrb.mxu3 %v2581_v1  ;;  %1263 = vmatpush.bf16.msra.mxu0 %v2581_v1 }
 0x108   :  { %v580_v51 = vpop.f32.mrf.mxu3 }
 0x109   :  { %v715_v53 = vpack.c.bf16 %v580_v51, %v580_v51 }
 0x10a   :  { %v682_v52 = vpop.f32.mrf.mxu0 }
 0x10b   :  { %v763_v59 = vunpack.c.l.b16 %v715_v53  ;;  %v730_v2 = vpack.c.bf16 %v682_v52, %v682_v52  ;;  %v1769_v53 = vld [vmem:[%s3076_s3 + $0x20] sm:$0xf] }
 0x10d   :  { %v766_v63 = vunpack.c.l.b16 %v730_v2 }
 0x10f   :  { %v768_v6 = vpack.c.b16 %v766_v63, %v765_v57 }
 0x110   :  { %v582_v55 = vpop.f32.mrf.mxu3 }
 0x111   :  { %v716_v56 = vpack.c.bf16 %v582_v55, %v582_v55  ;;  %v2018_v55 = vld [vmem:[%s3076_s3 + $0x28] sm:$0xf0] }
 0x112   :  { %v2496_v58 = vpop.f32.mrf.mxu0 }
 0x113   :  { %v764_v60 = vunpack.c.l.b16 %v716_v56 }
 0x115   :  { %v767_v61 = vpack.c.b16 %v764_v60, %v763_v59  ;;  %v1770_v59 = vor.u32 %v2018_v55, %v1769_v53  ;;  %v1757_v60 = vld [vmem:[%s3076_s3 + $0x8] sm:$0xf]  ;;  %v2680_v53 = vadd.f32 %v2455_v19, %v113_v50  ;;  %v2685_v55 = vadd.f32 %v2463_v12, %v113_v50 }
 0x116   :  { %v2694_v12 = vadd.f32 %v2485_v47, %v113_v50 }
 0x117   :  { %827 = vmatmul.bf16.vlgmr.msrb.gmra.mxu1 %v767_v61  ;;  %303 = vmatpush.bf16.msra.mxu2 %v1770_v59  ;;  %v2015_v61 = vld [vmem:[%s3076_s3 + $0x10] sm:$0xf0] }
 0x118   :  { %v2498_v62 = vpop.f32.mrf.mxu3  ;;  %v1758_v2 = vor.u32 %v2015_v61, %v1757_v60 }
 0x119   :  { %v717_v47 = vpack.c.bf16 %v2498_v62, %v2498_v62  ;;  %v731_v62 = vpack.c.bf16 %v2496_v58, %v2496_v58 }
 0x11a   :  { %v2500_v0 = vpop.f32.mrf.mxu0 }
 0x11b   :  { %304 = vmatpush.bf16.msra.mxu2 %v1758_v2 }
 0x11e   :  { %305 = vmatmul.bf16.vlgmr.msra.gmra.mxu2 %v2265_v54 }
 0x11f   :  { %916 = vmatpush.bf16.msrb.mxu2 %v2581_v1 }
 0x120   :  { %v2502_v3 = vpop.f32.mrf.mxu3 }
 0x122   :  { %v2504_v4 = vpop.f32.mrf.mxu0 }
 0x127   :  { %832 = vmatmul.bf16.gmra.mxu1 %v768_v6  ;;  %v2589_v6 = vld [vmem:[%s3080_s6 + $0x30] sm:$0xff] }
 0x128   :  { %v2506_v7 = vpop.f32.mrf.mxu3  ;;  %1078 = vmatpush.bf16.msrb.mxu3 %v2589_v6  ;;  %1264 = vmatpush.bf16.msra.mxu0 %v2589_v6 }
 0x129   :  { %917 = vmatpush.bf16.msrb.mxu2 %v2589_v6 }
 0x12a   :  { %v2508_v10 = vpop.f32.mrf.mxu0 }
 0x12c   :  { %1079 = vmatpush.bf16.msrb.mxu3 %v2602_v23  ;;  %1265 = vmatpush.bf16.msra.mxu0 %v2602_v23 }
 0x12d   :  { %918 = vmatpush.bf16.msrb.mxu2 %v2602_v23 }
 0x12e   :  { %310 = vmatmul.bf16.gmra.mxu2 %v2296_v5  ;;  %v2655_v5 = vld [vmem:[%s3080_s6] sm:$0xff] }
 0x130   :  { %v2510_v11 = vpop.f32.mrf.mxu3 }
 0x132   :  { %v2512_v13 = vpop.f32.mrf.mxu0 }
 0x138   :  { %v2514_v14 = vpop.f32.mrf.mxu3 }
 0x13a   :  { %v2522_v18 = vpop.f32.mrf.mxu0 }
 0x140   :  { %v2530_v25 = vpop.f32.mrf.mxu3 }
 0x142   :  { %v700_v29 = vpop.f32.mrf.mxu0 }
 0x143   :  { %v737_v35 = vpack.c.bf16 %v700_v29, %v700_v29  ;;  %v2612_v29 = vld [vmem:[%s3080_s6 + $0x20] sm:$0xff] }
 0x144   :  { %1080 = vmatpush.bf16.msrb.mxu3 %v2612_v29  ;;  %1266 = vmatpush.bf16.msra.mxu0 %v2612_v29 }
 0x145   :  { %v2552_v39 = vunpack.c.l.b16 %v737_v35  ;;  %919 = vmatpush.bf16.msrb.mxu2 %v2612_v29  ;;  %v2632_v35 = vpop.f32.mrf.mxu1 }
 0x148   :  { %v2544_v34 = vpop.f32.mrf.mxu3  ;;  %1081 = vmatpush.bf16.msrb.mxu3 %v2626_v33  ;;  %1267 = vmatpush.bf16.msra.mxu0 %v2626_v33 }
 0x149   :  { %920 = vmatpush.bf16.msrb.mxu2 %v2626_v33 }
 0x14a   :  { %v702_v9 = vpop.f32.mrf.mxu0 }
 0x14b   :  { %v738_v38 = vpack.c.bf16 %v702_v9, %v702_v9  ;;  %v2645_v9 = vld [vmem:[%s3080_s6 + $0x8] sm:$0xff] }
 0x14c   :  { %1082 = vmatpush.bf16.msrb.mxu3 %v2637_v8  ;;  %1268 = vmatpush.bf16.msra.mxu0 %v2637_v8 }
 0x14d   :  { %v2554_v40 = vunpack.c.l.b16 %v738_v38  ;;  %v2639_v36 = vpop.f32.mrf.mxu1  ;;  %921 = vmatpush.bf16.msrb.mxu2 %v2637_v8 }
 0x14f   :  { %v1324_v51 = vpack.c.b16 %v2554_v40, %v2552_v39 }
 0x150   :  { %v2564_v52 = vpop.f32.mrf.mxu3  ;;  %1083 = vmatpush.bf16.msrb.mxu3 %v2645_v9  ;;  %1269 = vmatpush.bf16.msra.mxu0 %v2645_v9 }
 0x151   :  { %922 = vmatpush.bf16.msrb.mxu2 %v2645_v9 }
 0x152   :  { %v705_v56 = vpop.f32.mrf.mxu0 }
 0x153   :  { %v739_v63 = vpack.c.bf16 %v705_v56, %v705_v56 }
 0x154   :  { %1084 = vmatpush.bf16.msrb.mxu3 %v2655_v5  ;;  %1270 = vmatpush.bf16.msra.mxu0 %v2655_v5 }
 0x155   :  { %v2594_v20 = vunpack.c.l.b16 %v739_v63  ;;  %923 = vmatpush.bf16.msrb.mxu2 %v2655_v5  ;;  %v2661_v37 = vpop.f32.mrf.mxu1  ;;  %v2697_v63 = vadd.f32 %v2494_v49, %v113_v50  ;;  %v718_v49 = vpack.c.bf16 %v2502_v3, %v2502_v3 }
 0x157   :  { %v1041_v50 = vunpack.c.l.b16 %v718_v49 }
 0x158   :  { %v605_v57 = vpop.f32.mrf.mxu3  ;;  %1170 = vmatpush.bf16.msra.mxu3 %v2581_v1 }
 0x159   :  { %v725_v24 = vpack.c.bf16 %v605_v57, %v605_v57  ;;  %1048 = vmatpush.bf16.msra.mxu2 %v2427_v15 }
 0x15a   :  { %v707_v16 = vpop.f32.mrf.mxu0 }
 0x15b   :  { %v740_v17 = vpack.c.bf16 %v707_v16, %v707_v16  ;;  %v2614_v30 = vunpack.c.l.b16 %v725_v24 }
 0x15c   :  { %1171 = vmatpush.bf16.msra.mxu3 %v2589_v6 }
 0x15d   :  { %v2596_v22 = vunpack.c.l.b16 %v740_v17  ;;  %1049 = vmatpush.bf16.msra.mxu2 %v2433_v21  ;;  %v2668_v38 = vpop.f32.mrf.mxu1 }
 0x15f   :  { %v1417_v26 = vpack.c.b16 %v2596_v22, %v2594_v20 }
 0x160   :  { %v607_v54 = vpop.f32.mrf.mxu3  ;;  %1172 = vmatpush.bf16.msra.mxu3 %v2602_v23 }
 0x161   :  { %v726_v27 = vpack.c.bf16 %v607_v54, %v607_v54  ;;  %1050 = vmatpush.bf16.msra.mxu2 %v2440_v28 }
 0x163   :  { %v2616_v31 = vunpack.c.l.b16 %v726_v27 }
 0x164   :  { %1173 = vmatpush.bf16.msra.mxu3 %v2612_v29 }
 0x165   :  { %v1416_v32 = vpack.c.b16 %v2616_v31, %v2614_v30  ;;  %1051 = vmatpush.bf16.msra.mxu2 %v2461_v41 }
 0x168   :  { %1174 = vmatpush.bf16.msra.mxu3 %v2626_v33 }
 0x169   :  { %1052 = vmatpush.bf16.msra.mxu2 %v2471_v44 }
 0x16c   :  { %1175 = vmatpush.bf16.msra.mxu3 %v2637_v8 }
 0x16d   :  { %1053 = vmatpush.bf16.msra.mxu2 %v2477_v45 }
 0x170   :  { %1176 = vmatpush.bf16.msra.mxu3 %v2645_v9 }
 0x171   :  { %1054 = vmatpush.bf16.msra.mxu2 %v2483_v46 }
 0x174   :  { %1177 = vmatpush.bf16.msra.mxu3 %v2655_v5 }
 0x175   :  { %1055 = vmatpush.bf16.msra.mxu2 %v2491_v48 }
 0x194   :  { %v828_v43 = vpop.f32.mrf.mxu1 }
 0x195   :  { %v838_v56 = vadd.f32 %v828_v43, %v2680_v53  ;;  %v1040_v43 = vunpack.c.l.b16 %v717_v47 }
 0x197   :  { %v842_v61 = vmax.f32 %v838_v56, 0.0  ;;  %v1044_v56 = vpack.c.b16 %v1041_v50, %v1040_v43 }
 0x19c   :  { %v830_v59 = vpop.f32.mrf.mxu1 }
 0x19d   :  { %v839_v60 = vadd.f32 %v830_v59, %v2685_v55  ;;  %v732_v59 = vpack.c.bf16 %v2500_v0, %v2500_v0  ;;  %v719_v0 = vpack.c.bf16 %v2506_v7, %v2506_v7 }
 0x19f   :  { %v843_v2 = vmax.f32 %v839_v60, 0.0  ;;  %v1043_v3 = vunpack.c.l.b16 %v732_v59  ;;  %v1042_v60 = vunpack.c.l.b16 %v731_v62  ;;  %v736_v59 = vpack.c.bf16 %v2522_v18, %v2522_v18 }
 0x1a1   :  { %v846_v19 = vpack.c.bf16 %v843_v2, %v842_v61  ;;  %v1045_v61 = vpack.c.b16 %v1043_v3, %v1042_v60  ;;  %v720_v2 = vpack.c.bf16 %v2510_v11, %v2510_v11  ;;  %v733_v11 = vpack.c.bf16 %v2504_v4, %v2504_v4  ;;  %v2745_v4 = vld [vmem:[%s3083_s8 + $0x30] sm:$0xff]  ;;  %v2768_v43 = vpop.f32.mrf.mxu2  ;;  %v2798_v60 = vld [vmem:[%s3083_s8 + $0x8] sm:$0xff] }
 0x1a2   :  { %v735_v3 = vpack.c.bf16 %v2512_v13, %v2512_v13 }
 0x1a3   :  { %924 = vmatmul.bf16.vlgmr.msrb.gmra.mxu2 %v846_v19  ;;  %v1134_v58 = vunpack.c.l.b16 %v720_v2  ;;  %v1133_v19 = vunpack.c.l.b16 %v719_v0  ;;  %v2806_v2 = vld [vmem:[%s3083_s8] sm:$0xff] }
 0x1a4   :  { %v833_v57 = vpop.f32.mrf.mxu1  ;;  %1141 = vmatpush.bf16.msrb.mxu2 %v2427_v15  ;;  %v1228_v18 = vunpack.c.l.b16 %v735_v3 }
 0x1a5   :  { %v840_v16 = vadd.f32 %v833_v57, %v2694_v12  ;;  %v1137_v57 = vpack.c.b16 %v1134_v58, %v1133_v19 }
 0x1a7   :  { %v844_v54 = vmax.f32 %v840_v16, 0.0  ;;  %v734_v16 = vpack.c.bf16 %v2508_v10, %v2508_v10  ;;  %v722_v10 = vpack.c.bf16 %v2530_v25, %v2530_v25  ;;  %v2765_v25 = vld [vmem:[%s3083_s8 + $0x20] sm:$0xff] }
 0x1a8   :  { %1142 = vmatpush.bf16.msrb.mxu2 %v2433_v21 }
 0x1a9   :  { %v1136_v7 = vunpack.c.l.b16 %v734_v16  ;;  %v1227_v47 = vunpack.c.l.b16 %v722_v10  ;;  %v2789_v62 = vpop.f32.mrf.mxu2 }
 0x1ac   :  { %v835_v17 = vpop.f32.mrf.mxu1  ;;  %1143 = vmatpush.bf16.msrb.mxu2 %v2440_v28 }
 0x1ad   :  { %v841_v24 = vadd.f32 %v835_v17, %v2697_v63  ;;  %v1135_v17 = vunpack.c.l.b16 %v733_v11 }
 0x1af   :  { %v845_v27 = vmax.f32 %v841_v24, 0.0  ;;  %v1138_v24 = vpack.c.b16 %v1136_v7, %v1135_v17 }
 0x1b0   :  { %1144 = vmatpush.bf16.msrb.mxu2 %v2461_v41 }
 0x1b1   :  { %v847_v42 = vpack.c.bf16 %v845_v27, %v844_v54  ;;  %v2738_v54 = vld [vmem:[%s3083_s8 + $0x38] sm:$0xff]  ;;  %v2755_v27 = vld [vmem:[%s3083_s8 + $0x28] sm:$0xff]  ;;  %v2812_v0 = vpop.f32.mrf.mxu2 }
 0x1b2   :  { %1009 = vmatpush.bf16.msra.mxu1 %v2738_v54  ;;  %1381 = vmatpush.bf16.msrb.mxu0 %v2738_v54 }
 0x1b3   :  { %929 = vmatmul.bf16.gmra.mxu2 %v847_v42  ;;  %v721_v42 = vpack.c.bf16 %v2514_v14, %v2514_v14  ;;  %v2776_v14 = vld [vmem:[%s3083_s8 + $0x18] sm:$0xff] }
 0x1b4   :  { %1145 = vmatpush.bf16.msrb.mxu2 %v2471_v44 }
 0x1b5   :  { %v1226_v49 = vunpack.c.l.b16 %v721_v42 }
 0x1b6   :  { %1010 = vmatpush.bf16.msra.mxu1 %v2745_v4  ;;  %1382 = vmatpush.bf16.msrb.mxu0 %v2745_v4 }
 0x1b7   :  { %v1230_v50 = vpack.c.b16 %v1227_v47, %v1226_v49 }
 0x1b8   :  { %1146 = vmatpush.bf16.msrb.mxu2 %v2477_v45 }
 0x1b9   :  { %v2819_v58 = vpop.f32.mrf.mxu2 }
 0x1ba   :  { %1011 = vmatpush.bf16.msra.mxu1 %v2755_v27  ;;  %1383 = vmatpush.bf16.msrb.mxu0 %v2755_v27 }
 0x1bc   :  { %1147 = vmatpush.bf16.msrb.mxu2 %v2483_v46 }
 0x1be   :  { %1012 = vmatpush.bf16.msra.mxu1 %v2765_v25  ;;  %1384 = vmatpush.bf16.msrb.mxu0 %v2765_v25 }
 0x1c0   :  { %1148 = vmatpush.bf16.msrb.mxu2 %v2491_v48 }
 0x1c2   :  { %1013 = vmatpush.bf16.msra.mxu1 %v2776_v14  ;;  %1385 = vmatpush.bf16.msrb.mxu0 %v2776_v14 }
 0x1c3   :  { %1056 = vmatmul.bf16.vlgmr.msra.gmra.mxu2 %v1044_v56  ;;  %v2784_v56 = vld [vmem:[%s3083_s8 + $0x10] sm:$0xff] }
 0x1c4   :  { %1234 = vmatpush.bf16.msra.mxu2 %v2427_v15 }
 0x1c6   :  { %1014 = vmatpush.bf16.msra.mxu1 %v2784_v56  ;;  %1386 = vmatpush.bf16.msrb.mxu0 %v2784_v56 }
 0x1c8   :  { %1235 = vmatpush.bf16.msra.mxu2 %v2433_v21 }
 0x1ca   :  { %1015 = vmatpush.bf16.msra.mxu1 %v2798_v60  ;;  %1387 = vmatpush.bf16.msrb.mxu0 %v2798_v60 }
 0x1cc   :  { %1236 = vmatpush.bf16.msra.mxu2 %v2440_v28 }
 0x1ce   :  { %1016 = vmatpush.bf16.msra.mxu1 %v2806_v2  ;;  %1388 = vmatpush.bf16.msrb.mxu0 %v2806_v2 }
 0x1d0   :  { %1237 = vmatpush.bf16.msra.mxu2 %v2461_v41 }
 0x1d2   :  { %1102 = vmatpush.bf16.msrb.mxu1 %v2738_v54 }
 0x1d3   :  { %1061 = vmatmul.bf16.gmra.mxu2 %v1045_v61  ;;  %v1229_v61 = vunpack.c.l.b16 %v736_v59 }
 0x1d4   :  { %1238 = vmatpush.bf16.msra.mxu2 %v2471_v44 }
 0x1d5   :  { %v1231_v13 = vpack.c.b16 %v1229_v61, %v1228_v18 }
 0x1d6   :  { %1103 = vmatpush.bf16.msrb.mxu1 %v2745_v4 }
 0x1d8   :  { %1239 = vmatpush.bf16.msra.mxu2 %v2477_v45 }
 0x1da   :  { %1104 = vmatpush.bf16.msrb.mxu1 %v2755_v27 }
 0x1dc   :  { %1240 = vmatpush.bf16.msra.mxu2 %v2483_v46 }
 0x1de   :  { %1105 = vmatpush.bf16.msrb.mxu1 %v2765_v25 }
 0x1e0   :  { %1241 = vmatpush.bf16.msra.mxu2 %v2491_v48 }
 0x1e2   :  { %1106 = vmatpush.bf16.msrb.mxu1 %v2776_v14 }
 0x1e3   :  { %1149 = vmatmul.bf16.vlgmr.msrb.gmra.mxu2 %v1137_v57  ;;  %v2828_v57 = vld [vmem:[%s3082_s7] ss:$0 sm:$0xff] }
 0x1e4   :  { %1356 = vmatpush.bf16.msrb.mxu2 %v2581_v1 }
 0x1e6   :  { %1107 = vmatpush.bf16.msrb.mxu1 %v2784_v56 }
 0x1e8   :  { %1357 = vmatpush.bf16.msrb.mxu2 %v2589_v6 }
 0x1ea   :  { %1108 = vmatpush.bf16.msrb.mxu1 %v2798_v60 }
 0x1ec   :  { %1358 = vmatpush.bf16.msrb.mxu2 %v2602_v23 }
 0x1ee   :  { %1109 = vmatpush.bf16.msrb.mxu1 %v2806_v2 }
 0x1f0   :  { %1359 = vmatpush.bf16.msrb.mxu2 %v2612_v29 }
 0x1f3   :  { %1154 = vmatmul.bf16.gmra.mxu2 %v1138_v24 }
 0x1f4   :  { %1360 = vmatpush.bf16.msrb.mxu2 %v2626_v33 }
 0x1f8   :  { %1361 = vmatpush.bf16.msrb.mxu2 %v2637_v8 }
 0x1fc   :  { %1362 = vmatpush.bf16.msrb.mxu2 %v2645_v9 }
 0x200   :  { %1363 = vmatpush.bf16.msrb.mxu2 %v2655_v5 }
 0x203   :  { %1242 = vmatmul.bf16.vlgmr.msra.gmra.mxu2 %v1230_v50 }
 0x204   :  { %1474 = vmatpush.bf16.msra.mxu2 %v2738_v54 }
 0x208   :  { %1475 = vmatpush.bf16.msra.mxu2 %v2745_v4 }
 0x20c   :  { %1476 = vmatpush.bf16.msra.mxu2 %v2755_v27 }
 0x210   :  { %1477 = vmatpush.bf16.msra.mxu2 %v2765_v25 }
 0x213   :  { %1247 = vmatmul.bf16.gmra.mxu2 %v1231_v13 }
 0x214   :  { %1478 = vmatpush.bf16.msra.mxu2 %v2776_v14 }
 0x218   :  { %1479 = vmatpush.bf16.msra.mxu2 %v2784_v56 }
 0x21c   :  { %1480 = vmatpush.bf16.msra.mxu2 %v2798_v60 }
 0x220   :  { %1481 = vmatpush.bf16.msra.mxu2 %v2806_v2 }
 0x226   :  { %v925_v19 = vpop.f32.mrf.mxu2 }
 0x227   :  { %v926_v16 = vadd.f32 %v2828_v57, %v925_v19 }
 0x229   :  { %v935_v17 = vmax.f32 %v926_v16, 0.0 }
 0x22e   :  { %v927_v11 = vpop.f32.mrf.mxu2 }
 0x22f   :  { %v928_v7 = vadd.f32 %v2828_v57, %v927_v11 }
 0x231   :  { %v936_v24 = vmax.f32 %v928_v7, 0.0 }
 0x233   :  { %v939_v10 = vpack.c.bf16 %v936_v24, %v935_v17 }
 0x235   :  { %1017 = vmatmul.bf16.vlgmr.msra.gmra.mxu1 %v939_v10 }
 0x236   :  { %v930_v42 = vpop.f32.mrf.mxu2  ;;  %1195 = vmatpush.bf16.msra.mxu1 %v2738_v54 }
 0x237   :  { %v931_v47 = vadd.f32 %v2828_v57, %v930_v42 }
 0x239   :  { %v937_v59 = vmax.f32 %v931_v47, 0.0 }
 0x23a   :  { %1196 = vmatpush.bf16.msra.mxu1 %v2745_v4 }
 0x23e   :  { %v932_v49 = vpop.f32.mrf.mxu2  ;;  %1197 = vmatpush.bf16.msra.mxu1 %v2755_v27 }
 0x23f   :  { %v933_v50 = vadd.f32 %v2828_v57, %v932_v49 }
 0x241   :  { %v938_v3 = vmax.f32 %v933_v50, 0.0 }
 0x242   :  { %1198 = vmatpush.bf16.msra.mxu1 %v2765_v25 }
 0x243   :  { %v940_v61 = vpack.c.bf16 %v938_v3, %v937_v59 }
 0x245   :  { %1022 = vmatmul.bf16.gmra.mxu1 %v940_v61 }
 0x246   :  { %v1057_v18 = vpop.f32.mrf.mxu2  ;;  %1199 = vmatpush.bf16.msra.mxu1 %v2776_v14 }
 0x247   :  { %v1067_v13 = vadd.f32 %v1057_v18, %v2680_v53 }
 0x249   :  { %v1071_v11 = vmax.f32 %v1067_v13, 0.0 }
 0x24a   :  { %1200 = vmatpush.bf16.msra.mxu1 %v2784_v56 }
 0x24e   :  { %v1059_v19 = vpop.f32.mrf.mxu2  ;;  %1201 = vmatpush.bf16.msra.mxu1 %v2798_v60 }
 0x24f   :  { %v1068_v16 = vadd.f32 %v1059_v19, %v2685_v55 }
 0x251   :  { %v1072_v7 = vmax.f32 %v1068_v16, 0.0 }
 0x252   :  { %1202 = vmatpush.bf16.msra.mxu1 %v2806_v2 }
 0x253   :  { %v1075_v17 = vpack.c.bf16 %v1072_v7, %v1071_v11 }
 0x255   :  { %1085 = vmatmul.bf16.vlgmr.msrb.gmra.mxu3 %v1075_v17 }
 0x256   :  { %v1062_v24 = vpop.f32.mrf.mxu2  ;;  %1288 = vmatpush.bf16.msrb.mxu3 %v2738_v54 }
 0x257   :  { %v1069_v10 = vadd.f32 %v1062_v24, %v2694_v12 }
 0x259   :  { %v1073_v49 = vmax.f32 %v1069_v10, 0.0 }
 0x25a   :  { %1289 = vmatpush.bf16.msrb.mxu3 %v2745_v4 }
 0x25e   :  { %v1064_v42 = vpop.f32.mrf.mxu2  ;;  %1290 = vmatpush.bf16.msrb.mxu3 %v2755_v27 }
 0x25f   :  { %v1070_v47 = vadd.f32 %v1064_v42, %v2697_v63 }
 0x261   :  { %v1074_v50 = vmax.f32 %v1070_v47, 0.0 }
 0x262   :  { %1291 = vmatpush.bf16.msrb.mxu3 %v2765_v25 }
 0x263   :  { %v1076_v59 = vpack.c.bf16 %v1074_v50, %v1073_v49 }
 0x265   :  { %1090 = vmatmul.bf16.gmra.mxu3 %v1076_v59 }
 0x266   :  { %v1150_v3 = vpop.f32.mrf.mxu2  ;;  %1292 = vmatpush.bf16.msrb.mxu3 %v2776_v14 }
 0x267   :  { %v1160_v61 = vadd.f32 %v1150_v3, %v2680_v53 }
 0x269   :  { %v1164_v19 = vmax.f32 %v1160_v61, 0.0 }
 0x26a   :  { %1293 = vmatpush.bf16.msrb.mxu3 %v2784_v56 }
 0x26e   :  { %v1152_v18 = vpop.f32.mrf.mxu2  ;;  %1294 = vmatpush.bf16.msrb.mxu3 %v2798_v60 }
 0x26f   :  { %v1161_v13 = vadd.f32 %v1152_v18, %v2685_v55 }
 0x271   :  { %v1165_v16 = vmax.f32 %v1161_v13, 0.0 }
 0x272   :  { %1295 = vmatpush.bf16.msrb.mxu3 %v2806_v2 }
 0x273   :  { %v1168_v11 = vpack.c.bf16 %v1165_v16, %v1164_v19 }
 0x275   :  { %1178 = vmatmul.bf16.vlgmr.msra.gmra.mxu3 %v1168_v11 }
 0x276   :  { %v1155_v7 = vpop.f32.mrf.mxu2  ;;  %1420 = vmatpush.bf16.msra.mxu3 %v2427_v15 }
 0x277   :  { %v1162_v17 = vadd.f32 %v1155_v7, %v2694_v12 }
 0x279   :  { %v1166_v42 = vmax.f32 %v1162_v17, 0.0 }
 0x27a   :  { %1421 = vmatpush.bf16.msra.mxu3 %v2433_v21 }
 0x27e   :  { %v1157_v24 = vpop.f32.mrf.mxu2  ;;  %1422 = vmatpush.bf16.msra.mxu3 %v2440_v28 }
 0x27f   :  { %v1163_v10 = vadd.f32 %v1157_v24, %v2697_v63 }
 0x281   :  { %v1167_v47 = vmax.f32 %v1163_v10, 0.0 }
 0x282   :  { %1423 = vmatpush.bf16.msra.mxu3 %v2461_v41 }
 0x283   :  { %v1169_v49 = vpack.c.bf16 %v1167_v47, %v1166_v42  ;;  %v2880_v47 = vpop.f32.mrf.mxu3 }
 0x285   :  { %1183 = vmatmul.bf16.gmra.mxu3 %v1169_v49 }
 0x286   :  { %v1243_v50 = vpop.f32.mrf.mxu2  ;;  %1424 = vmatpush.bf16.msra.mxu3 %v2471_v44 }
 0x287   :  { %v1253_v59 = vadd.f32 %v1243_v50, %v2680_v53 }
 0x289   :  { %v1257_v18 = vmax.f32 %v1253_v59, 0.0 }
 0x28a   :  { %1425 = vmatpush.bf16.msra.mxu3 %v2477_v45 }
 0x28b   :  { %v2882_v49 = vpop.f32.mrf.mxu3 }
 0x28e   :  { %v1245_v3 = vpop.f32.mrf.mxu2  ;;  %1426 = vmatpush.bf16.msra.mxu3 %v2483_v46 }
 0x28f   :  { %v1254_v61 = vadd.f32 %v1245_v3, %v2685_v55 }
 0x291   :  { %v1258_v13 = vmax.f32 %v1254_v61, 0.0 }
 0x292   :  { %1427 = vmatpush.bf16.msra.mxu3 %v2491_v48 }
 0x293   :  { %v1261_v19 = vpack.c.bf16 %v1258_v13, %v1257_v18 }
 0x295   :  { %1271 = vmatmul.bf16.vlgmr.msra.gmra.mxu0 %v1261_v19 }
 0x296   :  { %v1248_v16 = vpop.f32.mrf.mxu2  ;;  %1513 = vmatpush.bf16.msra.mxu0 %v2427_v15 }
 0x297   :  { %v1255_v11 = vadd.f32 %v1248_v16, %v2694_v12 }
 0x299   :  { %v1259_v24 = vmax.f32 %v1255_v11, 0.0 }
 0x29a   :  { %1514 = vmatpush.bf16.msra.mxu0 %v2433_v21 }
 0x29e   :  { %v1250_v7 = vpop.f32.mrf.mxu2  ;;  %1515 = vmatpush.bf16.msra.mxu0 %v2440_v28 }
 0x29f   :  { %v1256_v17 = vadd.f32 %v1250_v7, %v2697_v63 }
 0x2a1   :  { %v1260_v10 = vmax.f32 %v1256_v17, 0.0 }
 0x2a2   :  { %1516 = vmatpush.bf16.msra.mxu0 %v2461_v41 }
 0x2a3   :  { %v1262_v42 = vpack.c.bf16 %v1260_v10, %v1259_v24 }
 0x2a5   :  { %1276 = vmatmul.bf16.gmra.mxu0 %v1262_v42 }
 0x2a6   :  { %1517 = vmatpush.bf16.msra.mxu0 %v2471_v44 }
 0x2aa   :  { %1518 = vmatpush.bf16.msra.mxu0 %v2477_v45 }
 0x2ae   :  { %1519 = vmatpush.bf16.msra.mxu0 %v2483_v46 }
 0x2b2   :  { %1520 = vmatpush.bf16.msra.mxu0 %v2491_v48 }
 0x2d8   :  { %v1086_v50 = vpop.f32.mrf.mxu3 }
 0x2d9   :  { %v1087_v59 = vadd.f32 %v2828_v57, %v1086_v50 }
 0x2db   :  { %v1096_v18 = vmax.f32 %v1087_v59, 0.0 }
 0x2e0   :  { %v1088_v3 = vpop.f32.mrf.mxu3 }
 0x2e1   :  { %v1089_v61 = vadd.f32 %v2828_v57, %v1088_v3 }
 0x2e3   :  { %v1097_v13 = vmax.f32 %v1089_v61, 0.0 }
 0x2e5   :  { %v1100_v19 = vpack.c.bf16 %v1097_v13, %v1096_v18 }
 0x2e7   :  { %1110 = vmatmul.bf16.vlgmr.msrb.gmra.mxu1 %v1100_v19 }
 0x2e8   :  { %v1091_v16 = vpop.f32.mrf.mxu3  ;;  %1327 = vmatpush.bf16.msrb.mxu1 %v2427_v15 }
 0x2e9   :  { %v1092_v11 = vadd.f32 %v2828_v57, %v1091_v16 }
 0x2eb   :  { %v1098_v24 = vmax.f32 %v1092_v11, 0.0 }
 0x2ec   :  { %1328 = vmatpush.bf16.msrb.mxu1 %v2433_v21  ;;  %v2895_v21 = vpop.f32.mrf.mxu0 }
 0x2f0   :  { %v1093_v7 = vpop.f32.mrf.mxu3  ;;  %1329 = vmatpush.bf16.msrb.mxu1 %v2440_v28 }
 0x2f1   :  { %v1094_v17 = vadd.f32 %v2828_v57, %v1093_v7 }
 0x2f3   :  { %v1099_v10 = vmax.f32 %v1094_v17, 0.0 }
 0x2f4   :  { %1330 = vmatpush.bf16.msrb.mxu1 %v2461_v41 }
 0x2f5   :  { %v1101_v42 = vpack.c.bf16 %v1099_v10, %v1098_v24  ;;  %v724_v10 = vpack.c.bf16 %v2564_v52, %v2564_v52 }
 0x2f7   :  { %1115 = vmatmul.bf16.gmra.mxu1 %v1101_v42 }
 0x2f8   :  { %v1179_v50 = vpop.f32.mrf.mxu3  ;;  %1331 = vmatpush.bf16.msrb.mxu1 %v2471_v44  ;;  %v2901_v44 = vpop.f32.mrf.mxu0 }
 0x2f9   :  { %v1180_v15 = vadd.f32 %v2828_v57, %v1179_v50 }
 0x2fb   :  { %v1189_v3 = vmax.f32 %v1180_v15, 0.0  ;;  %v723_v15 = vpack.c.bf16 %v2544_v34, %v2544_v34 }
 0x2fc   :  { %1332 = vmatpush.bf16.msrb.mxu1 %v2477_v45 }
 0x300   :  { %v1181_v59 = vpop.f32.mrf.mxu3  ;;  %1333 = vmatpush.bf16.msrb.mxu1 %v2483_v46 }
 0x301   :  { %v1182_v28 = vadd.f32 %v2828_v57, %v1181_v59 }
 0x303   :  { %v1190_v61 = vmax.f32 %v1182_v28, 0.0  ;;  %v1320_v28 = vunpack.c.l.b16 %v724_v10 }
 0x304   :  { %1334 = vmatpush.bf16.msrb.mxu1 %v2491_v48 }
 0x305   :  { %v1193_v41 = vpack.c.bf16 %v1190_v61, %v1189_v3  ;;  %v1319_v61 = vunpack.c.l.b16 %v723_v15 }
 0x307   :  { %1203 = vmatmul.bf16.vlgmr.msra.gmra.mxu1 %v1193_v41  ;;  %v1323_v41 = vpack.c.b16 %v1320_v28, %v1319_v61 }
 0x308   :  { %v1184_v18 = vpop.f32.mrf.mxu3  ;;  %1449 = vmatpush.bf16.msra.mxu1 %v2581_v1 }
 0x309   :  { %v1185_v45 = vadd.f32 %v2828_v57, %v1184_v18 }
 0x30b   :  { %v1191_v16 = vmax.f32 %v1185_v45, 0.0 }
 0x30c   :  { %1450 = vmatpush.bf16.msra.mxu1 %v2589_v6 }
 0x310   :  { %v1186_v13 = vpop.f32.mrf.mxu3  ;;  %1451 = vmatpush.bf16.msra.mxu1 %v2602_v23 }
 0x311   :  { %v1187_v46 = vadd.f32 %v2828_v57, %v1186_v13 }
 0x312   :  { %v1272_v19 = vpop.f32.mrf.mxu0 }
 0x313   :  { %v1192_v11 = vmax.f32 %v1187_v46, 0.0  ;;  %v1273_v7 = vadd.f32 %v2828_v57, %v1272_v19 }
 0x314   :  { %1452 = vmatpush.bf16.msra.mxu1 %v2612_v29 }
 0x315   :  { %v1194_v48 = vpack.c.bf16 %v1192_v11, %v1191_v16  ;;  %v1282_v42 = vmax.f32 %v1273_v7, 0.0 }
 0x317   :  { %1208 = vmatmul.bf16.gmra.mxu1 %v1194_v48 }
 0x318   :  { %1453 = vmatpush.bf16.msra.mxu1 %v2626_v33 }
 0x31a   :  { %v1274_v17 = vpop.f32.mrf.mxu0 }
 0x31b   :  { %v1275_v24 = vadd.f32 %v2828_v57, %v1274_v17 }
 0x31c   :  { %1454 = vmatpush.bf16.msra.mxu1 %v2637_v8 }
 0x31d   :  { %v1283_v50 = vmax.f32 %v1275_v24, 0.0 }
 0x31f   :  { %v1286_v59 = vpack.c.bf16 %v1283_v50, %v1282_v42 }
 0x320   :  { %1455 = vmatpush.bf16.msra.mxu1 %v2645_v9 }
 0x321   :  { %1296 = vmatmul.bf16.vlgmr.msrb.gmra.mxu3 %v1286_v59 }
 0x322   :  { %v1277_v3 = vpop.f32.mrf.mxu0  ;;  %1542 = vmatpush.bf16.msrb.mxu3 %v2581_v1 }
 0x323   :  { %v1278_v52 = vadd.f32 %v2828_v57, %v1277_v3 }
 0x324   :  { %1456 = vmatpush.bf16.msra.mxu1 %v2655_v5 }
 0x325   :  { %v1284_v45 = vmax.f32 %v1278_v52, 0.0 }
 0x326   :  { %1543 = vmatpush.bf16.msrb.mxu3 %v2589_v6  ;;  %v1018_v6 = vpop.f32.mrf.mxu1 }
 0x327   :  { %1335 = vmatmul.bf16.vlgmr.msrb.gmra.mxu1 %v1323_v41 }
 0x328   :  { %1567 = vmatpush.bf16.msrb.mxu1 %v2738_v54 }
 0x32a   :  { %v1279_v34 = vpop.f32.mrf.mxu0  ;;  %1544 = vmatpush.bf16.msrb.mxu3 %v2602_v23 }
 0x32b   :  { %v1280_v18 = vadd.f32 %v2828_v57, %v1279_v34 }
 0x32c   :  { %1568 = vmatpush.bf16.msrb.mxu1 %v2745_v4 }
 0x32d   :  { %v1285_v1 = vmax.f32 %v1280_v18, 0.0 }
 0x32e   :  { %1545 = vmatpush.bf16.msrb.mxu3 %v2612_v29  ;;  %v1020_v23 = vpop.f32.mrf.mxu1 }
 0x32f   :  { %v1287_v13 = vpack.c.bf16 %v1285_v1, %v1284_v45 }
 0x330   :  { %1569 = vmatpush.bf16.msrb.mxu1 %v2755_v27 }
 0x331   :  { %1301 = vmatmul.bf16.gmra.mxu3 %v1287_v13 }
 0x332   :  { %1546 = vmatpush.bf16.msrb.mxu3 %v2626_v33 }
 0x334   :  { %1570 = vmatpush.bf16.msrb.mxu1 %v2765_v25 }
 0x336   :  { %1547 = vmatpush.bf16.msrb.mxu3 %v2637_v8  ;;  %v1023_v39 = vpop.f32.mrf.mxu1 }
 0x337   :  { %1340 = vmatmul.bf16.gmra.mxu1 %v1324_v51  ;;  %v2948_v51 = vld [vmem:[%s3084_s9] ss:$0 sm:$0xff] }
 0x338   :  { %1571 = vmatpush.bf16.msrb.mxu1 %v2776_v14  ;;  %v1019_v29 = vadd.f32 %v2948_v51, %v1018_v6  ;;  %v1024_v4 = vadd.f32 %v2948_v51, %v1023_v39 }
 0x33a   :  { %1548 = vmatpush.bf16.msrb.mxu3 %v2645_v9  ;;  %v1028_v31 = vmax.f32 %v1019_v29, 0.0  ;;  %v1021_v9 = vadd.f32 %v2948_v51, %v1020_v23  ;;  %v1030_v14 = vmax.f32 %v1024_v4, 0.0 }
 0x33c   :  { %1572 = vmatpush.bf16.msrb.mxu1 %v2784_v56  ;;  %v1029_v22 = vmax.f32 %v1021_v9, 0.0 }
 0x33e   :  { %1549 = vmatpush.bf16.msrb.mxu3 %v2655_v5  ;;  %v1025_v40 = vpop.f32.mrf.mxu1 }
 0x33f   :  { %v1026_v59 = vadd.f32 %v2948_v51, %v1025_v40 }
 0x340   :  { %1573 = vmatpush.bf16.msrb.mxu1 %v2798_v60 }
 0x341   :  { %1428 = vmatmul.bf16.vlgmr.msra.gmra.mxu3 %v1416_v32  ;;  %v1031_v41 = vmax.f32 %v1026_v59, 0.0 }
 0x344   :  { %1574 = vmatpush.bf16.msrb.mxu1 %v2806_v2 }
 0x351   :  { %1433 = vmatmul.bf16.gmra.mxu3 %v1417_v26 }
 0x364   :  { %v1111_v33 = vpop.f32.mrf.mxu1 }
 0x365   :  { %v1112_v30 = vadd.f32 %v2948_v51, %v1111_v33 }
 0x367   :  { %v1121_v32 = vmax.f32 %v1112_v30, 0.0 }
 0x369   :  { %v1125_v8 = vadd.f32 %v1121_v32, %v1028_v31 }
 0x36c   :  { %v1113_v5 = vpop.f32.mrf.mxu1 }
 0x36d   :  { %v1114_v20 = vadd.f32 %v2948_v51, %v1113_v5 }
 0x36f   :  { %v1122_v26 = vmax.f32 %v1114_v20, 0.0 }
 0x371   :  { %v1126_v54 = vadd.f32 %v1122_v26, %v1029_v22 }
 0x374   :  { %v1116_v27 = vpop.f32.mrf.mxu1 }
 0x375   :  { %v1117_v25 = vadd.f32 %v2948_v51, %v1116_v27 }
 0x377   :  { %v1123_v56 = vmax.f32 %v1117_v25, 0.0 }
 0x379   :  { %v1127_v60 = vadd.f32 %v1123_v56, %v1030_v14 }
 0x37c   :  { %v1118_v2 = vpop.f32.mrf.mxu1 }
 0x37d   :  { %v1119_v50 = vadd.f32 %v2948_v51, %v1118_v2 }
 0x37f   :  { %v1124_v3 = vmax.f32 %v1119_v50, 0.0 }
 0x381   :  { %v1128_v34 = vadd.f32 %v1124_v3, %v1031_v41 }
 0x384   :  { %v1204_v46 = vpop.f32.mrf.mxu1 }
 0x385   :  { %v1205_v19 = vadd.f32 %v2948_v51, %v1204_v46 }
 0x387   :  { %v1214_v16 = vmax.f32 %v1205_v19, 0.0 }
 0x389   :  { %v1218_v11 = vadd.f32 %v1214_v16, %v1125_v8 }
 0x38c   :  { %v1206_v48 = vpop.f32.mrf.mxu1 }
 0x38d   :  { %v1207_v7 = vadd.f32 %v2948_v51, %v1206_v48 }
 0x38f   :  { %v1215_v17 = vmax.f32 %v1207_v7, 0.0 }
 0x391   :  { %v1219_v24 = vadd.f32 %v1215_v17, %v1126_v54 }
 0x394   :  { %v1209_v10 = vpop.f32.mrf.mxu1 }
 0x395   :  { %v1210_v42 = vadd.f32 %v2948_v51, %v1209_v10 }
 0x397   :  { %v1216_v15 = vmax.f32 %v1210_v42, 0.0 }
 0x399   :  { %v1220_v28 = vadd.f32 %v1216_v15, %v1127_v60 }
 0x39c   :  { %v1211_v61 = vpop.f32.mrf.mxu1 }
 0x39d   :  { %v1212_v52 = vadd.f32 %v2948_v51, %v1211_v61 }
 0x39f   :  { %v1217_v18 = vmax.f32 %v1212_v52, 0.0 }
 0x3a1   :  { %v1221_v45 = vadd.f32 %v1217_v18, %v1128_v34 }
 0x3a4   :  { %v1297_v1 = vpop.f32.mrf.mxu3  ;;  %v1336_v13 = vpop.f32.mrf.mxu1 }
 0x3a5   :  { %v1298_v6 = vadd.f32 %v2948_v51, %v1297_v1  ;;  %v1346_v29 = vadd.f32 %v1336_v13, %v2680_v53 }
 0x3a7   :  { %v1307_v23 = vmax.f32 %v1298_v6, 0.0  ;;  %v1350_v32 = vmax.f32 %v1346_v29, 0.0 }
 0x3a9   :  { %v2963_v39 = vadd.f32 %v1307_v23, %v1218_v11 }
 0x3ac   :  { %v1299_v33 = vpop.f32.mrf.mxu3  ;;  %v1338_v40 = vpop.f32.mrf.mxu1 }
 0x3ad   :  { %v1300_v30 = vadd.f32 %v2948_v51, %v1299_v33  ;;  %v1347_v31 = vadd.f32 %v1338_v40, %v2685_v55 }
 0x3af   :  { %v1308_v8 = vmax.f32 %v1300_v30, 0.0  ;;  %v1351_v9 = vmax.f32 %v1347_v31, 0.0 }
 0x3b1   :  { %v2968_v5 = vadd.f32 %v1308_v8, %v1219_v24  ;;  %v1354_v20 = vpack.c.bf16 %v1351_v9, %v1350_v32 }
 0x3b3   :  { %1364 = vmatmul.bf16.vlgmr.msrb.gmra.mxu2 %v1354_v20 }
 0x3b4   :  { %v1302_v22 = vpop.f32.mrf.mxu3  ;;  %v1341_v26 = vpop.f32.mrf.mxu1 }
 0x3b5   :  { %v1303_v54 = vadd.f32 %v2948_v51, %v1302_v22  ;;  %v1348_v25 = vadd.f32 %v1341_v26, %v2694_v12 }
 0x3b7   :  { %v1309_v4 = vmax.f32 %v1303_v54, 0.0  ;;  %v1352_v46 = vmax.f32 %v1348_v25, 0.0 }
 0x3b9   :  { %v2971_v27 = vadd.f32 %v1309_v4, %v1220_v28  ;;  %v728_v4 = vpack.c.bf16 %v2882_v49, %v2882_v49  ;;  %v742_v49 = vpack.c.bf16 %v2901_v44, %v2901_v44 }
 0x3bc   :  { %v1304_v14 = vpop.f32.mrf.mxu3  ;;  %v1343_v56 = vpop.f32.mrf.mxu1 }
 0x3bd   :  { %v1305_v60 = vadd.f32 %v2948_v51, %v1304_v14  ;;  %v1349_v2 = vadd.f32 %v1343_v56, %v2697_v63  ;;  %v727_v56 = vpack.c.bf16 %v2880_v47, %v2880_v47  ;;  %v741_v47 = vpack.c.bf16 %v2895_v21, %v2895_v21 }
 0x3bf   :  { %v1310_v19 = vmax.f32 %v1305_v60, 0.0  ;;  %v1353_v16 = vmax.f32 %v1349_v2, 0.0  ;;  %v1506_v2 = vunpack.c.l.b16 %v728_v4 }
 0x3c1   :  { %v2976_v11 = vadd.f32 %v1310_v19, %v1221_v45  ;;  %v1355_v48 = vpack.c.bf16 %v1353_v16, %v1352_v46  ;;  %v1505_v19 = vunpack.c.l.b16 %v727_v56 }
 0x3c3   :  { %1369 = vmatmul.bf16.gmra.mxu2 %v1355_v48  ;;  %v1509_v16 = vpack.c.b16 %v1506_v2, %v1505_v19 }
 0x3c4   :  { %v1429_v7 = vpop.f32.mrf.mxu3 }
 0x3c5   :  { %v1439_v17 = vadd.f32 %v1429_v7, %v2680_v53 }
 0x3c7   :  { %v1443_v42 = vmax.f32 %v1439_v17, 0.0 }
 0x3cc   :  { %v1431_v24 = vpop.f32.mrf.mxu3 }
 0x3cd   :  { %v1440_v10 = vadd.f32 %v1431_v24, %v2685_v55 }
 0x3cf   :  { %v1444_v50 = vmax.f32 %v1440_v10, 0.0 }
 0x3d1   :  { %v1447_v15 = vpack.c.bf16 %v1444_v50, %v1443_v42  ;;  %v1508_v50 = vunpack.c.l.b16 %v742_v49  ;;  %v2066_v49 = vld [vmem:[%s3085_s10 + $0x28] sm:$0xff] }
 0x3d3   :  { %1457 = vmatmul.bf16.vlgmr.msra.gmra.mxu1 %v1447_v15  ;;  %v1507_v15 = vunpack.c.l.b16 %v741_v47  ;;  %v2062_v47 = vld [vmem:[%s3085_s10 + $0x8] sm:$0xff] }
 0x3d4   :  { %v1434_v59 = vpop.f32.mrf.mxu3 }
 0x3d5   :  { %v1441_v28 = vadd.f32 %v1434_v59, %v2694_v12  ;;  %v1510_v59 = vpack.c.b16 %v1508_v50, %v1507_v15  ;;  %v2061_v50 = vld [vmem:[%s3085_s10] sm:$0xff] }
 0x3d7   :  { %v1445_v41 = vmax.f32 %v1441_v28, 0.0 }
 0x3dc   :  { %v1436_v3 = vpop.f32.mrf.mxu3 }
 0x3dd   :  { %v1442_v61 = vadd.f32 %v1436_v3, %v2697_v63 }
 0x3df   :  { %v1446_v52 = vmax.f32 %v1442_v61, 0.0 }
 0x3e1   :  { %v1448_v34 = vpack.c.bf16 %v1446_v52, %v1445_v41 }
 0x3e3   :  { %1462 = vmatmul.bf16.gmra.mxu1 %v1448_v34 }
 0x436   :  { %v1365_v18 = vpop.f32.mrf.mxu2 }
 0x437   :  { %v1366_v45 = vadd.f32 %v2828_v57, %v1365_v18 }
 0x439   :  { %v1375_v6 = vmax.f32 %v1366_v45, 0.0 }
 0x43e   :  { %v1367_v1 = vpop.f32.mrf.mxu2 }
 0x43f   :  { %v1368_v13 = vadd.f32 %v2828_v57, %v1367_v1 }
 0x441   :  { %v1376_v23 = vmax.f32 %v1368_v13, 0.0 }
 0x443   :  { %v1379_v29 = vpack.c.bf16 %v1376_v23, %v1375_v6 }
 0x445   :  { %1389 = vmatmul.bf16.vlgmr.msrb.gmra.mxu0 %v1379_v29 }
 0x446   :  { %v1370_v33 = vpop.f32.mrf.mxu2 }
 0x447   :  { %v1371_v40 = vadd.f32 %v2828_v57, %v1370_v33 }
 0x449   :  { %v1377_v8 = vmax.f32 %v1371_v40, 0.0 }
 0x44e   :  { %v1372_v30 = vpop.f32.mrf.mxu2 }
 0x44f   :  { %v1373_v31 = vadd.f32 %v2828_v57, %v1372_v30 }
 0x450   :  { %v1458_v32 = vpop.f32.mrf.mxu1 }
 0x451   :  { %v1378_v9 = vmax.f32 %v1373_v31, 0.0  ;;  %v1459_v22 = vadd.f32 %v2828_v57, %v1458_v32 }
 0x453   :  { %v1380_v20 = vpack.c.bf16 %v1378_v9, %v1377_v8  ;;  %v1468_v25 = vmax.f32 %v1459_v22, 0.0 }
 0x455   :  { %1394 = vmatmul.bf16.gmra.mxu0 %v1380_v20 }
 0x458   :  { %v1460_v26 = vpop.f32.mrf.mxu1 }
 0x459   :  { %v1461_v54 = vadd.f32 %v2828_v57, %v1460_v26 }
 0x45b   :  { %v1469_v14 = vmax.f32 %v1461_v54, 0.0 }
 0x45d   :  { %v1472_v60 = vpack.c.bf16 %v1469_v14, %v1468_v25 }
 0x45f   :  { %1482 = vmatmul.bf16.vlgmr.msra.gmra.mxu2 %v1472_v60 }
 0x460   :  { %v1463_v46 = vpop.f32.mrf.mxu1 }
 0x461   :  { %v1464_v48 = vadd.f32 %v2828_v57, %v1463_v46 }
 0x463   :  { %v1470_v24 = vmax.f32 %v1464_v48, 0.0 }
 0x465   :  { %1521 = vmatmul.bf16.vlgmr.msra.gmra.mxu0 %v1509_v16 }
 0x468   :  { %v1465_v7 = vpop.f32.mrf.mxu1 }
 0x469   :  { %v1466_v17 = vadd.f32 %v2828_v57, %v1465_v7 }
 0x46b   :  { %v1471_v10 = vmax.f32 %v1466_v17, 0.0 }
 0x46d   :  { %v1473_v42 = vpack.c.bf16 %v1471_v10, %v1470_v24  ;;  %v2065_v24 = vld [vmem:[%s3085_s10 + $0x20] sm:$0xff]  ;;  %v2064_v10 = vld [vmem:[%s3085_s10 + $0x18] sm:$0xff] }
 0x46f   :  { %1487 = vmatmul.bf16.gmra.mxu2 %v1473_v42 }
 0x475   :  { %1526 = vmatmul.bf16.gmra.mxu0 %v1510_v59 }
 0x4c2   :  { %v1390_v28 = vpop.f32.mrf.mxu0 }
 0x4c3   :  { %v1391_v3 = vadd.f32 %v2948_v51, %v1390_v28 }
 0x4c5   :  { %v1400_v61 = vmax.f32 %v1391_v3, 0.0 }
 0x4c7   :  { %v3000_v41 = vadd.f32 %v1400_v61, %v2963_v39 }
 0x4ca   :  { %v1392_v52 = vpop.f32.mrf.mxu0 }
 0x4cb   :  { %v1393_v44 = vadd.f32 %v2948_v51, %v1392_v52  ;;  %v2076_v52 = vld [vmem:[%s3081_s4] sm:$0x7] }
 0x4cd   :  { %v1401_v34 = vmax.f32 %v1393_v44, 0.0  ;;  %v114_v44 = vperm.slane %v2076_v52, 1 }
 0x4cf   :  { %v3004_v18 = vadd.f32 %v1401_v34, %v2968_v5 }
 0x4d2   :  { %v1395_v21 = vpop.f32.mrf.mxu0 }
 0x4d3   :  { %v1396_v45 = vadd.f32 %v2948_v51, %v1395_v21 }
 0x4d5   :  { %v1402_v1 = vmax.f32 %v1396_v45, 0.0 }
 0x4d7   :  { %v3008_v13 = vadd.f32 %v1402_v1, %v2971_v27 }
 0x4da   :  { %v1397_v6 = vpop.f32.mrf.mxu0 }
 0x4db   :  { %v1398_v23 = vadd.f32 %v2948_v51, %v1397_v6 }
 0x4dd   :  { %v1403_v29 = vmax.f32 %v1398_v23, 0.0  ;;  %v288_v23 = vadd.f32 %v2632_v35, %v114_v44 }
 0x4df   :  { %v3012_v39 = vadd.f32 %v1403_v29, %v2976_v11 }
 0x4e2   :  { %v1522_v33 = vpop.f32.mrf.mxu0  ;;  %v1483_v42 = vpop.f32.mrf.mxu2 }
 0x4e3   :  { %v1532_v40 = vadd.f32 %v1522_v33, %v2680_v53  ;;  %v2068_v53 = vld [vmem:[%s3085_s10 + $0x38] sm:$0xff]  ;;  %v1484_v15 = vadd.f32 %v2948_v51, %v1483_v42 }
 0x4e4   :  { %1696 = vmatpush.bf16.msrb.mxu2 %v2068_v53 }
 0x4e5   :  { %v1536_v31 = vmax.f32 %v1532_v40, 0.0  ;;  %v1493_v28 = vmax.f32 %v1484_v15, 0.0 }
 0x4e7   :  { %v1497_v34 = vadd.f32 %v1493_v28, %v3000_v41  ;;  %v290_v41 = vadd.f32 %v2639_v36, %v114_v44  ;;  %v293_v36 = vadd.f32 %v2661_v37, %v114_v44  ;;  %v1619_v37 = vpop.permute.xlu0 %1618  ;;  %v115_v28 = vperm.slane %v2076_v52, 2 }
 0x4ea   :  { %v1524_v30 = vpop.f32.mrf.mxu0  ;;  %v1485_v59 = vpop.f32.mrf.mxu2 }
 0x4eb   :  { %v1533_v5 = vadd.f32 %v1524_v30, %v2685_v55  ;;  %v2067_v55 = vld [vmem:[%s3085_s10 + $0x30] sm:$0xff]  ;;  %v1486_v21 = vadd.f32 %v2948_v51, %v1485_v59 }
 0x4ec   :  { %1697 = vmatpush.bf16.msrb.mxu2 %v2067_v55 }
 0x4ed   :  { %v1537_v32 = vmax.f32 %v1533_v5, 0.0  ;;  %v1494_v29 = vmax.f32 %v1486_v21, 0.0 }
 0x4ef   :  { %v1540_v8 = vpack.c.bf16 %v1537_v32, %v1536_v31  ;;  %v1498_v31 = vadd.f32 %v1494_v29, %v3004_v18 }
 0x4f0   :  { %1698 = vmatpush.bf16.msrb.mxu2 %v2066_v49  ;;  %v295_v49 = vadd.f32 %v2668_v38, %v114_v44 }
 0x4f1   :  { %1550 = vmatmul.bf16.vlgmr.msrb.gmra.mxu3 %v1540_v8 }
 0x4f2   :  { %v1527_v9 = vpop.f32.mrf.mxu0  ;;  %v1488_v6 = vpop.f32.mrf.mxu2 }
 0x4f3   :  { %v1534_v27 = vadd.f32 %v1527_v9, %v2694_v12  ;;  %v1489_v32 = vadd.f32 %v2948_v51, %v1488_v6 }
 0x4f4   :  { %1699 = vmatpush.bf16.msrb.mxu2 %v2065_v24 }
 0x4f5   :  { %v1538_v26 = vmax.f32 %v1534_v27, 0.0  ;;  %v1495_v27 = vmax.f32 %v1489_v32, 0.0 }
 0x4f7   :  { %v1499_v53 = vadd.f32 %v1495_v27, %v3008_v13 }
 0x4f8   :  { %1700 = vmatpush.bf16.msrb.mxu2 %v2064_v10 }
 0x4fa   :  { %v1529_v20 = vpop.f32.mrf.mxu0 }
 0x4fb   :  { %v1535_v22 = vadd.f32 %v1529_v20, %v2697_v63 }
 0x4fd   :  { %v1539_v54 = vmax.f32 %v1535_v22, 0.0  ;;  %v1490_v22 = vpop.f32.mrf.mxu2 }
 0x4ff   :  { %v1541_v11 = vpack.c.bf16 %v1539_v54, %v1538_v26 }
 0x501   :  { %1555 = vmatmul.bf16.gmra.mxu3 %v1541_v11 }
 0x574   :  { %v1551_v4 = vpop.f32.mrf.mxu3 }
 0x575   :  { %v1552_v12 = vadd.f32 %v2828_v57, %v1551_v4  ;;  %v1491_v4 = vadd.f32 %v2948_v51, %v1490_v22 }
 0x577   :  { %v1561_v14 = vmax.f32 %v1552_v12, 0.0  ;;  %v1609_v12 = vpop.permute.xlu1 %1608 }
 0x57c   :  { %v1553_v25 = vpop.f32.mrf.mxu3 }
 0x57d   :  { %v1554_v63 = vadd.f32 %v2828_v57, %v1553_v25  ;;  %v1614_v25 = vpop.permute.xlu2 %1613 }
 0x57f   :  { %v1562_v56 = vmax.f32 %v1554_v63, 0.0  ;;  %v1624_v42 = vpop.permute.xlu1 %1623 }
 0x581   :  { %v1565_v60 = vpack.c.bf16 %v1562_v56, %v1561_v14 }
 0x583   :  { %1575 = vmatmul.bf16.vlgmr.msrb.gmra.mxu1 %v1565_v60  ;;  %v1496_v60 = vmax.f32 %v1491_v4, 0.0 }
 0x584   :  { %v1556_v2 = vpop.f32.mrf.mxu3 }
 0x585   :  { %v1557_v46 = vadd.f32 %v2828_v57, %v1556_v2  ;;  %v1500_v13 = vadd.f32 %v1496_v60, %v3012_v39  ;;  %v309_v39 = vadd.f32 %v2789_v62, %v115_v28 }
 0x587   :  { %v1563_v48 = vmax.f32 %v1557_v46, 0.0 }
 0x58c   :  { %v1558_v19 = vpop.f32.mrf.mxu3 }
 0x58d   :  { %v1559_v16 = vadd.f32 %v2828_v57, %v1558_v19  ;;  %v2063_v57 = vld [vmem:[%s3085_s10 + $0x10] sm:$0xff] }
 0x58e   :  { %1701 = vmatpush.bf16.msrb.mxu2 %v2063_v57 }
 0x58f   :  { %v1564_v7 = vmax.f32 %v1559_v16, 0.0 }
 0x591   :  { %v1566_v17 = vpack.c.bf16 %v1564_v7, %v1563_v48 }
 0x592   :  { %1702 = vmatpush.bf16.msrb.mxu2 %v2062_v47 }
 0x593   :  { %1580 = vmatmul.bf16.gmra.mxu1 %v1566_v17 }
 0x596   :  { %1703 = vmatpush.bf16.msrb.mxu2 %v2061_v50 }
 0x600   :  { %v1576_v3 = vpop.f32.mrf.mxu1 }
 0x601   :  { %v1577_v61 = vadd.f32 %v2948_v51, %v1576_v3 }
 0x603   :  { %v1586_v45 = vmax.f32 %v1577_v61, 0.0 }
 0x605   :  { %v1590_v1 = vadd.f32 %v1586_v45, %v1497_v34 }
 0x607   :  { %v1594_v33 = vmul.f32 0.14285715, %v1590_v1 }
 0x608   :  { %v1578_v40 = vpop.f32.mrf.mxu1 }
 0x609   :  { %v1598_v30 = vadd.f32 %v1594_v33, %v288_v23  ;;  %v1579_v5 = vadd.f32 %v2948_v51, %v1578_v40  ;;  %v312_v33 = vadd.f32 %v2812_v0, %v115_v28 }
 0x60b   :  { %v1587_v8 = vmax.f32 %v1579_v5, 0.0  ;;  %v1602_v54 = vmax.f32 %v1598_v30, 0.0  ;;  %v314_v5 = vadd.f32 %v2819_v58, %v115_v28 }
 0x60d   :  { %v1591_v9 = vadd.f32 %v1587_v8, %v1498_v31  ;;  %v1626_v63 = vmul.f32 %v1609_v12, %v1602_v54 }
 0x60f   :  { %v1595_v20 = vmul.f32 0.14285715, %v1591_v9 }
 0x610   :  { %v1581_v26 = vpop.f32.mrf.mxu1 }
 0x611   :  { %v1599_v35 = vadd.f32 %v1595_v20, %v290_v41  ;;  %v1582_v11 = vadd.f32 %v2948_v51, %v1581_v26 }
 0x613   :  { %v1603_v55 = vmax.f32 %v1599_v35, 0.0  ;;  %v1588_v18 = vmax.f32 %v1582_v11, 0.0 }
 0x615   :  { %v1627_v14 = vmul.f32 %v1614_v25, %v1603_v55  ;;  %v1592_v56 = vadd.f32 %v1588_v18, %v1499_v53 }
 0x617   :  { %v1630_v2 = vpack.c.bf16 %v1627_v14, %v1626_v63  ;;  %v1596_v46 = vmul.f32 0.14285715, %v1592_v56 }
 0x618   :  { %v1583_v19 = vpop.f32.mrf.mxu1 }
 0x619   :  { %v1600_v16 = vadd.f32 %v1596_v46, %v293_v36  ;;  %v1584_v48 = vadd.f32 %v2948_v51, %v1583_v19  ;;  %1704 = vmatmul.bf16.vlgmr.msrb.gmra.mxu2 %v1630_v2  ;;  %v307_v51 = vadd.f32 %v2768_v43, %v115_v28 }
 0x61b   :  { %v1589_v7 = vmax.f32 %v1584_v48, 0.0  ;;  %v1604_v10 = vmax.f32 %v1600_v16, 0.0 }
 0x61d   :  { %v1593_v17 = vadd.f32 %v1589_v7, %v1500_v13  ;;  %v1628_v50 = vmul.f32 %v1619_v37, %v1604_v10 }
 0x61f   :  { %v1597_v24 = vmul.f32 0.14285715, %v1593_v17 }
 0x621   :  { %v1601_v57 = vadd.f32 %v1597_v24, %v295_v49 }
 0x623   :  { %v1605_v47 = vmax.f32 %v1601_v57, 0.0 }
 0x625   :  { %v1629_v15 = vmul.f32 %v1624_v42, %v1605_v47 }
 0x627   :  { %v1631_v59 = vpack.c.bf16 %v1629_v15, %v1628_v50 }
 0x629   :  { %1709 = vmatmul.bf16.gmra.mxu2 %v1631_v59 }
 0x69c   :  { %v1705_v3 = vpop.f32.mrf.mxu2 }
 0x69d   :  { %v1715_v61 = vadd.f32 %v1705_v3, %v307_v51 }
 0x69f   :  { %v1719_v21 = vmax.f32 %v1715_v61, 0.0 }
 0x6a1   :  { %v1723_v45 = vmul.f32 %v1719_v21, %v1609_v12 }
 0x6a4   :  { %v1707_v34 = vpop.f32.mrf.mxu2 }
 0x6a5   :  { %v1716_v38 = vadd.f32 %v1707_v34, %v309_v39 }
 0x6a7   :  { %v1720_v44 = vmax.f32 %v1716_v38, 0.0 }
 0x6a9   :  { %v1724_v1 = vmul.f32 %v1720_v44, %v1614_v25 }
 0x6ab   :  { %v1727_v6 = vadd.f32 %v1724_v1, %v1723_v45 }
 0x6ac   :  { %v1710_v23 = vpop.f32.mrf.mxu2 }
 0x6ad   :  { %v1728_v29 = vrot.slane %v1727_v6, 4  ;;  %v1717_v52 = vadd.f32 %v1710_v23, %v312_v33 }
 0x6af   :  { %v1729_v40 = vadd.f32 %v1728_v29, %v1727_v6  ;;  %v1721_v62 = vmax.f32 %v1717_v52, 0.0 }
 0x6b1   :  { %v1730_v30 = vrot.slane %v1729_v40, 2  ;;  %v1725_v27 = vmul.f32 %v1721_v62, %v1619_v37 }
 0x6b3   :  { %v1731_v43 = vadd.f32 %v1730_v30, %v1729_v40 }
 0x6b4   :  { %v1712_v31 = vpop.f32.mrf.mxu2 }
 0x6b5   :  { %v1732_v32 = vrot.slane %v1731_v43, 1  ;;  %v1718_v8 = vadd.f32 %v1712_v31, %v314_v5 }
 0x6b7   :  { %v1733_v9 = vadd.f32 %v1732_v32, %v1731_v43  ;;  %v1722_v41 = vmax.f32 %v1718_v8, 0.0 }
 0x6b9   :  { %1741 = vst [vmem:[%s3086_s11] sm:$0x1] %v1733_v9  ;;  %v1726_v20 = vmul.f32 %v1722_v41, %v1624_v42 }
 0x6bb   :  { %v1734_v22 = vadd.f32 %v1726_v20, %v1725_v27 }
 0x6bd   :  { %v1735_v0 = vrot.slane %v1734_v22, 4 }
 0x6bf   :  { %v1736_v26 = vadd.f32 %v1735_v0, %v1734_v22 }
 0x6c1   :  { %v1737_v54 = vrot.slane %v1736_v26, 2 }
 0x6c3   :  { %v1738_v35 = vadd.f32 %v1737_v54, %v1736_v26 }
 0x6c5   :  { %v1739_v11 = vrot.slane %v1738_v35, 1 }
 0x6c7   :  { %v1740_v58 = vadd.f32 %v1739_v11, %v1738_v35 }
 0x6c9   :  { %1742 = vst [vmem:[%s3086_s11 + $0x1] sm:$0x1] %v1740_v58 }

// kernel: particle_net_tagger_forward.10
= control target key start
LH: loop header
LB: loop body
LE: loop exit
PB: predicated region body
PF: predicated region fallthrough
CT: control target
= control target key end

     0   :  { %v1801_v0 = vmov 0   ;;  %v228_v47 = vlaneseq  ;;  %v1802_v52 = vmov 0.0   ;;  %vm461_vm4 = vcmask 130048   ;;  %s2709_s1 = inlined_call_operand.vmem [shape: s32[2,112,1], index: 1, kind: input, shape index: {}]   ;;  %s2710_s2 = inlined_call_operand.vmem [shape: f32[2,16,1], index: 2, kind: input, shape index: {}]   ;;  %s2711_s0 = inlined_call_operand.vmem [shape: f32[2,16,128], index: 0, kind: input, shape index: {}]   ;;  %s2712_s3 = inlined_call_operand.vmem [shape: bf16[128,256], index: 3, kind: input, shape index: {}]   ;;  %s2713_s5 = inlined_call_operand.vmem [shape: bf16[128,128], index: 5, kind: input, shape index: {}]   ;;  %s2714_s6 = inlined_call_operand.vmem [shape: bf16[128,128], index: 6, kind: input, shape index: {}]   ;;  %s2715_s7 = inlined_call_operand.vmem [shape: f32[1,128], index: 7, kind: input, shape index: {}]   ;;  %s2716_s4 = inlined_call_operand.vmem [shape: f32[1,256], index: 4, kind: input, shape index: {}]   ;;  %s2717_s8 = inlined_call_operand.vmem [shape: bf16[128,128], index: 8, kind: input, shape index: {}]   ;;  %s2718_s9 = inlined_call_operand.vmem [shape: f32[1,128], index: 9, kind: input, shape index: {}]   ;;  %s2719_s10 = inlined_call_operand.vmem [shape: f32[2,16,128], index: 10, kind: output, shape index: {}]  }
   0x1   :  { %1797 = vset.pattern.permute.xlu2 %v1801_v0  ;;  %1796 = vset.pattern.permute.xlu1 %v1801_v0  ;;  %v58_v1 = vld [vmem:[%s2709_s1 + $0x70] sm:$0xff]  ;;  %v56_v2 = vld [vmem:[%s2709_s1 + $0x60] sm:$0xff]  ;;  %v59_v4 = vld [vmem:[%s2709_s1 + $0x78] sm:$0xff] }
   0x2   :  { %v44_v3 = vld [vmem:[%s2709_s1] sm:$0xff]  ;;  %1795 = vset.pattern.permute.xlu0 %v1801_v0  ;;  %273 = vperm.xlu2 %1797, %v58_v1   ;;  %v57_v5 = vld [vmem:[%s2709_s1 + $0x68] sm:$0xff]  ;;  %v47_v8 = vld [vmem:[%s2709_s1 + $0x18] sm:$0xff]  ;;  %v1973_v48 = vand.u32 127, %v228_v47 }
   0x3   :  { %267 = vperm.xlu1 %1796, %v56_v2   ;;  %231 = vperm.xlu0 %1795, %v44_v3   ;;  %v45_v6 = vld [vmem:[%s2709_s1 + $0x8] sm:$0xff]  ;;  %v48_v7 = vld [vmem:[%s2709_s1 + $0x20] sm:$0xff]  ;;  %v46_v9 = vld [vmem:[%s2709_s1 + $0x10] sm:$0xff] }
   0x4   :  { %v61_v10 = vld [vmem:[%s2709_s1 + $0x88] sm:$0xff]  ;;  %v60_v11 = vld [vmem:[%s2709_s1 + $0x80] sm:$0xff]  ;;  %v50_v13 = vld [vmem:[%s2709_s1 + $0x30] sm:$0xff] }
   0x5   :  { %v49_v12 = vld [vmem:[%s2709_s1 + $0x28] sm:$0xff]  ;;  %v63_v14 = vld [vmem:[%s2709_s1 + $0x98] sm:$0xff]  ;;  %v62_v15 = vld [vmem:[%s2709_s1 + $0x90] sm:$0xff] }
   0x6   :  { %v53_v16 = vld [vmem:[%s2709_s1 + $0x48] sm:$0xff]  ;;  %v52_v17 = vld [vmem:[%s2709_s1 + $0x40] sm:$0xff]  ;;  %v51_v18 = vld [vmem:[%s2709_s1 + $0x38] sm:$0xff] }
   0x7   :  { %v64_v19 = vld [vmem:[%s2709_s1 + $0xa0] sm:$0xff]  ;;  %v55_v20 = vld [vmem:[%s2709_s1 + $0x58] sm:$0xff]  ;;  %v54_v21 = vld [vmem:[%s2709_s1 + $0x50] sm:$0xff] }
   0x8   :  { %v67_v22 = vld [vmem:[%s2709_s1 + $0xb8] sm:$0xff]  ;;  %v66_v23 = vld [vmem:[%s2709_s1 + $0xb0] sm:$0xff]  ;;  %v65_v24 = vld [vmem:[%s2709_s1 + $0xa8] sm:$0xff] }
   0x9   :  { %v70_v25 = vld [vmem:[%s2709_s1 + $0xd0] sm:$0xff]  ;;  %v69_v26 = vld [vmem:[%s2709_s1 + $0xc8] sm:$0xff]  ;;  %v68_v27 = vld [vmem:[%s2709_s1 + $0xc0] sm:$0xff] }
   0xa   :  { %276 = vperm.xlu2 %1797, %v59_v4   ;;  %v41_v28 = vld [vmem:[%s2710_s2 + $0x8] sm:$0xff]  ;;  %v40_v29 = vld [vmem:[%s2710_s2] sm:$0xff]  ;;  %v71_v30 = vld [vmem:[%s2709_s1 + $0xd8] sm:$0xff] }
   0xb   :  { %270 = vperm.xlu1 %1796, %v57_v5   ;;  %234 = vperm.xlu0 %1795, %v45_v6   ;;  %v43_v31 = vld [vmem:[%s2710_s2 + $0x18] sm:$0xff]  ;;  %v42_v32 = vld [vmem:[%s2710_s2 + $0x10] sm:$0xff]  ;;  %v36_v33 = vld [vmem:[%s2711_s0] sm:$0xff] }
   0xc   :  { %v37_v34 = vld [vmem:[%s2711_s0 + $0x8] sm:$0xff]  ;;  %v72_v35 = vpack.c.bf16 %v36_v33, %v36_v33  ;;  %v38_v40 = vld [vmem:[%s2711_s0 + $0x10] sm:$0xff]  ;;  %v39_v41 = vld [vmem:[%s2711_s0 + $0x18] sm:$0xff] }
   0xd   :  { %v73_v36 = vpack.c.bf16 %v37_v34, %v37_v34  ;;  %v74_v42 = vpack.c.bf16 %v38_v40, %v38_v40  ;;  %v75_v43 = vpack.c.bf16 %v39_v41, %v39_v41  ;;  %v1767_v47 = vld [vmem:[%s2712_s3 + $0x74] sm:$0xf0] }
   0xe   :  { %v102_v37 = vunpack.c.l.b16 %v72_v35 }
   0xf   :  { %v103_v38 = vunpack.c.l.b16 %v73_v36  ;;  %v104_v44 = vunpack.c.l.b16 %v74_v42  ;;  %v105_v45 = vunpack.c.l.b16 %v75_v43 }
  0x11   :  { %v1960_v39 = vpack.c.b16 %v103_v38, %v102_v37  ;;  %v1970_v46 = vpack.c.b16 %v105_v45, %v104_v44  ;;  %v1608_v45 = vld [vmem:[%s2712_s3 + $0x70] sm:$0xf] }
  0x12   :  { %243 = vperm.xlu2 %1797, %v48_v7  }
  0x13   :  { %240 = vperm.xlu1 %1796, %v47_v8   ;;  %237 = vperm.xlu0 %1795, %v46_v9  }
  0x14   :  { %490 = vmatpush.bf16.msra.mxu2 %v1960_v39  ;;  %1792 = vmatpush.bf16.msra.mxu3 %v1960_v39 }
  0x18   :  { %590 = vmatpush.bf16.msrb.mxu3 %v1970_v46 }
  0x1a   :  { %282 = vperm.xlu2 %1797, %v61_v10  }
  0x1b   :  { %279 = vperm.xlu1 %1796, %v60_v11   ;;  %246 = vperm.xlu0 %1795, %v49_v12  }
  0x22   :  { %249 = vperm.xlu2 %1797, %v50_v13  }
  0x23   :  { %288 = vperm.xlu1 %1796, %v63_v14   ;;  %285 = vperm.xlu0 %1795, %v62_v15  }
  0x2a   :  { %258 = vperm.xlu2 %1797, %v53_v16  }
  0x2b   :  { %255 = vperm.xlu1 %1796, %v52_v17   ;;  %252 = vperm.xlu0 %1795, %v51_v18  }
  0x32   :  { %291 = vperm.xlu2 %1797, %v64_v19  }
  0x33   :  { %264 = vperm.xlu1 %1796, %v55_v20   ;;  %261 = vperm.xlu0 %1795, %v54_v21  }
  0x3a   :  { %300 = vperm.xlu2 %1797, %v67_v22  }
  0x3b   :  { %297 = vperm.xlu1 %1796, %v66_v23   ;;  %294 = vperm.xlu0 %1795, %v65_v24  }
  0x42   :  { %309 = vperm.xlu2 %1797, %v70_v25  }
  0x43   :  { %306 = vperm.xlu1 %1796, %v69_v26   ;;  %303 = vperm.xlu0 %1795, %v68_v27  }
  0x4a   :  { %1525 = vperm.xlu2 %1797, %v41_v28  }
  0x4b   :  { %1520 = vperm.xlu1 %1796, %v40_v29   ;;  %312 = vperm.xlu0 %1795, %v71_v30  }
  0x53   :  { %1535 = vperm.xlu1 %1796, %v43_v31   ;;  %1530 = vperm.xlu0 %1795, %v42_v32  }
  0x5c   :  { %v274_v51 = vpop.permute.xlu2 %273 }
  0x5d   :  { %vm328_vm5 = vcmp.eq.s32.totalorder %v1973_v48, %v274_v51  ;;  %v1765_v51 = vld [vmem:[%s2712_s3 + $0x64] sm:$0xf0] }
  0x5e   :  { %v1628_v8 = vsel %vm328_vm5, 1.0, %v1802_v52 }
  0x5f   :  { %v412_v12 = vpack.c.bf16 %v1628_v8, %v1628_v8 }
  0x61   :  { %v541_v18 = vunpack.c.l.b16 %v412_v12 }
  0x64   :  { %v277_v3 = vpop.permute.xlu2 %276 }
  0x65   :  { %vm329_vm6 = vcmp.eq.s32.totalorder %v1973_v48, %v277_v3 }
  0x66   :  { %v1629_v9 = vsel %vm329_vm6, 1.0, %v1802_v52 }
  0x67   :  { %v413_v13 = vpack.c.bf16 %v1629_v9, %v1629_v9  ;;  %v1592_v9 = vld [vmem:[%s2712_s3 + $0x50] sm:$0xf] }
  0x69   :  { %v542_v19 = vunpack.c.l.b16 %v413_v13  ;;  %v1761_v13 = vld [vmem:[%s2712_s3 + $0x44] sm:$0xf0] }
  0x6b   :  { %v555_v23 = vpack.c.b16 %v542_v19, %v541_v18  ;;  %v1576_v18 = vld [vmem:[%s2712_s3 + $0x30] sm:$0xf]  ;;  %v1759_v19 = vld [vmem:[%s2712_s3 + $0x34] sm:$0xf0] }
  0x6c   :  { %v244_v16 = vpop.permute.xlu2 %243 }
  0x6d   :  { %vm318_vm11 = vcmp.eq.s32.totalorder %v1973_v48, %v244_v16 }
  0x6e   :  { %v1618_v29 = vsel %vm318_vm11, 1.0, %v1802_v52 }
  0x6f   :  { %v402_v33 = vpack.c.bf16 %v1618_v29, %v1618_v29 }
  0x71   :  { %v444_v40 = vunpack.c.l.b16 %v402_v33 }
  0x74   :  { %v283_v26 = vpop.permute.xlu2 %282 }
  0x75   :  { %v268_v49 = vpop.permute.xlu1 %267  ;;  %v232_v50 = vpop.permute.xlu0 %231  ;;  %vm331_vm12 = vcmp.eq.s32.totalorder %v1973_v48, %v283_v26 }
  0x76   :  { %vm326_vm0 = vcmp.eq.s32.totalorder %v1973_v48, %v268_v49  ;;  %vm314_vm1 = vcmp.eq.s32.totalorder %v1973_v48, %v232_v50  ;;  %v1631_v30 = vsel %vm331_vm12, 1.0, %v1802_v52  ;;  %v1600_v49 = vld [vmem:[%s2712_s3 + $0x60] sm:$0xf]  ;;  %v1609_v50 = vor.u32 %v1767_v47, %v1608_v45 }
  0x77   :  { %v1626_v53 = vsel %vm326_vm0, 1.0, %v1802_v52  ;;  %v1614_v54 = vsel %vm314_vm1, 1.0, %v1802_v52  ;;  %v415_v34 = vpack.c.bf16 %v1631_v30, %v1631_v30 }
  0x78   :  { %v410_v57 = vpack.c.bf16 %v1626_v53, %v1626_v53  ;;  %v398_v58 = vpack.c.bf16 %v1614_v54, %v1614_v54  ;;  %190 = vmatpush.bf16.msra.mxu0 %v1609_v50 }
  0x79   :  { %v544_v41 = vunpack.c.l.b16 %v415_v34 }
  0x7a   :  { %v452_v63 = vunpack.c.l.b16 %v410_v57  ;;  %v440_v0 = vunpack.c.l.b16 %v398_v58  ;;  %v1601_v57 = vor.u32 %v1765_v51, %v1600_v49 }
  0x7c   :  { %v250_v38 = vpop.permute.xlu2 %249  ;;  %191 = vmatpush.bf16.msra.mxu0 %v1601_v57 }
  0x7d   :  { %v271_v55 = vpop.permute.xlu1 %270  ;;  %v235_v56 = vpop.permute.xlu0 %234  ;;  %vm320_vm0 = vcmp.eq.s32.totalorder %v1973_v48, %v250_v38  ;;  %v1560_v38 = vld [vmem:[%s2712_s3 + $0x10] sm:$0xf] }
  0x7e   :  { %vm327_vm2 = vcmp.eq.s32.totalorder %v1973_v48, %v271_v55  ;;  %vm315_vm3 = vcmp.eq.s32.totalorder %v1973_v48, %v235_v56  ;;  %v1620_v58 = vsel %vm320_vm0, 1.0, %v1802_v52 }
  0x7f   :  { %v1627_v59 = vsel %vm327_vm2, 1.0, %v1802_v52  ;;  %v1615_v60 = vsel %vm315_vm3, 1.0, %v1802_v52 }
  0x80   :  { %v411_v61 = vpack.c.bf16 %v1627_v59, %v1627_v59  ;;  %v399_v62 = vpack.c.bf16 %v1615_v60, %v1615_v60 }
  0x82   :  { %v453_v1 = vunpack.c.l.b16 %v411_v61  ;;  %v441_v2 = vunpack.c.l.b16 %v399_v62 }
  0x84   :  { %v454_v4 = vpack.c.b16 %v441_v2, %v440_v0  ;;  %v460_v5 = vpack.c.b16 %v453_v1, %v452_v63  ;;  %v259_v59 = vpop.permute.xlu2 %258  ;;  %v404_v63 = vpack.c.bf16 %v1620_v58, %v1620_v58 }
  0x85   :  { %v241_v6 = vpop.permute.xlu1 %240  ;;  %v238_v7 = vpop.permute.xlu0 %237  ;;  %vm323_vm3 = vcmp.eq.s32.totalorder %v1973_v48, %v259_v59 }
  0x86   :  { %vm317_vm7 = vcmp.eq.s32.totalorder %v1973_v48, %v241_v6  ;;  %vm316_vm8 = vcmp.eq.s32.totalorder %v1973_v48, %v238_v7  ;;  %1642 = vmatmul.msk.bf16.vlgmr.msra.gmra.mxu2 %vm461_vm4, %v454_v4  ;;  %1648 = vmatmul.msk.bf16.vlgmr.msra.gmra.mxu3 %vm461_vm4, %v460_v5  ;;  %v446_v4 = vunpack.c.l.b16 %v404_v63 }
  0x87   :  { %v1617_v10 = vsel %vm317_vm7, 1.0, %v1802_v52  ;;  %v1616_v11 = vsel %vm316_vm8, 1.0, %v1802_v52 }
  0x88   :  { %v401_v14 = vpack.c.bf16 %v1617_v10, %v1617_v10  ;;  %v400_v15 = vpack.c.bf16 %v1616_v11, %v1616_v11  ;;  %v1763_v10 = vld [vmem:[%s2712_s3 + $0x54] sm:$0xf0]  ;;  %v1584_v11 = vld [vmem:[%s2712_s3 + $0x40] sm:$0xf] }
  0x89   :  { %v1593_v12 = vor.u32 %v1763_v10, %v1592_v9  ;;  %v2113_v9 = vld [vmem:[%s2713_s5 + $0x20] sm:$0xff] }
  0x8a   :  { %v443_v20 = vunpack.c.l.b16 %v401_v14  ;;  %v442_v21 = vunpack.c.l.b16 %v400_v15 }
  0x8b   :  { %192 = vmatpush.bf16.msra.mxu0 %v1593_v12 }
  0x8c   :  { %v455_v24 = vpack.c.b16 %v443_v20, %v442_v21  ;;  %v292_v8 = vpop.permute.xlu2 %291  ;;  %v1623_v20 = vsel %vm323_vm3, 1.0, %v1802_v52 }
  0x8d   :  { %v247_v17 = vpop.permute.xlu0 %246  ;;  %v280_v22 = vpop.permute.xlu1 %279  ;;  %vm334_vm5 = vcmp.eq.s32.totalorder %v1973_v48, %v292_v8 }
  0x8e   :  { %vm330_vm9 = vcmp.eq.s32.totalorder %v1973_v48, %v280_v22  ;;  %vm319_vm10 = vcmp.eq.s32.totalorder %v1973_v48, %v247_v17  ;;  %v1585_v17 = vor.u32 %v1761_v13, %v1584_v11  ;;  %v1634_v21 = vsel %vm334_vm5, 1.0, %v1802_v52  ;;  %v2119_v13 = vld [vmem:[%s2713_s5 + $0x18] sm:$0xff] }
  0x8f   :  { %v1630_v27 = vsel %vm330_vm9, 1.0, %v1802_v52  ;;  %v1619_v28 = vsel %vm319_vm10, 1.0, %v1802_v52  ;;  %v418_v26 = vpack.c.bf16 %v1634_v21, %v1634_v21 }
  0x90   :  { %v414_v31 = vpack.c.bf16 %v1630_v27, %v1630_v27  ;;  %v403_v32 = vpack.c.bf16 %v1619_v28, %v1619_v28  ;;  %193 = vmatpush.bf16.msra.mxu0 %v1585_v17  ;;  %v1568_v27 = vld [vmem:[%s2712_s3 + $0x20] sm:$0xf]  ;;  %v1757_v28 = vld [vmem:[%s2712_s3 + $0x24] sm:$0xf0] }
  0x91   :  { %v547_v33 = vunpack.c.l.b16 %v418_v26 }
  0x92   :  { %v543_v36 = vunpack.c.l.b16 %v414_v31  ;;  %v445_v37 = vunpack.c.l.b16 %v403_v32  ;;  %v1569_v31 = vor.u32 %v1757_v28, %v1568_v27 }
  0x94   :  { %v456_v43 = vpack.c.b16 %v445_v37, %v444_v40  ;;  %v556_v44 = vpack.c.b16 %v544_v41, %v543_v36  ;;  %v301_v37 = vpop.permute.xlu2 %300  ;;  %v1755_v40 = vld [vmem:[%s2712_s3 + $0x14] sm:$0xf0]  ;;  %v1552_v41 = vld [vmem:[%s2712_s3] sm:$0xf] }
  0x95   :  { %v286_v25 = vpop.permute.xlu0 %285  ;;  %v289_v42 = vpop.permute.xlu1 %288  ;;  %vm337_vm9 = vcmp.eq.s32.totalorder %v1973_v48, %v301_v37 }
  0x96   :  { %1643 = vmatmul.msk.bf16.gmra.mxu2 %vm461_vm4, %v455_v24  ;;  %1649 = vmatmul.msk.bf16.vlgmr.msrb.gmra.mxu3 %vm461_vm4, %v555_v23  ;;  %vm333_vm13 = vcmp.eq.s32.totalorder %v1973_v48, %v289_v42  ;;  %vm332_vm14 = vcmp.eq.s32.totalorder %v1973_v48, %v286_v25  ;;  %v1577_v24 = vor.u32 %v1759_v19, %v1576_v18  ;;  %v1637_v50 = vsel %vm337_vm9, 1.0, %v1802_v52  ;;  %v2136_v18 = vld [vmem:[%s2713_s5 + $0x8] sm:$0xff] }
  0x97   :  { %v1633_v53 = vsel %vm333_vm13, 1.0, %v1802_v52  ;;  %v1632_v54 = vsel %vm332_vm14, 1.0, %v1802_v52  ;;  %v407_v25 = vpack.c.bf16 %v1623_v20, %v1623_v20  ;;  %v1561_v42 = vor.u32 %v1755_v40, %v1560_v38 }
  0x98   :  { %v417_v60 = vpack.c.bf16 %v1633_v53, %v1633_v53  ;;  %v416_v61 = vpack.c.bf16 %v1632_v54, %v1632_v54  ;;  %194 = vmatpush.bf16.msra.mxu0 %v1577_v24 }
  0x99   :  { %v449_v32 = vunpack.c.l.b16 %v407_v25 }
  0x9a   :  { %v546_v1 = vunpack.c.l.b16 %v417_v60  ;;  %v545_v2 = vunpack.c.l.b16 %v416_v61 }
  0x9c   :  { %v557_v7 = vpack.c.b16 %v546_v1, %v545_v2  ;;  %195 = vmatpush.bf16.msra.mxu0 %v1569_v31  ;;  %v2098_v1 = vld [vmem:[%s2713_s5 + $0x30] sm:$0xff]  ;;  %v310_v12 = vpop.permute.xlu2 %309 }
  0x9d   :  { %v253_v35 = vpop.permute.xlu0 %252  ;;  %v256_v0 = vpop.permute.xlu1 %255  ;;  %vm340_vm13 = vcmp.eq.s32.totalorder %v1973_v48, %v310_v12 }
  0x9e   :  { %vm321_vm15 = vcmp.eq.s32.totalorder %v1973_v48, %v253_v35  ;;  %vm322_vm1 = vcmp.eq.s32.totalorder %v1973_v48, %v256_v0  ;;  %v2092_v0 = vld [vmem:[%s2713_s5 + $0x38] sm:$0xff] }
  0x9f   :  { %v1621_v55 = vsel %vm321_vm15, 1.0, %v1802_v52  ;;  %v1622_v14 = vsel %vm322_vm1, 1.0, %v1802_v52 }
  0xa0   :  { %v405_v62 = vpack.c.bf16 %v1621_v55, %v1621_v55  ;;  %v406_v22 = vpack.c.bf16 %v1622_v14, %v1622_v14  ;;  %196 = vmatpush.bf16.msra.mxu0 %v1561_v42  ;;  %v421_v55 = vpack.c.bf16 %v1637_v50, %v1637_v50  ;;  %v1610_v50 = vld [vmem:[%s2712_s3 + $0x78] sm:$0xf0] }
  0xa2   :  { %v447_v3 = vunpack.c.l.b16 %v405_v62  ;;  %v448_v29 = vunpack.c.l.b16 %v406_v22  ;;  %v550_v59 = vunpack.c.l.b16 %v421_v55 }
  0xa4   :  { %v457_v6 = vpack.c.b16 %v447_v3, %v446_v4  ;;  %v458_v35 = vpack.c.b16 %v449_v32, %v448_v29 }
  0xa5   :  { %v2024_v56 = vpop.permute.xlu0 %261  ;;  %v265_v15 = vpop.permute.xlu1 %264 }
  0xa6   :  { %1644 = vmatmul.msk.bf16.gmra.mxu2 %vm461_vm4, %v456_v43  ;;  %1650 = vmatmul.msk.bf16.gmra.mxu3 %vm461_vm4, %v556_v44  ;;  %vm325_vm6 = vcmp.eq.s32.totalorder %v1973_v48, %v265_v15  ;;  %vm324_vm7 = vcmp.eq.s32.totalorder %v1973_v48, %v2024_v56  ;;  %v1753_v43 = vld [vmem:[%s2712_s3 + $0x4] sm:$0xf0]  ;;  %v1640_v15 = vsel %vm340_vm13, 1.0, %v1802_v52 }
  0xa7   :  { %v1625_v44 = vsel %vm325_vm6, 1.0, %v1802_v52  ;;  %v1624_v45 = vsel %vm324_vm7, 1.0, %v1802_v52  ;;  %v1553_v49 = vor.u32 %v1753_v43, %v1552_v41 }
  0xa8   :  { %v409_v51 = vpack.c.bf16 %v1625_v44, %v1625_v44  ;;  %v408_v53 = vpack.c.bf16 %v1624_v45, %v1624_v45 }
  0xa9   :  { %197 = vmatpush.bf16.msra.mxu0 %v1553_v49  ;;  %v1766_v49 = vld [vmem:[%s2712_s3 + $0x74] sm:$0xf] }
  0xaa   :  { %v451_v56 = vunpack.c.l.b16 %v409_v51  ;;  %v450_v57 = vunpack.c.l.b16 %v408_v53  ;;  %v1613_v51 = vor.u32 %v1766_v49, %v1610_v50  ;;  %v1764_v53 = vld [vmem:[%s2712_s3 + $0x64] sm:$0xf]  ;;  %v2251_v49 = vld [vmem:[%s2714_s6 + $0x28] sm:$0xff] }
  0xab   :  { %v2259_v50 = vld [vmem:[%s2714_s6 + $0x20] sm:$0xff] }
  0xac   :  { %198 = vmatmul.bf16.vlgmr.msra.gmra.mxu0 %v1960_v39  ;;  %v459_v62 = vpack.c.b16 %v451_v56, %v450_v57  ;;  %209 = vmatpush.bf16.msra.mxu1 %v1613_v51 }
  0xad   :  { %v295_v5 = vpop.permute.xlu0 %294  ;;  %v298_v34 = vpop.permute.xlu1 %297  ;;  %731 = vmatpush.bf16.msrb.mxu0 %v2092_v0 }
  0xae   :  { %vm335_vm2 = vcmp.eq.s32.totalorder %v1973_v48, %v295_v5  ;;  %vm336_vm8 = vcmp.eq.s32.totalorder %v1973_v48, %v298_v34 }
  0xaf   :  { %v1635_v16 = vsel %vm335_vm2, 1.0, %v1802_v52  ;;  %v1636_v47 = vsel %vm336_vm8, 1.0, %v1802_v52 }
  0xb0   :  { %v419_v23 = vpack.c.bf16 %v1635_v16, %v1635_v16  ;;  %v420_v54 = vpack.c.bf16 %v1636_v47, %v1636_v47  ;;  %v2130_v16 = vld [vmem:[%s2713_s5 + $0x10] sm:$0xff] }
  0xb1   :  { %732 = vmatpush.bf16.msrb.mxu0 %v2098_v1 }
  0xb2   :  { %v548_v30 = vunpack.c.l.b16 %v419_v23  ;;  %v549_v58 = vunpack.c.l.b16 %v420_v54  ;;  %v1602_v54 = vld [vmem:[%s2712_s3 + $0x68] sm:$0xf0] }
  0xb3   :  { %v1605_v55 = vor.u32 %v1764_v53, %v1602_v54 }
  0xb4   :  { %v558_v36 = vpack.c.b16 %v548_v30, %v547_v33  ;;  %v559_v63 = vpack.c.b16 %v550_v59, %v549_v58  ;;  %v1762_v58 = vld [vmem:[%s2712_s3 + $0x54] sm:$0xf]  ;;  %v1594_v59 = vld [vmem:[%s2712_s3 + $0x58] sm:$0xf0] }
  0xb5   :  { %v307_v60 = vpop.permute.xlu1 %306  ;;  %v304_v61 = vpop.permute.xlu0 %303  ;;  %210 = vmatpush.bf16.msra.mxu1 %v1605_v55  ;;  %v2266_v55 = vld [vmem:[%s2714_s6 + $0x18] sm:$0xff] }
  0xb6   :  { %1645 = vmatmul.msk.bf16.gmra.mxu2 %vm461_vm4, %v457_v6  ;;  %1651 = vmatmul.msk.bf16.gmra.mxu3 %vm461_vm4, %v557_v7  ;;  %vm339_vm10 = vcmp.eq.s32.totalorder %v1973_v48, %v307_v60  ;;  %vm338_vm11 = vcmp.eq.s32.totalorder %v1973_v48, %v304_v61  ;;  %v2106_v6 = vld [vmem:[%s2713_s5 + $0x28] sm:$0xff]  ;;  %v1597_v60 = vor.u32 %v1762_v58, %v1594_v59  ;;  %v1760_v61 = vld [vmem:[%s2712_s3 + $0x44] sm:$0xf] }
  0xb7   :  { %v1639_v2 = vsel %vm339_vm10, 1.0, %v1802_v52  ;;  %v1638_v3 = vsel %vm338_vm11, 1.0, %v1802_v52  ;;  %733 = vmatpush.bf16.msrb.mxu0 %v2106_v6 }
  0xb8   :  { %v423_v4 = vpack.c.bf16 %v1639_v2, %v1639_v2  ;;  %v422_v5 = vpack.c.bf16 %v1638_v3, %v1638_v3 }
  0xb9   :  { %211 = vmatpush.bf16.msra.mxu1 %v1597_v60 }
  0xba   :  { %v552_v7 = vunpack.c.l.b16 %v423_v4  ;;  %v551_v8 = vunpack.c.l.b16 %v422_v5  ;;  %v1758_v4 = vld [vmem:[%s2712_s3 + $0x34] sm:$0xf]  ;;  %v1578_v5 = vld [vmem:[%s2712_s3 + $0x38] sm:$0xf0] }
  0xbb   :  { %734 = vmatpush.bf16.msrb.mxu0 %v2113_v9 }
  0xbc   :  { %203 = vmatmul.bf16.gmra.mxu0 %v1970_v46  ;;  %v560_v11 = vpack.c.b16 %v552_v7, %v551_v8  ;;  %v1581_v7 = vor.u32 %v1758_v4, %v1578_v5  ;;  %v1756_v8 = vld [vmem:[%s2712_s3 + $0x24] sm:$0xf] }
  0xbd   :  { %v313_v10 = vpop.permute.xlu0 %312 }
  0xbe   :  { %vm341_vm12 = vcmp.eq.s32.totalorder %v1973_v48, %v313_v10  ;;  %v424_v48 = vpack.c.bf16 %v1640_v15, %v1640_v15  ;;  %v1570_v10 = vld [vmem:[%s2712_s3 + $0x28] sm:$0xf0] }
  0xbf   :  { %v1641_v14 = vsel %vm341_vm12, 1.0, %v1802_v52  ;;  %735 = vmatpush.bf16.msrb.mxu0 %v2119_v13  ;;  %v2142_v52 = vld [vmem:[%s2713_s5] sm:$0xff] }
  0xc0   :  { %v425_v17 = vpack.c.bf16 %v1641_v14, %v1641_v14  ;;  %v553_v20 = vunpack.c.l.b16 %v424_v48  ;;  %v1754_v48 = vld [vmem:[%s2712_s3 + $0x14] sm:$0xf] }
  0xc2   :  { %v554_v19 = vunpack.c.l.b16 %v425_v17 }
  0xc3   :  { %736 = vmatpush.bf16.msrb.mxu0 %v2130_v16 }
  0xc4   :  { %v561_v21 = vpack.c.b16 %v554_v19, %v553_v20  ;;  %v1562_v19 = vld [vmem:[%s2712_s3 + $0x18] sm:$0xf0] }
  0xc5   :  { %v1565_v20 = vor.u32 %v1754_v48, %v1562_v19 }
  0xc6   :  { %1646 = vmatmul.msk.bf16.gmra.mxu2 %vm461_vm4, %v458_v35  ;;  %1652 = vmatmul.msk.bf16.gmra.mxu3 %vm461_vm4, %v558_v36 }
  0xc7   :  { %737 = vmatpush.bf16.msrb.mxu0 %v2136_v18 }
  0xcb   :  { %738 = vmatpush.bf16.msrb.mxu0 %v2142_v52 }
  0xd6   :  { %1647 = vmatmul.msk.bf16.gmra.mxu2 %vm461_vm4, %v459_v62  ;;  %1653 = vmatmul.msk.bf16.gmra.mxu3 %vm461_vm4, %v559_v63  ;;  %v1586_v62 = vld [vmem:[%s2712_s3 + $0x48] sm:$0xf0] }
  0xd7   :  { %v1589_v63 = vor.u32 %v1760_v61, %v1586_v62  ;;  %v2280_v61 = vld [vmem:[%s2714_s6 + $0x10] sm:$0xff] }
  0xd9   :  { %212 = vmatpush.bf16.msra.mxu1 %v1589_v63  ;;  %v2286_v63 = vld [vmem:[%s2714_s6 + $0x8] sm:$0xff] }
  0xdd   :  { %213 = vmatpush.bf16.msra.mxu1 %v1581_v7  ;;  %v92_v7 = vld [vmem:[%s2716_s4] sm:$0x3] }
  0xe6   :  { %1654 = vmatmul.msk.bf16.gmra.mxu3 %vm461_vm4, %v560_v11  ;;  %v1573_v11 = vor.u32 %v1756_v8, %v1570_v10  ;;  %v94_v10 = vperm.slane %v92_v7, 0 }
  0xe8   :  { %214 = vmatpush.bf16.msra.mxu1 %v1573_v11 }
  0xec   :  { %215 = vmatpush.bf16.msra.mxu1 %v1565_v20 }
  0xf6   :  { %1655 = vmatmul.msk.bf16.gmra.mxu3 %vm461_vm4, %v561_v21 }
 0x109   :  { %v492_v22 = vpop.f32.mrf.mxu2  ;;  %v2146_v23 = vpop.f32.mrf.mxu3 }
 0x10a   :  { %v627_v24 = vpack.c.bf16 %v492_v22, %v492_v22 }
 0x10c   :  { %v675_v28 = vunpack.c.l.b16 %v627_v24  ;;  %v1752_v24 = vld [vmem:[%s2712_s3 + $0x4] sm:$0xf] }
 0x111   :  { %v494_v25 = vpop.f32.mrf.mxu2  ;;  %v2148_v26 = vpop.f32.mrf.mxu3 }
 0x112   :  { %v628_v27 = vpack.c.bf16 %v494_v25, %v494_v25  ;;  %v1554_v25 = vld [vmem:[%s2712_s3 + $0x8] sm:$0xf0] }
 0x114   :  { %v676_v29 = vunpack.c.l.b16 %v628_v27  ;;  %v1557_v27 = vor.u32 %v1752_v24, %v1554_v25 }
 0x116   :  { %v679_v30 = vpack.c.b16 %v676_v29, %v675_v28  ;;  %216 = vmatpush.bf16.msra.mxu1 %v1557_v27 }
 0x118   :  { %739 = vmatmul.bf16.vlgmr.msrb.gmra.mxu0 %v679_v30 }
 0x119   :  { %v2150_v31 = vpop.f32.mrf.mxu2  ;;  %v592_v32 = vpop.f32.mrf.mxu3  ;;  %217 = vmatmul.bf16.vlgmr.msra.gmra.mxu1 %v1960_v39  ;;  %v2243_v39 = vld [vmem:[%s2714_s6 + $0x30] sm:$0xff] }
 0x11a   :  { %v641_v33 = vpack.c.bf16 %v592_v32, %v592_v32 }
 0x11c   :  { %v677_v37 = vunpack.c.l.b16 %v641_v33 }
 0x121   :  { %v2152_v34 = vpop.f32.mrf.mxu2  ;;  %v594_v35 = vpop.f32.mrf.mxu3 }
 0x122   :  { %v642_v36 = vpack.c.bf16 %v594_v35, %v594_v35  ;;  %v2232_v35 = vld [vmem:[%s2714_s6 + $0x38] sm:$0xff] }
 0x123   :  { %828 = vmatpush.bf16.msrb.mxu1 %v2232_v35  ;;  %989 = vmatpush.bf16.msrb.mxu2 %v2232_v35 }
 0x124   :  { %v678_v38 = vunpack.c.l.b16 %v642_v36 }
 0x126   :  { %v680_v40 = vpack.c.b16 %v678_v38, %v677_v37 }
 0x127   :  { %829 = vmatpush.bf16.msrb.mxu1 %v2243_v39  ;;  %990 = vmatpush.bf16.msrb.mxu2 %v2243_v39 }
 0x128   :  { %744 = vmatmul.bf16.gmra.mxu0 %v680_v40 }
 0x129   :  { %v2154_v41 = vpop.f32.mrf.mxu2  ;;  %v2156_v42 = vpop.f32.mrf.mxu3  ;;  %222 = vmatmul.bf16.gmra.mxu1 %v1970_v46 }
 0x12a   :  { %v199_v51 = vpop.f32.mrf.mxu0 }
 0x12b   :  { %830 = vmatpush.bf16.msrb.mxu1 %v2251_v49  ;;  %991 = vmatpush.bf16.msrb.mxu2 %v2251_v49  ;;  %v2307_v11 = vadd.f32 %v199_v51, %v94_v10 }
 0x12f   :  { %831 = vmatpush.bf16.msrb.mxu1 %v2259_v50  ;;  %992 = vmatpush.bf16.msrb.mxu2 %v2259_v50 }
 0x131   :  { %v2158_v43 = vpop.f32.mrf.mxu2  ;;  %v2160_v44 = vpop.f32.mrf.mxu3 }
 0x132   :  { %v201_v62 = vpop.f32.mrf.mxu0  ;;  %v644_v7 = vpack.c.bf16 %v2160_v44, %v2160_v44  ;;  %v2349_v44 = vld [vmem:[%s2717_s8 + $0x30] sm:$0xff] }
 0x133   :  { %832 = vmatpush.bf16.msrb.mxu1 %v2266_v55  ;;  %993 = vmatpush.bf16.msrb.mxu2 %v2266_v55 }
 0x137   :  { %833 = vmatpush.bf16.msrb.mxu1 %v2280_v61  ;;  %994 = vmatpush.bf16.msrb.mxu2 %v2280_v61 }
 0x139   :  { %v2162_v45 = vpop.f32.mrf.mxu2  ;;  %v2164_v47 = vpop.f32.mrf.mxu3 }
 0x13a   :  { %v204_v4 = vpop.f32.mrf.mxu0 }
 0x13b   :  { %834 = vmatpush.bf16.msrb.mxu1 %v2286_v63  ;;  %995 = vmatpush.bf16.msrb.mxu2 %v2286_v63  ;;  %v2317_v27 = vadd.f32 %v204_v4, %v94_v10 }
 0x141   :  { %v2178_v56 = vpop.f32.mrf.mxu2  ;;  %v2180_v57 = vpop.f32.mrf.mxu3 }
 0x142   :  { %v206_v5 = vpop.f32.mrf.mxu0 }
 0x149   :  { %v512_v2 = vpop.f32.mrf.mxu2  ;;  %v2194_v3 = vpop.f32.mrf.mxu3 }
 0x14a   :  { %v635_v12 = vpack.c.bf16 %v512_v2, %v512_v2  ;;  %v2294_v2 = vld [vmem:[%s2714_s6] sm:$0xff] }
 0x14b   :  { %835 = vmatpush.bf16.msrb.mxu1 %v2294_v2  ;;  %996 = vmatpush.bf16.msrb.mxu2 %v2294_v2 }
 0x14c   :  { %v2216_v21 = vunpack.c.l.b16 %v635_v12  ;;  %v2310_v12 = vadd.f32 %v201_v62, %v94_v10 }
 0x14f   :  { %960 = vmatpush.bf16.msra.mxu1 %v2092_v0 }
 0x151   :  { %v514_v14 = vpop.f32.mrf.mxu2  ;;  %v2208_v15 = vpop.f32.mrf.mxu3 }
 0x152   :  { %v636_v17 = vpack.c.bf16 %v514_v14, %v514_v14 }
 0x153   :  { %961 = vmatpush.bf16.msra.mxu1 %v2098_v1 }
 0x154   :  { %v2218_v22 = vunpack.c.l.b16 %v636_v17 }
 0x157   :  { %962 = vmatpush.bf16.msra.mxu1 %v2106_v6 }
 0x159   :  { %v612_v29 = vpop.f32.mrf.mxu3 }
 0x15a   :  { %v649_v30 = vpack.c.bf16 %v612_v29, %v612_v29  ;;  %v2319_v29 = vadd.f32 %v206_v5, %v94_v10 }
 0x15b   :  { %963 = vmatpush.bf16.msra.mxu1 %v2113_v9 }
 0x15c   :  { %v2234_v36 = vunpack.c.l.b16 %v649_v30 }
 0x15f   :  { %964 = vmatpush.bf16.msra.mxu1 %v2119_v13 }
 0x161   :  { %v614_v32 = vpop.f32.mrf.mxu3 }
 0x162   :  { %v650_v33 = vpack.c.bf16 %v614_v32, %v614_v32 }
 0x163   :  { %965 = vmatpush.bf16.msra.mxu1 %v2130_v16 }
 0x164   :  { %v2236_v37 = vunpack.c.l.b16 %v650_v33 }
 0x167   :  { %966 = vmatpush.bf16.msra.mxu1 %v2136_v18 }
 0x169   :  { %v617_v40 = vpop.f32.mrf.mxu3 }
 0x16a   :  { %v651_v53 = vpack.c.bf16 %v617_v40, %v617_v40 }
 0x16b   :  { %967 = vmatpush.bf16.msra.mxu1 %v2142_v52 }
 0x16c   :  { %v2269_v58 = vunpack.c.l.b16 %v651_v53 }
 0x171   :  { %v619_v54 = vpop.f32.mrf.mxu3 }
 0x172   :  { %v652_v46 = vpack.c.bf16 %v619_v54, %v619_v54  ;;  %v630_v54 = vpack.c.bf16 %v2152_v34, %v2152_v34  ;;  %v643_v34 = vpack.c.bf16 %v2156_v42, %v2156_v42  ;;  %v2355_v42 = vld [vmem:[%s2717_s8 + $0x28] sm:$0xff] }
 0x174   :  { %v2271_v59 = vunpack.c.l.b16 %v652_v46  ;;  %v629_v46 = vpack.c.bf16 %v2150_v31, %v2150_v31  ;;  %v953_v62 = vunpack.c.l.b16 %v630_v54  ;;  %v955_v31 = vunpack.c.l.b16 %v644_v7 }
 0x175   :  { %v954_v10 = vunpack.c.l.b16 %v643_v34 }
 0x176   :  { %v952_v4 = vunpack.c.l.b16 %v629_v46 }
 0x178   :  { %v956_v5 = vpack.c.b16 %v953_v62, %v952_v4 }
 0x195   :  { %v740_v8 = vpop.f32.mrf.mxu0 }
 0x196   :  { %v750_v14 = vadd.f32 %v740_v8, %v2307_v11  ;;  %v2338_v8 = vld [vmem:[%s2717_s8 + $0x38] sm:$0xff] }
 0x197   :  { %921 = vmatpush.bf16.msra.mxu0 %v2338_v8  ;;  %1014 = vmatpush.bf16.msra.mxu3 %v2338_v8 }
 0x198   :  { %v754_v19 = vmax.f32 %v750_v14, 0.0  ;;  %1107 = vmatpush.bf16.msra.mxu2 %v2338_v8  ;;  %v957_v14 = vpack.c.b16 %v955_v31, %v954_v10 }
 0x19b   :  { %922 = vmatpush.bf16.msra.mxu0 %v2349_v44  ;;  %1015 = vmatpush.bf16.msra.mxu3 %v2349_v44 }
 0x19c   :  { %1108 = vmatpush.bf16.msra.mxu2 %v2349_v44 }
 0x19d   :  { %v742_v17 = vpop.f32.mrf.mxu0 }
 0x19e   :  { %v751_v48 = vadd.f32 %v742_v17, %v2310_v12  ;;  %v2364_v17 = vld [vmem:[%s2717_s8 + $0x20] sm:$0xff] }
 0x19f   :  { %923 = vmatpush.bf16.msra.mxu0 %v2355_v42  ;;  %1016 = vmatpush.bf16.msra.mxu3 %v2355_v42 }
 0x1a0   :  { %v755_v20 = vmax.f32 %v751_v48, 0.0  ;;  %1109 = vmatpush.bf16.msra.mxu2 %v2355_v42  ;;  %v2373_v48 = vld [vmem:[%s2717_s8 + $0x18] sm:$0xff] }
 0x1a2   :  { %v758_v24 = vpack.c.bf16 %v755_v20, %v754_v19  ;;  %v2382_v19 = vpop.f32.mrf.mxu1  ;;  %v2387_v20 = vld [vmem:[%s2717_s8 + $0x10] sm:$0xff] }
 0x1a3   :  { %924 = vmatpush.bf16.msra.mxu0 %v2364_v17  ;;  %1017 = vmatpush.bf16.msra.mxu3 %v2364_v17 }
 0x1a4   :  { %836 = vmatmul.bf16.vlgmr.msrb.gmra.mxu1 %v758_v24  ;;  %1110 = vmatpush.bf16.msra.mxu2 %v2364_v17 }
 0x1a5   :  { %v745_v25 = vpop.f32.mrf.mxu0  ;;  %1082 = vmatpush.bf16.msrb.mxu1 %v2232_v35 }
 0x1a6   :  { %v752_v30 = vadd.f32 %v745_v25, %v2317_v27  ;;  %v2395_v25 = vld [vmem:[%s2717_s8 + $0x8] sm:$0xff] }
 0x1a7   :  { %925 = vmatpush.bf16.msra.mxu0 %v2373_v48  ;;  %1018 = vmatpush.bf16.msra.mxu3 %v2373_v48 }
 0x1a8   :  { %v756_v40 = vmax.f32 %v752_v30, 0.0  ;;  %1111 = vmatpush.bf16.msra.mxu2 %v2373_v48  ;;  %v2407_v30 = vld [vmem:[%s2717_s8] sm:$0xff] }
 0x1a9   :  { %1083 = vmatpush.bf16.msrb.mxu1 %v2243_v39 }
 0x1aa   :  { %v2389_v24 = vpop.f32.mrf.mxu1 }
 0x1ab   :  { %926 = vmatpush.bf16.msra.mxu0 %v2387_v20  ;;  %1019 = vmatpush.bf16.msra.mxu3 %v2387_v20 }
 0x1ac   :  { %1112 = vmatpush.bf16.msra.mxu2 %v2387_v20 }
 0x1ad   :  { %v747_v32 = vpop.f32.mrf.mxu0  ;;  %1084 = vmatpush.bf16.msrb.mxu1 %v2251_v49 }
 0x1ae   :  { %v753_v33 = vadd.f32 %v747_v32, %v2319_v29 }
 0x1af   :  { %927 = vmatpush.bf16.msra.mxu0 %v2395_v25  ;;  %1020 = vmatpush.bf16.msra.mxu3 %v2395_v25 }
 0x1b0   :  { %v757_v51 = vmax.f32 %v753_v33, 0.0  ;;  %1113 = vmatpush.bf16.msra.mxu2 %v2395_v25 }
 0x1b1   :  { %1085 = vmatpush.bf16.msrb.mxu1 %v2259_v50 }
 0x1b2   :  { %v759_v53 = vpack.c.bf16 %v757_v51, %v756_v40  ;;  %v2413_v32 = vpop.f32.mrf.mxu1  ;;  %v2432_v51 = vld [vmem:[%s2715_s7] ss:$0 sm:$0xff] }
 0x1b3   :  { %928 = vmatpush.bf16.msra.mxu0 %v2407_v30  ;;  %1021 = vmatpush.bf16.msra.mxu3 %v2407_v30  ;;  %2720 = vst [vmem:[#allocation2_spill] sm:$0xff] %v2413_v32 }
 0x1b4   :  { %841 = vmatmul.bf16.gmra.mxu1 %v759_v53  ;;  %1114 = vmatpush.bf16.msra.mxu2 %v2407_v30 }
 0x1b5   :  { %1086 = vmatpush.bf16.msrb.mxu1 %v2266_v55 }
 0x1b7   :  { %1053 = vmatpush.bf16.msrb.mxu0 %v2092_v0  ;;  %1146 = vmatpush.bf16.msrb.mxu3 %v2092_v0 }
 0x1b9   :  { %1087 = vmatpush.bf16.msrb.mxu1 %v2280_v61 }
 0x1ba   :  { %v2421_v33 = vpop.f32.mrf.mxu1 }
 0x1bb   :  { %1054 = vmatpush.bf16.msrb.mxu0 %v2098_v1  ;;  %1147 = vmatpush.bf16.msrb.mxu3 %v2098_v1  ;;  %2721 = vst [vmem:[#allocation3_spill] sm:$0xff] %v2421_v33 }
 0x1bd   :  { %1088 = vmatpush.bf16.msrb.mxu1 %v2286_v63 }
 0x1bf   :  { %1055 = vmatpush.bf16.msrb.mxu0 %v2106_v6  ;;  %1148 = vmatpush.bf16.msrb.mxu3 %v2106_v6 }
 0x1c1   :  { %1089 = vmatpush.bf16.msrb.mxu1 %v2294_v2 }
 0x1c3   :  { %1056 = vmatpush.bf16.msrb.mxu0 %v2113_v9  ;;  %1149 = vmatpush.bf16.msrb.mxu3 %v2113_v9 }
 0x1c4   :  { %968 = vmatmul.bf16.vlgmr.msra.gmra.mxu1 %v956_v5 }
 0x1c5   :  { %1200 = vmatpush.bf16.msra.mxu1 %v2338_v8 }
 0x1c7   :  { %1057 = vmatpush.bf16.msrb.mxu0 %v2119_v13  ;;  %1150 = vmatpush.bf16.msrb.mxu3 %v2119_v13 }
 0x1c9   :  { %1201 = vmatpush.bf16.msra.mxu1 %v2349_v44 }
 0x1cb   :  { %1058 = vmatpush.bf16.msrb.mxu0 %v2130_v16  ;;  %1151 = vmatpush.bf16.msrb.mxu3 %v2130_v16 }
 0x1cd   :  { %1202 = vmatpush.bf16.msra.mxu1 %v2355_v42 }
 0x1cf   :  { %1059 = vmatpush.bf16.msrb.mxu0 %v2136_v18  ;;  %1152 = vmatpush.bf16.msrb.mxu3 %v2136_v18 }
 0x1d1   :  { %1203 = vmatpush.bf16.msra.mxu1 %v2364_v17 }
 0x1d3   :  { %1060 = vmatpush.bf16.msrb.mxu0 %v2142_v52  ;;  %1153 = vmatpush.bf16.msrb.mxu3 %v2142_v52 }
 0x1d4   :  { %973 = vmatmul.bf16.gmra.mxu1 %v957_v14 }
 0x1d5   :  { %1204 = vmatpush.bf16.msra.mxu1 %v2373_v48 }
 0x1d9   :  { %1205 = vmatpush.bf16.msra.mxu1 %v2387_v20 }
 0x1dd   :  { %1206 = vmatpush.bf16.msra.mxu1 %v2395_v25 }
 0x1e1   :  { %1207 = vmatpush.bf16.msra.mxu1 %v2407_v30 }
 0x221   :  { %v837_v40 = vpop.f32.mrf.mxu1 }
 0x222   :  { %v838_v53 = vadd.f32 %v2432_v51, %v837_v40 }
 0x224   :  { %v847_v62 = vmax.f32 %v838_v53, 0.0 }
 0x229   :  { %v839_v54 = vpop.f32.mrf.mxu1 }
 0x22a   :  { %v840_v46 = vadd.f32 %v2432_v51, %v839_v54 }
 0x22c   :  { %v848_v4 = vmax.f32 %v840_v46, 0.0  ;;  %v632_v46 = vpack.c.bf16 %v2158_v43, %v2158_v43 }
 0x22e   :  { %v851_v5 = vpack.c.bf16 %v848_v4, %v847_v62  ;;  %v631_v62 = vpack.c.bf16 %v2154_v41, %v2154_v41  ;;  %v646_v41 = vpack.c.bf16 %v2180_v57, %v2180_v57 }
 0x230   :  { %929 = vmatmul.bf16.vlgmr.msra.gmra.mxu0 %v851_v5 }
 0x231   :  { %v842_v7 = vpop.f32.mrf.mxu1  ;;  %1175 = vmatpush.bf16.msra.mxu0 %v2232_v35 }
 0x232   :  { %v843_v34 = vadd.f32 %v2432_v51, %v842_v7  ;;  %v1046_v7 = vunpack.c.l.b16 %v632_v46 }
 0x234   :  { %v849_v14 = vmax.f32 %v843_v34, 0.0 }
 0x235   :  { %1176 = vmatpush.bf16.msra.mxu0 %v2243_v39 }
 0x239   :  { %v844_v31 = vpop.f32.mrf.mxu1  ;;  %1177 = vmatpush.bf16.msra.mxu0 %v2251_v49 }
 0x23a   :  { %v845_v10 = vadd.f32 %v2432_v51, %v844_v31  ;;  %v1045_v31 = vunpack.c.l.b16 %v631_v62 }
 0x23c   :  { %v850_v40 = vmax.f32 %v845_v10, 0.0 }
 0x23d   :  { %1178 = vmatpush.bf16.msra.mxu0 %v2259_v50 }
 0x23e   :  { %v852_v53 = vpack.c.bf16 %v850_v40, %v849_v14  ;;  %v1049_v40 = vpack.c.b16 %v1046_v7, %v1045_v31 }
 0x240   :  { %934 = vmatmul.bf16.gmra.mxu0 %v852_v53 }
 0x241   :  { %v969_v54 = vpop.f32.mrf.mxu1  ;;  %1179 = vmatpush.bf16.msra.mxu0 %v2266_v55 }
 0x242   :  { %v979_v4 = vadd.f32 %v969_v54, %v2307_v11  ;;  %v645_v54 = vpack.c.bf16 %v2164_v47, %v2164_v47 }
 0x244   :  { %v983_v10 = vmax.f32 %v979_v4, 0.0  ;;  %v1048_v4 = vunpack.c.l.b16 %v646_v41  ;;  %v1047_v7 = vunpack.c.l.b16 %v645_v54 }
 0x245   :  { %1180 = vmatpush.bf16.msra.mxu0 %v2280_v61 }
 0x249   :  { %v971_v5 = vpop.f32.mrf.mxu1  ;;  %1181 = vmatpush.bf16.msra.mxu0 %v2286_v63 }
 0x24a   :  { %v980_v34 = vadd.f32 %v971_v5, %v2310_v12 }
 0x24c   :  { %v984_v14 = vmax.f32 %v980_v34, 0.0 }
 0x24d   :  { %1182 = vmatpush.bf16.msra.mxu0 %v2294_v2 }
 0x24e   :  { %v987_v53 = vpack.c.bf16 %v984_v14, %v983_v10  ;;  %v1050_v10 = vpack.c.b16 %v1048_v4, %v1047_v7 }
 0x250   :  { %997 = vmatmul.bf16.vlgmr.msrb.gmra.mxu2 %v987_v53  ;;  %1061 = vmatmul.bf16.vlgmr.msrb.gmra.mxu0 %v1049_v40  ;;  %v2484_v53 = vpop.f32.mrf.mxu2 }
 0x251   :  { %v974_v43 = vpop.f32.mrf.mxu1  ;;  %1239 = vmatpush.bf16.msrb.mxu2 %v2092_v0  ;;  %1293 = vmatpush.bf16.msrb.mxu0 %v2338_v8 }
 0x252   :  { %v981_v46 = vadd.f32 %v974_v43, %v2317_v27 }
 0x254   :  { %v985_v34 = vmax.f32 %v981_v46, 0.0 }
 0x255   :  { %1240 = vmatpush.bf16.msrb.mxu2 %v2098_v1  ;;  %1294 = vmatpush.bf16.msrb.mxu0 %v2349_v44 }
 0x258   :  { %v2488_v41 = vpop.f32.mrf.mxu2 }
 0x259   :  { %v976_v62 = vpop.f32.mrf.mxu1  ;;  %1241 = vmatpush.bf16.msrb.mxu2 %v2106_v6  ;;  %1295 = vmatpush.bf16.msrb.mxu0 %v2355_v42 }
 0x25a   :  { %v982_v5 = vadd.f32 %v976_v62, %v2319_v29 }
 0x25c   :  { %v986_v31 = vmax.f32 %v982_v5, 0.0 }
 0x25d   :  { %1242 = vmatpush.bf16.msrb.mxu2 %v2113_v9  ;;  %1296 = vmatpush.bf16.msrb.mxu0 %v2364_v17 }
 0x25e   :  { %v988_v57 = vpack.c.bf16 %v986_v31, %v985_v34 }
 0x260   :  { %1002 = vmatmul.bf16.gmra.mxu2 %v988_v57  ;;  %1066 = vmatmul.bf16.gmra.mxu0 %v1050_v10 }
 0x261   :  { %1243 = vmatpush.bf16.msrb.mxu2 %v2119_v13  ;;  %1297 = vmatpush.bf16.msrb.mxu0 %v2373_v48 }
 0x265   :  { %1244 = vmatpush.bf16.msrb.mxu2 %v2130_v16  ;;  %1298 = vmatpush.bf16.msrb.mxu0 %v2387_v20 }
 0x269   :  { %1245 = vmatpush.bf16.msrb.mxu2 %v2136_v18  ;;  %1299 = vmatpush.bf16.msrb.mxu0 %v2395_v25 }
 0x26d   :  { %1246 = vmatpush.bf16.msrb.mxu2 %v2142_v52  ;;  %1300 = vmatpush.bf16.msrb.mxu0 %v2407_v30 }
 0x2ad   :  { %v2478_v47 = vpop.f32.mrf.mxu0 }
 0x2b5   :  { %v2480_v14 = vpop.f32.mrf.mxu0 }
 0x2bd   :  { %v2482_v40 = vpop.f32.mrf.mxu0 }
 0x2c5   :  { %v2486_v43 = vpop.f32.mrf.mxu0 }
 0x2cd   :  { %v1062_v54 = vpop.f32.mrf.mxu0 }
 0x2ce   :  { %v1072_v62 = vadd.f32 %v1062_v54, %v2307_v11 }
 0x2d0   :  { %v1076_v7 = vmax.f32 %v1072_v62, 0.0 }
 0x2d3   :  { %v998_v46 = vpop.f32.mrf.mxu2 }
 0x2d4   :  { %v999_v31 = vadd.f32 %v2432_v51, %v998_v46 }
 0x2d5   :  { %v1064_v4 = vpop.f32.mrf.mxu0 }
 0x2d6   :  { %v1073_v5 = vadd.f32 %v1064_v4, %v2310_v12  ;;  %v1008_v28 = vmax.f32 %v999_v31, 0.0 }
 0x2d8   :  { %v1077_v34 = vmax.f32 %v1073_v5, 0.0 }
 0x2da   :  { %v1080_v57 = vpack.c.bf16 %v1077_v34, %v1076_v7 }
 0x2db   :  { %v1000_v10 = vpop.f32.mrf.mxu2 }
 0x2dc   :  { %v1001_v60 = vadd.f32 %v2432_v51, %v1000_v10  ;;  %1090 = vmatmul.bf16.vlgmr.msrb.gmra.mxu1 %v1080_v57  ;;  %v634_v57 = vpack.c.bf16 %v2178_v56, %v2178_v56  ;;  %v633_v10 = vpack.c.bf16 %v2162_v45, %v2162_v45  ;;  %v648_v56 = vpack.c.bf16 %v2208_v15, %v2208_v15  ;;  %v2530_v15 = vpop.f32.mrf.mxu3 }
 0x2dd   :  { %v1067_v38 = vpop.f32.mrf.mxu0  ;;  %1332 = vmatpush.bf16.msrb.mxu1 %v2092_v0 }
 0x2de   :  { %v1009_v33 = vmax.f32 %v1001_v60, 0.0  ;;  %v1074_v62 = vadd.f32 %v1067_v38, %v2317_v27  ;;  %v1141_v45 = vunpack.c.l.b16 %v648_v56 }
 0x2e0   :  { %v1012_v32 = vpack.c.bf16 %v1009_v33, %v1008_v28  ;;  %v1078_v5 = vmax.f32 %v1074_v62, 0.0  ;;  %v1138_v62 = vunpack.c.l.b16 %v633_v10 }
 0x2e1   :  { %1333 = vmatpush.bf16.msrb.mxu1 %v2098_v1 }
 0x2e2   :  { %1022 = vmatmul.bf16.vlgmr.msra.gmra.mxu3 %v1012_v32 }
 0x2e3   :  { %v1003_v54 = vpop.f32.mrf.mxu2  ;;  %1268 = vmatpush.bf16.msra.mxu3 %v2232_v35 }
 0x2e4   :  { %v1004_v28 = vadd.f32 %v2432_v51, %v1003_v54  ;;  %v1139_v54 = vunpack.c.l.b16 %v634_v57 }
 0x2e5   :  { %v1069_v46 = vpop.f32.mrf.mxu0  ;;  %1334 = vmatpush.bf16.msrb.mxu1 %v2106_v6 }
 0x2e6   :  { %v1075_v4 = vadd.f32 %v1069_v46, %v2319_v29  ;;  %v1010_v38 = vmax.f32 %v1004_v28, 0.0  ;;  %v1142_v46 = vpack.c.b16 %v1139_v54, %v1138_v62 }
 0x2e7   :  { %1269 = vmatpush.bf16.msra.mxu3 %v2243_v39 }
 0x2e8   :  { %v1079_v7 = vmax.f32 %v1075_v4, 0.0  ;;  %v647_v4 = vpack.c.bf16 %v2194_v3, %v2194_v3  ;;  %v2532_v3 = vpop.f32.mrf.mxu3 }
 0x2e9   :  { %1335 = vmatpush.bf16.msrb.mxu1 %v2113_v9 }
 0x2ea   :  { %v1081_v60 = vpack.c.bf16 %v1079_v7, %v1078_v5  ;;  %v1140_v5 = vunpack.c.l.b16 %v647_v4 }
 0x2eb   :  { %v1005_v32 = vpop.f32.mrf.mxu2  ;;  %1270 = vmatpush.bf16.msra.mxu3 %v2251_v49 }
 0x2ec   :  { %v1006_v33 = vadd.f32 %v2432_v51, %v1005_v32  ;;  %1095 = vmatmul.bf16.gmra.mxu1 %v1081_v60  ;;  %v1143_v7 = vpack.c.b16 %v1141_v45, %v1140_v5  ;;  %v2537_v60 = vld [vmem:[%s2718_s9] ss:$0 sm:$0xff] }
 0x2ed   :  { %1336 = vmatpush.bf16.msrb.mxu1 %v2119_v13  ;;  %v933_v5 = vadd.f32 %v2537_v60, %v2480_v14 }
 0x2ee   :  { %v1011_v34 = vmax.f32 %v1006_v33, 0.0 }
 0x2ef   :  { %1271 = vmatpush.bf16.msra.mxu3 %v2259_v50 }
 0x2f0   :  { %v1013_v31 = vpack.c.bf16 %v1011_v34, %v1010_v38  ;;  %v931_v34 = vadd.f32 %v2537_v60, %v2478_v47 }
 0x2f1   :  { %1337 = vmatpush.bf16.msrb.mxu1 %v2130_v16 }
 0x2f2   :  { %1027 = vmatmul.bf16.gmra.mxu3 %v1013_v31 }
 0x2f3   :  { %1272 = vmatpush.bf16.msra.mxu3 %v2266_v55 }
 0x2f5   :  { %1338 = vmatpush.bf16.msrb.mxu1 %v2136_v18 }
 0x2f7   :  { %1273 = vmatpush.bf16.msra.mxu3 %v2280_v61 }
 0x2f9   :  { %1339 = vmatpush.bf16.msrb.mxu1 %v2142_v52 }
 0x2fb   :  { %1274 = vmatpush.bf16.msra.mxu3 %v2286_v63 }
 0x2ff   :  { %1275 = vmatpush.bf16.msra.mxu3 %v2294_v2 }
 0x302   :  { %1154 = vmatmul.bf16.vlgmr.msrb.gmra.mxu3 %v1142_v46  ;;  %v940_v46 = vmax.f32 %v931_v34, 0.0 }
 0x303   :  { %1386 = vmatpush.bf16.msrb.mxu3 %v2338_v8 }
 0x307   :  { %1387 = vmatpush.bf16.msrb.mxu3 %v2349_v44 }
 0x30b   :  { %1388 = vmatpush.bf16.msrb.mxu3 %v2355_v42 }
 0x30f   :  { %1389 = vmatpush.bf16.msrb.mxu3 %v2364_v17 }
 0x312   :  { %1159 = vmatmul.bf16.gmra.mxu3 %v1143_v7 }
 0x313   :  { %1390 = vmatpush.bf16.msrb.mxu3 %v2373_v48 }
 0x317   :  { %1391 = vmatpush.bf16.msrb.mxu3 %v2387_v20 }
 0x31b   :  { %1392 = vmatpush.bf16.msrb.mxu3 %v2395_v25 }
 0x31f   :  { %1393 = vmatpush.bf16.msrb.mxu3 %v2407_v30 }
 0x359   :  { %v1091_v28 = vpop.f32.mrf.mxu1 }
 0x35a   :  { %v1092_v32 = vadd.f32 %v2432_v51, %v1091_v28  ;;  %v941_v28 = vmax.f32 %v933_v5, 0.0 }
 0x35c   :  { %v1101_v31 = vmax.f32 %v1092_v32, 0.0 }
 0x361   :  { %v1093_v33 = vpop.f32.mrf.mxu1 }
 0x362   :  { %v1094_v38 = vadd.f32 %v2432_v51, %v1093_v33 }
 0x364   :  { %v1102_v57 = vmax.f32 %v1094_v38, 0.0 }
 0x365   :  { %v1023_v10 = vpop.f32.mrf.mxu3 }
 0x366   :  { %v1105_v54 = vpack.c.bf16 %v1102_v57, %v1101_v31  ;;  %v1024_v62 = vadd.f32 %v2537_v60, %v1023_v10  ;;  %v936_v57 = vadd.f32 %v2537_v60, %v2482_v40 }
 0x368   :  { %v1033_v56 = vmax.f32 %v1024_v62, 0.0  ;;  %1115 = vmatmul.bf16.vlgmr.msra.gmra.mxu2 %v1105_v54 }
 0x369   :  { %v1096_v4 = vpop.f32.mrf.mxu1  ;;  %1361 = vmatpush.bf16.msra.mxu2 %v2232_v35 }
 0x36a   :  { %v2545_v45 = vadd.f32 %v1033_v56, %v940_v46  ;;  %v1097_v32 = vadd.f32 %v2432_v51, %v1096_v4  ;;  %v942_v56 = vmax.f32 %v936_v57, 0.0 }
 0x36c   :  { %v1103_v14 = vmax.f32 %v1097_v32, 0.0 }
 0x36d   :  { %v1025_v7 = vpop.f32.mrf.mxu3  ;;  %1362 = vmatpush.bf16.msra.mxu2 %v2243_v39 }
 0x36e   :  { %v1026_v47 = vadd.f32 %v2537_v60, %v1025_v7  ;;  %v938_v7 = vadd.f32 %v2537_v60, %v2486_v43 }
 0x370   :  { %v1034_v33 = vmax.f32 %v1026_v47, 0.0 }
 0x371   :  { %v1098_v38 = vpop.f32.mrf.mxu1  ;;  %1363 = vmatpush.bf16.msra.mxu2 %v2251_v49 }
 0x372   :  { %v2553_v34 = vadd.f32 %v1034_v33, %v941_v28  ;;  %v1099_v31 = vadd.f32 %v2432_v51, %v1098_v38  ;;  %v943_v28 = vmax.f32 %v938_v7, 0.0 }
 0x374   :  { %v1104_v10 = vmax.f32 %v1099_v31, 0.0  ;;  %v2722_v31 = vpack.c.b16 %v2218_v22, %v2216_v21  ;;  %v2723_v21 = vpack.c.b16 %v2236_v37, %v2234_v36 }
 0x375   :  { %v1028_v54 = vpop.f32.mrf.mxu3  ;;  %1364 = vmatpush.bf16.msra.mxu2 %v2259_v50 }
 0x376   :  { %v1029_v62 = vadd.f32 %v2537_v60, %v1028_v54  ;;  %v1106_v46 = vpack.c.bf16 %v1104_v10, %v1103_v14 }
 0x378   :  { %v1035_v4 = vmax.f32 %v1029_v62, 0.0  ;;  %1120 = vmatmul.bf16.gmra.mxu2 %v1106_v46 }
 0x379   :  { %1365 = vmatpush.bf16.msra.mxu2 %v2266_v55 }
 0x37a   :  { %v1039_v5 = vadd.f32 %v1035_v4, %v942_v56 }
 0x37d   :  { %v1030_v47 = vpop.f32.mrf.mxu3  ;;  %1366 = vmatpush.bf16.msra.mxu2 %v2280_v61 }
 0x37e   :  { %v1031_v40 = vadd.f32 %v2537_v60, %v1030_v47 }
 0x380   :  { %v1036_v32 = vmax.f32 %v1031_v40, 0.0 }
 0x381   :  { %1367 = vmatpush.bf16.msra.mxu2 %v2286_v63 }
 0x382   :  { %v1040_v33 = vadd.f32 %v1036_v32, %v943_v28 }
 0x385   :  { %v1155_v38 = vpop.f32.mrf.mxu3  ;;  %1368 = vmatpush.bf16.msra.mxu2 %v2294_v2 }
 0x386   :  { %v1165_v43 = vadd.f32 %v1155_v38, %v2307_v11 }
 0x388   :  { %1247 = vmatmul.bf16.vlgmr.msrb.gmra.mxu2 %v2722_v31  ;;  %v1169_v10 = vmax.f32 %v1165_v43, 0.0 }
 0x389   :  { %1479 = vmatpush.bf16.msrb.mxu2 %v2338_v8 }
 0x38d   :  { %v1157_v57 = vpop.f32.mrf.mxu3  ;;  %1480 = vmatpush.bf16.msrb.mxu2 %v2349_v44 }
 0x38e   :  { %v1166_v14 = vadd.f32 %v1157_v57, %v2310_v12 }
 0x390   :  { %v1170_v54 = vmax.f32 %v1166_v14, 0.0 }
 0x391   :  { %1481 = vmatpush.bf16.msrb.mxu2 %v2355_v42 }
 0x392   :  { %v1173_v62 = vpack.c.bf16 %v1170_v54, %v1169_v10 }
 0x394   :  { %1183 = vmatmul.bf16.vlgmr.msra.gmra.mxu0 %v1173_v62 }
 0x395   :  { %v1160_v46 = vpop.f32.mrf.mxu3  ;;  %1425 = vmatpush.bf16.msra.mxu0 %v2092_v0  ;;  %1482 = vmatpush.bf16.msrb.mxu2 %v2364_v17 }
 0x396   :  { %v1167_v22 = vadd.f32 %v1160_v46, %v2317_v27 }
 0x398   :  { %1252 = vmatmul.bf16.gmra.mxu2 %v2723_v21  ;;  %v1171_v0 = vmax.f32 %v1167_v22, 0.0 }
 0x399   :  { %1426 = vmatpush.bf16.msra.mxu0 %v2098_v1  ;;  %1483 = vmatpush.bf16.msrb.mxu2 %v2373_v48 }
 0x39d   :  { %v1162_v8 = vpop.f32.mrf.mxu3  ;;  %1427 = vmatpush.bf16.msra.mxu0 %v2106_v6  ;;  %1484 = vmatpush.bf16.msrb.mxu2 %v2387_v20 }
 0x39e   :  { %v1168_v44 = vadd.f32 %v1162_v8, %v2319_v29 }
 0x3a0   :  { %v1172_v42 = vmax.f32 %v1168_v44, 0.0 }
 0x3a1   :  { %1428 = vmatpush.bf16.msra.mxu0 %v2113_v9  ;;  %1485 = vmatpush.bf16.msrb.mxu2 %v2395_v25 }
 0x3a2   :  { %v1174_v36 = vpack.c.bf16 %v1172_v42, %v1171_v0 }
 0x3a4   :  { %1188 = vmatmul.bf16.gmra.mxu0 %v1174_v36 }
 0x3a5   :  { %1429 = vmatpush.bf16.msra.mxu0 %v2119_v13  ;;  %1486 = vmatpush.bf16.msrb.mxu2 %v2407_v30 }
 0x3a9   :  { %1430 = vmatpush.bf16.msra.mxu0 %v2130_v16 }
 0x3ad   :  { %1431 = vmatpush.bf16.msra.mxu0 %v2136_v18 }
 0x3b1   :  { %1432 = vmatpush.bf16.msra.mxu0 %v2142_v52 }
 0x3eb   :  { %v1116_v1 = vpop.f32.mrf.mxu2 }
 0x3ec   :  { %v1117_v6 = vadd.f32 %v2537_v60, %v1116_v1 }
 0x3ee   :  { %v1126_v37 = vmax.f32 %v1117_v6, 0.0 }
 0x3f0   :  { %v2595_v9 = vadd.f32 %v1126_v37, %v2545_v45 }
 0x3f3   :  { %v1118_v17 = vpop.f32.mrf.mxu2 }
 0x3f4   :  { %v1119_v48 = vadd.f32 %v2537_v60, %v1118_v17  ;;  %v637_v17 = vpack.c.bf16 %v2484_v53, %v2484_v53 }
 0x3f6   :  { %v1127_v20 = vmax.f32 %v1119_v48, 0.0  ;;  %v1324_v48 = vunpack.c.l.b16 %v637_v17 }
 0x3f8   :  { %v2599_v13 = vadd.f32 %v1127_v20, %v2553_v34 }
 0x3fb   :  { %v1121_v25 = vpop.f32.mrf.mxu2 }
 0x3fc   :  { %v1122_v16 = vadd.f32 %v2537_v60, %v1121_v25 }
 0x3fe   :  { %v1128_v18 = vmax.f32 %v1122_v16, 0.0 }
 0x400   :  { %v2602_v30 = vadd.f32 %v1128_v18, %v1039_v5 }
 0x403   :  { %v1123_v52 = vpop.f32.mrf.mxu2 }
 0x404   :  { %v1124_v56 = vadd.f32 %v2537_v60, %v1123_v52 }
 0x406   :  { %v1129_v4 = vmax.f32 %v1124_v56, 0.0 }
 0x408   :  { %v2605_v7 = vadd.f32 %v1129_v4, %v1040_v33 }
 0x40b   :  { %v1248_v45 = vpop.f32.mrf.mxu2 }
 0x40c   :  { %v1258_v40 = vadd.f32 %v1248_v45, %v2307_v11 }
 0x40e   :  { %v1262_v32 = vmax.f32 %v1258_v40, 0.0 }
 0x411   :  { %v1184_v47 = vpop.f32.mrf.mxu0 }
 0x412   :  { %v1185_v31 = vadd.f32 %v2432_v51, %v1184_v47 }
 0x413   :  { %v1250_v28 = vpop.f32.mrf.mxu2 }
 0x414   :  { %v1259_v34 = vadd.f32 %v1250_v28, %v2310_v12  ;;  %v1194_v10 = vmax.f32 %v1185_v31, 0.0 }
 0x416   :  { %v1263_v38 = vmax.f32 %v1259_v34, 0.0 }
 0x418   :  { %v1266_v43 = vpack.c.bf16 %v1263_v38, %v1262_v32 }
 0x419   :  { %v1186_v5 = vpop.f32.mrf.mxu0 }
 0x41a   :  { %v1187_v57 = vadd.f32 %v2432_v51, %v1186_v5  ;;  %1276 = vmatmul.bf16.vlgmr.msra.gmra.mxu3 %v1266_v43 }
 0x41b   :  { %v1253_v14 = vpop.f32.mrf.mxu2 }
 0x41c   :  { %v1195_v33 = vmax.f32 %v1187_v57, 0.0  ;;  %v1260_v46 = vadd.f32 %v1253_v14, %v2317_v27 }
 0x41e   :  { %v1198_v54 = vpack.c.bf16 %v1195_v33, %v1194_v10  ;;  %v1264_v8 = vmax.f32 %v1260_v46, 0.0 }
 0x420   :  { %1208 = vmatmul.bf16.vlgmr.msra.gmra.mxu1 %v1198_v54 }
 0x421   :  { %v1189_v62 = vpop.f32.mrf.mxu0  ;;  %1454 = vmatpush.bf16.msra.mxu1 %v2232_v35 }
 0x422   :  { %v1190_v0 = vadd.f32 %v2432_v51, %v1189_v62  ;;  %v640_v62 = vpack.c.bf16 %v2148_v26, %v2148_v26  ;;  %v654_v26 = vpack.c.bf16 %v2532_v3, %v2532_v3 }
 0x423   :  { %v1255_v21 = vpop.f32.mrf.mxu2 }
 0x424   :  { %v1261_v22 = vadd.f32 %v1255_v21, %v2319_v29  ;;  %v1196_v6 = vmax.f32 %v1190_v0, 0.0 }
 0x425   :  { %1455 = vmatpush.bf16.msra.mxu1 %v2243_v39  ;;  %v638_v39 = vpack.c.bf16 %v2488_v41, %v2488_v41 }
 0x426   :  { %v1265_v44 = vmax.f32 %v1261_v22, 0.0  ;;  %v1418_v22 = vunpack.c.l.b16 %v640_v62 }
 0x428   :  { %v1267_v42 = vpack.c.bf16 %v1265_v44, %v1264_v8 }
 0x429   :  { %v1191_v36 = vpop.f32.mrf.mxu0  ;;  %1456 = vmatpush.bf16.msra.mxu1 %v2251_v49  ;;  %v1325_v49 = vunpack.c.l.b16 %v638_v39 }
 0x42a   :  { %v1192_v1 = vadd.f32 %v2432_v51, %v1191_v36  ;;  %1281 = vmatmul.bf16.gmra.mxu3 %v1267_v42 }
 0x42b   :  { %v1328_v20 = vpack.c.b16 %v1325_v49, %v1324_v48 }
 0x42c   :  { %v1197_v35 = vmax.f32 %v1192_v1, 0.0 }
 0x42d   :  { %1457 = vmatpush.bf16.msra.mxu1 %v2259_v50  ;;  %v2724_v50 = vpack.c.b16 %v2271_v59, %v2269_v58 }
 0x42e   :  { %v1199_v37 = vpack.c.bf16 %v1197_v35, %v1196_v6 }
 0x430   :  { %1213 = vmatmul.bf16.gmra.mxu1 %v1199_v37  ;;  %v1420_v37 = vunpack.c.l.b16 %v654_v26 }
 0x431   :  { %1458 = vmatpush.bf16.msra.mxu1 %v2266_v55 }
 0x435   :  { %1459 = vmatpush.bf16.msra.mxu1 %v2280_v61 }
 0x439   :  { %1460 = vmatpush.bf16.msra.mxu1 %v2286_v63 }
 0x43d   :  { %1461 = vmatpush.bf16.msra.mxu1 %v2294_v2 }
 0x440   :  { %1340 = vmatmul.bf16.vlgmr.msrb.gmra.mxu1 %v1328_v20 }
 0x450   :  { %1345 = vmatmul.bf16.gmra.mxu1 %v2724_v50 }
 0x49d   :  { %v1209_v55 = vpop.f32.mrf.mxu1  ;;  %v1277_v61 = vpop.f32.mrf.mxu3 }
 0x49e   :  { %v1210_v25 = vadd.f32 %v2537_v60, %v1209_v55  ;;  %v1278_v53 = vadd.f32 %v2432_v51, %v1277_v61 }
 0x4a0   :  { %v1219_v41 = vmax.f32 %v1210_v25, 0.0  ;;  %v1287_v56 = vmax.f32 %v1278_v53, 0.0 }
 0x4a2   :  { %v1223_v16 = vadd.f32 %v1219_v41, %v2595_v9 }
 0x4a5   :  { %v1211_v63 = vpop.f32.mrf.mxu1  ;;  %v1279_v18 = vpop.f32.mrf.mxu3 }
 0x4a6   :  { %v1212_v52 = vadd.f32 %v2537_v60, %v1211_v63  ;;  %v1280_v2 = vadd.f32 %v2432_v51, %v1279_v18 }
 0x4a8   :  { %v1220_v4 = vmax.f32 %v1212_v52, 0.0  ;;  %v1288_v45 = vmax.f32 %v1280_v2, 0.0 }
 0x4aa   :  { %v1224_v58 = vadd.f32 %v1220_v4, %v2599_v13  ;;  %v1291_v59 = vpack.c.bf16 %v1288_v45, %v1287_v56 }
 0x4ac   :  { %1301 = vmatmul.bf16.vlgmr.msrb.gmra.mxu0 %v1291_v59 }
 0x4ad   :  { %v1214_v47 = vpop.f32.mrf.mxu1  ;;  %v1282_v40 = vpop.f32.mrf.mxu3 }
 0x4ae   :  { %v1215_v28 = vadd.f32 %v2537_v60, %v1214_v47  ;;  %v1283_v32 = vadd.f32 %v2432_v51, %v1282_v40 }
 0x4b0   :  { %v1221_v9 = vmax.f32 %v1215_v28, 0.0  ;;  %v1289_v57 = vmax.f32 %v1283_v32, 0.0 }
 0x4b2   :  { %v1225_v34 = vadd.f32 %v1221_v9, %v2602_v30  ;;  %v639_v30 = vpack.c.bf16 %v2146_v23, %v2146_v23  ;;  %v653_v23 = vpack.c.bf16 %v2530_v15, %v2530_v15 }
 0x4b4   :  { %v1417_v44 = vunpack.c.l.b16 %v639_v30  ;;  %v1419_v17 = vunpack.c.l.b16 %v653_v23 }
 0x4b5   :  { %v1216_v38 = vpop.f32.mrf.mxu1  ;;  %v1284_v31 = vpop.f32.mrf.mxu3 }
 0x4b6   :  { %v1217_v43 = vadd.f32 %v2537_v60, %v1216_v38  ;;  %v1285_v5 = vadd.f32 %v2432_v51, %v1284_v31  ;;  %v1421_v36 = vpack.c.b16 %v1418_v22, %v1417_v44  ;;  %v1422_v20 = vpack.c.b16 %v1420_v37, %v1419_v17 }
 0x4b8   :  { %v1222_v14 = vmax.f32 %v1217_v43, 0.0  ;;  %v1290_v13 = vmax.f32 %v1285_v5, 0.0 }
 0x4ba   :  { %v1226_v10 = vadd.f32 %v1222_v14, %v2605_v7  ;;  %v1292_v33 = vpack.c.bf16 %v1290_v13, %v1289_v57 }
 0x4bc   :  { %1306 = vmatmul.bf16.gmra.mxu0 %v1292_v33 }
 0x4bd   :  { %v1341_v54 = vpop.f32.mrf.mxu1 }
 0x4be   :  { %v1351_v46 = vadd.f32 %v1341_v54, %v2307_v11 }
 0x4c0   :  { %v1355_v0 = vmax.f32 %v1351_v46, 0.0 }
 0x4c5   :  { %v1343_v21 = vpop.f32.mrf.mxu1 }
 0x4c6   :  { %v1352_v8 = vadd.f32 %v1343_v21, %v2310_v12 }
 0x4c8   :  { %v1356_v42 = vmax.f32 %v1352_v8, 0.0 }
 0x4ca   :  { %v1359_v7 = vpack.c.bf16 %v1356_v42, %v1355_v0 }
 0x4cc   :  { %1369 = vmatmul.bf16.vlgmr.msra.gmra.mxu2 %v1359_v7  ;;  %1433 = vmatmul.bf16.vlgmr.msra.gmra.mxu0 %v1421_v36 }
 0x4cd   :  { %v1346_v1 = vpop.f32.mrf.mxu1 }
 0x4ce   :  { %v1353_v6 = vadd.f32 %v1346_v1, %v2317_v27 }
 0x4d0   :  { %v1357_v49 = vmax.f32 %v1353_v6, 0.0 }
 0x4d5   :  { %v1348_v35 = vpop.f32.mrf.mxu1 }
 0x4d6   :  { %v1354_v39 = vadd.f32 %v1348_v35, %v2319_v29 }
 0x4d8   :  { %v1358_v48 = vmax.f32 %v1354_v39, 0.0 }
 0x4da   :  { %v1360_v50 = vpack.c.bf16 %v1358_v48, %v1357_v49 }
 0x4dc   :  { %1374 = vmatmul.bf16.gmra.mxu2 %v1360_v50  ;;  %1438 = vmatmul.bf16.gmra.mxu0 %v1422_v20 }
 0x529   :  { %v1302_v55 = vpop.f32.mrf.mxu0 }
 0x52a   :  { %v1303_v61 = vadd.f32 %v2537_v60, %v1302_v55 }
 0x52c   :  { %v1312_v3 = vmax.f32 %v1303_v61, 0.0 }
 0x52e   :  { %v2655_v25 = vadd.f32 %v1312_v3, %v1223_v16 }
 0x531   :  { %v1304_v15 = vpop.f32.mrf.mxu0 }
 0x532   :  { %v1305_v41 = vadd.f32 %v2537_v60, %v1304_v15 }
 0x534   :  { %v1313_v53 = vmax.f32 %v1305_v41, 0.0  ;;  %v1800_v41 = vld [vmem:[%s2716_s4] sm:$0x3] }
 0x536   :  { %v2658_v63 = vadd.f32 %v1313_v53, %v1224_v58  ;;  %v95_v53 = vperm.slane %v1800_v41, 1 }
 0x539   :  { %v1307_v18 = vpop.f32.mrf.mxu0 }
 0x53a   :  { %v1308_v52 = vadd.f32 %v2537_v60, %v1307_v18 }
 0x53c   :  { %v1314_v2 = vmax.f32 %v1308_v52, 0.0 }
 0x53e   :  { %v2661_v56 = vadd.f32 %v1314_v2, %v1225_v34 }
 0x541   :  { %v1309_v4 = vpop.f32.mrf.mxu0 }
 0x542   :  { %v1310_v45 = vadd.f32 %v2537_v60, %v1309_v4 }
 0x544   :  { %v1315_v59 = vmax.f32 %v1310_v45, 0.0  ;;  %v219_v45 = vadd.f32 %v2382_v19, %v95_v53 }
 0x546   :  { %v2664_v47 = vadd.f32 %v1315_v59, %v1226_v10 }
 0x549   :  { %v1434_v16 = vpop.f32.mrf.mxu0 }
 0x54a   :  { %v1444_v28 = vadd.f32 %v1434_v16, %v2307_v11 }
 0x54c   :  { %v1448_v32 = vmax.f32 %v1444_v28, 0.0 }
 0x54f   :  { %v1370_v40 = vpop.f32.mrf.mxu2 }
 0x550   :  { %v1371_v31 = vadd.f32 %v2432_v51, %v1370_v40 }
 0x551   :  { %v1436_v9 = vpop.f32.mrf.mxu0 }
 0x552   :  { %v1445_v58 = vadd.f32 %v1436_v9, %v2310_v12  ;;  %v1380_v14 = vmax.f32 %v1371_v31, 0.0 }
 0x554   :  { %v1449_v38 = vmax.f32 %v1445_v58, 0.0 }
 0x556   :  { %v1452_v43 = vpack.c.bf16 %v1449_v38, %v1448_v32 }
 0x557   :  { %v1372_v34 = vpop.f32.mrf.mxu2 }
 0x558   :  { %v1373_v5 = vadd.f32 %v2432_v51, %v1372_v34  ;;  %1462 = vmatmul.bf16.vlgmr.msra.gmra.mxu1 %v1452_v43 }
 0x559   :  { %v1439_v57 = vpop.f32.mrf.mxu0 }
 0x55a   :  { %v1381_v13 = vmax.f32 %v1373_v5, 0.0  ;;  %v1446_v11 = vadd.f32 %v1439_v57, %v2317_v27  ;;  %v221_v5 = vadd.f32 %v2389_v24, %v95_v53 }
 0x55c   :  { %v1384_v10 = vpack.c.bf16 %v1381_v13, %v1380_v14  ;;  %v1450_v62 = vmax.f32 %v1446_v11, 0.0 }
 0x55e   :  { %1394 = vmatmul.bf16.vlgmr.msrb.gmra.mxu3 %v1384_v10 }
 0x55f   :  { %v1375_v33 = vpop.f32.mrf.mxu2 }
 0x560   :  { %v1376_v46 = vadd.f32 %v2432_v51, %v1375_v33 }
 0x561   :  { %v1441_v54 = vpop.f32.mrf.mxu0 }
 0x562   :  { %v1447_v12 = vadd.f32 %v1441_v54, %v2319_v29  ;;  %v1382_v44 = vmax.f32 %v1376_v46, 0.0  ;;  %v2725_v46 = vld [vmem:[#allocation2_spill] sm:$0xff] }
 0x564   :  { %v1451_v30 = vmax.f32 %v1447_v12, 0.0 }
 0x566   :  { %v1453_v21 = vpack.c.bf16 %v1451_v30, %v1450_v62  ;;  %v1526_v62 = vpop.permute.xlu2 %1525 }
 0x567   :  { %v1377_v22 = vpop.f32.mrf.mxu2 }
 0x568   :  { %v1378_v8 = vadd.f32 %v2432_v51, %v1377_v22  ;;  %1467 = vmatmul.bf16.gmra.mxu1 %v1453_v21  ;;  %v224_v21 = vadd.f32 %v2725_v46, %v95_v53 }
 0x56a   :  { %v1383_v0 = vmax.f32 %v1378_v8, 0.0 }
 0x56c   :  { %v1385_v42 = vpack.c.bf16 %v1383_v0, %v1382_v44 }
 0x56e   :  { %1399 = vmatmul.bf16.gmra.mxu3 %v1385_v42 }
 0x5d5   :  { %v1463_v36 = vpop.f32.mrf.mxu1 }
 0x5d6   :  { %v1464_v7 = vadd.f32 %v2432_v51, %v1463_v36 }
 0x5d8   :  { %v1473_v29 = vmax.f32 %v1464_v7, 0.0 }
 0x5dd   :  { %v1465_v27 = vpop.f32.mrf.mxu1 }
 0x5de   :  { %v1466_v1 = vadd.f32 %v2432_v51, %v1465_v27  ;;  %v1531_v27 = vpop.permute.xlu0 %1530 }
 0x5e0   :  { %v1474_v26 = vmax.f32 %v1466_v1, 0.0 }
 0x5e1   :  { %v1395_v20 = vpop.f32.mrf.mxu3 }
 0x5e2   :  { %v1477_v23 = vpack.c.bf16 %v1474_v26, %v1473_v29  ;;  %v1396_v50 = vadd.f32 %v2537_v60, %v1395_v20  ;;  %v2726_v26 = vld [vmem:[#allocation3_spill] sm:$0xff] }
 0x5e4   :  { %1487 = vmatmul.bf16.vlgmr.msrb.gmra.mxu2 %v1477_v23  ;;  %v1405_v61 = vmax.f32 %v1396_v50, 0.0  ;;  %v226_v23 = vadd.f32 %v2726_v26, %v95_v53 }
 0x5e5   :  { %v1468_v6 = vpop.f32.mrf.mxu1 }
 0x5e6   :  { %v1469_v35 = vadd.f32 %v2432_v51, %v1468_v6  ;;  %v1409_v18 = vadd.f32 %v1405_v61, %v2655_v25  ;;  %v1521_v25 = vpop.permute.xlu1 %1520 }
 0x5e8   :  { %v1475_v17 = vmax.f32 %v1469_v35, 0.0 }
 0x5e9   :  { %v1397_v55 = vpop.f32.mrf.mxu3 }
 0x5ed   :  { %v1470_v37 = vpop.f32.mrf.mxu1 }
 0x5ee   :  { %v1471_v39 = vadd.f32 %v2432_v51, %v1470_v37  ;;  %v1398_v51 = vadd.f32 %v2537_v60, %v1397_v55 }
 0x5f0   :  { %v1476_v49 = vmax.f32 %v1471_v39, 0.0  ;;  %v1406_v59 = vmax.f32 %v1398_v51, 0.0  ;;  %v1536_v39 = vpop.permute.xlu1 %1535 }
 0x5f1   :  { %v1400_v4 = vpop.f32.mrf.mxu3 }
 0x5f2   :  { %v1478_v48 = vpack.c.bf16 %v1476_v49, %v1475_v17  ;;  %v1410_v58 = vadd.f32 %v1406_v59, %v2658_v63  ;;  %v1401_v32 = vadd.f32 %v2537_v60, %v1400_v4 }
 0x5f4   :  { %1492 = vmatmul.bf16.gmra.mxu2 %v1478_v48  ;;  %v1407_v57 = vmax.f32 %v1401_v32, 0.0 }
 0x5f6   :  { %v1411_v33 = vadd.f32 %v1407_v57, %v2661_v56 }
 0x5f9   :  { %v1402_v14 = vpop.f32.mrf.mxu3 }
 0x5fa   :  { %v1403_v11 = vadd.f32 %v2537_v60, %v1402_v14 }
 0x5fc   :  { %v1408_v22 = vmax.f32 %v1403_v11, 0.0 }
 0x5fe   :  { %v1412_v56 = vadd.f32 %v1408_v22, %v2664_v47 }
 0x667   :  { %v1488_v3 = vpop.f32.mrf.mxu2 }
 0x668   :  { %v1489_v15 = vadd.f32 %v2537_v60, %v1488_v3 }
 0x66a   :  { %v1498_v52 = vmax.f32 %v1489_v15, 0.0 }
 0x66c   :  { %v1502_v2 = vadd.f32 %v1498_v52, %v1409_v18 }
 0x66e   :  { %v1506_v16 = vmul.f32 0.14285715, %v1502_v2 }
 0x66f   :  { %v1490_v40 = vpop.f32.mrf.mxu2 }
 0x670   :  { %v1510_v28 = vadd.f32 %v1506_v16, %v219_v45  ;;  %v1491_v9 = vadd.f32 %v2537_v60, %v1490_v40 }
 0x672   :  { %v1514_v38 = vmax.f32 %v1510_v28, 0.0  ;;  %v1499_v31 = vmax.f32 %v1491_v9, 0.0 }
 0x674   :  { %v1538_v43 = vmul.f32 %v1521_v25, %v1514_v38  ;;  %v1503_v34 = vadd.f32 %v1499_v31, %v1410_v58 }
 0x676   :  { %1542 = vst [vmem:[%s2719_s10] sm:$0xff] %v1538_v43  ;;  %v1507_v19 = vmul.f32 0.14285715, %v1503_v34 }
 0x677   :  { %v1493_v13 = vpop.f32.mrf.mxu2 }
 0x678   :  { %v1511_v10 = vadd.f32 %v1507_v19, %v221_v5  ;;  %v1494_v63 = vadd.f32 %v2537_v60, %v1493_v13 }
 0x67a   :  { %v1515_v54 = vmax.f32 %v1511_v10, 0.0  ;;  %v1500_v12 = vmax.f32 %v1494_v63, 0.0 }
 0x67c   :  { %v1539_v30 = vmul.f32 %v1526_v62, %v1515_v54  ;;  %v1504_v24 = vadd.f32 %v1500_v12, %v1411_v33 }
 0x67e   :  { %1543 = vst [vmem:[%s2719_s10 + $0x8] sm:$0xff] %v1539_v30  ;;  %v1508_v8 = vmul.f32 0.14285715, %v1504_v24 }
 0x67f   :  { %v1495_v44 = vpop.f32.mrf.mxu2 }
 0x680   :  { %v1512_v0 = vadd.f32 %v1508_v8, %v224_v21  ;;  %v1496_v42 = vadd.f32 %v2537_v60, %v1495_v44 }
 0x682   :  { %v1516_v36 = vmax.f32 %v1512_v0, 0.0  ;;  %v1501_v7 = vmax.f32 %v1496_v42, 0.0 }
 0x684   :  { %v1540_v1 = vmul.f32 %v1531_v27, %v1516_v36  ;;  %v1505_v29 = vadd.f32 %v1501_v7, %v1412_v56 }
 0x686   :  { %1544 = vst [vmem:[%s2719_s10 + $0x10] sm:$0xff] %v1540_v1  ;;  %v1509_v6 = vmul.f32 0.14285715, %v1505_v29 }
 0x688   :  { %v1513_v35 = vadd.f32 %v1509_v6, %v226_v23 }
 0x68a   :  { %v1517_v37 = vmax.f32 %v1513_v35, 0.0 }
 0x68c   :  { %v1541_v17 = vmul.f32 %v1536_v39, %v1517_v37 }
 0x68e   :  { %1545 = vst [vmem:[%s2719_s10 + $0x18] sm:$0xff] %v1541_v17 }

</bundles_post_ra>
